<compile_context>
chip_gen: v6e
topology: v6e:2x2x1
jax: 0.10.0
libtpu: 0.0.40
codegen_flags: <defaults>
</compile_context>

<pallas_src>
import functools

import jax
import jax.numpy as jnp
from jax.experimental import pallas as pl
from jax.experimental.pallas import tpu as pltpu


# ----------------------------------------------------------------------------
# Fused residual-block kernel (one grid step per batch element)
# ----------------------------------------------------------------------------
def _residual_block_kernel(x_ref, w1_ref, s1_ref, b1_ref, w2_ref, s2_ref, b2_ref,
                           o_ref, pad_ref, *, H, W, C):
    # x_ref   : (NROWS, C) f32   zero-padded input plane, flattened (NROWS >= (H+2)*(W+2)+2)
    # w*_ref  : (9*C, C)  bf16   HWIO conv weights flattened over (ky, kx, cin)
    # s*_ref  : (1, C)    f32    folded BN scale  gamma / sqrt(var + eps)
    # b*_ref  : (1, C)    f32    folded BN bias   beta - mean * scale
    # o_ref   : (M, C)    f32    output in padded-column layout, M = H*(W+2)
    # pad_ref : (NROWS, C) bf16  padded conv1-activation plane (VMEM scratch)
    Wp = W + 2
    M = H * Wp                       # matmul rows: valid pixels + 2 junk columns per row

    def conv3x3(load_tap, w_ref):
        # 9 shift-and-accumulate matmuls; each tap LHS is a contiguous row window of the
        # flattened padded plane (costs ~12.5% extra MXU rows -- MXU has huge slack here).
        acc = jnp.zeros((M, C), jnp.float32)
        for dy in range(3):
            for dx in range(3):
                t = dy * 3 + dx
                acc = acc + jnp.dot(load_tap(dy * Wp + dx),
                                    w_ref[t * C:(t + 1) * C, :],
                                    preferred_element_type=jnp.float32)
        return acc

    # ---- conv1 (3x3, pad=1, bias=False) + BN1 + ReLU: taps read the pre-padded input --
    h = conv3x3(lambda off: x_ref[off:off + M, :].astype(jnp.bfloat16), w1_ref)
    h = jnp.maximum(h * s1_ref[...] + b1_ref[...], 0.0)

    # Rows whose flat column index >= W are junk outputs (windows straddling the halo);
    # zero them so that, written back at offset Wp+1, they land exactly on the halo
    # columns of the padded plane and re-create the zero border needed by conv2.
    col = jax.lax.broadcasted_iota(jnp.int32, (M, C), 0) % Wp
    h = jnp.where(col < W, h, 0.0)

    # Re-zero only the thin halo strips the interior writeback cannot reach.
    # Done EVERY grid step (no program_id gate): under "parallel" semantics each
    # TensorCore (v7x) owns its own scratch instance.
    pad_ref[0:Wp + 1, :] = jnp.zeros((Wp + 1, C), jnp.bfloat16)          # top halo row
    bot = (H + 1) * Wp
    pad_ref[bot:bot + Wp + 2, :] = jnp.zeros((Wp + 2, C), jnp.bfloat16)  # bottom halo rows
    # Single contiguous writeback of the conv1 activation (bf16 halves vst traffic).
    pad_ref[Wp + 1:Wp + 1 + M, :] = h.astype(jnp.bfloat16)

    # ---- conv2 (3x3, pad=1, bias=False) + BN2 ------------------------------------------
    y = conv3x3(lambda off: pad_ref[off:off + M, :], w2_ref)
    y = y * s2_ref[...] + b2_ref[...]

    # ---- identity skip (exact f32, same padded-flat layout) + final ReLU ---------------
    identity = x_ref[Wp + 1:Wp + 1 + M, :]
    o_ref[...] = jnp.maximum(y + identity, 0.0)


def _residual_block_pallas(x_pad, w1, s1, b1, w2, s2, b2, *, H, W, C):
    B, NROWS, _ = x_pad.shape
    Wp = W + 2
    M = H * Wp

    kernel = functools.partial(_residual_block_kernel, H=H, W=W, C=C)

    flops = 2 * B * (2 * M * (9 * C) * C)                      # two 3x3 convs (MAC = 2 flops)
    bytes_accessed = (x_pad.size * 4 + B * M * C * 4
                      + (w1.size + w2.size) * 2
                      + (s1.size + b1.size + s2.size + b2.size) * 4)

    # NOTE: on single-TC v5e/v6e, a batch block of >=2 planes per grid step would further
    # amortize the ~0.35us/step pipeline overhead; kept at 1 so v7x's two TensorCores each
    # get a grid step at B=2.  Weight specs could additionally be single-buffered
    # (pipeline_mode=pl.Buffered(1)) at larger C; at ~150 KB here it is negligible.
    return pl.pallas_call(
        kernel,
        out_shape=jax.ShapeDtypeStruct((B, M, C), jnp.float32),
        grid=(B,),
        in_specs=[
            pl.BlockSpec((None, NROWS, C), lambda b: (b, 0, 0)),   # padded input plane
            pl.BlockSpec((9 * C, C), lambda b: (0, 0)),            # w1 (bf16)
            pl.BlockSpec((1, C), lambda b: (0, 0)),                # bn1 scale
            pl.BlockSpec((1, C), lambda b: (0, 0)),                # bn1 bias
            pl.BlockSpec((9 * C, C), lambda b: (0, 0)),            # w2 (bf16)
            pl.BlockSpec((1, C), lambda b: (0, 0)),                # bn2 scale
            pl.BlockSpec((1, C), lambda b: (0, 0)),                # bn2 bias
        ],
        out_specs=pl.BlockSpec((None, M, C), lambda b: (b, 0, 0)),
        scratch_shapes=[pltpu.VMEM((NROWS, C), jnp.bfloat16)],     # padded conv1 activation
        compiler_params=pltpu.CompilerParams(
            dimension_semantics=("parallel",),                     # batch -> 2 TCs on v7x
            vmem_limit_bytes=32 * 1024 * 1024),
        cost_estimate=pl.CostEstimate(flops=flops, transcendentals=0,
                                      bytes_accessed=bytes_accessed),
    )(x_pad, w1, s1, b1, w2, s2, b2)


@jax.jit
def residual_block_forward(x_nchw, params):
    """PyTorch-facing NCHW wrapper. In a full network the activations should stay NHWC
    between blocks; the transposes here are the one-time entry/exit layout conversion."""
    B, C, H, W = x_nchw.shape
    Wp = W + 2
    x = jnp.transpose(x_nchw, (0, 2, 3, 1)).astype(jnp.float32)       # NCHW -> NHWC
    # Zero halo for 'same' 3x3 conv: 1 row top, 2 rows bottom (the extra row keeps every
    # shifted tap window of the flattened plane in-bounds), 1 column left/right.
    x_pad = jnp.pad(x, ((0, 0), (1, 2), (1, 1), (0, 0)))
    x_pad = x_pad.reshape(B, (H + 3) * Wp, C)

    out = _residual_block_pallas(
        x_pad,
        params["w1"].astype(jnp.bfloat16), params["s1"], params["b1"],
        params["w2"].astype(jnp.bfloat16), params["s2"], params["b2"],
        H=H, W=W, C=C)

    # (B, H*Wp, C) padded-column layout -> drop junk columns -> NCHW.
    out = out.reshape(B, H, Wp, C)[:, :, :W, :]
    return jnp.transpose(out, (0, 3, 1, 2))


# ----------------------------------------------------------------------------
# Pure-JAX reference (f32) and synthetic parameters
# ----------------------------------------------------------------------------
def reference_forward(x_nchw, params):
    C = params["s1"].shape[1]
    x = jnp.transpose(x_nchw, (0, 2, 3, 1)).astype(jnp.float32)

    def conv(z, w_flat):
        w = w_flat.reshape(3, 3, C, C)
        return jax.lax.conv_general_dilated(
            z, w, window_strides=(1, 1), padding="SAME",
            dimension_numbers=("NHWC", "HWIO", "NHWC"))

    h = jnp.maximum(conv(x, params["w1"]) * params["s1"] + params["b1"], 0.0)
    y = conv(h, params["w2"]) * params["s2"] + params["b2"]
    out = jnp.maximum(y + x, 0.0)
    return jnp.transpose(out, (0, 3, 1, 2))


def make_params(key, channels, eps=1e-5):
    C = channels
    ks = jax.random.split(key, 10)
    bound = (9 * C) ** -0.5

    def bn_fold(kg, kb, km, kv):
        gamma = jax.random.uniform(kg, (C,), jnp.float32, 0.5, 1.5)
        beta = jax.random.uniform(kb, (C,), jnp.float32, -0.1, 0.1)
        mean = jax.random.uniform(km, (C,), jnp.float32, -0.1, 0.1)
        var = jax.random.uniform(kv, (C,), jnp.float32, 0.5, 1.5)
        scale = gamma * jax.lax.rsqrt(var + eps)
        bias = beta - mean * scale                     # conv bias=False in the module
        return scale.reshape(1, C), bias.reshape(1, C)

    w1 = jax.random.uniform(ks[0], (3, 3, C, C), jnp.float32, -bound, bound)
    s1, b1 = bn_fold(ks[1], ks[2], ks[3], ks[4])
    w2 = jax.random.uniform(ks[5], (3, 3, C, C), jnp.float32, -bound, bound)
    s2, b2 = bn_fold(ks[6], ks[7], ks[8], ks[9])
    return {"w1": w1.reshape(9 * C, C), "s1": s1, "b1": b1,
            "w2": w2.reshape(9 * C, C), "s2": s2, "b2": b2}


if __name__ == "__main__":
    key = jax.random.PRNGKey(0)
    kx, kp = jax.random.split(key)
    # Small ResNet-style block: batch=2, in_channels=out_channels=64, 16x16 feature map.
    B, C, H, W = 2, 64, 16, 16
    x = jax.random.normal(kx, (B, C, H, W), jnp.float32)
    params = make_params(kp, channels=C)

    out = residual_block_forward(x, params)
    jax.block_until_ready(out)
    assert out.shape == (B, C, H, W)
    assert bool(jnp.all(jnp.isfinite(out)))

    ref = reference_forward(x, params)
    err = float(jnp.max(jnp.abs(out - ref)))
    # bf16 matmul operands with f32 accumulation vs. an all-f32 reference.
    assert err < 3e-2, f"max abs error vs reference: {err}"

    print("KERNEL_OK")
</pallas_src>

<mosaic_0001>
module attributes {stable_mosaic.version = 11 : i64} {
  func.func @_residual_block_kernel(%arg0: i32, %arg1: memref<1x342x64xf32, #tpu.memory_space<vmem>>, %arg2: memref<576x64xbf16, #tpu.memory_space<vmem>>, %arg3: memref<1x64xf32, #tpu.memory_space<vmem>>, %arg4: memref<1x64xf32, #tpu.memory_space<vmem>>, %arg5: memref<576x64xbf16, #tpu.memory_space<vmem>>, %arg6: memref<1x64xf32, #tpu.memory_space<vmem>>, %arg7: memref<1x64xf32, #tpu.memory_space<vmem>>, %arg8: memref<1x288x64xf32, #tpu.memory_space<vmem>>, %arg9: memref<342x64xbf16, #tpu.memory_space<vmem>>) attributes {dimension_semantics = [#tpu.dimension_semantics<parallel>], iteration_bounds = array<i64: 2>, scalar_prefetch = 0 : i64, scratch_operands = 1 : i64, tpu.core_type = #tpu.core_type<tc>, window_params = [{transform_indices = @transform_0, window_bounds = array<i64: 1, 342, 64>}, {pipeline_mode = #tpu.pipeline_mode<synchronous>, transform_indices = @transform_1, window_bounds = array<i64: 576, 64>}, {pipeline_mode = #tpu.pipeline_mode<synchronous>, transform_indices = @transform_2, window_bounds = array<i64: 1, 64>}, {pipeline_mode = #tpu.pipeline_mode<synchronous>, transform_indices = @transform_3, window_bounds = array<i64: 1, 64>}, {pipeline_mode = #tpu.pipeline_mode<synchronous>, transform_indices = @transform_4, window_bounds = array<i64: 576, 64>}, {pipeline_mode = #tpu.pipeline_mode<synchronous>, transform_indices = @transform_5, window_bounds = array<i64: 1, 64>}, {pipeline_mode = #tpu.pipeline_mode<synchronous>, transform_indices = @transform_6, window_bounds = array<i64: 1, 64>}, {transform_indices = @transform_7, window_bounds = array<i64: 1, 288, 64>}]} {
    %cst = arith.constant 0.000000e+00 : f32
    %0 = vector.broadcast %cst : f32 to vector<288x64xf32>
    %c0 = arith.constant 0 : index
    %c0_0 = arith.constant 0 : index
    %c0_1 = arith.constant 0 : index
    %1 = vector.load %arg1[%c0, %c0_0, %c0_1] : memref<1x342x64xf32, #tpu.memory_space<vmem>>, vector<1x288x64xf32>
    %2 = vector.shape_cast %1 : vector<1x288x64xf32> to vector<288x64xf32>
    %3 = arith.truncf %2 : vector<288x64xf32> to vector<288x64xbf16>
    %c0_2 = arith.constant 0 : index
    %c0_3 = arith.constant 0 : index
    %4 = vector.load %arg2[%c0_2, %c0_3] : memref<576x64xbf16, #tpu.memory_space<vmem>>, vector<64x64xbf16>
    %cst_4 = arith.constant dense<0.000000e+00> : vector<288x64xf32>
    %5 = tpu.matmul %3, %4, %cst_4 {dimension_numbers = #tpu.dot_dimension_numbers<[1], [0], [0], [1], [0, 0, 1, 1], [], []>} : vector<288x64xbf16>, vector<64x64xbf16>, vector<288x64xf32> -> vector<288x64xf32>
    %6 = arith.addf %0, %5 : vector<288x64xf32>
    %c0_5 = arith.constant 0 : index
    %c1 = arith.constant 1 : index
    %c0_6 = arith.constant 0 : index
    %7 = vector.load %arg1[%c0_5, %c1, %c0_6] : memref<1x342x64xf32, #tpu.memory_space<vmem>>, vector<1x288x64xf32>
    %8 = vector.shape_cast %7 : vector<1x288x64xf32> to vector<288x64xf32>
    %9 = arith.truncf %8 : vector<288x64xf32> to vector<288x64xbf16>
    %c64 = arith.constant 64 : index
    %c0_7 = arith.constant 0 : index
    %10 = vector.load %arg2[%c64, %c0_7] : memref<576x64xbf16, #tpu.memory_space<vmem>>, vector<64x64xbf16>
    %cst_8 = arith.constant dense<0.000000e+00> : vector<288x64xf32>
    %11 = tpu.matmul %9, %10, %cst_8 {dimension_numbers = #tpu.dot_dimension_numbers<[1], [0], [0], [1], [0, 0, 1, 1], [], []>} : vector<288x64xbf16>, vector<64x64xbf16>, vector<288x64xf32> -> vector<288x64xf32>
    %12 = arith.addf %6, %11 : vector<288x64xf32>
    %c0_9 = arith.constant 0 : index
    %c2 = arith.constant 2 : index
    %c0_10 = arith.constant 0 : index
    %13 = vector.load %arg1[%c0_9, %c2, %c0_10] : memref<1x342x64xf32, #tpu.memory_space<vmem>>, vector<1x288x64xf32>
    %14 = vector.shape_cast %13 : vector<1x288x64xf32> to vector<288x64xf32>
    %15 = arith.truncf %14 : vector<288x64xf32> to vector<288x64xbf16>
    %c128 = arith.constant 128 : index
    %c0_11 = arith.constant 0 : index
    %16 = vector.load %arg2[%c128, %c0_11] : memref<576x64xbf16, #tpu.memory_space<vmem>>, vector<64x64xbf16>
    %cst_12 = arith.constant dense<0.000000e+00> : vector<288x64xf32>
    %17 = tpu.matmul %15, %16, %cst_12 {dimension_numbers = #tpu.dot_dimension_numbers<[1], [0], [0], [1], [0, 0, 1, 1], [], []>} : vector<288x64xbf16>, vector<64x64xbf16>, vector<288x64xf32> -> vector<288x64xf32>
    %18 = arith.addf %12, %17 : vector<288x64xf32>
    %c0_13 = arith.constant 0 : index
    %c18 = arith.constant 18 : index
    %c0_14 = arith.constant 0 : index
    %19 = vector.load %arg1[%c0_13, %c18, %c0_14] : memref<1x342x64xf32, #tpu.memory_space<vmem>>, vector<1x288x64xf32>
    %20 = vector.shape_cast %19 : vector<1x288x64xf32> to vector<288x64xf32>
    %21 = arith.truncf %20 : vector<288x64xf32> to vector<288x64xbf16>
    %c192 = arith.constant 192 : index
    %c0_15 = arith.constant 0 : index
    %22 = vector.load %arg2[%c192, %c0_15] : memref<576x64xbf16, #tpu.memory_space<vmem>>, vector<64x64xbf16>
    %cst_16 = arith.constant dense<0.000000e+00> : vector<288x64xf32>
    %23 = tpu.matmul %21, %22, %cst_16 {dimension_numbers = #tpu.dot_dimension_numbers<[1], [0], [0], [1], [0, 0, 1, 1], [], []>} : vector<288x64xbf16>, vector<64x64xbf16>, vector<288x64xf32> -> vector<288x64xf32>
    %24 = arith.addf %18, %23 : vector<288x64xf32>
    %c0_17 = arith.constant 0 : index
    %c19 = arith.constant 19 : index
    %c0_18 = arith.constant 0 : index
    %25 = vector.load %arg1[%c0_17, %c19, %c0_18] : memref<1x342x64xf32, #tpu.memory_space<vmem>>, vector<1x288x64xf32>
    %26 = vector.shape_cast %25 : vector<1x288x64xf32> to vector<288x64xf32>
    %27 = arith.truncf %26 : vector<288x64xf32> to vector<288x64xbf16>
    %c256 = arith.constant 256 : index
    %c0_19 = arith.constant 0 : index
    %28 = vector.load %arg2[%c256, %c0_19] : memref<576x64xbf16, #tpu.memory_space<vmem>>, vector<64x64xbf16>
    %cst_20 = arith.constant dense<0.000000e+00> : vector<288x64xf32>
    %29 = tpu.matmul %27, %28, %cst_20 {dimension_numbers = #tpu.dot_dimension_numbers<[1], [0], [0], [1], [0, 0, 1, 1], [], []>} : vector<288x64xbf16>, vector<64x64xbf16>, vector<288x64xf32> -> vector<288x64xf32>
    %30 = arith.addf %24, %29 : vector<288x64xf32>
    %c0_21 = arith.constant 0 : index
    %c20 = arith.constant 20 : index
    %c0_22 = arith.constant 0 : index
    %31 = vector.load %arg1[%c0_21, %c20, %c0_22] : memref<1x342x64xf32, #tpu.memory_space<vmem>>, vector<1x288x64xf32>
    %32 = vector.shape_cast %31 : vector<1x288x64xf32> to vector<288x64xf32>
    %33 = arith.truncf %32 : vector<288x64xf32> to vector<288x64xbf16>
    %c320 = arith.constant 320 : index
    %c0_23 = arith.constant 0 : index
    %34 = vector.load %arg2[%c320, %c0_23] : memref<576x64xbf16, #tpu.memory_space<vmem>>, vector<64x64xbf16>
    %cst_24 = arith.constant dense<0.000000e+00> : vector<288x64xf32>
    %35 = tpu.matmul %33, %34, %cst_24 {dimension_numbers = #tpu.dot_dimension_numbers<[1], [0], [0], [1], [0, 0, 1, 1], [], []>} : vector<288x64xbf16>, vector<64x64xbf16>, vector<288x64xf32> -> vector<288x64xf32>
    %36 = arith.addf %30, %35 : vector<288x64xf32>
    %c0_25 = arith.constant 0 : index
    %c36 = arith.constant 36 : index
    %c0_26 = arith.constant 0 : index
    %37 = vector.load %arg1[%c0_25, %c36, %c0_26] : memref<1x342x64xf32, #tpu.memory_space<vmem>>, vector<1x288x64xf32>
    %38 = vector.shape_cast %37 : vector<1x288x64xf32> to vector<288x64xf32>
    %39 = arith.truncf %38 : vector<288x64xf32> to vector<288x64xbf16>
    %c384 = arith.constant 384 : index
    %c0_27 = arith.constant 0 : index
    %40 = vector.load %arg2[%c384, %c0_27] : memref<576x64xbf16, #tpu.memory_space<vmem>>, vector<64x64xbf16>
    %cst_28 = arith.constant dense<0.000000e+00> : vector<288x64xf32>
    %41 = tpu.matmul %39, %40, %cst_28 {dimension_numbers = #tpu.dot_dimension_numbers<[1], [0], [0], [1], [0, 0, 1, 1], [], []>} : vector<288x64xbf16>, vector<64x64xbf16>, vector<288x64xf32> -> vector<288x64xf32>
    %42 = arith.addf %36, %41 : vector<288x64xf32>
    %c0_29 = arith.constant 0 : index
    %c37 = arith.constant 37 : index
    %c0_30 = arith.constant 0 : index
    %43 = vector.load %arg1[%c0_29, %c37, %c0_30] : memref<1x342x64xf32, #tpu.memory_space<vmem>>, vector<1x288x64xf32>
    %44 = vector.shape_cast %43 : vector<1x288x64xf32> to vector<288x64xf32>
    %45 = arith.truncf %44 : vector<288x64xf32> to vector<288x64xbf16>
    %c448 = arith.constant 448 : index
    %c0_31 = arith.constant 0 : index
    %46 = vector.load %arg2[%c448, %c0_31] : memref<576x64xbf16, #tpu.memory_space<vmem>>, vector<64x64xbf16>
    %cst_32 = arith.constant dense<0.000000e+00> : vector<288x64xf32>
    %47 = tpu.matmul %45, %46, %cst_32 {dimension_numbers = #tpu.dot_dimension_numbers<[1], [0], [0], [1], [0, 0, 1, 1], [], []>} : vector<288x64xbf16>, vector<64x64xbf16>, vector<288x64xf32> -> vector<288x64xf32>
    %48 = arith.addf %42, %47 : vector<288x64xf32>
    %c0_33 = arith.constant 0 : index
    %c38 = arith.constant 38 : index
    %c0_34 = arith.constant 0 : index
    %49 = vector.load %arg1[%c0_33, %c38, %c0_34] : memref<1x342x64xf32, #tpu.memory_space<vmem>>, vector<1x288x64xf32>
    %50 = vector.shape_cast %49 : vector<1x288x64xf32> to vector<288x64xf32>
    %51 = arith.truncf %50 : vector<288x64xf32> to vector<288x64xbf16>
    %c512 = arith.constant 512 : index
    %c0_35 = arith.constant 0 : index
    %52 = vector.load %arg2[%c512, %c0_35] : memref<576x64xbf16, #tpu.memory_space<vmem>>, vector<64x64xbf16>
    %cst_36 = arith.constant dense<0.000000e+00> : vector<288x64xf32>
    %53 = tpu.matmul %51, %52, %cst_36 {dimension_numbers = #tpu.dot_dimension_numbers<[1], [0], [0], [1], [0, 0, 1, 1], [], []>} : vector<288x64xbf16>, vector<64x64xbf16>, vector<288x64xf32> -> vector<288x64xf32>
    %54 = arith.addf %48, %53 : vector<288x64xf32>
    %c0_37 = arith.constant 0 : index
    %c0_38 = arith.constant 0 : index
    %55 = vector.load %arg3[%c0_37, %c0_38] : memref<1x64xf32, #tpu.memory_space<vmem>>, vector<1x64xf32>
    %56 = vector.broadcast %55 : vector<1x64xf32> to vector<288x64xf32>
    %57 = arith.mulf %54, %56 : vector<288x64xf32>
    %c0_39 = arith.constant 0 : index
    %c0_40 = arith.constant 0 : index
    %58 = vector.load %arg4[%c0_39, %c0_40] : memref<1x64xf32, #tpu.memory_space<vmem>>, vector<1x64xf32>
    %59 = vector.broadcast %58 : vector<1x64xf32> to vector<288x64xf32>
    %60 = arith.addf %57, %59 : vector<288x64xf32>
    %cst_41 = arith.constant 0.000000e+00 : f32
    %61 = vector.broadcast %cst_41 : f32 to vector<288x64xf32>
    %62 = arith.maximumf %60, %61 : vector<288x64xf32>
    %63 = tpu.iota {dimensions = array<i32: 0>} : vector<288x64xi32>
    %c18_i32 = arith.constant 18 : i32
    %c0_i32 = arith.constant 0 : i32
    %64 = arith.cmpi eq, %c18_i32, %c0_i32 : i32
    %c1_i32 = arith.constant 1 : i32
    %65 = arith.select %64, %c1_i32, %c18_i32 : i32
    %66 = vector.broadcast %65 : i32 to vector<288x64xi32>
    %67 = arith.remsi %63, %66 : vector<288x64xi32>
    %c0_i32_42 = arith.constant 0 : i32
    %68 = vector.broadcast %c0_i32_42 : i32 to vector<288x64xi32>
    %69 = arith.cmpi ne, %67, %68 : vector<288x64xi32>
    %c0_i32_43 = arith.constant 0 : i32
    %70 = vector.broadcast %c0_i32_43 : i32 to vector<288x64xi32>
    %71 = arith.cmpi slt, %67, %70 : vector<288x64xi32>
    %c0_i32_44 = arith.constant 0 : i32
    %72 = arith.cmpi slt, %65, %c0_i32_44 : i32
    %73 = vector.broadcast %72 : i1 to vector<288x64xi1>
    %74 = vector.broadcast %73 : vector<288x64xi1> to vector<288x64xi1>
    %75 = arith.xori %71, %74 : vector<288x64xi1>
    %76 = arith.andi %75, %69 : vector<288x64xi1>
    %77 = vector.broadcast %65 : i32 to vector<288x64xi32>
    %78 = arith.addi %67, %77 : vector<288x64xi32>
    %79 = arith.select %76, %78, %67 : vector<288x64xi1>, vector<288x64xi32>
    %c16_i32 = arith.constant 16 : i32
    %80 = vector.broadcast %c16_i32 : i32 to vector<288x64xi32>
    %81 = arith.cmpi slt, %79, %80 : vector<288x64xi32>
    %cst_45 = arith.constant 0.000000e+00 : f32
    %82 = vector.broadcast %cst_45 : f32 to vector<288x64xf32>
    %83 = arith.select %81, %62, %82 : vector<288x64xi1>, vector<288x64xf32>
    %cst_46 = arith.constant 0.000000e+00 : bf16
    %84 = vector.broadcast %cst_46 : bf16 to vector<19x64xbf16>
    %c0_47 = arith.constant 0 : index
    %c0_48 = arith.constant 0 : index
    %85 = vector.load %arg9[%c0_47, %c0_48] : memref<342x64xbf16, #tpu.memory_space<vmem>>, vector<19x64xbf16>
    tpu.vector_store %arg9[%c0_47, %c0_48], %84 {strides = array<i32>} : memref<342x64xbf16, #tpu.memory_space<vmem>>, vector<19x64xbf16>,
    %cst_49 = arith.constant 0.000000e+00 : bf16
    %86 = vector.broadcast %cst_49 : bf16 to vector<20x64xbf16>
    %c306 = arith.constant 306 : index
    %c0_50 = arith.constant 0 : index
    %87 = vector.load %arg9[%c306, %c0_50] : memref<342x64xbf16, #tpu.memory_space<vmem>>, vector<20x64xbf16>
    tpu.vector_store %arg9[%c306, %c0_50], %86 {strides = array<i32>} : memref<342x64xbf16, #tpu.memory_space<vmem>>, vector<20x64xbf16>,
    %88 = arith.truncf %83 : vector<288x64xf32> to vector<288x64xbf16>
    %c19_51 = arith.constant 19 : index
    %c0_52 = arith.constant 0 : index
    %89 = vector.load %arg9[%c19_51, %c0_52] : memref<342x64xbf16, #tpu.memory_space<vmem>>, vector<288x64xbf16>
    tpu.vector_store %arg9[%c19_51, %c0_52], %88 {strides = array<i32>} : memref<342x64xbf16, #tpu.memory_space<vmem>>, vector<288x64xbf16>,
    %cst_53 = arith.constant 0.000000e+00 : f32
    %90 = vector.broadcast %cst_53 : f32 to vector<288x64xf32>
    %c0_54 = arith.constant 0 : index
    %c0_55 = arith.constant 0 : index
    %91 = vector.load %arg9[%c0_54, %c0_55] : memref<342x64xbf16, #tpu.memory_space<vmem>>, vector<288x64xbf16>
    %c0_56 = arith.constant 0 : index
    %c0_57 = arith.constant 0 : index
    %92 = vector.load %arg5[%c0_56, %c0_57] : memref<576x64xbf16, #tpu.memory_space<vmem>>, vector<64x64xbf16>
    %cst_58 = arith.constant dense<0.000000e+00> : vector<288x64xf32>
    %93 = tpu.matmul %91, %92, %cst_58 {dimension_numbers = #tpu.dot_dimension_numbers<[1], [0], [0], [1], [0, 0, 1, 1], [], []>} : vector<288x64xbf16>, vector<64x64xbf16>, vector<288x64xf32> -> vector<288x64xf32>
    %94 = arith.addf %90, %93 : vector<288x64xf32>
    %c1_59 = arith.constant 1 : index
    %c0_60 = arith.constant 0 : index
    %95 = vector.load %arg9[%c1_59, %c0_60] : memref<342x64xbf16, #tpu.memory_space<vmem>>, vector<288x64xbf16>
    %c64_61 = arith.constant 64 : index
    %c0_62 = arith.constant 0 : index
    %96 = vector.load %arg5[%c64_61, %c0_62] : memref<576x64xbf16, #tpu.memory_space<vmem>>, vector<64x64xbf16>
    %cst_63 = arith.constant dense<0.000000e+00> : vector<288x64xf32>
    %97 = tpu.matmul %95, %96, %cst_63 {dimension_numbers = #tpu.dot_dimension_numbers<[1], [0], [0], [1], [0, 0, 1, 1], [], []>} : vector<288x64xbf16>, vector<64x64xbf16>, vector<288x64xf32> -> vector<288x64xf32>
    %98 = arith.addf %94, %97 : vector<288x64xf32>
    %c2_64 = arith.constant 2 : index
    %c0_65 = arith.constant 0 : index
    %99 = vector.load %arg9[%c2_64, %c0_65] : memref<342x64xbf16, #tpu.memory_space<vmem>>, vector<288x64xbf16>
    %c128_66 = arith.constant 128 : index
    %c0_67 = arith.constant 0 : index
    %100 = vector.load %arg5[%c128_66, %c0_67] : memref<576x64xbf16, #tpu.memory_space<vmem>>, vector<64x64xbf16>
    %cst_68 = arith.constant dense<0.000000e+00> : vector<288x64xf32>
    %101 = tpu.matmul %99, %100, %cst_68 {dimension_numbers = #tpu.dot_dimension_numbers<[1], [0], [0], [1], [0, 0, 1, 1], [], []>} : vector<288x64xbf16>, vector<64x64xbf16>, vector<288x64xf32> -> vector<288x64xf32>
    %102 = arith.addf %98, %101 : vector<288x64xf32>
    %c18_69 = arith.constant 18 : index
    %c0_70 = arith.constant 0 : index
    %103 = vector.load %arg9[%c18_69, %c0_70] : memref<342x64xbf16, #tpu.memory_space<vmem>>, vector<288x64xbf16>
    %c192_71 = arith.constant 192 : index
    %c0_72 = arith.constant 0 : index
    %104 = vector.load %arg5[%c192_71, %c0_72] : memref<576x64xbf16, #tpu.memory_space<vmem>>, vector<64x64xbf16>
    %cst_73 = arith.constant dense<0.000000e+00> : vector<288x64xf32>
    %105 = tpu.matmul %103, %104, %cst_73 {dimension_numbers = #tpu.dot_dimension_numbers<[1], [0], [0], [1], [0, 0, 1, 1], [], []>} : vector<288x64xbf16>, vector<64x64xbf16>, vector<288x64xf32> -> vector<288x64xf32>
    %106 = arith.addf %102, %105 : vector<288x64xf32>
    %c19_74 = arith.constant 19 : index
    %c0_75 = arith.constant 0 : index
    %107 = vector.load %arg9[%c19_74, %c0_75] : memref<342x64xbf16, #tpu.memory_space<vmem>>, vector<288x64xbf16>
    %c256_76 = arith.constant 256 : index
    %c0_77 = arith.constant 0 : index
    %108 = vector.load %arg5[%c256_76, %c0_77] : memref<576x64xbf16, #tpu.memory_space<vmem>>, vector<64x64xbf16>
    %cst_78 = arith.constant dense<0.000000e+00> : vector<288x64xf32>
    %109 = tpu.matmul %107, %108, %cst_78 {dimension_numbers = #tpu.dot_dimension_numbers<[1], [0], [0], [1], [0, 0, 1, 1], [], []>} : vector<288x64xbf16>, vector<64x64xbf16>, vector<288x64xf32> -> vector<288x64xf32>
    %110 = arith.addf %106, %109 : vector<288x64xf32>
    %c20_79 = arith.constant 20 : index
    %c0_80 = arith.constant 0 : index
    %111 = vector.load %arg9[%c20_79, %c0_80] : memref<342x64xbf16, #tpu.memory_space<vmem>>, vector<288x64xbf16>
    %c320_81 = arith.constant 320 : index
    %c0_82 = arith.constant 0 : index
    %112 = vector.load %arg5[%c320_81, %c0_82] : memref<576x64xbf16, #tpu.memory_space<vmem>>, vector<64x64xbf16>
    %cst_83 = arith.constant dense<0.000000e+00> : vector<288x64xf32>
    %113 = tpu.matmul %111, %112, %cst_83 {dimension_numbers = #tpu.dot_dimension_numbers<[1], [0], [0], [1], [0, 0, 1, 1], [], []>} : vector<288x64xbf16>, vector<64x64xbf16>, vector<288x64xf32> -> vector<288x64xf32>
    %114 = arith.addf %110, %113 : vector<288x64xf32>
    %c36_84 = arith.constant 36 : index
    %c0_85 = arith.constant 0 : index
    %115 = vector.load %arg9[%c36_84, %c0_85] : memref<342x64xbf16, #tpu.memory_space<vmem>>, vector<288x64xbf16>
    %c384_86 = arith.constant 384 : index
    %c0_87 = arith.constant 0 : index
    %116 = vector.load %arg5[%c384_86, %c0_87] : memref<576x64xbf16, #tpu.memory_space<vmem>>, vector<64x64xbf16>
    %cst_88 = arith.constant dense<0.000000e+00> : vector<288x64xf32>
    %117 = tpu.matmul %115, %116, %cst_88 {dimension_numbers = #tpu.dot_dimension_numbers<[1], [0], [0], [1], [0, 0, 1, 1], [], []>} : vector<288x64xbf16>, vector<64x64xbf16>, vector<288x64xf32> -> vector<288x64xf32>
    %118 = arith.addf %114, %117 : vector<288x64xf32>
    %c37_89 = arith.constant 37 : index
    %c0_90 = arith.constant 0 : index
    %119 = vector.load %arg9[%c37_89, %c0_90] : memref<342x64xbf16, #tpu.memory_space<vmem>>, vector<288x64xbf16>
    %c448_91 = arith.constant 448 : index
    %c0_92 = arith.constant 0 : index
    %120 = vector.load %arg5[%c448_91, %c0_92] : memref<576x64xbf16, #tpu.memory_space<vmem>>, vector<64x64xbf16>
    %cst_93 = arith.constant dense<0.000000e+00> : vector<288x64xf32>
    %121 = tpu.matmul %119, %120, %cst_93 {dimension_numbers = #tpu.dot_dimension_numbers<[1], [0], [0], [1], [0, 0, 1, 1], [], []>} : vector<288x64xbf16>, vector<64x64xbf16>, vector<288x64xf32> -> vector<288x64xf32>
    %122 = arith.addf %118, %121 : vector<288x64xf32>
    %c38_94 = arith.constant 38 : index
    %c0_95 = arith.constant 0 : index
    %123 = vector.load %arg9[%c38_94, %c0_95] : memref<342x64xbf16, #tpu.memory_space<vmem>>, vector<288x64xbf16>
    %c512_96 = arith.constant 512 : index
    %c0_97 = arith.constant 0 : index
    %124 = vector.load %arg5[%c512_96, %c0_97] : memref<576x64xbf16, #tpu.memory_space<vmem>>, vector<64x64xbf16>
    %cst_98 = arith.constant dense<0.000000e+00> : vector<288x64xf32>
    %125 = tpu.matmul %123, %124, %cst_98 {dimension_numbers = #tpu.dot_dimension_numbers<[1], [0], [0], [1], [0, 0, 1, 1], [], []>} : vector<288x64xbf16>, vector<64x64xbf16>, vector<288x64xf32> -> vector<288x64xf32>
    %126 = arith.addf %122, %125 : vector<288x64xf32>
    %c0_99 = arith.constant 0 : index
    %c0_100 = arith.constant 0 : index
    %127 = vector.load %arg6[%c0_99, %c0_100] : memref<1x64xf32, #tpu.memory_space<vmem>>, vector<1x64xf32>
    %128 = vector.broadcast %127 : vector<1x64xf32> to vector<288x64xf32>
    %129 = arith.mulf %126, %128 : vector<288x64xf32>
    %c0_101 = arith.constant 0 : index
    %c0_102 = arith.constant 0 : index
    %130 = vector.load %arg7[%c0_101, %c0_102] : memref<1x64xf32, #tpu.memory_space<vmem>>, vector<1x64xf32>
    %131 = vector.broadcast %130 : vector<1x64xf32> to vector<288x64xf32>
    %132 = arith.addf %129, %131 : vector<288x64xf32>
    %c0_103 = arith.constant 0 : index
    %c19_104 = arith.constant 19 : index
    %c0_105 = arith.constant 0 : index
    %133 = vector.load %arg1[%c0_103, %c19_104, %c0_105] : memref<1x342x64xf32, #tpu.memory_space<vmem>>, vector<1x288x64xf32>
    %134 = vector.shape_cast %133 : vector<1x288x64xf32> to vector<288x64xf32>
    %135 = arith.addf %132, %134 : vector<288x64xf32>
    %cst_106 = arith.constant 0.000000e+00 : f32
    %136 = vector.broadcast %cst_106 : f32 to vector<288x64xf32>
    %137 = arith.maximumf %135, %136 : vector<288x64xf32>
    %c0_107 = arith.constant 0 : index
    %c0_108 = arith.constant 0 : index
    %c0_109 = arith.constant 0 : index
    %138 = vector.load %arg8[%c0_107, %c0_108, %c0_109] : memref<1x288x64xf32, #tpu.memory_space<vmem>>, vector<1x288x64xf32>
    %139 = vector.shape_cast %138 : vector<1x288x64xf32> to vector<288x64xf32>
    %140 = vector.shape_cast %137 : vector<288x64xf32> to vector<1x288x64xf32>
    tpu.vector_store %arg8[%c0_107, %c0_108, %c0_109], %140 {strides = array<i32>} : memref<1x288x64xf32, #tpu.memory_space<vmem>>, vector<1x288x64xf32>,
    return
  }
  func.func @transform_0(%arg0: i32) -> (i32, i32, i32) {
    %c0_i32 = arith.constant 0 : i32
    %c0_i32_0 = arith.constant 0 : i32
    %c0_i32_1 = arith.constant 0 : i32
    return %arg0, %c0_i32, %c0_i32_0 : i32, i32, i32
  }
  func.func @transform_1(%arg0: i32) -> (i32, i32) {
    %c0_i32 = arith.constant 0 : i32
    %c0_i32_0 = arith.constant 0 : i32
    %c0_i32_1 = arith.constant 0 : i32
    return %c0_i32, %c0_i32_0 : i32, i32
  }
  func.func @transform_2(%arg0: i32) -> (i32, i32) {
    %c0_i32 = arith.constant 0 : i32
    %c0_i32_0 = arith.constant 0 : i32
    %c0_i32_1 = arith.constant 0 : i32
    return %c0_i32, %c0_i32_0 : i32, i32
  }
  func.func @transform_3(%arg0: i32) -> (i32, i32) {
    %c0_i32 = arith.constant 0 : i32
    %c0_i32_0 = arith.constant 0 : i32
    %c0_i32_1 = arith.constant 0 : i32
    return %c0_i32, %c0_i32_0 : i32, i32
  }
  func.func @transform_4(%arg0: i32) -> (i32, i32) {
    %c0_i32 = arith.constant 0 : i32
    %c0_i32_0 = arith.constant 0 : i32
    %c0_i32_1 = arith.constant 0 : i32
    return %c0_i32, %c0_i32_0 : i32, i32
  }
  func.func @transform_5(%arg0: i32) -> (i32, i32) {
    %c0_i32 = arith.constant 0 : i32
    %c0_i32_0 = arith.constant 0 : i32
    %c0_i32_1 = arith.constant 0 : i32
    return %c0_i32, %c0_i32_0 : i32, i32
  }
  func.func @transform_6(%arg0: i32) -> (i32, i32) {
    %c0_i32 = arith.constant 0 : i32
    %c0_i32_0 = arith.constant 0 : i32
    %c0_i32_1 = arith.constant 0 : i32
    return %c0_i32, %c0_i32_0 : i32, i32
  }
  func.func @transform_7(%arg0: i32) -> (i32, i32, i32) {
    %c0_i32 = arith.constant 0 : i32
    %c0_i32_0 = arith.constant 0 : i32
    %c0_i32_1 = arith.constant 0 : i32
    return %arg0, %c0_i32, %c0_i32_0 : i32, i32, i32
  }
}

</mosaic_0001>

<bundles_post_ra>
// kernel: residual_block_forward.1
= control target key start
LH: loop header
LB: loop body
LE: loop exit
PB: predicated region body
PF: predicated region fallthrough
CT: control target
= control target key end

     0   :  { %s10740_s24 = smov 0   ;;  %s15566_s0 = inlined_call_operand.vmem [shape: f32[2,342,64], index: 0, kind: input, shape index: {}]   ;;  %s15567_s1 = inlined_call_operand.vmem [shape: bf16[576,64], index: 1, kind: input, shape index: {}]   ;;  %s15568_s2 = inlined_call_operand.vmem [shape: f32[1,64], index: 2, kind: input, shape index: {}]   ;;  %s15569_s3 = inlined_call_operand.vmem [shape: f32[1,64], index: 3, kind: input, shape index: {}]   ;;  %s15570_s4 = inlined_call_operand.vmem [shape: bf16[576,64], index: 4, kind: input, shape index: {}]   ;;  %s15571_s5 = inlined_call_operand.vmem [shape: f32[1,64], index: 5, kind: input, shape index: {}]   ;;  %s15572_s6 = inlined_call_operand.vmem [shape: f32[1,64], index: 6, kind: input, shape index: {}]   ;;  %s15573_s7 = inlined_call_operand.vmem [shape: f32[2,288,64], index: 7, kind: output, shape index: {}]  }
   0x1 LB: > { %s8732_s25 = sadd.s32 4294967295, %s10697_s24   ;;  %p8736_p0 = scmp.ge.s32.totalorder %s10697_s24, 1  ;;  %s10697_s24 = sphi %s10740_s24, %s17_s24  }
   0x2   : > { %p237_p1 = scmp.lt.s32.totalorder %s10697_s24, 3 }
   0x4   : > { %p238_p2 = pnand %p8736_p0, %p237_p1 }
   0x6   : > { %241 = sbr.rel (%p238_p2) target bundleno = 1205 (0x4b5), region = 48 }
   0xb   : > { %v10546_v0 = vld [vmem:[%s15567_s1 + $0x38] sm:$0xff]   ;;  %p269_p3 = scmp.lt.s32.totalorder %s8732_s25, 1  ;;  %v10548_v2 = vld [vmem:[%s15567_s1 + $0x30] sm:$0xff]   ;;  %v10550_v4 = vld [vmem:[%s15567_s1 + $0x28] sm:$0xff]   ;;  %vm15590_vm0 = vcmask 523264   ;;  %vm4196_vm1 = vcmask 517120  }
   0xc   : > { %v10547_v1 = vld [vmem:[%s15567_s1 + $0x18] sm:$0xff]   ;;  %9671 = vmatprep.subr.bf16.mxu0 %v10546_v0  ;;  %v10549_v3 = vld [vmem:[%s15567_s1 + $0x10] sm:$0xff]   ;;  %v10551_v5 = vld [vmem:[%s15567_s1 + $0x8] sm:$0xff]   ;;  %vm15593_vm2 = vsmask.f32 1280  ;;  %vm15591_vm4 = vcmask 519168  }
   0xd   : > { %s16471_s25 = smov (!%p269_p3, %s8732_s25), 1  ;;  %9715 = vmatprep.subr.bf16.mxu1 %v10547_v1  ;;  %9672 = vmatpush3.bf16.msra.mxu0 %v10546_v0  ;;  %v10552_v6 = vld [vmem:[%s15567_s1 + $0x20] sm:$0xff]   ;;  %v10554_v18 = vld [vmem:[%s15567_s1 + $0x58] sm:$0xff]   ;;  %v10555_v27 = vld [vmem:[%s15567_s1 + $0x50] sm:$0xff]   ;;  %vm15594_vm5 = vcmask 519169   ;;  %vm4205_vm6 = vcmask 518144  }
   0xe   : > { %9716 = vmatpush3.bf16.msra.mxu1 %v10547_v1  ;;  %9673 = vmatprep.subr.bf16.mxu0 %v10548_v2  ;;  %s10463_s13 = smul.u32 344, %s16471_s25  ;;  %v10553_v10 = vld [vmem:[%s15567_s1] sm:$0xff]   ;;  %v10556_v40 = vld [vmem:[%s15567_s1 + $0x48] sm:$0xff]   ;;  %v10558_v55 = vld [vmem:[%s15567_s1 + $0x78] sm:$0xff]  }
   0xf   : > { %9717 = vmatprep.subr.bf16.mxu1 %v10549_v3  ;;  %v10557_v50 = vld [vmem:[%s15567_s1 + $0x40] sm:$0xff]   ;;  %v10559_v58 = vld [vmem:[%s15567_s1 + $0x70] sm:$0xff]   ;;  %v10560_v1 = vld [vmem:[%s15567_s1 + $0x68] sm:$0xff]   ;;  %s10464_s29 = smul.u32 288, %s16471_s25 }
  0x10   : > { %s10772_s18 = scalar_lea.vmem %s15566_s0, %s10463_s13  ;;  %vm11635_vm3 = vmand %vm4196_vm1, %vm15593_vm2 }
  0x11   : > { %9674 = vmatpush3.bf16.msra.mxu0 %v10548_v2  ;;  %v342_v7 = vld [vmem:[%s10772_s18 + $0x1] sm:$0xff]  ;;  %v343_v8 = vld [vmem:[%s10772_s18 + $0x9] sm:$0xff]  ;;  %v344_v14 = vld [vmem:[%s10772_s18 + $0x11] sm:$0xff]  ;;  %s15312_s8 = scalar_lea.vmem %s15573_s7, %s10464_s29 }
  0x12   : > { %9718 = vmatpush3.bf16.msra.mxu1 %v10549_v3  ;;  %9675 = vmatprep.subr.bf16.mxu0 %v10550_v4  ;;  %v280_v9 = vld [vmem:[%s10772_s18] sm:$0xff]  ;;  %v378_v11 = vpack.c.bf16 %v343_v8, %v342_v7  ;;  %v281_v12 = vld [vmem:[%s10772_s18 + $0x8] sm:$0xff]  ;;  %v282_v16 = vld [vmem:[%s10772_s18 + $0x10] sm:$0xff] }
  0x13   : > { %9719 = vmatprep.subr.bf16.mxu1 %v10551_v5  ;;  %v316_v13 = vpack.c.bf16 %v281_v12, %v280_v9  ;;  %v345_v15 = vld [vmem:[%s10772_s18 + $0x19] sm:$0xff]  ;;  %v346_v19 = vld [vmem:[%s10772_s18 + $0x21] sm:$0xff]  ;;  %v347_v20 = vld [vmem:[%s10772_s18 + $0x29] sm:$0xff] }
  0x14   : > { %9679 = vmatprep.mubr.msk.bf16.mxu0 %vm15590_vm0, %v378_v11  ;;  %v283_v17 = vld [vmem:[%s10772_s18 + $0x18] sm:$0xff]  ;;  %v284_v21 = vld [vmem:[%s10772_s18 + $0x20] sm:$0xff]  ;;  %v285_v22 = vld [vmem:[%s10772_s18 + $0x28] sm:$0xff]  ;;  %v379_v23 = vpack.c.bf16 %v345_v15, %v344_v14  ;;  %v380_v25 = vpack.c.bf16 %v347_v20, %v346_v19 }
  0x15   : > { %9676 = vmatpush3.bf16.msra.mxu0 %v10550_v4  ;;  %9723 = vmatprep.mubr.msk.bf16.mxu1 %vm15590_vm0, %v316_v13  ;;  %v317_v24 = vpack.c.bf16 %v283_v17, %v282_v16  ;;  %v318_v26 = vpack.c.bf16 %v285_v22, %v284_v21  ;;  %v348_v28 = vld [vmem:[%s10772_s18 + $0x31] sm:$0xff]  ;;  %v349_v29 = vld [vmem:[%s10772_s18 + $0x39] sm:$0xff]  ;;  %v350_v32 = vld [vmem:[%s10772_s18 + $0x41] sm:$0xff] }
  0x16   : > { %9720 = vmatpush3.bf16.msra.mxu1 %v10551_v5  ;;  %9677 = vmatprep.subr.bf16.mxu0 %v10552_v6  ;;  %v286_v30 = vld [vmem:[%s10772_s18 + $0x30] sm:$0xff]  ;;  %v287_v31 = vld [vmem:[%s10772_s18 + $0x38] sm:$0xff]  ;;  %v288_v34 = vld [vmem:[%s10772_s18 + $0x40] sm:$0xff]  ;;  %v381_v36 = vpack.c.bf16 %v349_v29, %v348_v28 }
  0x17   : > { %9721 = vmatprep.subr.bf16.mxu1 %v10553_v10  ;;  %v351_v33 = vld [vmem:[%s10772_s18 + $0x49] sm:$0xff]  ;;  %v319_v37 = vpack.c.bf16 %v287_v31, %v286_v30  ;;  %v352_v41 = vld [vmem:[%s10772_s18 + $0x51] sm:$0xff]  ;;  %v353_v42 = vld [vmem:[%s10772_s18 + $0x59] sm:$0xff] }
  0x18   : > { %v289_v35 = vld [vmem:[%s10772_s18 + $0x48] sm:$0xff]  ;;  %v382_v38 = vpack.c.bf16 %v351_v33, %v350_v32  ;;  %v290_v43 = vld [vmem:[%s10772_s18 + $0x50] sm:$0xff]  ;;  %v291_v44 = vld [vmem:[%s10772_s18 + $0x58] sm:$0xff]  ;;  %v383_v49 = vpack.c.bf16 %v353_v42, %v352_v41 }
  0x19   : > { %9678 = vmatpush3.bf16.msra.mxu0 %v10552_v6  ;;  %v320_v39 = vpack.c.bf16 %v289_v35, %v288_v34  ;;  %v354_v45 = vld [vmem:[%s10772_s18 + $0x61] sm:$0xff]  ;;  %v355_v46 = vld [vmem:[%s10772_s18 + $0x69] sm:$0xff]  ;;  %v321_v51 = vpack.c.bf16 %v291_v44, %v290_v43  ;;  %v356_v54 = vld [vmem:[%s10772_s18 + $0x71] sm:$0xff] }
  0x1a   : > { %9722 = vmatpush3.bf16.msra.mxu1 %v10553_v10  ;;  %9759 = vmatprep.subr.bf16.mxu0 %v10554_v18  ;;  %v292_v47 = vld [vmem:[%s10772_s18 + $0x60] sm:$0xff]  ;;  %v293_v48 = vld [vmem:[%s10772_s18 + $0x68] sm:$0xff]  ;;  %v384_v52 = vpack.c.bf16 %v355_v46, %v354_v45  ;;  %v294_v57 = vld [vmem:[%s10772_s18 + $0x70] sm:$0xff] }
  0x1b   : > { %v322_v53 = vpack.c.bf16 %v293_v48, %v292_v47  ;;  %v357_v56 = vld [vmem:[%s10772_s18 + $0x79] sm:$0xff]  ;;  %v358_v60 = vld [vmem:[%s10772_s18 + $0x81] sm:$0xff]  ;;  %v359_v61 = vld [vmem:[%s10772_s18 + $0x89] sm:$0xff]  ;;  %9803 = vmatprep.subr.bf16.mxu1 %v10558_v55 }
  0x1c   : > { %9680 = vmatmul.mubr.msk.bf16.vlgmr.msra.gmra.mxu0 %vm15590_vm0, %v379_v23  ;;  %v295_v59 = vld [vmem:[%s10772_s18 + $0x78] sm:$0xff]  ;;  %v296_v62 = vld [vmem:[%s10772_s18 + $0x80] sm:$0xff]  ;;  %v297_v63 = vld [vmem:[%s10772_s18 + $0x88] sm:$0xff]  ;;  %v385_v0 = vpack.c.bf16 %v357_v56, %v356_v54  ;;  %v386_v3 = vpack.c.bf16 %v359_v61, %v358_v60 }
  0x1d   : > { %9724 = vmatmul.mubr.msk.bf16.vlgmr.msra.gmra.mxu1 %vm15590_vm0, %v317_v24  ;;  %9760 = vmatpush3.bf16.msra.mxu0 %v10554_v18  ;;  %v323_v2 = vpack.c.bf16 %v295_v59, %v294_v57  ;;  %v324_v4 = vpack.c.bf16 %v297_v63, %v296_v62  ;;  %v10561_v5 = vld [vmem:[%s15567_s1 + $0x60] sm:$0xff]   ;;  %v10858_v6 = vld [vmem:[%s15567_s1 + $0x98] sm:$0xff]   ;;  %v298_v9 = vld [vmem:[%s10772_s18 + $0x90] sm:$0xff] }
  0x1e   : > { %9683 = vmatprep.mubr.msk.bf16.mxu0 %vm15590_vm0, %v380_v25  ;;  %9727 = vmatprep.mubr.msk.bf16.mxu1 %vm15590_vm0, %v318_v26  ;;  %v360_v7 = vld [vmem:[%s10772_s18 + $0x91] sm:$0xff]  ;;  %v361_v8 = vld [vmem:[%s10772_s18 + $0x99] sm:$0xff]  ;;  %v362_v11 = vld [vmem:[%s10772_s18 + $0xa1] sm:$0xff] }
  0x1f   : > { %9761 = vmatprep.subr.bf16.mxu0 %v10555_v27  ;;  %9804 = vmatpush3.bf16.msra.mxu1 %v10558_v55  ;;  %v299_v10 = vld [vmem:[%s10772_s18 + $0x98] sm:$0xff]  ;;  %v363_v12 = vld [vmem:[%s10772_s18 + $0xa9] sm:$0xff]  ;;  %v300_v13 = vld [vmem:[%s10772_s18 + $0xa0] sm:$0xff]  ;;  %v387_v15 = vpack.c.bf16 %v361_v8, %v360_v7 }
  0x20   : > { %9805 = vmatprep.subr.bf16.mxu1 %v10559_v58  ;;  %v301_v14 = vld [vmem:[%s10772_s18 + $0xa8] sm:$0xff]  ;;  %v325_v16 = vpack.c.bf16 %v299_v10, %v298_v9  ;;  %v388_v17 = vpack.c.bf16 %v363_v12, %v362_v11  ;;  %v364_v19 = vld [vmem:[%s10772_s18 + $0xb1] sm:$0xff]  ;;  %v365_v20 = vld [vmem:[%s10772_s18 + $0xb9] sm:$0xff] }
  0x21   : > { %9762 = vmatpush3.bf16.msra.mxu0 %v10555_v27  ;;  %v326_v18 = vpack.c.bf16 %v301_v14, %v300_v13  ;;  %v302_v21 = vld [vmem:[%s10772_s18 + $0xb0] sm:$0xff]  ;;  %v303_v22 = vld [vmem:[%s10772_s18 + $0xb8] sm:$0xff]  ;;  %v366_v23 = vld [vmem:[%s10772_s18 + $0xc1] sm:$0xff]  ;;  %v389_v27 = vpack.c.bf16 %v365_v20, %v364_v19 }
  0x22   : > { %9763 = vmatprep.subr.bf16.mxu0 %v10556_v40  ;;  %v367_v24 = vld [vmem:[%s10772_s18 + $0xc9] sm:$0xff]  ;;  %v304_v25 = vld [vmem:[%s10772_s18 + $0xc0] sm:$0xff]  ;;  %v327_v28 = vpack.c.bf16 %v303_v22, %v302_v21  ;;  %v10887_v31 = vld [vmem:[%s15567_s1 + $0xb8] sm:$0xff]  }
  0x23   : > { %9806 = vmatpush3.bf16.msra.mxu1 %v10559_v58  ;;  %v305_v26 = vld [vmem:[%s10772_s18 + $0xc8] sm:$0xff]  ;;  %v390_v29 = vpack.c.bf16 %v367_v24, %v366_v23  ;;  %v368_v32 = vld [vmem:[%s10772_s18 + $0xd1] sm:$0xff]  ;;  %v369_v33 = vld [vmem:[%s10772_s18 + $0xd9] sm:$0xff] }
  0x24   : > { %9684 = vmatmul.mubr.msk.bf16.gmra.mxu0 %vm15590_vm0, %v381_v36  ;;  %9807 = vmatprep.subr.bf16.mxu1 %v10560_v1  ;;  %v328_v30 = vpack.c.bf16 %v305_v26, %v304_v25  ;;  %v306_v34 = vld [vmem:[%s10772_s18 + $0xd0] sm:$0xff]  ;;  %v307_v35 = vld [vmem:[%s10772_s18 + $0xd8] sm:$0xff]  ;;  %v370_v36 = vld [vmem:[%s10772_s18 + $0xe1] sm:$0xff] }
  0x25   : > { %9728 = vmatmul.mubr.msk.bf16.gmra.mxu1 %vm15590_vm0, %v319_v37  ;;  %9687 = vmatprep.mubr.msk.bf16.mxu0 %vm15590_vm0, %v382_v38  ;;  %v371_v37 = vld [vmem:[%s10772_s18 + $0xe9] sm:$0xff]  ;;  %v308_v38 = vld [vmem:[%s10772_s18 + $0xe0] sm:$0xff]  ;;  %v329_v41 = vpack.c.bf16 %v307_v35, %v306_v34  ;;  %v372_v44 = vld [vmem:[%s10772_s18 + $0xf1] sm:$0xff] }
  0x26   : > { %9731 = vmatprep.mubr.msk.bf16.mxu1 %vm15590_vm0, %v320_v39  ;;  %9764 = vmatpush3.bf16.msra.mxu0 %v10556_v40  ;;  %v309_v39 = vld [vmem:[%s10772_s18 + $0xe8] sm:$0xff]  ;;  %v391_v40 = vpack.c.bf16 %v369_v33, %v368_v32  ;;  %v392_v42 = vpack.c.bf16 %v371_v37, %v370_v36  ;;  %v373_v45 = vld [vmem:[%s10772_s18 + $0xf9] sm:$0xff]  ;;  %v310_v46 = vld [vmem:[%s10772_s18 + $0xf0] sm:$0xff] }
  0x27   : > { %9765 = vmatprep.subr.bf16.mxu0 %v10557_v50  ;;  %9808 = vmatpush3.bf16.msra.mxu1 %v10560_v1  ;;  %v330_v43 = vpack.c.bf16 %v309_v39, %v308_v38  ;;  %v311_v47 = vld [vmem:[%s10772_s18 + $0xf8] sm:$0xff]  ;;  %v374_v48 = vld [vmem:[%s10772_s18 + $0x101] sm:$0xff]  ;;  %v314_v58 = vld [vmem:[%s10772_s18 + $0x110] sm:$0xff] }
  0x28   : > { %9809 = vmatprep.subr.bf16.mxu1 %v10561_v5  ;;  %v376_v56 = vld [vmem:[%s10772_s18 + $0x111] sm:$0xff]  ;;  %v377_v57 = vld [vmem:[%s10772_s18 + $0x119] sm:$0xff]  ;;  %v915_v60 = vld [vmem:[%s10772_s18 + $0x2] sm:$0xff] }
  0x29   : > { %v315_v59 = vld [vmem:[%s10772_s18 + $0x118] sm:$0xff]  ;;  %v916_v61 = vld [vmem:[%s10772_s18 + $0xa] sm:$0xff]  ;;  %v1274_v12 = vld [vmem:[%s10772_s18 + $0x42] sm:$0xff] }
  0x2a   : > { %9766 = vmatpush3.bf16.msra.mxu0 %v10557_v50  ;;  %v312_v50 = vld [vmem:[%s10772_s18 + $0x100] sm:$0xff]  ;;  %v917_v62 = vld [vmem:[%s10772_s18 + $0x12] sm:$0xff]  ;;  %v333_v1 = vpack.c.bf16 %v315_v59, %v314_v58  ;;  %v1275_v13 = vld [vmem:[%s10772_s18 + $0x4a] sm:$0xff] }
  0x2b   : > { %9847 = vmatprep.subr.bf16.mxu0 %v10858_v6  ;;  %9810 = vmatpush3.bf16.msra.mxu1 %v10561_v5  ;;  %v918_v63 = vld [vmem:[%s10772_s18 + $0x1a] sm:$0xff]  ;;  %v1271_v5 = vld [vmem:[%s10772_s18 + $0x2a] sm:$0xff]  ;;  %v921_v7 = vld [vmem:[%s10772_s18 + $0x32] sm:$0xff] }
  0x2c   : > { %9688 = vmatmul.mubr.msk.bf16.gmra.mxu0 %vm15590_vm0, %v383_v49  ;;  %9891 = vmatprep.subr.bf16.mxu1 %v10887_v31  ;;  %v375_v49 = vld [vmem:[%s10772_s18 + $0x109] sm:$0xff]  ;;  %v922_v8 = vld [vmem:[%s10772_s18 + $0x3a] sm:$0xff]  ;;  %v929_v24 = vld [vmem:[%s10772_s18 + $0x72] sm:$0xff] }
  0x2d   : > { %9732 = vmatmul.mubr.msk.bf16.gmra.mxu1 %vm15590_vm0, %v321_v51  ;;  %9691 = vmatprep.mubr.msk.bf16.mxu0 %vm15590_vm0, %v384_v52  ;;  %v313_v51 = vld [vmem:[%s10772_s18 + $0x108] sm:$0xff]  ;;  %v393_v52 = vpack.c.bf16 %v373_v45, %v372_v44  ;;  %v394_v54 = vpack.c.bf16 %v375_v49, %v374_v48  ;;  %v954_v10 = vpack.c.bf16 %v922_v8, %v921_v7  ;;  %v10563_v11 = vld [vmem:[%s15567_s1 + $0x90] sm:$0xff]   ;;  %v10565_v20 = vld [vmem:[%s15567_s1 + $0x80] sm:$0xff]  }
  0x2e   : > { %9735 = vmatprep.mubr.msk.bf16.mxu1 %vm15590_vm0, %v322_v53  ;;  %v331_v53 = vpack.c.bf16 %v311_v47, %v310_v46  ;;  %v332_v55 = vpack.c.bf16 %v313_v51, %v312_v50  ;;  %v10567_v14 = vld [vmem:[%s15567_s1 + $0xb0] sm:$0xff]   ;;  %v1278_v21 = vld [vmem:[%s10772_s18 + $0x62] sm:$0xff]  ;;  %v930_v25 = vld [vmem:[%s10772_s18 + $0x7a] sm:$0xff] }
  0x2f   : > { %v1279_v22 = vld [vmem:[%s10772_s18 + $0x6a] sm:$0xff]  ;;  %v10569_v23 = vld [vmem:[%s15567_s1 + $0xa0] sm:$0xff]   ;;  %v10972_v26 = vld [vmem:[%s15567_s1 + $0xd8] sm:$0xff]  }
  0x30   : > { %v933_v32 = vld [vmem:[%s10772_s18 + $0x92] sm:$0xff]  ;;  %v934_v33 = vld [vmem:[%s10772_s18 + $0x9a] sm:$0xff]  ;;  %v1286_v36 = vld [vmem:[%s10772_s18 + $0xa2] sm:$0xff] }
  0x31   : > { %v960_v35 = vpack.c.bf16 %v934_v33, %v933_v32  ;;  %v1287_v37 = vld [vmem:[%s10772_s18 + $0xaa] sm:$0xff]  ;;  %v937_v38 = vld [vmem:[%s10772_s18 + $0xb2] sm:$0xff]  ;;  %v938_v39 = vld [vmem:[%s10772_s18 + $0xba] sm:$0xff] }
  0x32   : > { %v941_v44 = vld [vmem:[%s10772_s18 + $0xd2] sm:$0xff]  ;;  %v942_v45 = vld [vmem:[%s10772_s18 + $0xda] sm:$0xff]  ;;  %v1294_v48 = vld [vmem:[%s10772_s18 + $0xe2] sm:$0xff] }
  0x33   : > { %v964_v47 = vpack.c.bf16 %v942_v45, %v941_v44  ;;  %v1295_v49 = vld [vmem:[%s10772_s18 + $0xea] sm:$0xff]  ;;  %v945_v50 = vld [vmem:[%s10772_s18 + $0xf2] sm:$0xff]  ;;  %v946_v51 = vld [vmem:[%s10772_s18 + $0xfa] sm:$0xff] }
  0x34   : > { %9692 = vmatmul.mubr.msk.bf16.gmra.mxu0 %vm15590_vm0, %v385_v0  ;;  %v395_v0 = vpack.c.bf16 %v377_v57, %v376_v56  ;;  %v949_v56 = vld [vmem:[%s10772_s18 + $0x112] sm:$0xff]  ;;  %v950_v57 = vld [vmem:[%s10772_s18 + $0x11a] sm:$0xff]  ;;  %v1976_v8 = vld [vmem:[%s10772_s18 + $0x24] sm:$0xff] }
  0x35   : > { %9736 = vmatmul.mubr.msk.bf16.gmra.mxu1 %vm15590_vm0, %v323_v2  ;;  %9695 = vmatprep.mubr.msk.bf16.mxu0 %vm15590_vm0, %v386_v3  ;;  %v951_v2 = vpack.c.bf16 %v916_v61, %v915_v60  ;;  %v952_v3 = vpack.c.bf16 %v918_v63, %v917_v62  ;;  %v968_v59 = vpack.c.bf16 %v950_v57, %v949_v56  ;;  %v1302_v60 = vld [vmem:[%s10772_s18 + $0x122] sm:$0xff]  ;;  %v1303_v61 = vld [vmem:[%s10772_s18 + $0x12a] sm:$0xff]  ;;  %v1621_v62 = vld [vmem:[%s10772_s18 + $0x13] sm:$0xff] }
  0x36   : > { %9739 = vmatprep.mubr.msk.bf16.mxu1 %vm15590_vm0, %v324_v4  ;;  %v1270_v4 = vld [vmem:[%s10772_s18 + $0x22] sm:$0xff]  ;;  %v1624_v7 = vld [vmem:[%s10772_s18 + $0x2b] sm:$0xff] }
  0x37   : > { %v1305_v9 = vpack.c.bf16 %v1271_v5, %v1270_v4  ;;  %v1622_v63 = vld [vmem:[%s10772_s18 + $0x1b] sm:$0xff]  ;;  %v1623_v5 = vld [vmem:[%s10772_s18 + $0x23] sm:$0xff] }
  0x3c   : > { %9696 = vmatmul.mubr.msk.bf16.gmra.mxu0 %vm15590_vm0, %v387_v15  ;;  %v925_v15 = vld [vmem:[%s10772_s18 + $0x52] sm:$0xff] }
  0x3d   : > { %9740 = vmatmul.mubr.msk.bf16.gmra.mxu1 %vm15590_vm0, %v325_v16  ;;  %9699 = vmatprep.mubr.msk.bf16.mxu0 %vm15590_vm0, %v388_v17  ;;  %v926_v16 = vld [vmem:[%s10772_s18 + $0x5a] sm:$0xff]  ;;  %v10564_v17 = vld [vmem:[%s15567_s1 + $0x88] sm:$0xff]  }
  0x3e   : > { %9743 = vmatprep.mubr.msk.bf16.mxu1 %vm15590_vm0, %v326_v18  ;;  %v10568_v18 = vld [vmem:[%s15567_s1 + $0xa8] sm:$0xff]   ;;  %v956_v19 = vpack.c.bf16 %v926_v16, %v925_v15 }
  0x44   : > { %9700 = vmatmul.mubr.msk.bf16.gmra.mxu0 %vm15590_vm0, %v389_v27  ;;  %v10978_v27 = vld [vmem:[%s15567_s1 + $0xf8] sm:$0xff]  }
  0x45   : > { %9744 = vmatmul.mubr.msk.bf16.gmra.mxu1 %vm15590_vm0, %v327_v28  ;;  %9703 = vmatprep.mubr.msk.bf16.mxu0 %vm15590_vm0, %v390_v29  ;;  %v1309_v28 = vpack.c.bf16 %v1279_v22, %v1278_v21  ;;  %v958_v29 = vpack.c.bf16 %v930_v25, %v929_v24  ;;  %v1980_v21 = vld [vmem:[%s10772_s18 + $0x44] sm:$0xff]  ;;  %v1981_v22 = vld [vmem:[%s10772_s18 + $0x4c] sm:$0xff]  ;;  %v1630_v24 = vld [vmem:[%s10772_s18 + $0x5b] sm:$0xff] }
  0x46   : > { %9747 = vmatprep.mubr.msk.bf16.mxu1 %vm15590_vm0, %v328_v30  ;;  %v1282_v30 = vld [vmem:[%s10772_s18 + $0x82] sm:$0xff] }
  0x47   : > { %v10572_v25 = vld [vmem:[%s15567_s1 + $0xc8] sm:$0xff]  }
  0x4c   : > { %9704 = vmatmul.mubr.msk.bf16.gmra.mxu0 %vm15590_vm0, %v391_v40  ;;  %v1313_v40 = vpack.c.bf16 %v1287_v37, %v1286_v36  ;;  %v1632_v36 = vld [vmem:[%s10772_s18 + $0x6b] sm:$0xff] }
  0x4d   : > { %9748 = vmatmul.mubr.msk.bf16.gmra.mxu1 %vm15590_vm0, %v329_v41  ;;  %9707 = vmatprep.mubr.msk.bf16.mxu0 %vm15590_vm0, %v392_v42  ;;  %v962_v41 = vpack.c.bf16 %v938_v39, %v937_v38  ;;  %v1290_v42 = vld [vmem:[%s10772_s18 + $0xc2] sm:$0xff]  ;;  %v1985_v38 = vld [vmem:[%s10772_s18 + $0x6c] sm:$0xff] }
  0x4e   : > { %9751 = vmatprep.mubr.msk.bf16.mxu1 %vm15590_vm0, %v330_v43  ;;  %v1291_v43 = vld [vmem:[%s10772_s18 + $0xca] sm:$0xff]  ;;  %v1633_v39 = vld [vmem:[%s10772_s18 + $0x73] sm:$0xff] }
  0x4f   : > { %v1315_v46 = vpack.c.bf16 %v1291_v43, %v1290_v42  ;;  %v1984_v37 = vld [vmem:[%s10772_s18 + $0x64] sm:$0xff]  ;;  %v1987_v42 = vld [vmem:[%s10772_s18 + $0x7c] sm:$0xff] }
  0x50   : > { %v11103_v43 = vld [vmem:[%s15567_s1 + $0x118] sm:$0xff]   ;;  %v11105_v45 = vpack.c.bf16 %v1985_v38, %v1984_v37  ;;  %v1651_v38 = vld [vmem:[%s10772_s18 + $0x103] sm:$0xff] }
  0x54   : > { %9708 = vmatmul.mubr.msk.bf16.gmra.mxu0 %vm15590_vm0, %v393_v52  ;;  %v1317_v52 = vpack.c.bf16 %v1295_v49, %v1294_v48  ;;  %v1635_v48 = vld [vmem:[%s10772_s18 + $0x83] sm:$0xff]  ;;  %v1636_v49 = vld [vmem:[%s10772_s18 + $0x8b] sm:$0xff] }
  0x55   : > { %9752 = vmatmul.mubr.msk.bf16.gmra.mxu1 %vm15590_vm0, %v331_v53  ;;  %9711 = vmatprep.mubr.msk.bf16.mxu0 %vm15590_vm0, %v394_v54  ;;  %v966_v53 = vpack.c.bf16 %v946_v51, %v945_v50  ;;  %v1298_v54 = vld [vmem:[%s10772_s18 + $0x102] sm:$0xff]  ;;  %v1989_v51 = vld [vmem:[%s10772_s18 + $0x8c] sm:$0xff]  ;;  %v1664_v56 = vpack.c.bf16 %v1636_v49, %v1635_v48 }
  0x56   : > { %9755 = vmatprep.mubr.msk.bf16.mxu1 %vm15590_vm0, %v332_v55  ;;  %v1299_v55 = vld [vmem:[%s10772_s18 + $0x10a] sm:$0xff]  ;;  %v1654_v48 = vld [vmem:[%s10772_s18 + $0x11b] sm:$0xff] }
  0x57   : > { %v1319_v58 = vpack.c.bf16 %v1299_v55, %v1298_v54  ;;  %v1988_v50 = vld [vmem:[%s10772_s18 + $0x84] sm:$0xff]  ;;  %v1990_v54 = vld [vmem:[%s10772_s18 + $0x94] sm:$0xff]  ;;  %v1991_v55 = vld [vmem:[%s10772_s18 + $0x9c] sm:$0xff] }
  0x58   : > { %v11124_v57 = vpack.c.bf16 %v1989_v51, %v1988_v50  ;;  %v2006_v50 = vld [vmem:[%s10772_s18 + $0x114] sm:$0xff]  ;;  %v2007_v51 = vld [vmem:[%s10772_s18 + $0x11c] sm:$0xff] }
  0x5c   : > { %9712 = vmatmul.mubr.msk.bf16.gmra.mxu0 %vm15590_vm0, %v395_v0  ;;  %v1974_v0 = vld [vmem:[%s10772_s18 + $0x14] sm:$0xff] }
  0x5d   : > { %9756 = vmatmul.mubr.msk.bf16.gmra.mxu1 %vm15590_vm0, %v333_v1  ;;  %9767 = vmatprep.mubr.msk.bf16.mxu0 %vm15590_vm0, %v951_v2  ;;  %v1975_v1 = vld [vmem:[%s10772_s18 + $0x1c] sm:$0xff]  ;;  %v1321_v2 = vpack.c.bf16 %v1303_v61, %v1302_v60  ;;  %v1640_v61 = vld [vmem:[%s10772_s18 + $0xab] sm:$0xff] }
  0x5e   : > { %9811 = vmatprep.mubr.msk.bf16.mxu1 %vm15590_vm0, %v952_v3  ;;  %v2010_v4 = vpack.c.bf16 %v1975_v1, %v1974_v0  ;;  %v1639_v60 = vld [vmem:[%s10772_s18 + $0xa3] sm:$0xff]  ;;  %v1641_v0 = vld [vmem:[%s10772_s18 + $0xb3] sm:$0xff]  ;;  %v1642_v1 = vld [vmem:[%s10772_s18 + $0xbb] sm:$0xff] }
  0x64   : > { %9768 = vmatmul.mubr.msk.bf16.vlgmr.msra.gmra.mxu0 %vm15590_vm0, %v952_v3  ;;  %v1657_v3 = vpack.c.bf16 %v1622_v63, %v1621_v62  ;;  %v1992_v62 = vld [vmem:[%s10772_s18 + $0xa4] sm:$0xff]  ;;  %v1993_v63 = vld [vmem:[%s10772_s18 + $0xac] sm:$0xff] }
  0x65   : > { %9848 = vmatpush3.bf16.msra.mxu0 %v10858_v6  ;;  %9812 = vmatmul.mubr.msk.bf16.vlgmr.msra.gmra.mxu1 %vm15590_vm0, %v1305_v9  ;;  %v1307_v6 = vpack.c.bf16 %v1275_v13, %v1274_v12  ;;  %v1978_v12 = vld [vmem:[%s10772_s18 + $0x34] sm:$0xff]  ;;  %v1979_v13 = vld [vmem:[%s10772_s18 + $0x3c] sm:$0xff] }
  0x66   : > { %9771 = vmatprep.mubr.msk.bf16.mxu0 %vm15590_vm0, %v1305_v9  ;;  %9815 = vmatprep.mubr.msk.bf16.mxu1 %vm15590_vm0, %v954_v10  ;;  %v1977_v9 = vld [vmem:[%s10772_s18 + $0x2c] sm:$0xff] }
  0x67   : > { %9849 = vmatprep.subr.bf16.mxu0 %v10563_v11  ;;  %9892 = vmatpush3.bf16.msra.mxu1 %v10887_v31  ;;  %v1283_v31 = vld [vmem:[%s10772_s18 + $0x8a] sm:$0xff]  ;;  %v11044_v15 = vpack.c.bf16 %v1977_v9, %v1976_v8 }
  0x68   : > { %9893 = vmatprep.subr.bf16.mxu1 %v10567_v14  ;;  %v1311_v34 = vpack.c.bf16 %v1283_v31, %v1282_v30  ;;  %v10576_v30 = vld [vmem:[%s15567_s1 + $0xe8] sm:$0xff]   ;;  %v11076_v31 = vpack.c.bf16 %v1981_v22, %v1980_v21 }
  0x69   : > { %9850 = vmatpush3.bf16.msra.mxu0 %v10563_v11  ;;  %v1626_v11 = vld [vmem:[%s10772_s18 + $0x3b] sm:$0xff]  ;;  %v1643_v9 = vld [vmem:[%s10772_s18 + $0xc3] sm:$0xff] }
  0x6a   : > { %9851 = vmatprep.subr.bf16.mxu0 %v10564_v17  ;;  %v1647_v22 = vld [vmem:[%s10772_s18 + $0xe3] sm:$0xff] }
  0x6b   : > { %9894 = vmatpush3.bf16.msra.mxu1 %v10567_v14  ;;  %v1658_v14 = vpack.c.bf16 %v1624_v7, %v1623_v5  ;;  %v11142_v5 = vpack.c.bf16 %v1993_v63, %v1992_v62  ;;  %v1667_v7 = vpack.c.bf16 %v1642_v1, %v1641_v0  ;;  %v11204_v62 = vpack.c.bf16 %v2007_v51, %v2006_v50 }
  0x6c   : > { %9772 = vmatmul.mubr.msk.bf16.gmra.mxu0 %vm15590_vm0, %v954_v10  ;;  %9895 = vmatprep.subr.bf16.mxu1 %v10568_v18  ;;  %v1625_v10 = vld [vmem:[%s10772_s18 + $0x33] sm:$0xff] }
  0x6d   : > { %9816 = vmatmul.mubr.msk.bf16.gmra.mxu1 %vm15590_vm0, %v1307_v6  ;;  %9775 = vmatprep.mubr.msk.bf16.mxu0 %vm15590_vm0, %v1307_v6  ;;  %v1659_v16 = vpack.c.bf16 %v1626_v11, %v1625_v10  ;;  %v1627_v6 = vld [vmem:[%s10772_s18 + $0x43] sm:$0xff]  ;;  %v1644_v10 = vld [vmem:[%s10772_s18 + $0xcb] sm:$0xff] }
  0x6e   : > { %9819 = vmatprep.mubr.msk.bf16.mxu1 %vm15590_vm0, %v956_v19  ;;  %9852 = vmatpush3.bf16.msra.mxu0 %v10564_v17  ;;  %v11046_v17 = vpack.c.bf16 %v1979_v13, %v1978_v12  ;;  %v1996_v11 = vld [vmem:[%s10772_s18 + $0xc4] sm:$0xff]  ;;  %v1997_v12 = vld [vmem:[%s10772_s18 + $0xcc] sm:$0xff] }
  0x6f   : > { %9853 = vmatprep.subr.bf16.mxu0 %v10565_v20  ;;  %9896 = vmatpush3.bf16.msra.mxu1 %v10568_v18  ;;  %v10571_v18 = vld [vmem:[%s15567_s1 + $0xd0] sm:$0xff]  }
  0x70   : > { %9897 = vmatprep.subr.bf16.mxu1 %v10569_v23  ;;  %v1645_v13 = vld [vmem:[%s10772_s18 + $0xd3] sm:$0xff] }
  0x72   : > { %9854 = vmatpush3.bf16.msra.mxu0 %v10565_v20  ;;  %v1628_v20 = vld [vmem:[%s10772_s18 + $0x4b] sm:$0xff] }
  0x73   : > { %9898 = vmatpush3.bf16.msra.mxu1 %v10569_v23  ;;  %9935 = vmatprep.subr.bf16.mxu0 %v10972_v26  ;;  %v1629_v23 = vld [vmem:[%s10772_s18 + $0x53] sm:$0xff] }
  0x74   : > { %9776 = vmatmul.mubr.msk.bf16.gmra.mxu0 %vm15590_vm0, %v956_v19  ;;  %9979 = vmatprep.subr.bf16.mxu1 %v10978_v27  ;;  %v10575_v19 = vld [vmem:[%s15567_s1 + $0xf0] sm:$0xff]   ;;  %v1661_v32 = vpack.c.bf16 %v1630_v24, %v1629_v23  ;;  %v2000_v24 = vld [vmem:[%s10772_s18 + $0xe4] sm:$0xff] }
  0x75   : > { %9820 = vmatmul.mubr.msk.bf16.gmra.mxu1 %vm15590_vm0, %v1309_v28  ;;  %9779 = vmatprep.mubr.msk.bf16.mxu0 %vm15590_vm0, %v1309_v28  ;;  %v1982_v28 = vld [vmem:[%s10772_s18 + $0x54] sm:$0xff]  ;;  %v1648_v23 = vld [vmem:[%s10772_s18 + $0xeb] sm:$0xff] }
  0x76   : > { %9823 = vmatprep.mubr.msk.bf16.mxu1 %vm15590_vm0, %v958_v29 }
  0x7c   : > { %9780 = vmatmul.mubr.msk.bf16.gmra.mxu0 %vm15590_vm0, %v958_v29  ;;  %v1983_v29 = vld [vmem:[%s10772_s18 + $0x5c] sm:$0xff] }
  0x7d   : > { %9824 = vmatmul.mubr.msk.bf16.gmra.mxu1 %vm15590_vm0, %v1311_v34  ;;  %9783 = vmatprep.mubr.msk.bf16.mxu0 %vm15590_vm0, %v1311_v34  ;;  %v11078_v33 = vpack.c.bf16 %v1983_v29, %v1982_v28  ;;  %v10577_v34 = vld [vmem:[%s15567_s1 + $0xe0] sm:$0xff]   ;;  %v1649_v28 = vld [vmem:[%s10772_s18 + $0xf3] sm:$0xff] }
  0x7e   : > { %9827 = vmatprep.mubr.msk.bf16.mxu1 %vm15590_vm0, %v960_v35  ;;  %v1650_v29 = vld [vmem:[%s10772_s18 + $0xfb] sm:$0xff] }
  0x84   : > { %9784 = vmatmul.mubr.msk.bf16.gmra.mxu0 %vm15590_vm0, %v960_v35  ;;  %v1631_v35 = vld [vmem:[%s10772_s18 + $0x63] sm:$0xff] }
  0x85   : > { %9828 = vmatmul.mubr.msk.bf16.gmra.mxu1 %vm15590_vm0, %v1313_v40  ;;  %9787 = vmatprep.mubr.msk.bf16.mxu0 %vm15590_vm0, %v1313_v40  ;;  %v1634_v40 = vld [vmem:[%s10772_s18 + $0x7b] sm:$0xff]  ;;  %v1662_v44 = vpack.c.bf16 %v1632_v36, %v1631_v35 }
  0x86   : > { %9831 = vmatprep.mubr.msk.bf16.mxu1 %vm15590_vm0, %v962_v41 }
  0x8c   : > { %9788 = vmatmul.mubr.msk.bf16.gmra.mxu0 %vm15590_vm0, %v962_v41  ;;  %v1986_v41 = vld [vmem:[%s10772_s18 + $0x74] sm:$0xff] }
  0x8d   : > { %9832 = vmatmul.mubr.msk.bf16.gmra.mxu1 %vm15590_vm0, %v1315_v46  ;;  %9791 = vmatprep.mubr.msk.bf16.mxu0 %vm15590_vm0, %v1315_v46  ;;  %v1663_v46 = vpack.c.bf16 %v1634_v40, %v1633_v39  ;;  %v1652_v39 = vld [vmem:[%s10772_s18 + $0x10b] sm:$0xff] }
  0x8e   : > { %9835 = vmatprep.mubr.msk.bf16.mxu1 %vm15590_vm0, %v964_v47  ;;  %v2004_v40 = vld [vmem:[%s10772_s18 + $0x104] sm:$0xff] }
  0x94   : > { %9792 = vmatmul.mubr.msk.bf16.gmra.mxu0 %vm15590_vm0, %v964_v47  ;;  %v11107_v47 = vpack.c.bf16 %v1987_v42, %v1986_v41 }
  0x95   : > { %9836 = vmatmul.mubr.msk.bf16.gmra.mxu1 %vm15590_vm0, %v1317_v52  ;;  %9795 = vmatprep.mubr.msk.bf16.mxu0 %vm15590_vm0, %v1317_v52  ;;  %v1637_v52 = vld [vmem:[%s10772_s18 + $0x93] sm:$0xff] }
  0x96   : > { %9839 = vmatprep.mubr.msk.bf16.mxu1 %vm15590_vm0, %v966_v53 }
  0x9c   : > { %9796 = vmatmul.mubr.msk.bf16.gmra.mxu0 %vm15590_vm0, %v966_v53  ;;  %v1638_v53 = vld [vmem:[%s10772_s18 + $0x9b] sm:$0xff] }
  0x9d   : > { %9840 = vmatmul.mubr.msk.bf16.gmra.mxu1 %vm15590_vm0, %v1319_v58  ;;  %9799 = vmatprep.mubr.msk.bf16.mxu0 %vm15590_vm0, %v1319_v58  ;;  %v1665_v58 = vpack.c.bf16 %v1638_v53, %v1637_v52 }
  0x9e   : > { %9843 = vmatprep.mubr.msk.bf16.mxu1 %vm15590_vm0, %v968_v59 }
  0xa4   : > { %9800 = vmatmul.mubr.msk.bf16.gmra.mxu0 %vm15590_vm0, %v968_v59  ;;  %v11126_v59 = vpack.c.bf16 %v1991_v55, %v1990_v54  ;;  %v1672_v54 = vpack.c.bf16 %v1652_v39, %v1651_v38  ;;  %v2684_v39 = vld [vmem:[%s10772_s18 + $0x45] sm:$0xff] }
  0xa5   : > { %9844 = vmatmul.mubr.msk.bf16.gmra.mxu1 %vm15590_vm0, %v1321_v2  ;;  %9855 = vmatprep.mubr.msk.bf16.mxu0 %vm15590_vm0, %v1657_v3  ;;  %v1994_v2 = vld [vmem:[%s10772_s18 + $0xb4] sm:$0xff]  ;;  %v1995_v3 = vld [vmem:[%s10772_s18 + $0xbc] sm:$0xff] }
  0xa6   : > { %9899 = vmatprep.mubr.msk.bf16.mxu1 %vm15590_vm0, %v2010_v4  ;;  %v1666_v4 = vpack.c.bf16 %v1640_v61, %v1639_v60  ;;  %v11144_v8 = vpack.c.bf16 %v1995_v3, %v1994_v2  ;;  %v1655_v3 = vld [vmem:[%s10772_s18 + $0x123] sm:$0xff] }
  0xac   : > { %9856 = vmatmul.mubr.msk.bf16.vlgmr.msra.gmra.mxu0 %vm15590_vm0, %v1658_v14  ;;  %v1646_v14 = vld [vmem:[%s10772_s18 + $0xdb] sm:$0xff] }
  0xad   : > { %9936 = vmatpush3.bf16.msra.mxu0 %v10972_v26  ;;  %9900 = vmatmul.mubr.msk.bf16.vlgmr.msra.gmra.mxu1 %vm15590_vm0, %v11044_v15  ;;  %v1660_v26 = vpack.c.bf16 %v1628_v20, %v1627_v6  ;;  %v1668_v6 = vpack.c.bf16 %v1644_v10, %v1643_v9  ;;  %v1669_v20 = vpack.c.bf16 %v1646_v14, %v1645_v13  ;;  %v2008_v10 = vld [vmem:[%s10772_s18 + $0x124] sm:$0xff]  ;;  %v2681_v14 = vld [vmem:[%s10772_s18 + $0x2d] sm:$0xff] }
  0xae   : > { %9859 = vmatprep.mubr.msk.bf16.mxu0 %vm15590_vm0, %v1659_v16  ;;  %9903 = vmatprep.mubr.msk.bf16.mxu1 %vm15590_vm0, %v11046_v17  ;;  %v1998_v16 = vld [vmem:[%s10772_s18 + $0xd4] sm:$0xff]  ;;  %v2680_v13 = vld [vmem:[%s10772_s18 + $0x25] sm:$0xff] }
  0xaf   : > { %9937 = vmatprep.subr.bf16.mxu0 %v10571_v18  ;;  %9980 = vmatpush3.bf16.msra.mxu1 %v10978_v27  ;;  %v10573_v27 = vld [vmem:[%s15567_s1 + $0xc0] sm:$0xff]  }
  0xb0   : > { %9981 = vmatprep.subr.bf16.mxu1 %v10575_v19 }
  0xb1   : > { %9938 = vmatpush3.bf16.msra.mxu0 %v10571_v18  ;;  %v1999_v18 = vld [vmem:[%s10772_s18 + $0xdc] sm:$0xff] }
  0xb2   : > { %9939 = vmatprep.subr.bf16.mxu0 %v10572_v25  ;;  %v11162_v21 = vpack.c.bf16 %v1999_v18, %v1998_v16 }
  0xb3   : > { %9982 = vmatpush3.bf16.msra.mxu1 %v10575_v19  ;;  %v11160_v19 = vpack.c.bf16 %v1997_v12, %v1996_v11  ;;  %v2009_v11 = vld [vmem:[%s10772_s18 + $0x12c] sm:$0xff] }
  0xb4   : > { %9860 = vmatmul.mubr.msk.bf16.gmra.mxu0 %vm15590_vm0, %v1660_v26  ;;  %9983 = vmatprep.subr.bf16.mxu1 %v10576_v30  ;;  %v2002_v26 = vld [vmem:[%s10772_s18 + $0xf4] sm:$0xff] }
  0xb5   : > { %9904 = vmatmul.mubr.msk.bf16.gmra.mxu1 %vm15590_vm0, %v11076_v31  ;;  %9863 = vmatprep.mubr.msk.bf16.mxu0 %vm15590_vm0, %v1661_v32  ;;  %v1670_v32 = vpack.c.bf16 %v1648_v23, %v1647_v22  ;;  %v11224_v22 = vpack.c.bf16 %v2009_v11, %v2008_v10 }
  0xb6   : > { %9907 = vmatprep.mubr.msk.bf16.mxu1 %vm15590_vm0, %v11078_v33  ;;  %9940 = vmatpush3.bf16.msra.mxu0 %v10572_v25  ;;  %v2001_v25 = vld [vmem:[%s10772_s18 + $0xec] sm:$0xff] }
  0xb7   : > { %9941 = vmatprep.subr.bf16.mxu0 %v10573_v27  ;;  %9984 = vmatpush3.bf16.msra.mxu1 %v10576_v30  ;;  %v2003_v30 = vld [vmem:[%s10772_s18 + $0xfc] sm:$0xff] }
  0xb8   : > { %9985 = vmatprep.subr.bf16.mxu1 %v10577_v34  ;;  %v11180_v35 = vpack.c.bf16 %v2003_v30, %v2002_v26 }
  0xba   : > { %9942 = vmatpush3.bf16.msra.mxu0 %v10573_v27  ;;  %v11178_v27 = vpack.c.bf16 %v2001_v25, %v2000_v24  ;;  %v2716_v25 = vpack.c.bf16 %v2681_v14, %v2680_v13 }
  0xbb   : > { %9986 = vmatpush3.bf16.msra.mxu1 %v10577_v34  ;;  %10023 = vmatprep.subr.bf16.mxu0 %v11103_v43  ;;  %v1671_v34 = vpack.c.bf16 %v1650_v29, %v1649_v28 }
  0xbc   : > { %9864 = vmatmul.mubr.msk.bf16.gmra.mxu0 %vm15590_vm0, %v1662_v44  ;;  %v2005_v44 = vld [vmem:[%s10772_s18 + $0x10c] sm:$0xff] }
  0xbd   : > { %9908 = vmatmul.mubr.msk.bf16.gmra.mxu1 %vm15590_vm0, %v11105_v45  ;;  %9867 = vmatprep.mubr.msk.bf16.mxu0 %vm15590_vm0, %v1663_v46  ;;  %v1653_v46 = vld [vmem:[%s10772_s18 + $0x113] sm:$0xff] }
  0xbe   : > { %9911 = vmatprep.mubr.msk.bf16.mxu1 %vm15590_vm0, %v11107_v47 }
  0xc4   : > { %9868 = vmatmul.mubr.msk.bf16.gmra.mxu0 %vm15590_vm0, %v1664_v56  ;;  %v11200_v56 = vpack.c.bf16 %v2005_v44, %v2004_v40  ;;  %v2685_v40 = vld [vmem:[%s10772_s18 + $0x4d] sm:$0xff] }
  0xc5   : > { %9912 = vmatmul.mubr.msk.bf16.gmra.mxu1 %vm15590_vm0, %v11124_v57  ;;  %9871 = vmatprep.mubr.msk.bf16.mxu0 %vm15590_vm0, %v1665_v58  ;;  %v1673_v58 = vpack.c.bf16 %v1654_v48, %v1653_v46  ;;  %v2718_v50 = vpack.c.bf16 %v2685_v40, %v2684_v39 }
  0xc6   : > { %9915 = vmatprep.mubr.msk.bf16.mxu1 %vm15590_vm0, %v11126_v59 }
  0xcc   : > { %9872 = vmatmul.mubr.msk.bf16.gmra.mxu0 %vm15590_vm0, %v1666_v4  ;;  %v1656_v4 = vld [vmem:[%s10772_s18 + $0x12b] sm:$0xff] }
  0xcd   : > { %9916 = vmatmul.mubr.msk.bf16.gmra.mxu1 %vm15590_vm0, %v11142_v5  ;;  %9875 = vmatprep.mubr.msk.bf16.mxu0 %vm15590_vm0, %v1667_v7 }
  0xce   : > { %9919 = vmatprep.mubr.msk.bf16.mxu1 %vm15590_vm0, %v11144_v8 }
  0xd4   : > { %9876 = vmatmul.mubr.msk.bf16.gmra.mxu0 %vm15590_vm0, %v1668_v6  ;;  %v1674_v6 = vpack.c.bf16 %v1656_v4, %v1655_v3  ;;  %v10580_v3 = vld [vmem:[%s15567_s1 + $0x108] sm:$0xff]  }
  0xd5   : > { %9920 = vmatmul.mubr.msk.bf16.gmra.mxu1 %vm15590_vm0, %v11160_v19  ;;  %9879 = vmatprep.mubr.msk.bf16.mxu0 %vm15590_vm0, %v1669_v20  ;;  %v2688_v4 = vld [vmem:[%s10772_s18 + $0x65] sm:$0xff] }
  0xd6   : > { %9923 = vmatprep.mubr.msk.bf16.mxu1 %vm15590_vm0, %v11162_v21 }
  0xdc   : > { %v9681_v36 = vpop.f32.mrf.mxu0  ;;  %9880 = vmatmul.mubr.msk.bf16.gmra.mxu0 %vm15590_vm0, %v1670_v32 }
  0xdd   : > { %v9725_v37 = vpop.f32.mrf.mxu1  ;;  %9924 = vmatmul.mubr.msk.bf16.gmra.mxu1 %vm15590_vm0, %v11178_v27  ;;  %9883 = vmatprep.mubr.msk.bf16.mxu0 %vm15590_vm0, %v1671_v34 }
  0xde   : > { %v11189_v41 = vadd.f32 %v9725_v37, %v9681_v36  ;;  %v517_v42 = vpop.f32.mrf.mxu0  ;;  %9927 = vmatprep.mubr.msk.bf16.mxu1 %vm15590_vm0, %v11180_v35  ;;  %v2682_v36 = vld [vmem:[%s10772_s18 + $0x35] sm:$0xff]  ;;  %v2683_v37 = vld [vmem:[%s10772_s18 + $0x3d] sm:$0xff] }
  0xdf   : > { %v772_v49 = vpop.f32.mrf.mxu1  ;;  %v2717_v48 = vpack.c.bf16 %v2683_v37, %v2682_v36  ;;  %v2692_v37 = vld [vmem:[%s10772_s18 + $0x85] sm:$0xff] }
  0xe0   : > { %v11198_v52 = vadd.f32 %v772_v49, %v517_v42  ;;  %v9682_v53 = vpop.f32.mrf.mxu0 }
  0xe1   : > { %v9726_v55 = vpop.f32.mrf.mxu1 }
  0xe2   : > { %v11202_v60 = vadd.f32 %v9726_v55, %v9682_v53  ;;  %v520_v61 = vpop.f32.mrf.mxu0  ;;  %v10579_v53 = vld [vmem:[%s15567_s1 + $0x110] sm:$0xff]  }
  0xe3   : > { %v775_v63 = vpop.f32.mrf.mxu1 }
  0xe4   : > { %v11206_v0 = vadd.f32 %v775_v63, %v520_v61  ;;  %v9685_v1 = vpop.f32.mrf.mxu0  ;;  %9884 = vmatmul.mubr.msk.bf16.gmra.mxu0 %vm15590_vm0, %v1672_v54 }
  0xe5   : > { %v9729_v2 = vpop.f32.mrf.mxu1  ;;  %9928 = vmatmul.mubr.msk.bf16.gmra.mxu1 %vm15590_vm0, %v11200_v56  ;;  %9887 = vmatprep.mubr.msk.bf16.mxu0 %vm15590_vm0, %v1673_v58 }
  0xe6   : > { %v11214_v7 = vadd.f32 %v9729_v2, %v9685_v1  ;;  %v533_v9 = vpop.f32.mrf.mxu0  ;;  %9931 = vmatprep.mubr.msk.bf16.mxu1 %vm15590_vm0, %v11204_v62  ;;  %v2686_v1 = vld [vmem:[%s10772_s18 + $0x55] sm:$0xff]  ;;  %v2687_v2 = vld [vmem:[%s10772_s18 + $0x5d] sm:$0xff] }
  0xe7   : > { %v788_v12 = vpop.f32.mrf.mxu1 }
  0xe8   : > { %v11222_v16 = vadd.f32 %v788_v12, %v533_v9  ;;  %v9686_v18 = vpop.f32.mrf.mxu0  ;;  %v2689_v9 = vld [vmem:[%s10772_s18 + $0x6d] sm:$0xff]  ;;  %v2719_v12 = vpack.c.bf16 %v2687_v2, %v2686_v1  ;;  %v2695_v1 = vld [vmem:[%s10772_s18 + $0x9d] sm:$0xff] }
  0xe9   : > { %v9730_v20 = vpop.f32.mrf.mxu1  ;;  %v2720_v14 = vpack.c.bf16 %v2689_v9, %v2688_v4 }
  0xea   : > { %v11226_v23 = vadd.f32 %v9730_v20, %v9686_v18  ;;  %v536_v24 = vpop.f32.mrf.mxu0 }
  0xeb   : > { %v791_v28 = vpop.f32.mrf.mxu1 }
  0xec   : > { %v11228_v29 = vadd.f32 %v791_v28, %v536_v24  ;;  %v9689_v26 = vpop.f32.mrf.mxu0  ;;  %9888 = vmatmul.mubr.msk.bf16.gmra.mxu0 %vm15590_vm0, %v1674_v6  ;;  %v10581_v6 = vld [vmem:[%s15567_s1 + $0x100] sm:$0xff]  }
  0xed   : > { %v9733_v30 = vpop.f32.mrf.mxu1  ;;  %9932 = vmatmul.mubr.msk.bf16.gmra.mxu1 %vm15590_vm0, %v11224_v22  ;;  %9943 = vmatprep.mubr.msk.bf16.mxu0 %vm15590_vm0, %v11044_v15 }
  0xee   : > { %v11235_v32 = vadd.f32 %v9733_v30, %v9689_v26  ;;  %v549_v34 = vpop.f32.mrf.mxu0  ;;  %9987 = vmatprep.mubr.msk.bf16.mxu1 %vm15590_vm0, %v2716_v25  ;;  %v2690_v30 = vld [vmem:[%s10772_s18 + $0x75] sm:$0xff] }
  0xef   : > { %v804_v38 = vpop.f32.mrf.mxu1 }
  0xf0   : > { %v11242_v42 = vadd.f32 %v804_v38, %v549_v34  ;;  %v9690_v44 = vpop.f32.mrf.mxu0  ;;  %v2691_v34 = vld [vmem:[%s10772_s18 + $0x7d] sm:$0xff]  ;;  %v2693_v38 = vld [vmem:[%s10772_s18 + $0x8d] sm:$0xff] }
  0xf1   : > { %v9734_v46 = vpop.f32.mrf.mxu1 }
  0xf2   : > { %v11244_v49 = vadd.f32 %v9734_v46, %v9690_v44  ;;  %v552_v15 = vpop.f32.mrf.mxu0  ;;  %v2721_v44 = vpack.c.bf16 %v2691_v34, %v2690_v30  ;;  %v2699_v30 = vld [vmem:[%s10772_s18 + $0xbd] sm:$0xff] }
  0xf3   : > { %v807_v51 = vpop.f32.mrf.mxu1 }
  0xf4   : > { %v11249_v54 = vadd.f32 %v807_v51, %v552_v15  ;;  %v9693_v55 = vpop.f32.mrf.mxu0  ;;  %9944 = vmatmul.mubr.msk.bf16.vlgmr.msra.gmra.mxu0 %vm15590_vm0, %v11046_v17 }
  0xf5   : > { %v9737_v58 = vpop.f32.mrf.mxu1  ;;  %10024 = vmatpush3.bf16.msra.mxu0 %v11103_v43  ;;  %9988 = vmatmul.mubr.msk.bf16.vlgmr.msra.gmra.mxu1 %vm15590_vm0, %v2717_v48  ;;  %v2722_v48 = vpack.c.bf16 %v2693_v38, %v2692_v37  ;;  %v2701_v37 = vld [vmem:[%s10772_s18 + $0xcd] sm:$0xff] }
  0xf6   : > { %v11255_v61 = vadd.f32 %v9737_v58, %v9693_v55  ;;  %v565_v63 = vpop.f32.mrf.mxu0  ;;  %9947 = vmatprep.mubr.msk.bf16.mxu0 %vm15590_vm0, %v11076_v31  ;;  %9991 = vmatprep.mubr.msk.bf16.mxu1 %vm15590_vm0, %v2718_v50 }
  0xf7   : > { %v820_v17 = vpop.f32.mrf.mxu1  ;;  %10025 = vmatprep.subr.bf16.mxu0 %v10579_v53 }
  0xf8   : > { %v11267_v43 = vadd.f32 %v820_v17, %v565_v63  ;;  %v9694_v10 = vpop.f32.mrf.mxu0  ;;  %v2694_v63 = vld [vmem:[%s10772_s18 + $0x95] sm:$0xff]  ;;  %v2697_v17 = vld [vmem:[%s10772_s18 + $0xad] sm:$0xff] }
  0xf9   : > { %v9738_v11 = vpop.f32.mrf.mxu1  ;;  %10026 = vmatpush3.bf16.msra.mxu0 %v10579_v53 }
  0xfa   : > { %v11269_v31 = vadd.f32 %v9738_v11, %v9694_v10  ;;  %v568_v13 = vpop.f32.mrf.mxu0  ;;  %10027 = vmatprep.subr.bf16.mxu0 %v10580_v3  ;;  %v2723_v10 = vpack.c.bf16 %v2695_v1, %v2694_v63  ;;  %v2702_v1 = vld [vmem:[%s10772_s18 + $0xd5] sm:$0xff] }
  0xfb   : > { %v823_v18 = vpop.f32.mrf.mxu1 }
  0xfc   : > { %v11274_v20 = vadd.f32 %v823_v18, %v568_v13  ;;  %v9697_v24 = vpop.f32.mrf.mxu0  ;;  %9948 = vmatmul.mubr.msk.bf16.gmra.mxu0 %vm15590_vm0, %v11078_v33 }
  0xfd   : > { %v9741_v25 = vpop.f32.mrf.mxu1  ;;  %9992 = vmatmul.mubr.msk.bf16.gmra.mxu1 %vm15590_vm0, %v2719_v12  ;;  %9951 = vmatprep.mubr.msk.bf16.mxu0 %vm15590_vm0, %v11105_v45 }
  0xfe   : > { %v11281_v28 = vadd.f32 %v9741_v25, %v9697_v24  ;;  %v581_v26 = vpop.f32.mrf.mxu0  ;;  %9995 = vmatprep.mubr.msk.bf16.mxu1 %vm15590_vm0, %v2720_v14  ;;  %10028 = vmatpush3.bf16.msra.mxu0 %v10580_v3  ;;  %v2696_v3 = vld [vmem:[%s10772_s18 + $0xa5] sm:$0xff] }
  0xff   : > { %v836_v36 = vpop.f32.mrf.mxu1  ;;  %10029 = vmatprep.subr.bf16.mxu0 %v10581_v6  ;;  %v2724_v12 = vpack.c.bf16 %v2697_v17, %v2696_v3  ;;  %v2704_v17 = vld [vmem:[%s10772_s18 + $0xe5] sm:$0xff] }
 0x100   : > { %v11288_v39 = vadd.f32 %v836_v36, %v581_v26  ;;  %v9698_v33 = vpop.f32.mrf.mxu0  ;;  %v2698_v26 = vld [vmem:[%s10772_s18 + $0xb5] sm:$0xff]  ;;  %v2700_v36 = vld [vmem:[%s10772_s18 + $0xc5] sm:$0xff] }
 0x101   : > { %v9742_v40 = vpop.f32.mrf.mxu1 }
 0x102   : > { %v11290_v45 = vadd.f32 %v9742_v40, %v9698_v33  ;;  %v584_v46 = vpop.f32.mrf.mxu0  ;;  %10030 = vmatpush3.bf16.msra.mxu0 %v10581_v6  ;;  %v2725_v40 = vpack.c.bf16 %v2699_v30, %v2698_v26 }
 0x103   : > { %v839_v15 = vpop.f32.mrf.mxu1 }
 0x104   : > { %v11292_v50 = vadd.f32 %v839_v15, %v584_v46  ;;  %v9701_v51 = vpop.f32.mrf.mxu0  ;;  %9952 = vmatmul.mubr.msk.bf16.gmra.mxu0 %vm15590_vm0, %v11107_v47  ;;  %v2726_v46 = vpack.c.bf16 %v2701_v37, %v2700_v36  ;;  %v2706_v36 = vld [vmem:[%s10772_s18 + $0xf5] sm:$0xff]  ;;  %v2707_v37 = vld [vmem:[%s10772_s18 + $0xfd] sm:$0xff] }
 0x105   : > { %v9745_v53 = vpop.f32.mrf.mxu1  ;;  %9996 = vmatmul.mubr.msk.bf16.gmra.mxu1 %vm15590_vm0, %v2721_v44  ;;  %9955 = vmatprep.mubr.msk.bf16.mxu0 %vm15590_vm0, %v11124_v57 }
 0x106   : > { %v11299_v55 = vadd.f32 %v9745_v53, %v9701_v51  ;;  %v597_v58 = vpop.f32.mrf.mxu0  ;;  %9999 = vmatprep.mubr.msk.bf16.mxu1 %vm15590_vm0, %v2722_v48 }
 0x107   : > { %v852_v2 = vpop.f32.mrf.mxu1 }
 0x108   : > { %v11306_v4 = vadd.f32 %v852_v2, %v597_v58  ;;  %v9702_v9 = vpop.f32.mrf.mxu0  ;;  %v2703_v2 = vld [vmem:[%s10772_s18 + $0xdd] sm:$0xff] }
 0x109   : > { %v9746_v47 = vpop.f32.mrf.mxu1 }
 0x10a   : > { %v11308_v11 = vadd.f32 %v9746_v47, %v9702_v9  ;;  %v600_v57 = vpop.f32.mrf.mxu0  ;;  %v2705_v9 = vld [vmem:[%s10772_s18 + $0xed] sm:$0xff] }
 0x10b   : > { %v855_v13 = vpop.f32.mrf.mxu1 }
 0x10c   : > { %v11310_v14 = vadd.f32 %v855_v13, %v600_v57  ;;  %v9705_v18 = vpop.f32.mrf.mxu0  ;;  %9956 = vmatmul.mubr.msk.bf16.gmra.mxu0 %vm15590_vm0, %v11126_v59  ;;  %v2727_v57 = vpack.c.bf16 %v2703_v2, %v2702_v1  ;;  %v2728_v13 = vpack.c.bf16 %v2705_v9, %v2704_v17  ;;  %v2710_v9 = vld [vmem:[%s10772_s18 + $0x115] sm:$0xff] }
 0x10d   : > { %v9749_v6 = vpop.f32.mrf.mxu1  ;;  %10000 = vmatmul.mubr.msk.bf16.gmra.mxu1 %vm15590_vm0, %v2723_v10  ;;  %9959 = vmatprep.mubr.msk.bf16.mxu0 %vm15590_vm0, %v11142_v5 }
 0x10e   : > { %v11317_v24 = vadd.f32 %v9749_v6, %v9705_v18  ;;  %v613_v25 = vpop.f32.mrf.mxu0  ;;  %10003 = vmatprep.mubr.msk.bf16.mxu1 %vm15590_vm0, %v2724_v12 }
 0x10f   : > { %v868_v34 = vpop.f32.mrf.mxu1 }
 0x110   : > { %v11324_v38 = vadd.f32 %v868_v34, %v613_v25  ;;  %v9706_v33 = vpop.f32.mrf.mxu0 }
 0x111   : > { %v9750_v59 = vpop.f32.mrf.mxu1 }
 0x112   : > { %v11326_v44 = vadd.f32 %v9750_v59, %v9706_v33  ;;  %v616_v5 = vpop.f32.mrf.mxu0  ;;  %v2708_v59 = vld [vmem:[%s10772_s18 + $0x105] sm:$0xff] }
 0x113   : > { %v871_v48 = vpop.f32.mrf.mxu1 }
 0x114   : > { %v11328_v15 = vadd.f32 %v871_v48, %v616_v5  ;;  %v9709_v51 = vpop.f32.mrf.mxu0  ;;  %9960 = vmatmul.mubr.msk.bf16.gmra.mxu0 %vm15590_vm0, %v11144_v8  ;;  %v2729_v48 = vpack.c.bf16 %v2707_v37, %v2706_v36 }
 0x115   : > { %v9753_v53 = vpop.f32.mrf.mxu1  ;;  %10004 = vmatmul.mubr.msk.bf16.gmra.mxu1 %vm15590_vm0, %v2725_v40  ;;  %9963 = vmatprep.mubr.msk.bf16.mxu0 %vm15590_vm0, %v11160_v19  ;;  %v2709_v40 = vld [vmem:[%s10772_s18 + $0x10d] sm:$0xff] }
 0x116   : > { %v11335_v58 = vadd.f32 %v9753_v53, %v9709_v51  ;;  %v629_v63 = vpop.f32.mrf.mxu0  ;;  %10007 = vmatprep.mubr.msk.bf16.mxu1 %vm15590_vm0, %v2726_v46  ;;  %v2730_v53 = vpack.c.bf16 %v2709_v40, %v2708_v59 }
 0x117   : > { %v884_v3 = vpop.f32.mrf.mxu1 }
 0x118   : > { %v11342_v47 = vadd.f32 %v884_v3, %v629_v63  ;;  %v9710_v10 = vpop.f32.mrf.mxu0 }
 0x119   : > { %v9754_v8 = vpop.f32.mrf.mxu1 }
 0x11a   : > { %v11344_v12 = vadd.f32 %v9754_v8, %v9710_v10  ;;  %v632_v19 = vpop.f32.mrf.mxu0  ;;  %v2711_v10 = vld [vmem:[%s10772_s18 + $0x11d] sm:$0xff] }
 0x11b   : > { %v887_v18 = vpop.f32.mrf.mxu1 }
 0x11c   : > { %v11346_v6 = vadd.f32 %v887_v18, %v632_v19  ;;  %v9713_v25 = vpop.f32.mrf.mxu0  ;;  %9964 = vmatmul.mubr.msk.bf16.gmra.mxu0 %vm15590_vm0, %v11162_v21 }
 0x11d   : > { %v9757_v26 = vpop.f32.mrf.mxu1  ;;  %10008 = vmatmul.mubr.msk.bf16.gmra.mxu1 %vm15590_vm0, %v2727_v57  ;;  %9967 = vmatprep.mubr.msk.bf16.mxu0 %vm15590_vm0, %v11178_v27 }
 0x11e   : > { %v11353_v30 = vadd.f32 %v9757_v26, %v9713_v25  ;;  %v645_v34 = vpop.f32.mrf.mxu0  ;;  %10011 = vmatprep.mubr.msk.bf16.mxu1 %vm15590_vm0, %v2728_v13  ;;  %v2712_v13 = vld [vmem:[%s10772_s18 + $0x125] sm:$0xff]  ;;  %v2731_v26 = vpack.c.bf16 %v2711_v10, %v2710_v9 }
 0x11f   : > { %v900_v33 = vpop.f32.mrf.mxu1 }
 0x120   : > { %v11360_v5 = vadd.f32 %v900_v33, %v645_v34  ;;  %v9714_v21 = vpop.f32.mrf.mxu0 }
 0x121   : > { %v9758_v46 = vpop.f32.mrf.mxu1 }
 0x122   : > { %v11362_v51 = vadd.f32 %v9758_v46, %v9714_v21  ;;  %v11364_v27 = vpop.f32.mrf.mxu0  ;;  %v2361_v21 = vld [vmem:[%s10772_s18 + $0x134] sm:$0xff] }
 0x123   : > { %v11366_v63 = vpop.f32.mrf.mxu1  ;;  %v2714_v46 = vld [vmem:[%s10772_s18 + $0x135] sm:$0xff] }
 0x124   : > { %v9769_v1 = vpop.f32.mrf.mxu0  ;;  %9968 = vmatmul.mubr.msk.bf16.gmra.mxu0 %vm15590_vm0, %v11180_v35  ;;  %v2713_v35 = vld [vmem:[%s10772_s18 + $0x12d] sm:$0xff] }
 0x125   : > { %v1234_v2 = vadd.f32 %v9769_v1, %v11189_v41  ;;  %v9813_v3 = vpop.f32.mrf.mxu1  ;;  %10012 = vmatmul.mubr.msk.bf16.gmra.mxu1 %vm15590_vm0, %v2729_v48  ;;  %9971 = vmatprep.mubr.msk.bf16.mxu0 %vm15590_vm0, %v11200_v56  ;;  %v2732_v36 = vpack.c.bf16 %v2713_v35, %v2712_v13  ;;  %v3033_v1 = vld [vmem:[%s10772_s18 + $0x26] sm:$0xff] }
 0x126   : > { %v1089_v17 = vpop.f32.mrf.mxu0  ;;  %10015 = vmatprep.mubr.msk.bf16.mxu1 %vm15590_vm0, %v2730_v53  ;;  %v2715_v53 = vld [vmem:[%s10772_s18 + $0x13d] sm:$0xff] }
 0x127   : > { %v1232_v8 = vadd.f32 %v1089_v17, %v11198_v52  ;;  %v11378_v57 = vadd.f32 %v9813_v3, %v1234_v2  ;;  %v1442_v19 = vpop.f32.mrf.mxu1  ;;  %v3034_v2 = vld [vmem:[%s10772_s18 + $0x2e] sm:$0xff] }
 0x128   : > { %v9770_v18 = vpop.f32.mrf.mxu0  ;;  %v3069_v13 = vpack.c.bf16 %v3034_v2, %v3033_v1 }
 0x129   : > { %v1235_v41 = vadd.f32 %v9770_v18, %v11202_v60  ;;  %v11383_v25 = vadd.f32 %v1442_v19, %v1232_v8  ;;  %v9814_v56 = vpop.f32.mrf.mxu1  ;;  %v2733_v19 = vpack.c.bf16 %v2715_v53, %v2714_v46 }
 0x12a   : > { %v1092_v34 = vpop.f32.mrf.mxu0 }
 0x12b   : > { %v11386_v52 = vadd.f32 %v1092_v34, %v11206_v0  ;;  %v11388_v37 = vadd.f32 %v9814_v56, %v1235_v41  ;;  %v11390_v33 = vpop.f32.mrf.mxu1  ;;  %v2362_v0 = vld [vmem:[%s10772_s18 + $0x13c] sm:$0xff] }
 0x12c   : > { %v9773_v59 = vpop.f32.mrf.mxu0  ;;  %9972 = vmatmul.mubr.msk.bf16.gmra.mxu0 %vm15590_vm0, %v11204_v62  ;;  %v2380_v9 = vpack.c.bf16 %v2362_v0, %v2361_v21  ;;  %v3035_v34 = vld [vmem:[%s10772_s18 + $0x36] sm:$0xff] }
 0x12d   : > { %v1238_v60 = vadd.f32 %v9773_v59, %v11214_v7  ;;  %v9817_v40 = vpop.f32.mrf.mxu1  ;;  %10016 = vmatmul.mubr.msk.bf16.gmra.mxu1 %vm15590_vm0, %v2731_v26  ;;  %9975 = vmatprep.mubr.msk.bf16.mxu0 %vm15590_vm0, %v11224_v22 }
 0x12e   : > { %v1105_v48 = vpop.f32.mrf.mxu0  ;;  %10019 = vmatprep.mubr.msk.bf16.mxu1 %vm15590_vm0, %v2732_v36  ;;  %v3036_v36 = vld [vmem:[%s10772_s18 + $0x3e] sm:$0xff] }
 0x12f   : > { %v1236_v3 = vadd.f32 %v1105_v48, %v11222_v16  ;;  %v11406_v62 = vadd.f32 %v9817_v40, %v1238_v60  ;;  %v1458_v7 = vpop.f32.mrf.mxu1  ;;  %v3037_v60 = vld [vmem:[%s10772_s18 + $0x46] sm:$0xff]  ;;  %v3070_v48 = vpack.c.bf16 %v3036_v36, %v3035_v34 }
 0x130   : > { %v9774_v17 = vpop.f32.mrf.mxu0 }
 0x131   : > { %v1239_v10 = vadd.f32 %v9774_v17, %v11226_v23  ;;  %v11409_v22 = vadd.f32 %v1458_v7, %v1236_v3  ;;  %v9818_v8 = vpop.f32.mrf.mxu1 }
 0x132   : > { %v1108_v35 = vpop.f32.mrf.mxu0 }
 0x133   : > { %v11412_v18 = vadd.f32 %v1108_v35, %v11228_v29  ;;  %v11414_v16 = vadd.f32 %v9818_v8, %v1239_v10  ;;  %v11416_v41 = vpop.f32.mrf.mxu1  ;;  %v3038_v29 = vld [vmem:[%s10772_s18 + $0x4e] sm:$0xff]  ;;  %v3039_v8 = vld [vmem:[%s10772_s18 + $0x56] sm:$0xff]  ;;  %v3041_v35 = vld [vmem:[%s10772_s18 + $0x66] sm:$0xff] }
 0x134   : > { %v9777_v56 = vpop.f32.mrf.mxu0  ;;  %9976 = vmatmul.mubr.msk.bf16.gmra.mxu0 %vm15590_vm0, %v2380_v9  ;;  %v3071_v2 = vpack.c.bf16 %v3038_v29, %v3037_v60 }
 0x135   : > { %v1242_v23 = vadd.f32 %v9777_v56, %v11235_v32  ;;  %v9821_v26 = vpop.f32.mrf.mxu1  ;;  %10020 = vmatmul.mubr.msk.bf16.gmra.mxu1 %vm15590_vm0, %v2733_v19  ;;  %10031 = vmatprep.mubr.msk.bf16.mxu0 %vm15590_vm0, %v3069_v13  ;;  %v3040_v19 = vld [vmem:[%s10772_s18 + $0x5e] sm:$0xff]  ;;  %v3042_v56 = vld [vmem:[%s10772_s18 + $0x6e] sm:$0xff] }
 0x136   : > { %v1121_v59 = vpop.f32.mrf.mxu0  ;;  %v3072_v36 = vpack.c.bf16 %v3040_v19, %v3039_v8  ;;  %v3073_v29 = vpack.c.bf16 %v3042_v56, %v3041_v35 }
 0x137   : > { %v1240_v40 = vadd.f32 %v1121_v59, %v11242_v42  ;;  %v11427_v21 = vadd.f32 %v9821_v26, %v1242_v23  ;;  %v1474_v0 = vpop.f32.mrf.mxu1 }
 0x138   : > { %v9778_v46 = vpop.f32.mrf.mxu0 }
 0x139   : > { %v1243_v32 = vadd.f32 %v9778_v46, %v11244_v49  ;;  %v11430_v53 = vadd.f32 %v1474_v0, %v1240_v40  ;;  %v9822_v1 = vpop.f32.mrf.mxu1 }
 0x13a   : > { %v1124_v3 = vpop.f32.mrf.mxu0 }
 0x13b   : > { %v11433_v7 = vadd.f32 %v1124_v3, %v11249_v54  ;;  %v11435_v42 = vadd.f32 %v9822_v1, %v1243_v32  ;;  %v11437_v17 = vpop.f32.mrf.mxu1  ;;  %v3043_v1 = vld [vmem:[%s10772_s18 + $0x76] sm:$0xff] }
 0x13c   : > { %v9781_v9 = vpop.f32.mrf.mxu0  ;;  %10032 = vmatmul.mubr.msk.bf16.vlgmr.msra.gmra.mxu0 %vm15590_vm0, %v3070_v48 }
 0x13d   : > { %v1246_v10 = vadd.f32 %v9781_v9, %v11255_v61  ;;  %v9825_v49 = vpop.f32.mrf.mxu1  ;;  %10035 = vmatprep.mubr.msk.bf16.mxu0 %vm15590_vm0, %v3071_v2  ;;  %v3044_v2 = vld [vmem:[%s10772_s18 + $0x7e] sm:$0xff]  ;;  %v3045_v9 = vld [vmem:[%s10772_s18 + $0x86] sm:$0xff] }
 0x13e   : > { %v1137_v13 = vpop.f32.mrf.mxu0 }
 0x13f   : > { %v1244_v54 = vadd.f32 %v1137_v13, %v11267_v43  ;;  %v11447_v23 = vadd.f32 %v9825_v49, %v1246_v10  ;;  %v1490_v26 = vpop.f32.mrf.mxu1  ;;  %v3046_v10 = vld [vmem:[%s10772_s18 + $0x8e] sm:$0xff]  ;;  %v3074_v13 = vpack.c.bf16 %v3044_v2, %v3043_v1 }
 0x140   : > { %v9782_v34 = vpop.f32.mrf.mxu0 }
 0x141   : > { %v1247_v59 = vadd.f32 %v9782_v34, %v11269_v31  ;;  %v11450_v61 = vadd.f32 %v1490_v26, %v1244_v54  ;;  %v9826_v60 = vpop.f32.mrf.mxu1  ;;  %v3075_v54 = vpack.c.bf16 %v3046_v10, %v3045_v9 }
 0x142   : > { %v1140_v40 = vpop.f32.mrf.mxu0 }
 0x143   : > { %v11453_v0 = vadd.f32 %v1140_v40, %v11274_v20  ;;  %v11455_v43 = vadd.f32 %v9826_v60, %v1247_v59  ;;  %v11457_v46 = vpop.f32.mrf.mxu1  ;;  %v3048_v40 = vld [vmem:[%s10772_s18 + $0x9e] sm:$0xff] }
 0x144   : > { %v9785_v48 = vpop.f32.mrf.mxu0  ;;  %10036 = vmatmul.mubr.msk.bf16.gmra.mxu0 %vm15590_vm0, %v3072_v36 }
 0x145   : > { %v1250_v32 = vadd.f32 %v9785_v48, %v11281_v28  ;;  %v9829_v31 = vpop.f32.mrf.mxu1  ;;  %10039 = vmatprep.mubr.msk.bf16.mxu0 %vm15590_vm0, %v3073_v29  ;;  %v3047_v29 = vld [vmem:[%s10772_s18 + $0x96] sm:$0xff] }
 0x146   : > { %v1153_v3 = vpop.f32.mrf.mxu0  ;;  %v3076_v9 = vpack.c.bf16 %v3048_v40, %v3047_v29  ;;  %v3054_v29 = vld [vmem:[%s10772_s18 + $0xce] sm:$0xff] }
 0x147   : > { %v1248_v20 = vadd.f32 %v1153_v3, %v11288_v39  ;;  %v11467_v49 = vadd.f32 %v9829_v31, %v1250_v32  ;;  %v1506_v8 = vpop.f32.mrf.mxu1  ;;  %v3049_v32 = vld [vmem:[%s10772_s18 + $0xa6] sm:$0xff]  ;;  %v3050_v31 = vld [vmem:[%s10772_s18 + $0xae] sm:$0xff] }
 0x148   : > { %v9786_v19 = vpop.f32.mrf.mxu0 }
 0x149   : > { %v1251_v35 = vadd.f32 %v9786_v19, %v11290_v45  ;;  %v11470_v28 = vadd.f32 %v1506_v8, %v1248_v20  ;;  %v9830_v56 = vpop.f32.mrf.mxu1  ;;  %v3077_v8 = vpack.c.bf16 %v3050_v31, %v3049_v32 }
 0x14a   : > { %v1156_v26 = vpop.f32.mrf.mxu0 }
 0x14b   : > { %v11473_v34 = vadd.f32 %v1156_v26, %v11292_v50  ;;  %v11475_v39 = vadd.f32 %v9830_v56, %v1251_v35  ;;  %v11477_v36 = vpop.f32.mrf.mxu1  ;;  %v3051_v26 = vld [vmem:[%s10772_s18 + $0xb6] sm:$0xff] }
 0x14c   : > { %v9789_v59 = vpop.f32.mrf.mxu0  ;;  %10040 = vmatmul.mubr.msk.bf16.gmra.mxu0 %vm15590_vm0, %v3074_v13 }
 0x14d   : > { %v1254_v60 = vadd.f32 %v9789_v59, %v11299_v55  ;;  %v9833_v45 = vpop.f32.mrf.mxu1  ;;  %10043 = vmatprep.mubr.msk.bf16.mxu0 %vm15590_vm0, %v3075_v54  ;;  %v3052_v59 = vld [vmem:[%s10772_s18 + $0xbe] sm:$0xff] }
 0x14e   : > { %v1169_v48 = vpop.f32.mrf.mxu0  ;;  %v3078_v31 = vpack.c.bf16 %v3052_v59, %v3051_v26  ;;  %v3057_v26 = vld [vmem:[%s10772_s18 + $0xe6] sm:$0xff]  ;;  %v3058_v59 = vld [vmem:[%s10772_s18 + $0xee] sm:$0xff] }
 0x14f   : > { %v1252_v50 = vadd.f32 %v1169_v48, %v11306_v4  ;;  %v11487_v1 = vadd.f32 %v9833_v45, %v1254_v60  ;;  %v1522_v2 = vpop.f32.mrf.mxu1  ;;  %v3053_v45 = vld [vmem:[%s10772_s18 + $0xc6] sm:$0xff] }
 0x150   : > { %v9790_v3 = vpop.f32.mrf.mxu0 }
 0x151   : > { %v1255_v10 = vadd.f32 %v9790_v3, %v11308_v11  ;;  %v11490_v55 = vadd.f32 %v1522_v2, %v1252_v50  ;;  %v9834_v20 = vpop.f32.mrf.mxu1  ;;  %v3079_v3 = vpack.c.bf16 %v3054_v29, %v3053_v45  ;;  %v10582_v29 = vld [vmem:[%s15570_s4 + $0x38] sm:$0xff]  }
 0x152   : > { %v1172_v19 = vpop.f32.mrf.mxu0  ;;  %10067 = vmatprep.subr.bf16.mxu1 %v10582_v29 }
 0x153   : > { %v11493_v13 = vadd.f32 %v1172_v19, %v11310_v14  ;;  %v11495_v4 = vadd.f32 %v9834_v20, %v1255_v10  ;;  %v11497_v35 = vpop.f32.mrf.mxu1  ;;  %10068 = vmatpush3.bf16.msra.mxu1 %v10582_v29 }
 0x154   : > { %v9793_v56 = vpop.f32.mrf.mxu0  ;;  %10044 = vmatmul.mubr.msk.bf16.gmra.mxu0 %vm15590_vm0, %v3076_v9 }
 0x155   : > { %v1258_v54 = vadd.f32 %v9793_v56, %v11317_v24  ;;  %v9837_v11 = vpop.f32.mrf.mxu1  ;;  %10047 = vmatprep.mubr.msk.bf16.mxu0 %vm15590_vm0, %v3077_v8  ;;  %v3055_v56 = vld [vmem:[%s10772_s18 + $0xd6] sm:$0xff] }
 0x156   : > { %v1185_v60 = vpop.f32.mrf.mxu0 }
 0x157   : > { %v1256_v14 = vadd.f32 %v1185_v60, %v11324_v38  ;;  %v11507_v40 = vadd.f32 %v9837_v11, %v1258_v54  ;;  %v1538_v48 = vpop.f32.mrf.mxu1  ;;  %v3056_v54 = vld [vmem:[%s10772_s18 + $0xde] sm:$0xff] }
 0x158   : > { %v9794_v32 = vpop.f32.mrf.mxu0 }
 0x159   : > { %v1259_v50 = vadd.f32 %v9794_v32, %v11326_v44  ;;  %v11510_v24 = vadd.f32 %v1538_v48, %v1256_v14  ;;  %v9838_v2 = vpop.f32.mrf.mxu1  ;;  %v3080_v48 = vpack.c.bf16 %v3056_v54, %v3055_v56  ;;  %v3060_v56 = vld [vmem:[%s10772_s18 + $0xfe] sm:$0xff] }
 0x15a   : > { %v1188_v9 = vpop.f32.mrf.mxu0 }
 0x15b   : > { %v11513_v10 = vadd.f32 %v1188_v9, %v11328_v15  ;;  %v11515_v38 = vadd.f32 %v9838_v2, %v1259_v50  ;;  %v11517_v20 = vpop.f32.mrf.mxu1  ;;  %v3081_v50 = vpack.c.bf16 %v3058_v59, %v3057_v26  ;;  %v3062_v26 = vld [vmem:[%s10772_s18 + $0x10e] sm:$0xff] }
 0x15c   : > { %v9797_v8 = vpop.f32.mrf.mxu0  ;;  %10048 = vmatmul.mubr.msk.bf16.gmra.mxu0 %vm15590_vm0, %v3078_v31 }
 0x15d   : > { %v1262_v19 = vadd.f32 %v9797_v8, %v11335_v58  ;;  %v9841_v44 = vpop.f32.mrf.mxu1  ;;  %10051 = vmatprep.mubr.msk.bf16.mxu0 %vm15590_vm0, %v3079_v3 }
 0x15e   : > { %v1201_v11 = vpop.f32.mrf.mxu0 }
 0x15f   : > { %v1260_v15 = vadd.f32 %v1201_v11, %v11342_v47  ;;  %v11527_v60 = vadd.f32 %v9841_v44, %v1262_v19  ;;  %v1554_v45 = vpop.f32.mrf.mxu1  ;;  %v3059_v44 = vld [vmem:[%s10772_s18 + $0xf6] sm:$0xff]  ;;  %v3061_v11 = vld [vmem:[%s10772_s18 + $0x106] sm:$0xff] }
 0x160   : > { %v9798_v14 = vpop.f32.mrf.mxu0  ;;  %v3082_v29 = vpack.c.bf16 %v3060_v56, %v3059_v44  ;;  %v3065_v56 = vld [vmem:[%s10772_s18 + $0x126] sm:$0xff] }
 0x161   : > { %v1263_v58 = vadd.f32 %v9798_v14, %v11344_v12  ;;  %v11533_v32 = vadd.f32 %v1554_v45, %v1260_v15  ;;  %v9842_v31 = vpop.f32.mrf.mxu1 }
 0x162   : > { %v1204_v47 = vpop.f32.mrf.mxu0 }
 0x163   : > { %v11536_v2 = vadd.f32 %v1204_v47, %v11346_v6  ;;  %v11538_v3 = vadd.f32 %v9842_v31, %v1263_v58  ;;  %v11540_v9 = vpop.f32.mrf.mxu1  ;;  %v3083_v58 = vpack.c.bf16 %v3062_v26, %v3061_v11 }
 0x164   : > { %v9801_v8 = vpop.f32.mrf.mxu0  ;;  %10052 = vmatmul.mubr.msk.bf16.gmra.mxu0 %vm15590_vm0, %v3080_v48 }
 0x165   : > { %v1266_v12 = vadd.f32 %v9801_v8, %v11353_v30  ;;  %v9845_v19 = vpop.f32.mrf.mxu1  ;;  %10055 = vmatprep.mubr.msk.bf16.mxu0 %vm15590_vm0, %v3081_v50 }
 0x166   : > { %v1217_v54 = vpop.f32.mrf.mxu0 }
 0x167   : > { %v1264_v6 = vadd.f32 %v1217_v54, %v11360_v5  ;;  %v11550_v59 = vadd.f32 %v9845_v19, %v1266_v12  ;;  %v1570_v15 = vpop.f32.mrf.mxu1  ;;  %v3064_v19 = vld [vmem:[%s10772_s18 + $0x11e] sm:$0xff]  ;;  %v3066_v54 = vld [vmem:[%s10772_s18 + $0x12e] sm:$0xff] }
 0x168   : > { %v9802_v45 = vpop.f32.mrf.mxu0 }
 0x169   : > { %v1267_v30 = vadd.f32 %v9802_v45, %v11362_v51  ;;  %v11553_v14 = vadd.f32 %v1570_v15, %v1264_v6  ;;  %v9846_v48 = vpop.f32.mrf.mxu1  ;;  %v3063_v51 = vld [vmem:[%s10772_s18 + $0x116] sm:$0xff] }
 0x16a   : > { %v11555_v31 = vpop.f32.mrf.mxu0  ;;  %v3084_v45 = vpack.c.bf16 %v3064_v19, %v3063_v51  ;;  %v3067_v19 = vld [vmem:[%s10772_s18 + $0x136] sm:$0xff] }
 0x16b   : > { %v11557_v50 = vadd.f32 %v9846_v48, %v1267_v30  ;;  %v11559_v5 = vpop.f32.mrf.mxu1  ;;  %v3085_v48 = vpack.c.bf16 %v3066_v54, %v3065_v56  ;;  %v3508_v56 = vlaneseq }
 0x16c   : > { %v9857_v47 = vpop.f32.mrf.mxu0  ;;  %10056 = vmatmul.mubr.msk.bf16.gmra.mxu0 %vm15590_vm0, %v3082_v29 }
 0x16d   : > { %15696 = vst [vmem:[#allocation3_spill] sm:$0xff] %v11557_v50  ;;  %v1940_v8 = vadd.f32 %v9857_v47, %v11378_v57  ;;  %v9901_v12 = vpop.f32.mrf.mxu1  ;;  %10059 = vmatprep.mubr.msk.bf16.mxu0 %vm15590_vm0, %v3083_v58  ;;  %v10583_v58 = vld [vmem:[%s15570_s4 + $0x30] sm:$0xff]  }
 0x16e   : > { %v1795_v44 = vpop.f32.mrf.mxu0  ;;  %10069 = vmatprep.subr.bf16.mxu1 %v10583_v58 }
 0x16f   : > { %v1938_v11 = vadd.f32 %v1795_v44, %v11383_v25  ;;  %v11569_v26 = vadd.f32 %v9901_v12, %v1940_v8  ;;  %v2148_v6 = vpop.f32.mrf.mxu1  ;;  %10070 = vmatpush3.bf16.msra.mxu1 %v10583_v58  ;;  %v3068_v44 = vld [vmem:[%s10772_s18 + $0x13e] sm:$0xff] }
 0x170   : > { %v9858_v15 = vpop.f32.mrf.mxu0 }
 0x171   : > { %15697 = vst [vmem:[#allocation4_spill] sm:$0xff] %v11569_v26  ;;  %v1941_v29 = vadd.f32 %v9858_v15, %v11388_v37  ;;  %v11572_v57 = vadd.f32 %v2148_v6, %v1938_v11  ;;  %v9902_v30 = vpop.f32.mrf.mxu1 }
 0x172   : > { %v11577_v47 = vpop.f32.mrf.mxu0 }
 0x173   : > { %15698 = vst [vmem:[#allocation5_spill] sm:$0xff] %v11572_v57  ;;  %v11579_v25 = vadd.f32 %v9902_v30, %v1941_v29  ;;  %v11581_v8 = vpop.f32.mrf.mxu1  ;;  %v3086_v30 = vpack.c.bf16 %v3068_v44, %v3067_v19 }
 0x174   : > { %v9861_v12 = vpop.f32.mrf.mxu0  ;;  %10060 = vmatmul.mubr.msk.bf16.gmra.mxu0 %vm15590_vm0, %v3084_v45 }
 0x175   : > { %15699 = vst [vmem:[#allocation6_spill] sm:$0xff] %v11579_v25  ;;  %v1944_v37 = vadd.f32 %v9861_v12, %v11406_v62  ;;  %v9905_v51 = vpop.f32.mrf.mxu1  ;;  %10063 = vmatprep.mubr.msk.bf16.mxu0 %vm15590_vm0, %v3085_v48  ;;  %v11594_v62 = vshrl.u32 %v3508_v56, 7 }
 0x176   : > { %v1811_v54 = vpop.f32.mrf.mxu0 }
 0x177   : > { %v1942_v11 = vadd.f32 %v1811_v54, %v11409_v22  ;;  %v11589_v6 = vadd.f32 %v9905_v51, %v1944_v37  ;;  %v2164_v15 = vpop.f32.mrf.mxu1  ;;  %v11605_v51 = vadd.s32 16, %v11594_v62 }
 0x178   : > { %v9862_v29 = vpop.f32.mrf.mxu0 }
 0x179   : > { %15700 = vst [vmem:[#allocation7_spill] sm:$0xff] %v11589_v6  ;;  %v1945_v25 = vadd.f32 %v9862_v29, %v11414_v16  ;;  %v11592_v45 = vadd.f32 %v2164_v15, %v1942_v11  ;;  %v9906_v58 = vpop.f32.mrf.mxu1 }
 0x17a   : > { %v11596_v12 = vpop.f32.mrf.mxu0 }
 0x17b   : > { %15701 = vst [vmem:[#allocation8_spill] sm:$0xff] %v11592_v45  ;;  %v11598_v48 = vadd.f32 %v9906_v58, %v1945_v25  ;;  %v11600_v57 = vpop.f32.mrf.mxu1 }
 0x17c   : > { %v9865_v26 = vpop.f32.mrf.mxu0  ;;  %10064 = vmatmul.mubr.msk.bf16.gmra.mxu0 %vm15590_vm0, %v3086_v30  ;;  %v11614_v29 = vmul.u32.u64.low 3817748708, %v11605_v51  ;;  %v11615_v30 = vmul.u32.u64.high 3817748708, %v11605_v51, %v11614_v29 }
 0x17d   : > { %15702 = vst [vmem:[#allocation9_spill] sm:$0xff] %v11598_v48  ;;  %v1948_v22 = vadd.f32 %v9865_v26, %v11427_v21  ;;  %v9909_v37 = vpop.f32.mrf.mxu1  ;;  %v15707_v29 = vmov 0 }
 0x17e   : > { %v1827_v16 = vpop.f32.mrf.mxu0  ;;  %v15708_v29 = vsel %vm11635_vm3, 4294967295, %v15707_v29 }
 0x17f   : > { %v1946_v19 = vadd.f32 %v1827_v16, %v11430_v53  ;;  %v11608_v44 = vadd.f32 %v9909_v37, %v1948_v22  ;;  %v2180_v56 = vpop.f32.mrf.mxu1  ;;  %v11624_v53 = vadd.s32 24, %v11594_v62  ;;  %15709 = vst [vmem:[#allocation14_spill] sm:$0xff] %v15708_v29 }
 0x180   : > { %v9866_v54 = vpop.f32.mrf.mxu0 }
 0x181   : > { %15703 = vst [vmem:[#allocation10_spill] sm:$0xff] %v11608_v44  ;;  %v1949_v25 = vadd.f32 %v9866_v54, %v11435_v42  ;;  %v11611_v11 = vadd.f32 %v2180_v56, %v1946_v19  ;;  %v9910_v15 = vpop.f32.mrf.mxu1  ;;  %v11628_v19 = vmul.u32.u64.low 3817748708, %v11594_v62  ;;  %v11629_v56 = vmul.u32.u64.high 3817748708, %v11594_v62, %v11628_v19 }
 0x182   : > { %v11617_v21 = vpop.f32.mrf.mxu0  ;;  %v11646_v44 = vadd.s32 8, %v11594_v62 }
 0x183   : > { %15704 = vst [vmem:[#allocation11_spill] sm:$0xff] %v11611_v11  ;;  %v11619_v26 = vadd.f32 %v9910_v15, %v1949_v25  ;;  %v11621_v58 = vpop.f32.mrf.mxu1 }
 0x184   : > { %v9869_v22 = vpop.f32.mrf.mxu0  ;;  %v11662_v45 = vmul.u32.u64.low 3817748708, %v11646_v44  ;;  %v11663_v6 = vmul.u32.u64.high 3817748708, %v11646_v44, %v11662_v45 }
 0x185   : > { %15705 = vst [vmem:[#allocation12_spill] sm:$0xff] %v11619_v26  ;;  %v1952_v37 = vadd.f32 %v9869_v22, %v11447_v23  ;;  %v9913_v42 = vpop.f32.mrf.mxu1  ;;  %v4199_v26 = vld [vmem:[#allocation2 + $0x8] sm:$0x3]  ;;  %v11640_v23 = vmul.u32.u64.low 3817748708, %v11624_v53  ;;  %v11641_v22 = vmul.u32.u64.high 3817748708, %v11624_v53, %v11640_v23  ;;  %v10699_v45 = vmov 0  }
 0x186   : > { %v1843_v16 = vpop.f32.mrf.mxu0  ;;  %v4200_v19 = vsel %vm11635_vm3, 0, %v4199_v26  ;;  %4194 = vst.msk [vmem:[#allocation2] sm:$0xf] %vm15591_vm4, %v10699_v45  ;;  %4195 = vst.msk [vmem:[#allocation2 + $0x4] sm:$0xf] %vm15591_vm4, %v10699_v45 }
 0x187   : > { %v1950_v54 = vadd.f32 %v1843_v16, %v11450_v61  ;;  %v11632_v25 = vadd.f32 %v9913_v42, %v1952_v37  ;;  %v2196_v15 = vpop.f32.mrf.mxu1  ;;  %v11649_v61 = vadd.s32 48, %v11594_v62  ;;  %4201 = vst [vmem:[#allocation2 + $0x8] sm:$0x3] %v4200_v19  ;;  %4203 = vst.msk [vmem:[#allocation2 + $0x98] sm:$0xe] %vm15594_vm5, %v10699_v45 }
 0x188   : > { %v9870_v11 = vpop.f32.mrf.mxu0  ;;  %4204 = vst.msk [vmem:[#allocation2 + $0x9c] sm:$0xf] %vm15591_vm4, %v10699_v45 }
 0x189   : > { %15706 = vst [vmem:[#allocation13_spill] sm:$0xff] %v11632_v25  ;;  %v1953_v37 = vadd.f32 %v9870_v11, %v11455_v43  ;;  %v11652_v42 = vadd.f32 %v2196_v15, %v1950_v54  ;;  %v9914_v16 = vpop.f32.mrf.mxu1  ;;  %v3573_v25 = vshrl.u32 %v11615_v30, 4  ;;  %4206 = vst.msk [vmem:[#allocation2 + $0xa0] sm:$0x7] %vm4205_vm6, %v10699_v45 }
 0x18a   : > { %v11655_v48 = vpop.f32.mrf.mxu0  ;;  %v11666_v50 = vmul.u32.u64.low 3817748708, %v11649_v61  ;;  %v11667_v43 = vmul.u32.u64.high 3817748708, %v11649_v61, %v11666_v50 }
 0x18b   : > { %v11657_v23 = vadd.f32 %v9914_v16, %v1953_v37  ;;  %v11659_v29 = vpop.f32.mrf.mxu1  ;;  %v3574_v30 = vmul.u32 18, %v3573_v25  ;;  %v1586_v25 = vadd.f32 %v11390_v33, %v11386_v52  ;;  %v11700_v52 = vadd.s32 32, %v11594_v62 }
 0x18c   : > { %v9873_v26 = vpop.f32.mrf.mxu0  ;;  %v11704_v33 = vadd.f32 %v11477_v36, %v11473_v34  ;;  %v10585_v34 = vld [vmem:[%s15570_s4 + $0x18] sm:$0xff]  }
 0x18d   : > { %15710 = vst [vmem:[#allocation15_spill] sm:$0xff] %v11657_v23  ;;  %v1956_v11 = vadd.f32 %v9873_v26, %v11467_v49  ;;  %v9917_v54 = vpop.f32.mrf.mxu1  ;;  %v3551_v23 = vshrl.u32 %v11629_v56, 4  ;;  %v904_v49 = vadd.f32 %v11366_v63, %v11364_v27  ;;  %v1594_v27 = vadd.f32 %v11437_v17, %v11433_v7  ;;  %10111 = vmatprep.subr.bf16.mxu0 %v10585_v34 }
 0x18e   : > { %v1859_v15 = vpop.f32.mrf.mxu0  ;;  %v11695_v63 = vadd.f32 %v11457_v46, %v11453_v0  ;;  %10112 = vmatpush3.bf16.msra.mxu0 %v10585_v34  ;;  %v11765_v34 = vadd.f32 %v11517_v20, %v11513_v10 }
 0x18f   : > { %v1954_v19 = vadd.f32 %v1859_v15, %v11470_v28  ;;  %v11671_v37 = vadd.f32 %v9917_v54, %v1956_v11  ;;  %v2212_v16 = vpop.f32.mrf.mxu1  ;;  %v3584_v28 = vshrl.u32 %v11641_v22, 4  ;;  %v11687_v54 = vsub.s32 %v11605_v51, %v3574_v30 }
 0x190   : > { %v9874_v50 = vpop.f32.mrf.mxu0  ;;  %v1590_v15 = vadd.f32 %v11416_v41, %v11412_v18  ;;  %v3552_v7 = vmul.u32 18, %v3551_v23  ;;  %v1265_v17 = vadd.f32 %v11555_v31, %v904_v49  ;;  %v3562_v51 = vshrl.u32 %v11663_v6, 4 }
 0x191   : > { %v1957_v56 = vadd.f32 %v9874_v50, %v11475_v39  ;;  %v11684_v26 = vadd.f32 %v2212_v16, %v1954_v19  ;;  %v9918_v11 = vpop.f32.mrf.mxu1  ;;  %15711 = vst [vmem:[#allocation16_spill] sm:$0xff] %v11687_v54  ;;  %v11708_v39 = vadd.f32 %v11497_v35, %v11493_v13  ;;  %v3585_v46 = vmul.u32 18, %v3584_v28 }
 0x192   : > { %v11697_v22 = vpop.f32.mrf.mxu0  ;;  %v3617_v30 = vshrl.u32 %v11667_v43, 4  ;;  %vm3943_vm7 = vcmp.ne.s32.totalorder %v11687_v54, 0  ;;  %vm3979_vm8 = vcmp.lt.s32.totalorder %v11687_v54, 0  ;;  %v11724_v35 = vadd.s32 56, %v11594_v62 }
 0x193   : > { %v11710_v18 = vadd.f32 %v9918_v11, %v1957_v56  ;;  %v11712_v41 = vpop.f32.mrf.mxu1  ;;  %v1939_v31 = vadd.f32 %v11577_v47, %v1586_v25  ;;  %v1943_v6 = vadd.f32 %v11596_v12, %v1590_v15  ;;  %v11736_v49 = vadd.s32 18, %v11687_v54  ;;  %v10584_v47 = vld [vmem:[%s15570_s4 + $0x28] sm:$0xff]   ;;  %vm11749_vm9 = vmand %vm3979_vm8, %vm3943_vm7 }
 0x194   : > { %v9877_v0 = vpop.f32.mrf.mxu0  ;;  %v11729_v43 = vmul.u32.u64.low 3817748708, %v11700_v52  ;;  %v11730_v19 = vmul.u32.u64.high 3817748708, %v11700_v52, %v11729_v43  ;;  %v11739_v50 = vsub.s32 %v11594_v62, %v3552_v7  ;;  %v1947_v12 = vadd.f32 %v11617_v21, %v1594_v27  ;;  %10071 = vmatprep.subr.bf16.mxu1 %v10584_v47 }
 0x195   : > { %v1960_v36 = vadd.f32 %v9877_v0, %v11487_v1  ;;  %v9921_v13 = vpop.f32.mrf.mxu1  ;;  %15712 = vst [vmem:[#allocation17_spill] sm:$0xff] %v11736_v49  ;;  %v11754_v25 = vsub.s32 %v11624_v53, %v3585_v46  ;;  %v3563_v56 = vmul.u32 18, %v3562_v51  ;;  %v3618_v11 = vmul.u32 18, %v3617_v30  ;;  %10072 = vmatpush3.bf16.msra.mxu1 %v10584_v47  ;;  %v10586_v30 = vld [vmem:[%s15570_s4 + $0x10] sm:$0xff]  }
 0x196   : > { %v1875_v23 = vpop.f32.mrf.mxu0  ;;  %15713 = vst [vmem:[#allocation18_spill] sm:$0xff] %v11739_v50  ;;  %v11760_v21 = vmul.u32.u64.low 3817748708, %v11724_v35  ;;  %v11761_v27 = vmul.u32.u64.high 3817748708, %v11724_v35, %v11760_v21  ;;  %v11769_v53 = vadd.f32 %v11540_v9, %v11536_v2  ;;  %v11772_v46 = vadd.f32 %v11559_v5, %v1265_v17  ;;  %10113 = vmatprep.subr.bf16.mxu0 %v10586_v30 }
 0x197   : > { %v1958_v1 = vadd.f32 %v1875_v23, %v11490_v55  ;;  %v11733_v16 = vadd.f32 %v9921_v13, %v1960_v36  ;;  %v2228_v45 = vpop.f32.mrf.mxu1  ;;  %v15714_v55 = vmov 0  ;;  %15717 = vst [vmem:[#allocation20_spill] sm:$0xff] %v11754_v25  ;;  %v11777_v51 = vadd.s32 40, %v11594_v62  ;;  %10114 = vmatpush3.bf16.msra.mxu0 %v10586_v30 }
 0x198   : > { %v9878_v28 = vpop.f32.mrf.mxu0  ;;  %v15715_v55 = vsel %vm11749_vm9, 4294967295, %v15714_v55  ;;  %v11783_v10 = vadd.f32 %v11581_v8, %v1939_v31  ;;  %v11786_v20 = vadd.f32 %v11600_v57, %v1943_v6  ;;  %vm3941_vm10 = vcmp.ne.s32.totalorder %v11739_v50, 0 }
 0x199   : > { %15716 = vst [vmem:[#allocation19_spill] sm:$0xff] %v15715_v55  ;;  %v1961_v15 = vadd.f32 %v9878_v28, %v11495_v4  ;;  %v11757_v7 = vadd.f32 %v2228_v45, %v1958_v1  ;;  %v9922_v0 = vpop.f32.mrf.mxu1  ;;  %vm3977_vm11 = vcmp.lt.s32.totalorder %v11739_v50, 0  ;;  %v11799_v8 = vadd.s32 18, %v11739_v50 }
 0x19a   : > { %v11774_v4 = vpop.f32.mrf.mxu0  ;;  %v11802_v57 = vsub.s32 %v11646_v44, %v3563_v56  ;;  %v11805_v36 = vadd.f32 %v11621_v58, %v1947_v12  ;;  %vm3944_vm12 = vcmp.ne.s32.totalorder %v11754_v25, 0  ;;  %v11810_v6 = vsub.s32 %v11649_v61, %v3618_v11  ;;  %vm11848_vm1 = vmand %vm3977_vm11, %vm3941_vm10 }
 0x19b   : > { %15718 = vst [vmem:[#allocation21_spill] sm:$0xff] %v11757_v7  ;;  %v11788_v2 = vadd.f32 %v9922_v0, %v1961_v15  ;;  %v11790_v9 = vpop.f32.mrf.mxu1  ;;  %15720 = vst [vmem:[#allocation23_spill] sm:$0xff] %v11799_v8  ;;  %v3595_v43 = vshrl.u32 %v11730_v19, 4  ;;  %v11814_v1 = vmul.u32.u64.low 3817748708, %v11777_v51  ;;  %v11815_v44 = vmul.u32.u64.high 3817748708, %v11777_v51, %v11814_v1 }
 0x19c   : > { %v9881_v17 = vpop.f32.mrf.mxu0  ;;  %15721 = vst [vmem:[#allocation24_spill] sm:$0xff] %v11802_v57  ;;  %15722 = vst [vmem:[#allocation25_spill] sm:$0xff] %v11810_v6  ;;  %v11818_v45 = vadd.s32 80, %v11594_v62  ;;  %vm3980_vm13 = vcmp.lt.s32.totalorder %v11754_v25, 0  ;;  %v11825_v61 = vadd.s32 64, %v11594_v62  ;;  %v11828_v19 = vadd.s32 18, %v11754_v25 }
 0x19d   : > { %15719 = vst [vmem:[#allocation22_spill] sm:$0xff] %v11788_v2  ;;  %v1964_v13 = vadd.f32 %v9881_v17, %v11507_v40  ;;  %v9925_v31 = vpop.f32.mrf.mxu1  ;;  %vm3942_vm14 = vcmp.ne.s32.totalorder %v11802_v57, 0  ;;  %vm3978_vm15 = vcmp.lt.s32.totalorder %v11802_v57, 0  ;;  %v11833_v28 = vadd.s32 88, %v11594_v62  ;;  %vm11875_vm7 = vmand %vm3980_vm13, %vm3944_vm12 }
 0x19e   : > { %v1891_v23 = vpop.f32.mrf.mxu0  ;;  %15724 = vst [vmem:[#allocation27_spill] sm:$0xff] %v11828_v19  ;;  %v11839_v15 = vadd.s32 18, %v11802_v57  ;;  %v3628_v0 = vshrl.u32 %v11761_v27, 4  ;;  %v15727_v30 = vmov 0  ;;  %vm3947_vm6 = vcmp.ne.s32.totalorder %v11810_v6, 0  ;;  %vm11898_vm10 = vmand %vm3978_vm15, %vm3942_vm14 }
 0x19f   : > { %v1962_v58 = vadd.f32 %v1891_v23, %v11510_v24  ;;  %v11821_v40 = vadd.f32 %v9925_v31, %v1964_v13  ;;  %v2244_v47 = vpop.f32.mrf.mxu1  ;;  %v15728_v30 = vsel %vm11848_vm1, 4294967295, %v15727_v30  ;;  %vm3983_vm8 = vcmp.lt.s32.totalorder %v11810_v6, 0 }
 0x1a0   : > { %v9882_v12 = vpop.f32.mrf.mxu0  ;;  %15726 = vst [vmem:[#allocation29_spill] sm:$0xff] %v11839_v15  ;;  %15729 = vst [vmem:[#allocation30_spill] sm:$0xff] %v15728_v30  ;;  %v11854_v17 = vmul.u32.u64.low 3817748708, %v11818_v45  ;;  %v11855_v13 = vmul.u32.u64.high 3817748708, %v11818_v45, %v11854_v17  ;;  %v11862_v23 = vmul.u32.u64.low 3817748708, %v11825_v61  ;;  %v11863_v1 = vmul.u32.u64.high 3817748708, %v11825_v61, %v11862_v23 }
 0x1a1   : > { %15723 = vst [vmem:[#allocation26_spill] sm:$0xff] %v11821_v40  ;;  %v1965_v24 = vadd.f32 %v9882_v12, %v11515_v38  ;;  %v11836_v56 = vadd.f32 %v2244_v47, %v1962_v58  ;;  %v9926_v11 = vpop.f32.mrf.mxu1  ;;  %v3596_v38 = vmul.u32 18, %v3595_v43  ;;  %v11866_v58 = vadd.s32 72, %v11594_v62  ;;  %v10588_v47 = vld [vmem:[%s15570_s4 + $0x8] sm:$0xff]   ;;  %vm11918_vm11 = vmand %vm3983_vm8, %vm3947_vm6  ;;  %v4758_v15 = vld [vmem:[#allocation2 + $0x4] sm:$0xf] }
 0x1a2   : > { %v11842_v21 = vpop.f32.mrf.mxu0  ;;  %v15731_v12 = vmov 0  ;;  %v11885_v17 = vadd.s32 112, %v11594_v62  ;;  %v1951_v23 = vadd.f32 %v11655_v48, %v11695_v63  ;;  %v3629_v55 = vmul.u32 18, %v3628_v0  ;;  %10115 = vmatprep.subr.bf16.mxu0 %v10588_v47 }
 0x1a3   : > { %15725 = vst [vmem:[#allocation28_spill] sm:$0xff] %v11836_v56  ;;  %v11857_v31 = vadd.f32 %v9926_v11, %v1965_v24  ;;  %v11859_v27 = vpop.f32.mrf.mxu1  ;;  %v15732_v12 = vsel %vm11875_vm7, 4294967295, %v15731_v12  ;;  %v11881_v24 = vmul.u32.u64.low 3817748708, %v11833_v28  ;;  %v11882_v11 = vmul.u32.u64.high 3817748708, %v11833_v28, %v11881_v24  ;;  %10116 = vmatpush3.bf16.msra.mxu0 %v10588_v47 }
 0x1a4   : > { %v9885_v43 = vpop.f32.mrf.mxu0  ;;  %15733 = vst [vmem:[#allocation32_spill] sm:$0xff] %v15732_v12  ;;  %v15734_v24 = vmov 0  ;;  %v1955_v48 = vadd.f32 %v11697_v22, %v11704_v33  ;;  %v11905_v63 = vadd.s32 18, %v11810_v6  ;;  %v3606_v49 = vshrl.u32 %v11815_v44, 4 }
 0x1a5   : > { %15730 = vst [vmem:[#allocation31_spill] sm:$0xff] %v11857_v31  ;;  %v1968_v5 = vadd.f32 %v9885_v43, %v11527_v60  ;;  %v9929_v54 = vpop.f32.mrf.mxu1  ;;  %v15735_v24 = vsel %vm11898_vm10, 4294967295, %v15734_v24  ;;  %v11908_v43 = vsub.s32 %v11700_v52, %v3596_v38  ;;  %v15740_v22 = vmov 0 }
 0x1a6   : > { %15736 = vst [vmem:[#allocation33_spill] sm:$0xff] %v15735_v24  ;;  %v1907_v60 = vpop.f32.mrf.mxu0  ;;  %15737 = vst [vmem:[#allocation34_spill] sm:$0xff] %v11905_v63  ;;  %v15741_v22 = vsel %vm11918_vm11, 4294967295, %v15740_v22  ;;  %v11923_v33 = vmul.u32.u64.low 3817748708, %v11866_v58  ;;  %v11924_v52 = vmul.u32.u64.high 3817748708, %v11866_v58, %v11923_v33  ;;  %v11939_v38 = vadd.f32 %v11659_v29, %v1951_v23 }
 0x1a7   : > { %15738 = vst [vmem:[#allocation35_spill] sm:$0xff] %v11908_v43  ;;  %v1966_v50 = vadd.f32 %v1907_v60, %v11533_v32  ;;  %v11912_v8 = vadd.f32 %v9929_v54, %v1968_v5  ;;  %v2260_v30 = vpop.f32.mrf.mxu1  ;;  %15742 = vst [vmem:[#allocation37_spill] sm:$0xff] %v15741_v22  ;;  %v11935_v5 = vmul.u32.u64.low 3817748708, %v11885_v17  ;;  %v11936_v44 = vmul.u32.u64.high 3817748708, %v11885_v17, %v11935_v5  ;;  %v10589_v32 = vld [vmem:[%s15570_s4] sm:$0xff]  }
 0x1a8   : > { %v9886_v0 = vpop.f32.mrf.mxu0  ;;  %15743 = vst [vmem:[#allocation38_spill] sm:$0xff] %v11939_v38  ;;  %v11945_v12 = vsub.s32 %v11724_v35, %v3629_v55  ;;  %v11951_v54 = vadd.f32 %v11712_v41, %v1955_v48  ;;  %v3607_v29 = vmul.u32 18, %v3606_v49  ;;  %vm3945_vm12 = vcmp.ne.s32.totalorder %v11908_v43, 0  ;;  %10117 = vmatprep.subr.bf16.mxu0 %v10589_v32  ;;  %v4757_v22 = vld [vmem:[#allocation2] sm:$0xf] }
 0x1a9   : > { %15739 = vst [vmem:[#allocation36_spill] sm:$0xff] %v11912_v8  ;;  %v1969_v47 = vadd.f32 %v9886_v0, %v11538_v3  ;;  %v11942_v60 = vadd.f32 %v2260_v30, %v1966_v50  ;;  %v9930_v33 = vpop.f32.mrf.mxu1  ;;  %v3661_v50 = vshrl.u32 %v11855_v13, 4  ;;  %vm3981_vm13 = vcmp.lt.s32.totalorder %v11908_v43, 0  ;;  %10118 = vmatpush3.bf16.msra.mxu0 %v10589_v32 }
 0x1aa   : > { %15745 = vst [vmem:[#allocation40_spill] sm:$0xff] %v11945_v12  ;;  %15746 = vst [vmem:[#allocation41_spill] sm:$0xff] %v11951_v54  ;;  %v11953_v57 = vpop.f32.mrf.mxu0  ;;  %v3639_v41 = vshrl.u32 %v11863_v1, 4  ;;  %v1959_v55 = vadd.f32 %v11774_v4, %v11708_v39  ;;  %v11970_v48 = vadd.s32 18, %v11908_v43  ;;  %v3672_v49 = vshrl.u32 %v11882_v11, 4  ;;  %v15778_v43 = vld [vmem:[#allocation7_spill] sm:$0xff] }
 0x1ab   : > { %15744 = vst [vmem:[#allocation39_spill] sm:$0xff] %v11942_v60  ;;  %v11960_v30 = vadd.f32 %v9930_v33, %v1969_v47  ;;  %v11962_v35 = vpop.f32.mrf.mxu1  ;;  %v11974_v13 = vadd.s32 96, %v11594_v62  ;;  %vm3948_vm14 = vcmp.ne.s32.totalorder %v11945_v12, 0  ;;  %vm3984_vm15 = vcmp.lt.s32.totalorder %v11945_v12, 0  ;;  %vm12002_vm6 = vmand %vm3981_vm13, %vm3945_vm12 }
 0x1ac   : > { %v9889_v23 = vpop.f32.mrf.mxu0  ;;  %15748 = vst [vmem:[#allocation43_spill] sm:$0xff] %v11970_v48  ;;  %v11980_v1 = vadd.s32 120, %v11594_v62  ;;  %v11983_v4 = vadd.s32 18, %v11945_v12  ;;  %v11986_v11 = vsub.s32 %v11777_v51, %v3607_v29  ;;  %v3662_v47 = vmul.u32 18, %v3661_v50  ;;  %vm12018_vm8 = vmand %vm3984_vm15, %vm3948_vm14 }
 0x1ad   : > { %15747 = vst [vmem:[#allocation42_spill] sm:$0xff] %v11960_v30  ;;  %v1972_v0 = vadd.f32 %v9889_v23, %v11550_v59  ;;  %v9933_v5 = vpop.f32.mrf.mxu1  ;;  %v10587_v59 = vld [vmem:[%s15570_s4 + $0x20] sm:$0xff]   ;;  %v11992_v32 = vadd.s32 104, %v11594_v62  ;;  %v3640_v6 = vmul.u32 18, %v3639_v41  ;;  %v3650_v63 = vshrl.u32 %v11924_v52, 4  ;;  %v15754_v52 = vld [vmem:[#allocation3_spill] sm:$0xff] }
 0x1ae   : > { %v1923_v39 = vpop.f32.mrf.mxu0  ;;  %15749 = vst [vmem:[#allocation44_spill] sm:$0xff] %v11983_v4  ;;  %v15751_v29 = vmov 0  ;;  %v3673_v50 = vmul.u32 18, %v3672_v49  ;;  %10073 = vmatprep.subr.bf16.mxu1 %v10587_v59  ;;  %v15756_v25 = vmov 0  ;;  %vm3946_vm12 = vcmp.ne.s32.totalorder %v11986_v11, 0 }
 0x1af   : > { %v1970_v33 = vadd.f32 %v1923_v39, %v11553_v14  ;;  %v11995_v23 = vadd.f32 %v9933_v5, %v1972_v0  ;;  %v2276_v3 = vpop.f32.mrf.mxu1  ;;  %v15752_v29 = vsel %vm12002_vm6, 4294967295, %v15751_v29  ;;  %v3705_v14 = vshrl.u32 %v11936_v44, 4  ;;  %10074 = vmatpush3.bf16.msra.mxu1 %v10587_v59 }
 0x1b0   : > { %v9890_v51 = vpop.f32.mrf.mxu0  ;;  %15753 = vst [vmem:[#allocation46_spill] sm:$0xff] %v15752_v29  ;;  %v12008_v0 = vmul.u32.u64.low 3817748708, %v11974_v13  ;;  %v12009_v41 = vmul.u32.u64.high 3817748708, %v11974_v13, %v12008_v0  ;;  %v15757_v25 = vsel %vm12018_vm8, 4294967295, %v15756_v25  ;;  %vm3982_vm13 = vcmp.lt.s32.totalorder %v11986_v11, 0 }
 0x1b1   : > { %15750 = vst [vmem:[#allocation45_spill] sm:$0xff] %v11995_v23  ;;  %v1973_v5 = vadd.f32 %v9890_v51, %v15754_v52  ;;  %v12012_v39 = vadd.f32 %v2276_v3, %v1970_v33  ;;  %v9934_v24 = vpop.f32.mrf.mxu1  ;;  %15758 = vst [vmem:[#allocation47_spill] sm:$0xff] %v15757_v25  ;;  %v12023_v44 = vmul.u32.u64.low 3817748708, %v11980_v1  ;;  %v12024_v49 = vmul.u32.u64.high 3817748708, %v11980_v1, %v12023_v44 }
 0x1b2   : > { %v12026_v19 = vpop.f32.mrf.mxu0  ;;  %v12029_v51 = vmul.u32.u64.low 3817748708, %v11992_v32  ;;  %v12030_v3 = vmul.u32.u64.high 3817748708, %v11992_v32, %v12029_v51  ;;  %v12033_v33 = vadd.s32 144, %v11594_v62  ;;  %v12035_v0 = vcombine.low %v4757_v22, %v4758_v15  ;;  %vm12123_vm4 = vmand %vm3982_vm13, %vm3946_vm12 }
 0x1b3   : > { %15755 = vst [vmem:[#allocation3_spill] sm:$0xff] %v12012_v39  ;;  %v12037_v52 = vadd.f32 %v9934_v24, %v1973_v5  ;;  %v12039_v39 = vpop.f32.mrf.mxu1  ;;  %v12046_v44 = vsub.s32 %v11818_v45, %v3662_v47  ;;  %v3651_v23 = vmul.u32 18, %v3650_v63  ;;  %v12049_v51 = vadd.f32 %v11790_v9, %v1959_v55  ;;  %v15763_v5 = vld [vmem:[#allocation4_spill] sm:$0xff] }
 0x1b4   : > { %v9945_v30 = vpop.f32.mrf.mxu0  ;;  %v12056_v24 = vsub.s32 %v11825_v61, %v3640_v6  ;;  %v3706_v22 = vmul.u32 18, %v3705_v14  ;;  %10119 = vmatprep.mubr.msk.bf16.mxu0 %vm15590_vm0, %v12035_v0  ;;  %v12068_v9 = vadd.s32 18, %v11986_v11  ;;  %v1963_v6 = vadd.f32 %v11842_v21, %v11765_v34  ;;  %v15765_v14 = vld [vmem:[#allocation5_spill] sm:$0xff] }
 0x1b5   : > { %15759 = vst [vmem:[#allocation48_spill] sm:$0xff] %v12037_v52  ;;  %15760 = vst [vmem:[#allocation49_spill] sm:$0xff] %v12046_v44  ;;  %v12061_v45 = vadd.f32 %v9945_v30, %v15763_v5  ;;  %v12063_v63 = vpop.f32.mrf.mxu1  ;;  %v12073_v55 = vsub.s32 %v11833_v28, %v3673_v50  ;;  %v12076_v47 = vmul.u32.u64.low 3817748708, %v12033_v33  ;;  %v12077_v30 = vmul.u32.u64.high 3817748708, %v12033_v33, %v12076_v47 }
 0x1b6   : > { %15761 = vst [vmem:[#allocation50_spill] sm:$0xff] %v12049_v51  ;;  %15762 = vst [vmem:[#allocation51_spill] sm:$0xff] %v12056_v24  ;;  %v2501_v61 = vpop.f32.mrf.mxu0  ;;  %vm3951_vm14 = vcmp.ne.s32.totalorder %v12046_v44, 0  ;;  %vm3987_vm15 = vcmp.lt.s32.totalorder %v12046_v44, 0  ;;  %v12087_v59 = vsub.s32 %v11866_v58, %v3651_v23  ;;  %v12090_v28 = vadd.s32 18, %v12046_v44 }
 0x1b7   : > { %15764 = vst [vmem:[#allocation4_spill] sm:$0xff] %v12073_v55  ;;  %v12080_v5 = vadd.f32 %v2501_v61, %v15765_v14  ;;  %v12082_v15 = vpop.f32.mrf.mxu1  ;;  %vm3949_vm0 = vcmp.ne.s32.totalorder %v12056_v24, 0  ;;  %v12094_v21 = vsub.s32 %v11885_v17, %v3706_v22  ;;  %v3683_v50 = vshrl.u32 %v12009_v41, 4  ;;  %v15769_v61 = vld [vmem:[#allocation6_spill] sm:$0xff]  ;;  %vm12138_vm2 = vmand %vm3987_vm15, %vm3951_vm14 }
 0x1b8   : > { %15766 = vst [vmem:[#allocation5_spill] sm:$0xff] %v12087_v59  ;;  %v9946_v34 = vpop.f32.mrf.mxu0  ;;  %15767 = vst [vmem:[#allocation52_spill] sm:$0xff] %v12090_v28  ;;  %v12104_v58 = vadd.s32 18, %v12056_v24  ;;  %v3716_v23 = vshrl.u32 %v12024_v49, 4  ;;  %v3694_v17 = vshrl.u32 %v12030_v3, 4  ;;  %v12113_v41 = vadd.s32 128, %v11594_v62 }
 0x1b9   : > { %15768 = vst [vmem:[#allocation53_spill] sm:$0xff] %v12094_v21  ;;  %v12098_v47 = vadd.f32 %v9946_v34, %v15769_v61  ;;  %v12100_v14 = vpop.f32.mrf.mxu1  ;;  %v1967_v22 = vadd.f32 %v11953_v57, %v11769_v53  ;;  %v12128_v61 = vadd.s32 18, %v12073_v55  ;;  %v12132_v3 = vadd.s32 152, %v11594_v62 }
 0x1ba   : > { %15770 = vst [vmem:[#allocation6_spill] sm:$0xff] %v12104_v58  ;;  %v12107_v12 = vpop.f32.mrf.mxu0  ;;  %v15774_v53 = vmov 0  ;;  %v12144_v57 = vadd.s32 18, %v12087_v59  ;;  %v3684_v25 = vmul.u32 18, %v3683_v50  ;;  %vm15779_vm14 = vcmp.lt.s32.totalorder %v12056_v24, 0 }
 0x1bb   : > { %v12117_v34 = vpop.f32.mrf.mxu1  ;;  %15773 = vst [vmem:[#allocation54_spill] sm:$0xff] %v12128_v61  ;;  %v15775_v53 = vsel %vm12138_vm2, 4294967295, %v15774_v53  ;;  %vm12156_vm15 = vmand %vm15779_vm14, %vm3949_vm0  ;;  %v15780_v52 = vmov 0  ;;  %vm3991_vm12 = vcmp.lt.s32.totalorder %v12094_v21, 0  ;;  %v3717_v60 = vmul.u32 18, %v3716_v23  ;;  %v15788_v23 = vld [vmem:[#allocation8_spill] sm:$0xff] }
 0x1bc   : > { %v9949_v4 = vpop.f32.mrf.mxu0  ;;  %15776 = vst [vmem:[#allocation55_spill] sm:$0xff] %v15775_v53  ;;  %15777 = vst [vmem:[#allocation56_spill] sm:$0xff] %v12144_v57  ;;  %v15781_v52 = vsel %vm12156_vm15, 4294967295, %v15780_v52  ;;  %v12162_v8 = vadd.s32 136, %v11594_v62  ;;  %vm15783_vm13 = vcmp.ne.s32.totalorder %v12073_v55, 0  ;;  %vm15784_vm5 = vcmp.lt.s32.totalorder %v12073_v55, 0 }
 0x1bd   : > { %v12148_v48 = vadd.f32 %v9949_v4, %v15778_v43  ;;  %v12150_v29 = vpop.f32.mrf.mxu1  ;;  %15782 = vst [vmem:[#allocation7_spill] sm:$0xff] %v15781_v52  ;;  %vm12168_vm3 = vmand %vm15784_vm5, %vm15783_vm13  ;;  %v15785_v43 = vmov 0  ;;  %v3695_v4 = vmul.u32 18, %v3694_v17  ;;  %v3749_v51 = vshrl.u32 %v12077_v30, 4 }
 0x1be   : > { %v2517_v50 = vpop.f32.mrf.mxu0  ;;  %v15786_v43 = vsel %vm12168_vm3, 4294967295, %v15785_v43  ;;  %v12174_v31 = vmul.u32.u64.low 3817748708, %v12113_v41  ;;  %v12175_v56 = vmul.u32.u64.high 3817748708, %v12113_v41, %v12174_v31  ;;  %vm15789_vm0 = vcmp.ne.s32.totalorder %v12087_v59, 0 }
 0x1bf   : > { %15787 = vst [vmem:[#allocation57_spill] sm:$0xff] %v15786_v43  ;;  %v12178_v54 = vadd.f32 %v2517_v50, %v15788_v23  ;;  %v12180_v40 = vpop.f32.mrf.mxu1  ;;  %vm15790_vm14 = vcmp.lt.s32.totalorder %v12087_v59, 0  ;;  %v15791_v2 = vmov 0  ;;  %v12191_v17 = vadd.s32 18, %v12094_v21  ;;  %v15825_v43 = vld [vmem:[#allocation13_spill] sm:$0xff] }
 0x1c0   : > { %vm12186_vm5 = vmand %vm15790_vm14, %vm15789_vm0  ;;  %v12194_v30 = vmul.u32.u64.low 3817748708, %v12132_v3  ;;  %v12195_v7 = vmul.u32.u64.high 3817748708, %v12132_v3, %v12194_v30  ;;  %v12198_v31 = vadd.f32 %v11859_v27, %v1963_v6  ;;  %v9950_v50 = vpop.f32.mrf.mxu0  ;;  %vm15796_vm13 = vcmp.ne.s32.totalorder %v12094_v21, 0  ;;  %v15801_v6 = vld [vmem:[#allocation9_spill] sm:$0xff] }
 0x1c1   : > { %v15792_v2 = vsel %vm12186_vm5, 4294967295, %v15791_v2  ;;  %15794 = vst [vmem:[#allocation58_spill] sm:$0xff] %v12191_v17  ;;  %vm12212_vm0 = vmand %vm3991_vm12, %vm15796_vm13  ;;  %v15797_v30 = vmov 0  ;;  %v12217_v27 = vsub.s32 %v11974_v13, %v3684_v25  ;;  %v12222_v23 = vpop.f32.mrf.mxu1  ;;  %v12233_v28 = vsub.s32 %v11980_v1, %v3717_v60 }
 0x1c2   : > { %15793 = vst [vmem:[#allocation8_spill] sm:$0xff] %v15792_v2  ;;  %15795 = vst [vmem:[#allocation59_spill] sm:$0xff] %v12198_v31  ;;  %v15798_v30 = vsel %vm12212_vm0, 4294967295, %v15797_v30  ;;  %v12220_v31 = vadd.f32 %v9950_v50, %v15801_v6  ;;  %v12235_v25 = vpop.f32.mrf.mxu0  ;;  %v12238_v13 = vsub.s32 %v11992_v32, %v3695_v4  ;;  %v3750_v50 = vmul.u32 18, %v3749_v51  ;;  %v15805_v4 = vld [vmem:[#allocation10_spill] sm:$0xff]  ;;  %v15814_v2 = vld [vmem:[#allocation12_spill] sm:$0xff] }
 0x1c3   : > { %15799 = vst [vmem:[#allocation60_spill] sm:$0xff] %v15798_v30  ;;  %15800 = vst [vmem:[#allocation61_spill] sm:$0xff] %v12217_v27  ;;  %v12241_v6 = vmul.u32.u64.low 3817748708, %v12162_v8  ;;  %v12242_v53 = vmul.u32.u64.high 3817748708, %v12162_v8, %v12241_v6  ;;  %v12245_v38 = vadd.f32 %v11962_v35, %v1967_v22  ;;  %v12247_v24 = vpop.f32.mrf.mxu1  ;;  %v12258_v32 = vadd.s32 176, %v11594_v62 }
 0x1c4   : > { %15802 = vst [vmem:[#allocation9_spill] sm:$0xff] %v12233_v28  ;;  %15803 = vst [vmem:[#allocation62_spill] sm:$0xff] %v12238_v13  ;;  %v1971_v51 = vadd.f32 %v12026_v19, %v11772_v46  ;;  %v9953_v35 = vpop.f32.mrf.mxu0  ;;  %v12265_v22 = vadd.s32 18, %v12217_v27  ;;  %v12275_v1 = vadd.s32 160, %v11594_v62  ;;  %vm3954_vm12 = vcmp.ne.s32.totalorder %v12238_v13, 0 }
 0x1c5   : > { %v12268_v6 = vadd.f32 %v9953_v35, %v15805_v4  ;;  %v12270_v60 = vpop.f32.mrf.mxu1  ;;  %v12280_v19 = vsub.s32 %v12033_v33, %v3750_v50  ;;  %v3727_v35 = vshrl.u32 %v12175_v56, 4  ;;  %v15807_v4 = vld [vmem:[#allocation11_spill] sm:$0xff]  ;;  %vm15808_vm0 = vcmp.ne.s32.totalorder %v12217_v27, 0 }
 0x1c6   : > { %15804 = vst [vmem:[#allocation63_spill] sm:$0xff] %v12265_v22  ;;  %v2533_v46 = vpop.f32.mrf.mxu0  ;;  %vm15809_vm13 = vcmp.lt.s32.totalorder %v12217_v27, 0  ;;  %v15810_v17 = vmov 0  ;;  %v3760_v30 = vshrl.u32 %v12195_v7, 4  ;;  %v12302_v56 = vadd.f32 %v12039_v39, %v1971_v51 }
 0x1c7   : > { %15806 = vst [vmem:[#allocation10_spill] sm:$0xff] %v12280_v19  ;;  %v12284_v44 = vadd.f32 %v2533_v46, %v15807_v4  ;;  %v12286_v21 = vpop.f32.mrf.mxu1  ;;  %vm12292_vm5 = vmand %vm15809_vm13, %vm15808_vm0  ;;  %v12298_v33 = vmul.u32.u64.low 3817748708, %v12258_v32  ;;  %v12299_v50 = vmul.u32.u64.high 3817748708, %v12258_v32, %v12298_v33  ;;  %v2645_v46 = vadd.f32 %v12107_v12, %v11783_v10 }
 0x1c8   : > { %v15811_v17 = vsel %vm12292_vm5, 4294967295, %v15810_v17  ;;  %v9954_v4 = vpop.f32.mrf.mxu0  ;;  %v12307_v59 = vadd.s32 18, %v12233_v28  ;;  %v3738_v57 = vshrl.u32 %v12242_v53, 4  ;;  %vm15815_vm0 = vcmp.ne.s32.totalorder %v12233_v28, 0 }
 0x1c9   : > { %15812 = vst [vmem:[#allocation11_spill] sm:$0xff] %v15811_v17  ;;  %v12311_v55 = vadd.f32 %v9954_v4, %v15814_v2  ;;  %v12313_v7 = vpop.f32.mrf.mxu1  ;;  %vm15816_vm13 = vcmp.lt.s32.totalorder %v12233_v28, 0  ;;  %v15817_v39 = vmov 0  ;;  %v12324_v10 = vadd.s32 18, %v12238_v13 }
 0x1ca   : > { %15813 = vst [vmem:[#allocation64_spill] sm:$0xff] %v12307_v59  ;;  %vm12319_vm14 = vmand %vm15816_vm13, %vm15815_vm0  ;;  %v12327_v12 = vmul.u32.u64.low 3817748708, %v12275_v1  ;;  %v12328_v51 = vmul.u32.u64.high 3817748708, %v12275_v1, %v12327_v12  ;;  %v12332_v2 = vadd.f32 %v12063_v63, %v12061_v45  ;;  %v12334_v53 = vpop.f32.mrf.mxu0  ;;  %vm15821_vm0 = vcmp.lt.s32.totalorder %v12238_v13, 0  ;;  %v15833_v59 = vld [vmem:[#allocation15_spill] sm:$0xff] }
 0x1cb   : > { %v15818_v39 = vsel %vm12319_vm14, 4294967295, %v15817_v39  ;;  %15820 = vst [vmem:[#allocation65_spill] sm:$0xff] %v12324_v10  ;;  %vm12344_vm13 = vmand %vm15821_vm0, %vm3954_vm12  ;;  %v15822_v4 = vmov 0  ;;  %v3728_v12 = vmul.u32 18, %v3727_v35  ;;  %v12349_v61 = vadd.s32 184, %v11594_v62  ;;  %v12355_v63 = vpop.f32.mrf.mxu1 }
 0x1cc   : > { %15819 = vst [vmem:[#allocation12_spill] sm:$0xff] %v15818_v39  ;;  %v15823_v4 = vsel %vm12344_vm13, 4294967295, %v15822_v4  ;;  %v12353_v45 = vadd.f32 %v12082_v15, %v12080_v5  ;;  %vm3959_vm5 = vcmp.ne.s32.totalorder %v12280_v19, 0  ;;  %vm3995_vm3 = vcmp.lt.s32.totalorder %v12280_v19, 0  ;;  %v9957_v22 = vpop.f32.mrf.mxu0 }
 0x1cd   : > { %15824 = vst [vmem:[#allocation66_spill] sm:$0xff] %v15823_v4  ;;  %v3761_v33 = vmul.u32 18, %v3760_v30  ;;  %v12361_v27 = vadd.f32 %v12100_v14, %v12098_v47  ;;  %v3739_v17 = vmul.u32 18, %v3738_v57  ;;  %v4907_v15 = vshll.u32 %v12035_v0, 16  ;;  %v12374_v30 = vpop.f32.mrf.mxu1  ;;  %vm12387_vm12 = vmand %vm3995_vm3, %vm3959_vm5 }
 0x1ce   : > { %v12369_v5 = vadd.f32 %v12117_v34, %v2645_v46  ;;  %v12372_v58 = vadd.f32 %v9957_v22, %v15825_v43  ;;  %v12381_v14 = vadd.s32 18, %v12280_v19  ;;  %v2549_v35 = vpop.f32.mrf.mxu0  ;;  %v15827_v34 = vmov 0 }
 0x1cf   : > { %v15828_v34 = vsel %vm12387_vm12, 4294967295, %v15827_v34  ;;  %v12392_v57 = vsub.s32 %v12113_v41, %v3728_v12  ;;  %v12395_v43 = vmul.u32.u64.low 3817748708, %v12349_v61  ;;  %v12396_v22 = vmul.u32.u64.high 3817748708, %v12349_v61, %v12395_v43  ;;  %v12404_v13 = vpop.f32.mrf.mxu1 }
 0x1d0   : > { %15826 = vst [vmem:[#allocation13_spill] sm:$0xff] %v12381_v14  ;;  %15829 = vst [vmem:[#allocation67_spill] sm:$0xff] %v15828_v34  ;;  %v12399_v46 = vadd.s32 168, %v11594_v62  ;;  %v12402_v47 = vadd.f32 %v2549_v35, %v11652_v42  ;;  %v12407_v10 = vsub.s32 %v12132_v3, %v3761_v33  ;;  %v3793_v4 = vshrl.u32 %v12299_v50, 4  ;;  %v9958_v28 = vpop.f32.mrf.mxu0 }
 0x1d1   : > { %15830 = vst [vmem:[#allocation68_spill] sm:$0xff] %v12392_v57  ;;  %v4905_v41 = vshrl.u32 %v12035_v0, 16  ;;  %v12413_v12 = vadd.f32 %v12150_v29, %v12148_v48  ;;  %v12417_v43 = vadd.f32 %v12180_v40, %v12178_v54  ;;  %v12420_v42 = vsub.s32 %v12162_v8, %v3739_v17  ;;  %v12425_v33 = vpop.f32.mrf.mxu1  ;;  %v10593_v48 = vld [vmem:[%s15570_s4 + $0x58] sm:$0xff]  }
 0x1d2   : > { %15831 = vst [vmem:[#allocation69_spill] sm:$0xff] %v12407_v10  ;;  %v4909_v35 = vrot.slane %v4907_v15, 1  ;;  %v12423_v3 = vadd.f32 %v9958_v28, %v15833_v59  ;;  %v3771_v29 = vshrl.u32 %v12328_v51, 4  ;;  %v12433_v40 = vadd.s32 208, %v11594_v62  ;;  %v12435_v54 = vpop.f32.mrf.mxu0  ;;  %10155 = vmatprep.subr.bf16.mxu1 %v10593_v48 }
 0x1d3   : > { %15832 = vst [vmem:[#allocation70_spill] sm:$0xff] %v12420_v42  ;;  %v12440_v8 = vmul.u32.u64.low 3817748708, %v12399_v46  ;;  %v12441_v0 = vmul.u32.u64.high 3817748708, %v12399_v46, %v12440_v8  ;;  %v2649_v59 = vadd.f32 %v12235_v25, %v11786_v20  ;;  %v12445_v28 = vpop.f32.mrf.mxu1  ;;  %v12448_v17 = vadd.s32 18, %v12392_v57 }
 0x1d4   : > { %v3794_v50 = vmul.u32 18, %v3793_v4  ;;  %v9961_v51 = vpop.f32.mrf.mxu0  ;;  %vm3996_vm3 = vcmp.lt.s32.totalorder %v12407_v10, 0  ;;  %vm3958_vm5 = vcmp.ne.s32.totalorder %v12420_v42, 0  ;;  %vm3994_vm12 = vcmp.lt.s32.totalorder %v12420_v42, 0 }
 0x1d5   : > { %15834 = vst [vmem:[#allocation15_spill] sm:$0xff] %v12448_v17  ;;  %v3804_v15 = vshrl.u32 %v12396_v22, 4  ;;  %v12456_v8 = vadd.f32 %v9961_v51, %v11671_v37  ;;  %v12458_v20 = vpop.f32.mrf.mxu1  ;;  %vm15835_vm13 = vcmp.ne.s32.totalorder %v12392_v57, 0  ;;  %vm15836_vm14 = vcmp.lt.s32.totalorder %v12392_v57, 0 }
 0x1d6   : > { %vm12464_vm0 = vmand %vm15836_vm14, %vm15835_vm13  ;;  %v15837_v25 = vmov 0  ;;  %v3772_v4 = vmul.u32 18, %v3771_v29  ;;  %v12472_v22 = vmul.u32.u64.low 3817748708, %v12433_v40  ;;  %v12473_v19 = vmul.u32.u64.high 3817748708, %v12433_v40, %v12472_v22  ;;  %v2565_v51 = vpop.f32.mrf.mxu0 }
 0x1d7   : > { %v15838_v25 = vsel %vm12464_vm0, 4294967295, %v15837_v25  ;;  %v12477_v37 = vadd.f32 %v12222_v23, %v12220_v31  ;;  %v12480_v14 = vadd.s32 18, %v12407_v10  ;;  %v12482_v34 = vor.u32 %v4909_v35, %v4905_v41  ;;  %v12492_v22 = vpop.f32.mrf.mxu1 }
 0x1d8   : > { %15839 = vst [vmem:[#allocation71_spill] sm:$0xff] %v15838_v25  ;;  %v12485_v29 = vadd.s32 192, %v11594_v62  ;;  %v2653_v39 = vadd.f32 %v12334_v53, %v11805_v36  ;;  %v12490_v52 = vadd.f32 %v2565_v51, %v11684_v26  ;;  %vm15842_vm14 = vcmp.ne.s32.totalorder %v12407_v10, 0  ;;  %v9962_v36 = vpop.f32.mrf.mxu0 }
 0x1d9   : > { %15840 = vst [vmem:[#allocation72_spill] sm:$0xff] %v12480_v14  ;;  %15841 = vst [vmem:[#allocation73_spill] sm:$0xff] %v12482_v34  ;;  %v15843_v31 = vmov 0  ;;  %v12503_v23 = vadd.s32 18, %v12420_v42  ;;  %v12506_v41 = vsub.s32 %v12258_v32, %v3794_v50  ;;  %v12509_v26 = vadd.f32 %v12247_v24, %v2649_v59  ;;  %v12535_v51 = vpop.f32.mrf.mxu1  ;;  %v15855_v42 = vld [vmem:[#allocation21_spill] sm:$0xff] }
 0x1da   : > { %vm12498_vm13 = vmand %vm3996_vm3, %vm15842_vm14  ;;  %v15848_v35 = vmov 0  ;;  %v3805_v32 = vmul.u32 18, %v3804_v15  ;;  %v3782_v48 = vshrl.u32 %v12441_v0, 4  ;;  %v12526_v24 = vadd.f32 %v12270_v60, %v12268_v6  ;;  %v12540_v34 = vpop.f32.mrf.mxu0 }
 0x1db   : > { %v15844_v31 = vsel %vm12498_vm13, 4294967295, %v15843_v31  ;;  %15846 = vst [vmem:[#allocation75_spill] sm:$0xff] %v12503_v23  ;;  %15847 = vst [vmem:[#allocation76_spill] sm:$0xff] %v12506_v41  ;;  %v12530_v59 = vadd.f32 %v12286_v21, %v12284_v44  ;;  %v12533_v50 = vadd.f32 %v9962_v36, %v11710_v18  ;;  %v12538_v53 = vsub.s32 %v12275_v1, %v3772_v4  ;;  %v12560_v1 = vpop.f32.mrf.mxu1 }
 0x1dc   : > { %15845 = vst [vmem:[#allocation74_spill] sm:$0xff] %v15844_v31  ;;  %vm12519_vm3 = vmand %vm3994_vm12, %vm3958_vm5  ;;  %v12547_v6 = vmul.u32.u64.low 3817748708, %v12485_v29  ;;  %v12548_v0 = vmul.u32.u64.high 3817748708, %v12485_v29, %v12547_v6  ;;  %v12551_v44 = vadd.s32 216, %v11594_v62  ;;  %v12555_v18 = vadd.f32 %v12313_v7, %v12311_v55  ;;  %v9965_v4 = vpop.f32.mrf.mxu0 }
 0x1dd   : > { %v15849_v35 = vsel %vm12519_vm3, 4294967295, %v15848_v35  ;;  %15851 = vst [vmem:[#allocation78_spill] sm:$0xff] %v12538_v53  ;;  %v12558_v21 = vadd.f32 %v12355_v63, %v2653_v39  ;;  %vm3963_vm12 = vcmp.ne.s32.totalorder %v12506_v41, 0  ;;  %vm3999_vm5 = vcmp.lt.s32.totalorder %v12506_v41, 0  ;;  %v12575_v63 = vpop.f32.mrf.mxu1 }
 0x1de   : > { %15850 = vst [vmem:[#allocation77_spill] sm:$0xff] %v15849_v35  ;;  %v12569_v36 = vsub.s32 %v12349_v61, %v3805_v32  ;;  %v3783_v55 = vmul.u32 18, %v3782_v48  ;;  %v3837_v7 = vshrl.u32 %v12473_v19, 4  ;;  %v12573_v39 = vadd.f32 %v9965_v4, %v11733_v16  ;;  %v2581_v15 = vpop.f32.mrf.mxu0  ;;  %v15854_v48 = vld [vmem:[#allocation38_spill] sm:$0xff]  ;;  %vm12605_vm13 = vmand %vm3999_vm5, %vm3963_vm12 }
 0x1df   : > { %vm3961_vm14 = vcmp.ne.s32.totalorder %v12538_v53, 0  ;;  %vm3997_vm3 = vcmp.lt.s32.totalorder %v12538_v53, 0  ;;  %v12580_v6 = vadd.s32 200, %v11594_v62  ;;  %v12583_v60 = vadd.s32 18, %v12506_v41  ;;  %v12599_v35 = vpop.f32.mrf.mxu1 }
 0x1e0   : > { %15852 = vst [vmem:[#allocation79_spill] sm:$0xff] %v12569_v36  ;;  %v3815_v61 = vshrl.u32 %v12548_v0, 4  ;;  %v12587_v19 = vmul.u32.u64.low 3817748708, %v12551_v44  ;;  %v12588_v32 = vmul.u32.u64.high 3817748708, %v12551_v44, %v12587_v19  ;;  %v12592_v16 = vadd.f32 %v12374_v30, %v12372_v58  ;;  %v9966_v58 = vpop.f32.mrf.mxu0  ;;  %vm12612_vm0 = vmand %vm3997_vm3, %vm3961_vm14 }
 0x1e1   : > { %15853 = vst [vmem:[#allocation80_spill] sm:$0xff] %v12583_v60  ;;  %v2657_v4 = vadd.f32 %v12435_v54, %v15854_v48  ;;  %v12597_v23 = vadd.f32 %v2581_v15, %v15855_v42  ;;  %v15856_v0 = vmov 0  ;;  %v12610_v19 = vadd.s32 18, %v12538_v53  ;;  %v15864_v15 = vld [vmem:[#allocation22_spill] sm:$0xff]  ;;  %v12624_v10 = vpop.f32.mrf.mxu1 }
 0x1e2   : > { %v15857_v0 = vsel %vm12605_vm13, 4294967295, %v15856_v0  ;;  %v15860_v30 = vmov 0  ;;  %vm3964_vm15 = vcmp.ne.s32.totalorder %v12569_v36, 0  ;;  %vm4000_vm2 = vcmp.lt.s32.totalorder %v12569_v36, 0  ;;  %v2584_v25 = vpop.f32.mrf.mxu0 }
 0x1e3   : > { %15858 = vst [vmem:[#allocation38_spill] sm:$0xff] %v15857_v0  ;;  %15859 = vst [vmem:[#allocation21_spill] sm:$0xff] %v12610_v19  ;;  %v15861_v30 = vsel %vm12612_vm0, 4294967295, %v15860_v30  ;;  %v12619_v42 = vsub.s32 %v12399_v46, %v3783_v55  ;;  %v3838_v54 = vmul.u32 18, %v3837_v7  ;;  %v12622_v48 = vadd.f32 %v9966_v58, %v15864_v15 }
 0x1e4   : > { %15862 = vst [vmem:[#allocation81_spill] sm:$0xff] %v15861_v30  ;;  %v3816_v14 = vmul.u32 18, %v3815_v61  ;;  %v12627_v31 = vmul.u32.u64.low 3817748708, %v12580_v6  ;;  %v12628_v57 = vmul.u32.u64.high 3817748708, %v12580_v6, %v12627_v31  ;;  %v12632_v17 = vadd.f32 %v12404_v13, %v12402_v47  ;;  %v12649_v13 = vpop.f32.mrf.mxu1  ;;  %v9969_v15 = vpop.f32.mrf.mxu0  ;;  %vm12666_vm3 = vmand %vm4000_vm2, %vm3964_vm15  ;;  %v15874_v30 = vld [vmem:[#allocation28_spill] sm:$0xff] }
 0x1e5   : > { %15863 = vst [vmem:[#allocation82_spill] sm:$0xff] %v12619_v42  ;;  %v3848_v55 = vshrl.u32 %v12588_v32, 4  ;;  %v12640_v7 = vadd.s32 240, %v11594_v62  ;;  %v12644_v61 = vadd.f32 %v12425_v33, %v12423_v3  ;;  %v12647_v31 = vadd.f32 %v12445_v28, %v2657_v4  ;;  %v15870_v4 = vld [vmem:[#allocation26_spill] sm:$0xff] }
 0x1e6   : > { %v12656_v58 = vadd.s32 18, %v12569_v36  ;;  %v12660_v32 = vadd.f32 %v12458_v20, %v12456_v8  ;;  %v15866_v3 = vmov 0  ;;  %vm3962_vm12 = vcmp.ne.s32.totalorder %v12619_v42, 0  ;;  %v12677_v8 = vpop.f32.mrf.mxu1  ;;  %v2597_v19 = vpop.f32.mrf.mxu0 }
 0x1e7   : > { %v15867_v3 = vsel %vm12666_vm3, 4294967295, %v15866_v3  ;;  %v12672_v33 = vsub.s32 %v12433_v40, %v3838_v54  ;;  %v3849_v28 = vmul.u32 18, %v3848_v55  ;;  %v12675_v47 = vadd.f32 %v9969_v15, %v15870_v4  ;;  %v15873_v15 = vld [vmem:[#allocation41_spill] sm:$0xff] }
 0x1e8   : > { %15865 = vst [vmem:[#allocation22_spill] sm:$0xff] %v12656_v58  ;;  %15868 = vst [vmem:[#allocation83_spill] sm:$0xff] %v15867_v3  ;;  %vm3998_vm5 = vcmp.lt.s32.totalorder %v12619_v42, 0  ;;  %v12681_v20 = vsub.s32 %v12485_v29, %v3816_v14  ;;  %v3826_v46 = vshrl.u32 %v12628_v57, 4  ;;  %v12686_v53 = vadd.f32 %v12492_v22, %v12490_v52  ;;  %v12700_v29 = vpop.f32.mrf.mxu1 }
 0x1e9   : > { %15869 = vst [vmem:[#allocation84_spill] sm:$0xff] %v12672_v33  ;;  %v12689_v40 = vmul.u32.u64.low 3817748708, %v12640_v7  ;;  %v12690_v54 = vmul.u32.u64.high 3817748708, %v12640_v7, %v12689_v40  ;;  %v12693_v55 = vadd.s32 224, %v11594_v62  ;;  %v2661_v4 = vadd.f32 %v12540_v34, %v15873_v15  ;;  %vm12715_vm2 = vmand %vm3998_vm5, %vm3962_vm12 }
 0x1ea   : > { %15871 = vst [vmem:[#allocation26_spill] sm:$0xff] %v12681_v20  ;;  %15872 = vst [vmem:[#allocation85_spill] sm:$0xff] %v12686_v53  ;;  %v12698_v14 = vadd.f32 %v2597_v19, %v15874_v30  ;;  %v12707_v57 = vadd.s32 18, %v12619_v42  ;;  %v12711_v22 = vadd.f32 %v12535_v51, %v12533_v50  ;;  %v9970_v40 = vpop.f32.mrf.mxu0  ;;  %v15877_v34 = vmov 0  ;;  %v15881_v30 = vld [vmem:[#allocation31_spill] sm:$0xff]  ;;  %v12727_v52 = vpop.f32.mrf.mxu1 }
 0x1eb   : > { %v15878_v34 = vsel %vm12715_vm2, 4294967295, %v15877_v34  ;;  %vm3967_vm15 = vcmp.ne.s32.totalorder %v12672_v33, 0  ;;  %vm4003_vm14 = vcmp.lt.s32.totalorder %v12672_v33, 0  ;;  %v12722_v19 = vsub.s32 %v12551_v44, %v3849_v28 }
 0x1ec   : > { %15875 = vst [vmem:[#allocation41_spill] sm:$0xff] %v12707_v57  ;;  %15876 = vst [vmem:[#allocation28_spill] sm:$0xff] %v12711_v22  ;;  %v12725_v15 = vadd.f32 %v9970_v40, %v15881_v30  ;;  %v3827_v50 = vmul.u32 18, %v3826_v46  ;;  %v12731_v51 = vadd.s32 248, %v11594_v62  ;;  %v2600_v36 = vpop.f32.mrf.mxu0  ;;  %v3881_v58 = vshrl.u32 %v12690_v54, 4  ;;  %v15883_v40 = vld [vmem:[#allocation50_spill] sm:$0xff]  ;;  %v12743_v41 = vpop.f32.mrf.mxu1 }
 0x1ed   : > { %15879 = vst [vmem:[#allocation86_spill] sm:$0xff] %v15878_v34  ;;  %15880 = vst [vmem:[#allocation87_spill] sm:$0xff] %v12722_v19  ;;  %v12736_v3 = vmul.u32.u64.low 3817748708, %v12693_v55  ;;  %v12737_v44 = vmul.u32.u64.high 3817748708, %v12693_v55, %v12736_v3  ;;  %v12740_v28 = vadd.f32 %v12560_v1, %v2661_v4  ;;  %v2665_v30 = vadd.f32 %v2584_v25, %v15883_v40  ;;  %v15889_v4 = vld [vmem:[#allocation36_spill] sm:$0xff] }
 0x1ee   : > { %v12750_v60 = vadd.s32 18, %v12672_v33  ;;  %v9973_v54 = vpop.f32.mrf.mxu0  ;;  %vm12756_vm5 = vmand %vm4003_vm14, %vm3967_vm15  ;;  %v15885_v1 = vmov 0  ;;  %v12761_v25 = vadd.s32 18, %v12681_v20  ;;  %vm3968_vm12 = vcmp.ne.s32.totalorder %v12722_v19, 0  ;;  %v12768_v46 = vpop.f32.mrf.mxu1 }
 0x1ef   : > { %15882 = vst [vmem:[#allocation31_spill] sm:$0xff] %v12740_v28  ;;  %v15886_v1 = vsel %vm12756_vm5, 4294967295, %v15885_v1  ;;  %vm4004_vm3 = vcmp.lt.s32.totalorder %v12722_v19, 0  ;;  %v3882_v3 = vmul.u32 18, %v3881_v58  ;;  %v12766_v40 = vadd.f32 %v9973_v54, %v15889_v4 }
 0x1f0   : > { %15884 = vst [vmem:[#allocation50_spill] sm:$0xff] %v12750_v60  ;;  %15887 = vst [vmem:[#allocation88_spill] sm:$0xff] %v15886_v1  ;;  %vm15890_vm2 = vcmp.ne.s32.totalorder %v12681_v20, 0  ;;  %vm15891_vm15 = vcmp.lt.s32.totalorder %v12681_v20, 0  ;;  %v15892_v42 = vmov 0  ;;  %v12779_v57 = vsub.s32 %v12580_v6, %v3827_v50  ;;  %v2613_v4 = vpop.f32.mrf.mxu0  ;;  %v15896_v50 = vld [vmem:[#allocation39_spill] sm:$0xff] }
 0x1f1   : > { %15888 = vst [vmem:[#allocation89_spill] sm:$0xff] %v12761_v25  ;;  %vm12774_vm14 = vmand %vm15891_vm15, %vm15890_vm2  ;;  %v12782_v34 = vmul.u32.u64.low 3817748708, %v12731_v51  ;;  %v12783_v28 = vmul.u32.u64.high 3817748708, %v12731_v51, %v12782_v34  ;;  %v12787_v58 = vadd.f32 %v12575_v63, %v12573_v39  ;;  %v12791_v54 = vadd.f32 %v12599_v35, %v12597_v23  ;;  %v15922_v1 = vld [vmem:[#allocation17_spill] sm:$0xff] }
 0x1f2   : > { %v15893_v42 = vsel %vm12774_vm14, 4294967295, %v15892_v42  ;;  %15895 = vst [vmem:[#allocation90_spill] sm:$0xff] %v12779_v57  ;;  %v3859_v0 = vshrl.u32 %v12737_v44, 4  ;;  %v3538_v22 = vadd.s32 232, %v11594_v62  ;;  %v12797_v6 = vadd.f32 %v12624_v10, %v12622_v48  ;;  %v2966_v34 = vpop.f32.mrf.mxu1  ;;  %v9974_v63 = vpop.f32.mrf.mxu0  ;;  %vm12818_vm2 = vmand %vm4004_vm3, %vm3968_vm12 }
 0x1f3   : > { %15894 = vst [vmem:[#allocation36_spill] sm:$0xff] %v15893_v42  ;;  %v2672_v53 = vadd.f32 %v2613_v4, %v15896_v50  ;;  %v12805_v23 = vadd.s32 18, %v12722_v19  ;;  %v12808_v35 = vadd.f32 %v12649_v13, %v2665_v30  ;;  %v15898_v48 = vmov 0  ;;  %v15901_v13 = vld [vmem:[#allocation42_spill] sm:$0xff] }
 0x1f4   : > { %v15899_v48 = vsel %vm12818_vm2, 4294967295, %v15898_v48  ;;  %v12823_v44 = vsub.s32 %v12640_v7, %v3882_v3  ;;  %v3860_v4 = vmul.u32 18, %v3859_v0  ;;  %v2675_v30 = vadd.f32 %v9974_v63, %v15901_v13  ;;  %v10018_v50 = vpop.f32.mrf.mxu1  ;;  %v2616_v20 = vpop.f32.mrf.mxu0 }
 0x1f5   : > { %15897 = vst [vmem:[#allocation39_spill] sm:$0xff] %v12805_v23  ;;  %15900 = vst [vmem:[#allocation91_spill] sm:$0xff] %v15899_v48  ;;  %vm3966_vm15 = vcmp.ne.s32.totalorder %v12779_v57, 0  ;;  %v3892_v39 = vshrl.u32 %v12783_v28, 4  ;;  %v12829_v10 = vadd.s32 272, %v11594_v62  ;;  %v12840_v0 = vadd.f32 %v12677_v8, %v12675_v47  ;;  %v15905_v28 = vld [vmem:[#allocation59_spill] sm:$0xff] }
 0x1f6   : > { %v12833_v25 = vsub.s32 %v12693_v55, %v3860_v4  ;;  %v12835_v42 = vmul.u32.u64.low 3817748708, %v3538_v22  ;;  %v12836_v7 = vmul.u32.u64.high 3817748708, %v3538_v22, %v12835_v42  ;;  %v12844_v3 = vadd.f32 %v12700_v29, %v12698_v14  ;;  %v2969_v13 = vpop.f32.mrf.mxu1  ;;  %v9977_v4 = vpop.f32.mrf.mxu0  ;;  %v15907_v47 = vld [vmem:[#allocation45_spill] sm:$0xff]  ;;  %v15913_v23 = vld [vmem:[#allocation3_spill] sm:$0xff] }
 0x1f7   : > { %15903 = vst [vmem:[#allocation92_spill] sm:$0xff] %v12840_v0  ;;  %v2669_v63 = vadd.f32 %v2600_v36, %v15905_v28  ;;  %v12852_v33 = vadd.s32 18, %v12779_v57  ;;  %vm3971_vm12 = vcmp.ne.s32.totalorder %v12823_v44, 0  ;;  %vm4007_vm3 = vcmp.lt.s32.totalorder %v12823_v44, 0  ;;  %v15923_v0 = vld [vmem:[#allocation16_spill] sm:$0xff] }
 0x1f8   : > { %15902 = vst [vmem:[#allocation42_spill] sm:$0xff] %v12833_v25  ;;  %15904 = vst [vmem:[#allocation93_spill] sm:$0xff] %v12844_v3  ;;  %v3893_v42 = vmul.u32 18, %v3892_v39  ;;  %v2678_v8 = vadd.f32 %v9977_v4, %v15907_v47  ;;  %v10021_v14 = vpop.f32.mrf.mxu1  ;;  %vm15908_vm14 = vcmp.lt.s32.totalorder %v12779_v57, 0  ;;  %v15909_v36 = vmov 0  ;;  %v2629_v28 = vpop.f32.mrf.mxu0 }
 0x1f9   : > { %15906 = vst [vmem:[#allocation59_spill] sm:$0xff] %v12852_v33  ;;  %vm12861_vm5 = vmand %vm15908_vm14, %vm3966_vm15  ;;  %vm3969_vm2 = vcmp.ne.s32.totalorder %v12833_v25, 0  ;;  %vm4005_vm0 = vcmp.lt.s32.totalorder %v12833_v25, 0  ;;  %v12868_v29 = vadd.s32 256, %v11594_v62  ;;  %v12872_v39 = vadd.f32 %v12727_v52, %v12725_v15 }
 0x1fa   : > { %v15910_v36 = vsel %vm12861_vm5, 4294967295, %v15909_v36  ;;  %v3870_v4 = vshrl.u32 %v12836_v7, 4  ;;  %v12876_v47 = vmul.u32.u64.low 3817748708, %v12829_v10  ;;  %v12877_v55 = vmul.u32.u64.high 3817748708, %v12829_v10, %v12876_v47  ;;  %v2982_v3 = vpop.f32.mrf.mxu1  ;;  %vm12887_vm14 = vmand %vm4007_vm3, %vm3971_vm12 }
 0x1fb   : > { %15911 = vst [vmem:[#allocation45_spill] sm:$0xff] %v15910_v36  ;;  %15912 = vst [vmem:[#allocation94_spill] sm:$0xff] %v12872_v39  ;;  %v2673_v19 = vadd.f32 %v2616_v20, %v12245_v38  ;;  %v12881_v48 = vadd.f32 %v2629_v28, %v15913_v23  ;;  %v15914_v52 = vmov 0  ;;  %v12892_v15 = vadd.s32 18, %v12823_v44  ;;  %v9978_v20 = vpop.f32.mrf.mxu0 }
 0x1fc   : > { %v15915_v52 = vsel %vm12887_vm14, 4294967295, %v15914_v52  ;;  %v12895_v7 = vadd.s32 18, %v12833_v25  ;;  %v12898_v38 = vadd.f32 %v12743_v41, %v2669_v63  ;;  %vm12908_vm15 = vmand %vm4005_vm0, %vm3969_vm2  ;;  %v15918_v28 = vmov 0  ;;  %v15920_v63 = vld [vmem:[#allocation48_spill] sm:$0xff] }
 0x1fd   : > { %v15919_v28 = vsel %vm12908_vm15, 4294967295, %v15918_v28  ;;  %v12913_v47 = vsub.s32 %v12731_v51, %v3893_v42  ;;  %v3871_v39 = vmul.u32 18, %v3870_v4  ;;  %v12917_v41 = vadd.f32 %v12768_v46, %v12766_v40  ;;  %v2632_v36 = vpop.f32.mrf.mxu0 }
 0x1fe   : > { %15916 = vst [vmem:[#allocation3_spill] sm:$0xff] %v12895_v7  ;;  %15917 = vst [vmem:[#allocation95_spill] sm:$0xff] %v12898_v38  ;;  %v2679_v38 = vadd.f32 %v9978_v20, %v15920_v63  ;;  %v12921_v23 = vmul.u32.u64.low 3817748708, %v12868_v29  ;;  %v12922_v57 = vmul.u32.u64.high 3817748708, %v12868_v29, %v12921_v23  ;;  %v12924_v33 = vadd.f32 %v2966_v34, %v2672_v53  ;;  %v10022_v34 = vpop.f32.mrf.mxu1 }
 0x1ff   : > { %v15924_v51 = vsel %vm11749_vm9, %v15922_v1, %v15923_v0  ;;  %v12935_v46 = vsub.s32 %v3538_v22, %v3871_v39  ;;  %v3925_v40 = vshrl.u32 %v12877_v55, 4  ;;  %v12939_v4 = vadd.s32 280, %v11594_v62  ;;  %v10033_v1 = vpop.f32.mrf.mxu0  ;;  %v12956_v0 = vld [vmem:[%s15568_s2] ss:$0 sm:$0xff]  ;;  %v15937_v22 = vld [vmem:[#allocation27_spill] sm:$0xff] }
 0x200   : > { %vm12931_vm0 = vcmp.lt.s32.totalorder %v15924_v51, 16  ;;  %v12941_v20 = vadd.f32 %v10018_v50, %v2675_v30  ;;  %v12943_v53 = vadd.f32 %v2969_v13, %v2673_v19  ;;  %v15931_v19 = vld [vmem:[#allocation23_spill] sm:$0xff]  ;;  %v15932_v50 = vld [vmem:[#allocation18_spill] sm:$0xff]  ;;  %vm3972_vm2 = vcmp.ne.s32.totalorder %v12913_v47, 0 }
 0x201   : > { %15927 = vst [vmem:[#allocation48_spill] sm:$0xff] %v12939_v4  ;;  %v15933_v13 = vsel %vm11848_vm1, %v15931_v19, %v15932_v50  ;;  %vm4008_vm3 = vcmp.lt.s32.totalorder %v12913_v47, 0  ;;  %v12970_v39 = vadd.s32 18, %v12913_v47  ;;  %v3926_v23 = vmul.u32 18, %v3925_v40  ;;  %v12980_v19 = vld [vmem:[%s15569_s3] ss:$0 sm:$0xff]  ;;  %v3207_v50 = vpop.f32.mrf.mxu0 }
 0x202   : > { %15928 = vst [vmem:[#allocation19_spill] sm:$0xff] %v12941_v20  ;;  %15929 = vst [vmem:[#allocation17_spill] sm:$0xff] %v12943_v53  ;;  %vm12963_vm9 = vcmp.lt.s32.totalorder %v15933_v13, 16  ;;  %v3352_v63 = vadd.f32 %v10033_v1, %v12332_v2  ;;  %vm3970_vm12 = vcmp.ne.s32.totalorder %v12935_v46, 0  ;;  %v3903_v51 = vshrl.u32 %v12922_v57, 4  ;;  %v15938_v40 = vld [vmem:[#allocation20_spill] sm:$0xff]  ;;  %v2985_v53 = vpop.f32.mrf.mxu1 }
 0x203   : > { %v2677_v30 = vadd.f32 %v2632_v36, %v12302_v56  ;;  %v15939_v60 = vsel %vm11875_vm7, %v15937_v22, %v15938_v40  ;;  %v12992_v1 = vsub.s32 %v12829_v10, %v3926_v23  ;;  %v12998_v36 = vadd.f32 %v10021_v14, %v2678_v8  ;;  %vm13006_vm7 = vmand %vm4008_vm3, %vm3972_vm2  ;;  %v10034_v22 = vpop.f32.mrf.mxu0  ;;  %v15948_v8 = vld [vmem:[#allocation29_spill] sm:$0xff]  ;;  %v15949_v14 = vld [vmem:[#allocation24_spill] sm:$0xff] }
 0x204   : > { %vm12987_vm1 = vcmp.lt.s32.totalorder %v15939_v60, 16  ;;  %v12995_v56 = vmul.u32.u64.low 3817748708, %v12939_v4  ;;  %v12996_v57 = vmul.u32.u64.high 3817748708, %v12939_v4, %v12995_v56  ;;  %v3395_v20 = vmul.f32 %v12956_v0, %v3352_v63 }
 0x205   : > { %15942 = vst [vmem:[#allocation16_spill] sm:$0xff] %v12992_v1  ;;  %15944 = vst [vmem:[#allocation23_spill] sm:$0xff] %v12998_v36  ;;  %v3350_v13 = vadd.f32 %v3207_v50, %v12353_v45  ;;  %v13011_v10 = vadd.s32 18, %v12935_v46  ;;  %v15950_v40 = vsel %vm11898_vm10, %v15948_v8, %v15949_v14  ;;  %vm15953_vm2 = vcmp.lt.s32.totalorder %v12935_v46, 0 }
 0x206   : > { %15943 = vst [vmem:[#allocation30_spill] sm:$0xff] %v12996_v57  ;;  %vm13018_vm15 = vcmp.lt.s32.totalorder %v15950_v40, 16  ;;  %vm13026_vm3 = vmand %vm15953_vm2, %vm3970_vm12  ;;  %vm3975_vm14 = vcmp.ne.s32.totalorder %v12992_v1, 0  ;;  %vm4011_vm5 = vcmp.lt.s32.totalorder %v12992_v1, 0  ;;  %v13033_v50 = vadd.s32 18, %v12992_v1 }
 0x207   : > { %v3904_v56 = vmul.u32 18, %v3903_v51  ;;  %v3438_v23 = vadd.f32 %v12980_v19, %v3395_v20  ;;  %v3393_v8 = vmul.f32 %v12956_v0, %v3350_v13  ;;  %v3353_v14 = vadd.f32 %v10034_v22, %v12361_v27  ;;  %vm13038_vm10 = vmand %vm4011_vm5, %vm3975_vm14  ;;  %v3210_v20 = vpop.f32.mrf.mxu0  ;;  %v15969_v27 = vld [vmem:[#allocation43_spill] sm:$0xff] }
 0x208   : > { %v13043_v4 = vadd.s32 264, %v11594_v62  ;;  %v13046_v36 = vadd.f32 %v2982_v3, %v12881_v48  ;;  %v13048_v25 = vadd.f32 %v10022_v34, %v2679_v38  ;;  %v13050_v7 = vadd.f32 %v2985_v53, %v2677_v30  ;;  %v15963_v38 = vld [vmem:[#allocation34_spill] sm:$0xff]  ;;  %v15964_v53 = vld [vmem:[#allocation25_spill] sm:$0xff] }
 0x209   : > { %vm4714_vm12 = vsmask.f32 7942  ;;  %v3474_v51 = vmax.f32 %v3438_v23, 0.0  ;;  %v3436_v13 = vadd.f32 %v12980_v19, %v3393_v8  ;;  %v3396_v62 = vmul.f32 %v12956_v0, %v3353_v14  ;;  %v10037_v48 = vpop.f32.mrf.mxu0  ;;  %v15970_v23 = vld [vmem:[#allocation35_spill] sm:$0xff] }
 0x20a   : > { %15958 = vst [vmem:[#allocation18_spill] sm:$0xff] %v13043_v4  ;;  %15959 = vst [vmem:[#allocation32_spill] sm:$0xff] %v13046_v36  ;;  %v3351_v22 = vadd.f32 %v3210_v20, %v12369_v5  ;;  %v15965_v34 = vsel %vm11918_vm11, %v15963_v38, %v15964_v53  ;;  %v13086_v20 = vsub.s32 %v12868_v29, %v3904_v56  ;;  %vm4315_vm11 = vsmask.f32 5392 }
 0x20b   : > { %15960 = vst [vmem:[#allocation27_spill] sm:$0xff] %v13048_v25  ;;  %15961 = vst [vmem:[#allocation20_spill] sm:$0xff] %v13050_v7  ;;  %vm13064_vm5 = vcmp.lt.s32.totalorder %v15965_v34, 16  ;;  %v15971_v25 = vsel %vm12002_vm6, %v15969_v27, %v15970_v23  ;;  %v3472_v27 = vmax.f32 %v3436_v13, 0.0  ;;  %v3439_v3 = vadd.f32 %v12980_v19, %v3396_v62  ;;  %v3223_v23 = vpop.f32.mrf.mxu0 }
 0x20c   : > { %vm13073_vm14 = vcmp.lt.s32.totalorder %v15971_v25, 16  ;;  %v4159_v25 = vsel %vm12931_vm0, %v3474_v51, 0.0  ;;  %v3394_v38 = vmul.f32 %v12956_v0, %v3351_v22  ;;  %v3356_v34 = vadd.f32 %v10037_v48, %v12413_v12 }
 0x20d   : > { %v9241_v53 = vpack.c.bf16 %v4159_v25, %v4159_v25  ;;  %v13095_v14 = vmul.u32.u64.low 3817748708, %v13043_v4  ;;  %v13096_v5 = vmul.u32.u64.high 3817748708, %v13043_v4, %v13095_v14  ;;  %v4157_v29 = vsel %vm12963_vm9, %v3472_v27, 0.0  ;;  %v10038_v12 = vpop.f32.mrf.mxu0 }
 0x20e   : > { %v3475_v42 = vmax.f32 %v3439_v3, 0.0  ;;  %v3437_v56 = vadd.f32 %v12980_v19, %v3394_v38  ;;  %v3354_v51 = vadd.f32 %v3223_v23, %v12417_v43  ;;  %v9239_v22 = vpack.c.bf16 %v4157_v29, %v4157_v29 }
 0x20f   : > { %15974 = vst [vmem:[#allocation33_spill] sm:$0xff] %v13096_v5  ;;  %v4337_v13 = vshrl.u32 %v9241_v53, 16  ;;  %v4340_v62 = vshll.u32 %v9241_v53, 16  ;;  %v3399_v25 = vmul.f32 %v12956_v0, %v3356_v34  ;;  %v3357_v55 = vadd.f32 %v10038_v12, %v12477_v37  ;;  %v3226_v5 = vpop.f32.mrf.mxu0  ;;  %v15990_v37 = vld [vmem:[#allocation55_spill] sm:$0xff] }
 0x210   : > { %v4160_v48 = vsel %vm12987_vm1, %v3475_v42, 0.0  ;;  %v3473_v7 = vmax.f32 %v3437_v56, 0.0  ;;  %v3397_v14 = vmul.f32 %v12956_v0, %v3354_v51  ;;  %v4318_v4 = vshrl.u32 %v9239_v22, 16 }
 0x211   : > { %v4339_v27 = vrot.slane %v4337_v13, 6  ;;  %v4342_v3 = vrot.slane %v4340_v62, 7  ;;  %v4321_v38 = vshll.u32 %v9239_v22, 16  ;;  %v9242_v43 = vpack.c.bf16 %v4160_v48, %v4160_v48  ;;  %v10041_v51 = vpop.f32.mrf.mxu0  ;;  %v4716_v13 = vld [vmem:[#allocation2 + $0x8] sm:$0xe] }
 0x212   : > { %v4158_v53 = vsel %vm13018_vm15, %v3473_v7, 0.0  ;;  %v3442_v34 = vadd.f32 %v12980_v19, %v3399_v25  ;;  %v3440_v23 = vadd.f32 %v12980_v19, %v3397_v14  ;;  %v4320_v29 = vrot.slane %v4318_v4, 6  ;;  %v15979_v4 = vld [vmem:[#allocation44_spill] sm:$0xff] }
 0x213   : > { %v4343_v2 = vor.u32 %v4342_v3, %v4339_v27  ;;  %v4323_v42 = vrot.slane %v4321_v38, 7  ;;  %v9240_v56 = vpack.c.bf16 %v4158_v53, %v4158_v53  ;;  %vm15975_vm6 = vcmask 519169   ;;  %v15980_v3 = vld [vmem:[#allocation40_spill] sm:$0xff]  ;;  %v3239_v36 = vpop.f32.mrf.mxu0 }
 0x214   : > { %vm13114_vm0 = vmand %vm15975_vm6, %vm4714_vm12  ;;  %v4347_v62 = vshrl.u32 %v9242_v43, 16  ;;  %v4350_v22 = vshll.u32 %v9242_v43, 16  ;;  %v3478_v63 = vmax.f32 %v3442_v34, 0.0  ;;  %v3476_v7 = vmax.f32 %v3440_v23, 0.0 }
 0x215   : > { %v4345_v12 = vrot.slane %v4343_v2, 4  ;;  %v4324_v25 = vor.u32 %v4323_v42, %v4320_v29  ;;  %v4327_v48 = vshrl.u32 %v9240_v56, 16  ;;  %v4330_v14 = vshll.u32 %v9240_v56, 16 }
 0x216   : > { %v15981_v38 = vsel %vm12018_vm8, %v15979_v4, %v15980_v3  ;;  %v4349_v57 = vrot.slane %v4347_v62, 6  ;;  %v4352_v1 = vrot.slane %v4350_v22, 7  ;;  %v4163_v43 = vsel %vm13064_vm5, %v3478_v63, 0.0  ;;  %v10042_v62 = vpop.f32.mrf.mxu0  ;;  %v15999_v3 = vld [vmem:[#allocation6_spill] sm:$0xff] }
 0x217   : > { %vm13123_vm15 = vcmp.lt.s32.totalorder %v15981_v38, 16  ;;  %v4161_v34 = vsel %vm13073_vm14, %v3476_v7, 0.0  ;;  %vm15984_vm9 = vsmask.f32 1280  ;;  %v4325_v29 = vrot.slane %v4324_v25, 4 }
 0x218   : > { %vm13133_vm1 = vmor %vm15984_vm9, %vm4315_vm11  ;;  %v4717_v42 = vsel %vm13114_vm0, %v4324_v25, %v4716_v13  ;;  %v4329_v56 = vrot.slane %v4327_v48, 6  ;;  %v4332_v27 = vrot.slane %v4330_v14, 7  ;;  %v15987_v30 = vsel %vm12123_vm4, %v12068_v9, %v11986_v11  ;;  %v15992_v13 = vld [vmem:[#allocation52_spill] sm:$0xff]  ;;  %v15993_v25 = vld [vmem:[#allocation49_spill] sm:$0xff] }
 0x219   : > { %vm13144_vm8 = vcmp.lt.s32.totalorder %v15987_v30, 16  ;;  %4718 = vst [vmem:[#allocation2 + $0x8] sm:$0xe] %v4717_v42  ;;  %v4353_v22 = vor.u32 %v4352_v1, %v4349_v57  ;;  %v9245_v63 = vpack.c.bf16 %v4163_v43, %v4163_v43  ;;  %v9243_v7 = vpack.c.bf16 %v4161_v34, %v4161_v34  ;;  %v15997_v57 = vld [vmem:[#allocation7_spill] sm:$0xff]  ;;  %v3242_v34 = vpop.f32.mrf.mxu0 }
 0x21a   : > { %v3400_v4 = vmul.f32 %v12956_v0, %v3357_v55  ;;  %vm15991_vm2 = vnez %v15990_v37  ;;  %v4333_v11 = vor.u32 %v4332_v27, %v4329_v56  ;;  %v3355_v9 = vadd.f32 %v3226_v5, %v12509_v26  ;;  %v16000_v55 = vld [vmem:[#allocation51_spill] sm:$0xff] }
 0x21b   : > { %v15994_v48 = vsel %vm15991_vm2, %v15992_v13, %v15993_v25  ;;  %v3360_v14 = vadd.f32 %v10041_v51, %v12526_v24  ;;  %v3358_v1 = vadd.f32 %v3239_v36, %v12530_v59  ;;  %vm15998_vm4 = vnez %v15997_v57  ;;  %v13175_v51 = vpop.f32.mrf.mxu0 }
 0x21c   : > { %vm13154_vm12 = vcmp.lt.s32.totalorder %v15994_v48, 16  ;;  %v16001_v38 = vsel %vm15998_vm4, %v15999_v3, %v16000_v55  ;;  %v4354_v42 = vsel %vm13133_vm1, %v4345_v12, %v4353_v22  ;;  %v4355_v56 = vrot.slane %v4353_v22, 4  ;;  %v16007_v3 = vld [vmem:[#allocation57_spill] sm:$0xff]  ;;  %v16010_v55 = vld [vmem:[#allocation4_spill] sm:$0xff] }
 0x21d   : > { %vm13166_vm5 = vcmp.lt.s32.totalorder %v16001_v38, 16  ;;  %v4377_v27 = vshrl.u32 %v9245_v63, 16  ;;  %v4380_v26 = vshll.u32 %v9245_v63, 16  ;;  %vm16004_vm14 = vcmask 519168   ;;  %v13183_v48 = vpop.f32.mrf.mxu0 }
 0x21e   : > { %4721 = vst.msk [vmem:[#allocation2 + $0x14] sm:$0xf] %vm16004_vm14, %v4354_v42  ;;  %v4334_v24 = vsel %vm13133_vm1, %v4325_v29, %v4333_v11  ;;  %v4335_v59 = vrot.slane %v4333_v11, 4  ;;  %v4357_v36 = vshrl.u32 %v9243_v7, 16  ;;  %v4360_v5 = vshll.u32 %v9243_v7, 16  ;;  %vm16005_vm11 = vmmov %vm16004_vm14 }
 0x21f   : > { %4719 = vst.msk [vmem:[#allocation2 + $0xc] sm:$0xf] %vm16005_vm11, %v4334_v24  ;;  %v4379_v30 = vrot.slane %v4377_v27, 6  ;;  %v4382_v37 = vrot.slane %v4380_v26, 7  ;;  %v3443_v13 = vadd.f32 %v12980_v19, %v3400_v4  ;;  %v3398_v12 = vmul.f32 %v12956_v0, %v3355_v9  ;;  %vm16006_vm6 = vmmov %vm16005_vm11  ;;  %v16009_v9 = vld [vmem:[#allocation54_spill] sm:$0xff] }
 0x220   : > { %v4344_v22 = vsel %vm13133_vm1, %v4335_v59, %v4343_v2  ;;  %v4359_v63 = vrot.slane %v4357_v36, 6  ;;  %v4362_v25 = vrot.slane %v4360_v5, 7  ;;  %v3403_v29 = vmul.f32 %v12956_v0, %v3360_v14  ;;  %v10609_v14 = vld [vmem:[%s15570_s4 + $0x78] sm:$0xff]   ;;  %vm16031_vm11 = vmmov %vm16006_vm6 }
 0x221   : > { %4720 = vst.msk [vmem:[#allocation2 + $0x10] sm:$0xf] %vm16006_vm6, %v4344_v22  ;;  %v13186_v7 = vor.u32 %v4382_v37, %v4379_v30  ;;  %v3479_v11 = vmax.f32 %v3443_v13, 0.0  ;;  %v3441_v57 = vadd.f32 %v12980_v19, %v3398_v12  ;;  %v3401_v4 = vmul.f32 %v12956_v0, %v3358_v1  ;;  %v16014_v5 = vld [vmem:[#allocation8_spill] sm:$0xff]  ;;  %v16017_v37 = vld [vmem:[#allocation5_spill] sm:$0xff]  ;;  %10199 = vmatprep.subr.bf16.mxu0 %v10609_v14 }
 0x222   : > { %vm16008_vm0 = vnez %v16007_v3  ;;  %v13202_v42 = vor.u32 %v4362_v25, %v4359_v63  ;;  %v3446_v27 = vadd.f32 %v12980_v19, %v3403_v29  ;;  %v3361_v26 = vadd.f32 %v10042_v62, %v12555_v18  ;;  %v16016_v30 = vld [vmem:[#allocation56_spill] sm:$0xff] }
 0x223   : > { %v16011_v2 = vsel %vm16008_vm0, %v16009_v9, %v16010_v55  ;;  %v3359_v1 = vadd.f32 %v3242_v34, %v12558_v21  ;;  %v4164_v24 = vsel %vm13123_vm15, %v3479_v11, 0.0  ;;  %v3477_v59 = vmax.f32 %v3441_v57, 0.0  ;;  %v13226_v34 = vpop.f32.mrf.mxu0  ;;  %v10611_v63 = vld [vmem:[%s15570_s4 + $0x70] sm:$0xff]   ;;  %vm16021_vm15 = vmmov %vm16006_vm6 }
 0x224   : > { %vm13195_vm9 = vcmp.lt.s32.totalorder %v16011_v2, 16  ;;  %v3444_v36 = vadd.f32 %v12980_v19, %v3401_v4  ;;  %vm16015_vm2 = vnez %v16014_v5  ;;  %v13220_v22 = vadd.s32 18, %v13086_v20 }
 0x225   : > { %v16018_v13 = vsel %vm16015_vm2, %v16016_v30, %v16017_v37  ;;  %v4385_v18 = vrot.slane %v13186_v7, 4  ;;  %v4364_v21 = vsel %vm13133_vm1, %v4355_v56, %v13202_v42  ;;  %v9246_v53 = vpack.c.bf16 %v4164_v24, %v4164_v24  ;;  %v13244_v5 = vpop.f32.mrf.mxu0 }
 0x226   : > { %vm13215_vm4 = vcmp.lt.s32.totalorder %v16018_v13, 16  ;;  %v3482_v62 = vmax.f32 %v3446_v27, 0.0  ;;  %4722 = vst.msk [vmem:[#allocation2 + $0x18] sm:$0xf] %vm16021_vm15, %v4364_v21  ;;  %v4162_v25 = vsel %vm13144_vm8, %v3477_v59, 0.0  ;;  %v3480_v29 = vmax.f32 %v3444_v36, 0.0 }
 0x227   : > { %v3404_v11 = vmul.f32 %v12956_v0, %v3361_v26  ;;  %v3402_v57 = vmul.f32 %v12956_v0, %v3359_v1  ;;  %v4387_v4 = vshrl.u32 %v9246_v53, 16  ;;  %v4390_v56 = vshll.u32 %v9246_v53, 16  ;;  %v13238_v55 = vld [vmem:[#allocation2 + $0x8] sm:$0xff]  }
 0x228   : > { %v9244_v3 = vpack.c.bf16 %v4162_v25, %v4162_v25  ;;  %v4167_v9 = vsel %vm13154_vm12, %v3482_v62, 0.0  ;;  %v4165_v27 = vsel %vm13166_vm5, %v3480_v29, 0.0  ;;  %vm16022_vm8 = vcmask 523264   ;;  %v13248_v21 = vld [vmem:[#allocation2 + $0x10] sm:$0xff]   ;;  %v10614_v29 = vld [vmem:[%s15570_s4 + $0x68] sm:$0xff]  }
 0x229   : > { %v9249_v2 = vpack.c.bf16 %v4167_v9, %v4167_v9  ;;  %v3447_v8 = vadd.f32 %v12980_v19, %v3404_v11  ;;  %v3445_v24 = vadd.f32 %v12980_v19, %v3402_v57  ;;  %v4389_v59 = vrot.slane %v4387_v4, 6  ;;  %10120 = vmatmul.mubr.msk.bf16.vlgmr.msra.gmra.mxu0 %vm16022_vm8, %v13238_v55  ;;  %v16025_v9 = vld [vmem:[#allocation58_spill] sm:$0xff]  ;;  %vm16030_vm14 = vmmov %vm16022_vm8 }
 0x22a   : > { %v4392_v26 = vrot.slane %v4390_v56, 7  ;;  %v4367_v36 = vshrl.u32 %v9244_v3, 16  ;;  %v4370_v1 = vshll.u32 %v9244_v3, 16  ;;  %v9247_v37 = vpack.c.bf16 %v4165_v27, %v4165_v27  ;;  %10200 = vmatpush3.bf16.msra.mxu0 %v10609_v14  ;;  %v16023_v3 = vld [vmem:[#allocation60_spill] sm:$0xff]  ;;  %10123 = vmatprep.mubr.msk.bf16.mxu0 %vm16030_vm14, %v13248_v21 }
 0x22b   : > { %v4417_v49 = vshrl.u32 %v9249_v2, 16  ;;  %v4420_v30 = vshll.u32 %v9249_v2, 16  ;;  %v3483_v13 = vmax.f32 %v3447_v8, 0.0  ;;  %v3481_v25 = vmax.f32 %v3445_v24, 0.0  ;;  %10201 = vmatprep.subr.bf16.mxu0 %v10611_v63  ;;  %v16026_v2 = vld [vmem:[#allocation53_spill] sm:$0xff] }
 0x22c   : > { %v4393_v43 = vor.u32 %v4392_v26, %v4389_v59  ;;  %v4369_v53 = vrot.slane %v4367_v36, 6  ;;  %v4372_v62 = vrot.slane %v4370_v1, 7  ;;  %v4397_v4 = vshrl.u32 %v9247_v37, 16  ;;  %v10049_v36 = vpop.f32.mrf.mxu0 }
 0x22d   : > { %v4419_v11 = vrot.slane %v4417_v49, 6  ;;  %v4422_v57 = vrot.slane %v4420_v30, 7  ;;  %v4400_v56 = vshll.u32 %v9247_v37, 16  ;;  %vm16024_vm12 = vnez %v16023_v3  ;;  %v16032_v3 = vld [vmem:[#allocation11_spill] sm:$0xff] }
 0x22e   : > { %v16027_v27 = vsel %vm16024_vm12, %v16025_v9, %v16026_v2  ;;  %v4365_v8 = vrot.slane %v13202_v42, 4  ;;  %v4394_v24 = vsel %vm13133_vm1, %v4385_v18, %v4393_v43  ;;  %v4373_v59 = vor.u32 %v4372_v62, %v4369_v53  ;;  %v16034_v9 = vld [vmem:[#allocation63_spill] sm:$0xff]  ;;  %v16035_v2 = vld [vmem:[#allocation61_spill] sm:$0xff]  ;;  %10202 = vmatpush3.bf16.msra.mxu0 %v10611_v63 }
 0x22f   : > { %vm13258_vm5 = vcmp.lt.s32.totalorder %v16027_v27, 16  ;;  %v4168_v26 = vsel %vm13195_vm9, %v3483_v13, 0.0  ;;  %4725 = vst.msk [vmem:[#allocation2 + $0x24] sm:$0xf] %vm16031_vm11, %v4394_v24  ;;  %v13270_v1 = vor.u32 %v4422_v57, %v4419_v11  ;;  %v4399_v49 = vrot.slane %v4397_v4, 6  ;;  %10203 = vmatprep.subr.bf16.mxu0 %v10614_v29  ;;  %v10617_v62 = vld [vmem:[%s15570_s4 + $0x60] sm:$0xff]   ;;  %vm16039_vm9 = vmmov %vm16031_vm11 }
 0x230   : > { %v4402_v30 = vrot.slane %v4400_v56, 7  ;;  %v9250_v37 = vpack.c.bf16 %v4168_v26, %v4168_v26  ;;  %vm16033_vm6 = vnez %v16032_v3  ;;  %v4374_v38 = vsel %vm13133_vm1, %v4365_v8, %v4373_v59  ;;  %vm16040_vm2 = vmmov %vm16039_vm9  ;;  %v16041_v26 = vld [vmem:[#allocation12_spill] sm:$0xff]  ;;  %v16051_v3 = vld [vmem:[#allocation62_spill] sm:$0xff] }
 0x231   : > { %v16036_v42 = vsel %vm16033_vm6, %v16034_v9, %v16035_v2  ;;  %v4375_v18 = vrot.slane %v4373_v59, 4  ;;  %v4166_v13 = vsel %vm13215_vm4, %v3481_v25, 0.0  ;;  %v3364_v53 = vadd.f32 %v13175_v51, %v12592_v16  ;;  %4723 = vst.msk [vmem:[#allocation2 + $0x1c] sm:$0xf] %vm16039_vm9, %v4374_v38  ;;  %v3271_v51 = vpop.f32.mrf.mxu0  ;;  %v16057_v38 = vld [vmem:[#allocation13_spill] sm:$0xff]  ;;  %vm16062_vm6 = vmmov %vm16040_vm2 }
 0x232   : > { %vm13277_vm0 = vcmp.lt.s32.totalorder %v16036_v42, 16  ;;  %v4395_v11 = vrot.slane %v4393_v43, 4  ;;  %v4403_v57 = vor.u32 %v4402_v30, %v4399_v49  ;;  %v4427_v63 = vshrl.u32 %v9250_v37, 16  ;;  %v16043_v49 = vld [vmem:[#allocation64_spill] sm:$0xff]  ;;  %v16055_v42 = vld [vmem:[#allocation67_spill] sm:$0xff]  ;;  %10204 = vmatpush3.bf16.msra.mxu0 %v10614_v29  ;;  %vm16063_vm9 = vmmov %vm16040_vm2 }
 0x233   : > { %v4430_v4 = vshll.u32 %v9250_v37, 16  ;;  %v4384_v56 = vsel %vm13133_vm1, %v4375_v18, %v13186_v7  ;;  %v9248_v12 = vpack.c.bf16 %v4166_v13, %v4166_v13  ;;  %v3407_v25 = vmul.f32 %v12956_v0, %v3364_v53  ;;  %v16044_v7 = vld [vmem:[#allocation9_spill] sm:$0xff]  ;;  %v16058_v18 = vld [vmem:[#allocation10_spill] sm:$0xff]  ;;  %10205 = vmatprep.subr.bf16.mxu0 %v10617_v62 }
 0x234   : > { %v3362_v16 = vadd.f32 %v13183_v48, %v12632_v17  ;;  %4724 = vst.msk [vmem:[#allocation2 + $0x20] sm:$0xf] %vm16040_vm2, %v4384_v56  ;;  %v4425_v43 = vrot.slane %v13270_v1, 4  ;;  %v4404_v8 = vsel %vm13133_vm1, %v4395_v11, %v4403_v57  ;;  %v4429_v24 = vrot.slane %v4427_v63, 6  ;;  %v16048_v17 = vld [vmem:[#allocation66_spill] sm:$0xff]  ;;  %v16050_v48 = vld [vmem:[#allocation65_spill] sm:$0xff] }
 0x235   : > { %v4432_v59 = vrot.slane %v4430_v4, 7  ;;  %vm16042_vm4 = vnez %v16041_v26  ;;  %vm16049_vm8 = vnez %v16048_v17  ;;  %vm16056_vm14 = vnez %v16055_v42  ;;  %4726 = vst.msk [vmem:[#allocation2 + $0x28] sm:$0xf] %vm16062_vm6, %v4404_v8  ;;  %v16076_v37 = vld [vmem:[#allocation74_spill] sm:$0xff]  ;;  %v16079_v2 = vld [vmem:[#allocation69_spill] sm:$0xff] }
 0x236   : > { %v16045_v30 = vsel %vm16042_vm4, %v16043_v49, %v16044_v7  ;;  %v16052_v9 = vsel %vm16049_vm8, %v16050_v48, %v16051_v3  ;;  %v16059_v13 = vsel %vm16056_vm14, %v16057_v38, %v16058_v18  ;;  %v4407_v11 = vshrl.u32 %v9248_v12, 16  ;;  %v10050_v48 = vpop.f32.mrf.mxu0  ;;  %10206 = vmatpush3.bf16.msra.mxu0 %v10617_v62  ;;  %v16064_v3 = vld [vmem:[#allocation85_spill] sm:$0xff]  ;;  %v16065_v18 = vld [vmem:[#allocation71_spill] sm:$0xff]  ;;  %vm16073_vm8 = vmmov %vm16062_vm6 }
 0x237   : > { %vm13306_vm15 = vcmp.lt.s32.totalorder %v16045_v30, 16  ;;  %vm13315_vm12 = vcmp.lt.s32.totalorder %v16052_v9, 16  ;;  %vm13324_vm11 = vcmp.lt.s32.totalorder %v16059_v13, 16  ;;  %v4410_v63 = vshll.u32 %v9248_v12, 16  ;;  %v16067_v13 = vld [vmem:[#allocation15_spill] sm:$0xff]  ;;  %vm16075_vm14 = vmmov %vm16062_vm6 }
 0x238   : > { %v3450_v4 = vadd.f32 %v12980_v19, %v3407_v25  ;;  %v3405_v56 = vmul.f32 %v12956_v0, %v3362_v16  ;;  %v13331_v26 = vor.u32 %v4432_v59, %v4429_v24  ;;  %v3365_v49 = vadd.f32 %v13226_v34, %v12644_v61 }
 0x239   : > { %v3363_v7 = vadd.f32 %v13244_v5, %v12647_v31  ;;  %v3368_v30 = vadd.f32 %v10049_v36, %v12660_v32  ;;  %v4409_v29 = vrot.slane %v4407_v11, 6  ;;  %v4412_v17 = vrot.slane %v4410_v63, 7  ;;  %v13348_v36 = vld [vmem:[#allocation2 + $0x18] sm:$0xff]  }
 0x23a   : > { %v3486_v8 = vmax.f32 %v3450_v4, 0.0  ;;  %v3448_v12 = vadd.f32 %v12980_v19, %v3405_v56  ;;  %v4405_v25 = vrot.slane %v4403_v57, 4  ;;  %v4434_v16 = vsel %vm13133_vm1, %v4425_v43, %v13331_v26  ;;  %v16068_v11 = vld [vmem:[#allocation68_spill] sm:$0xff]  ;;  %v13367_v56 = vpop.f32.mrf.mxu0 }
 0x23b   : > { %v3408_v24 = vmul.f32 %v12956_v0, %v3365_v49  ;;  %v3406_v61 = vmul.f32 %v12956_v0, %v3363_v7  ;;  %4729 = vst.msk [vmem:[#allocation2 + $0x34] sm:$0xf] %vm16063_vm9, %v4434_v16  ;;  %v4413_v31 = vor.u32 %v4412_v17, %v4409_v29  ;;  %v3411_v5 = vmul.f32 %v12956_v0, %v3368_v30 }
 0x23c   : > { %v4171_v32 = vsel %vm13258_vm5, %v3486_v8, 0.0  ;;  %v3484_v34 = vmax.f32 %v3448_v12, 0.0  ;;  %v3366_v9 = vadd.f32 %v3271_v51, %v16064_v3  ;;  %vm16066_vm5 = vnez %v16065_v18  ;;  %v13371_v51 = vld [vmem:[#allocation2 + $0x20] sm:$0xff]  }
 0x23d   : > { %v9253_v57 = vpack.c.bf16 %v4171_v32, %v4171_v32  ;;  %v3451_v59 = vadd.f32 %v12980_v19, %v3408_v24  ;;  %v3449_v43 = vadd.f32 %v12980_v19, %v3406_v61  ;;  %v4414_v62 = vsel %vm13133_vm1, %v4405_v25, %v4413_v31 }
 0x23e   : > { %v4415_v42 = vrot.slane %v4413_v31, 4  ;;  %v4169_v14 = vsel %vm13277_vm0, %v3484_v34, 0.0  ;;  %v3454_v38 = vadd.f32 %v12980_v19, %v3411_v5  ;;  %v16069_v63 = vsel %vm16066_vm5, %v16067_v13, %v16068_v11  ;;  %4727 = vst.msk [vmem:[#allocation2 + $0x2c] sm:$0xf] %vm16073_vm8, %v4414_v62  ;;  %v10053_v5 = vpop.f32.mrf.mxu0 }
 0x23f   : > { %vm13363_vm2 = vcmp.lt.s32.totalorder %v16069_v63, 16  ;;  %vm16072_vm4 = vcmask 523264   ;;  %v4457_v27 = vshrl.u32 %v9253_v57, 16  ;;  %v4460_v49 = vshll.u32 %v9253_v57, 16 }
 0x240   : > { %10124 = vmatmul.mubr.msk.bf16.gmra.mxu0 %vm16072_vm4, %v13348_v36  ;;  %v9251_v7 = vpack.c.bf16 %v4169_v14, %v4169_v14  ;;  %v3487_v30 = vmax.f32 %v3451_v59, 0.0  ;;  %v4424_v29 = vsel %vm13133_vm1, %v4415_v42, %v13270_v1  ;;  %v3485_v17 = vmax.f32 %v3449_v43, 0.0  ;;  %vm16074_vm0 = vmmov %vm16072_vm4 }
 0x241   : > { %v3490_v8 = vmax.f32 %v3454_v38, 0.0  ;;  %v3409_v12 = vmul.f32 %v12956_v0, %v3366_v9  ;;  %10127 = vmatprep.mubr.msk.bf16.mxu0 %vm16074_vm0, %v13371_v51  ;;  %4728 = vst.msk [vmem:[#allocation2 + $0x30] sm:$0xf] %vm16075_vm14, %v4424_v29  ;;  %v4459_v25 = vrot.slane %v4457_v27, 6  ;;  %v4462_v16 = vrot.slane %v4460_v49, 7  ;;  %v16078_v38 = vld [vmem:[#allocation72_spill] sm:$0xff]  ;;  %vm16084_vm9 = vmmov %vm16074_vm0 }
 0x242   : > { %v4437_v24 = vshrl.u32 %v9251_v7, 16  ;;  %v4440_v61 = vshll.u32 %v9251_v7, 16  ;;  %v4172_v31 = vsel %vm13306_vm15, %v3487_v30, 0.0  ;;  %v4170_v32 = vsel %vm13315_vm12, %v3485_v17, 0.0  ;;  %v16083_v27 = vld [vmem:[#allocation28_spill] sm:$0xff]  ;;  %v3287_v17 = vpop.f32.mrf.mxu0  ;;  %vm16098_vm8 = vmmov %vm16074_vm0 }
 0x243   : > { %v4175_v1 = vsel %vm13324_vm11, %v3490_v8, 0.0  ;;  %v3452_v34 = vadd.f32 %v12980_v19, %v3409_v12  ;;  %v4463_v57 = vor.u32 %v4462_v16, %v4459_v25  ;;  %v9254_v3 = vpack.c.bf16 %v4172_v31, %v4172_v31  ;;  %vm16099_vm0 = vmmov %vm16062_vm6 }
 0x244   : > { %v4439_v59 = vrot.slane %v4437_v24, 6  ;;  %v4442_v43 = vrot.slane %v4440_v61, 7  ;;  %v4435_v9 = vrot.slane %v13331_v26, 4  ;;  %v9252_v62 = vpack.c.bf16 %v4170_v32, %v4170_v32  ;;  %vm16102_vm14 = vmmov %vm16099_vm0 }
 0x245   : > { %v9257_v42 = vpack.c.bf16 %v4175_v1, %v4175_v1  ;;  %v3488_v14 = vmax.f32 %v3452_v34, 0.0  ;;  %vm16077_vm15 = vnez %v16076_v37  ;;  %v4467_v11 = vshrl.u32 %v9254_v3, 16  ;;  %v13401_v24 = vld [vmem:[#allocation2 + $0x28] sm:$0xff]  }
 0x246   : > { %v16080_v18 = vsel %vm16077_vm15, %v16078_v38, %v16079_v2  ;;  %v4443_v13 = vor.u32 %v4442_v43, %v4439_v59  ;;  %v4470_v63 = vshll.u32 %v9254_v3, 16  ;;  %v3369_v49 = vadd.f32 %v10050_v48, %v16083_v27  ;;  %v16085_v38 = vld [vmem:[#allocation77_spill] sm:$0xff]  ;;  %v16087_v2 = vld [vmem:[#allocation75_spill] sm:$0xff]  ;;  %v16094_v27 = vld [vmem:[#allocation76_spill] sm:$0xff] }
 0x247   : > { %vm13394_vm12 = vcmp.lt.s32.totalorder %v16080_v18, 16  ;;  %v4447_v7 = vshrl.u32 %v9252_v62, 16  ;;  %v4450_v30 = vshll.u32 %v9252_v62, 16  ;;  %v4497_v26 = vshrl.u32 %v9257_v42, 16  ;;  %v16088_v18 = vld [vmem:[#allocation70_spill] sm:$0xff] }
 0x248   : > { %v4500_v29 = vshll.u32 %v9257_v42, 16  ;;  %v4465_v8 = vrot.slane %v4463_v57, 4  ;;  %v4444_v12 = vsel %vm13133_vm1, %v4435_v9, %v4443_v13  ;;  %v4469_v25 = vrot.slane %v4467_v11, 6  ;;  %10128 = vmatmul.mubr.msk.bf16.gmra.mxu0 %vm16084_vm9, %v13401_v24  ;;  %v13410_v3 = vld [vmem:[#allocation2 + $0x30] sm:$0xff]   ;;  %v16105_v11 = vld [vmem:[#allocation21_spill] sm:$0xff] }
 0x249   : > { %v4472_v16 = vrot.slane %v4470_v63, 7  ;;  %vm4903_vm11 = vsmask.f32 7424  ;;  %4730 = vst.msk [vmem:[#allocation2 + $0x38] sm:$0xf] %vm16062_vm6, %v4444_v12  ;;  %v4449_v61 = vrot.slane %v4447_v7, 6  ;;  %v3412_v59 = vmul.f32 %v12956_v0, %v3369_v49  ;;  %v10054_v7 = vpop.f32.mrf.mxu0  ;;  %10131 = vmatprep.mubr.msk.bf16.mxu0 %vm16098_vm8, %v13410_v3 }
 0x24a   : > { %v4452_v31 = vrot.slane %v4450_v30, 7  ;;  %v4499_v32 = vrot.slane %v4497_v26, 6  ;;  %v4502_v48 = vrot.slane %v4500_v29, 7  ;;  %v4173_v34 = vsel %vm13363_vm2, %v3488_v14, 0.0  ;;  %v16093_v63 = vld [vmem:[#allocation80_spill] sm:$0xff] }
 0x24b   : > { %v4473_v1 = vor.u32 %v4472_v16, %v4469_v25  ;;  %v4920_v43 = vshll.u32 %v13248_v21, 16  ;;  %v4445_v9 = vrot.slane %v4443_v13, 4  ;;  %v9255_v37 = vpack.c.bf16 %v4173_v34, %v4173_v34  ;;  %v10679_v14 = vld [vmem:[%s15570_s4 + $0x58] sm:$0xff]  }
 0x24c   : > { %v4453_v62 = vor.u32 %v4452_v31, %v4449_v61  ;;  %v13412_v42 = vor.u32 %v4502_v48, %v4499_v32  ;;  %vm16086_vm5 = vnez %v16085_v38  ;;  %v16095_v49 = vsel %vm12605_vm13, %v16093_v63, %v16094_v27  ;;  %vm16100_vm13 = vmmov %vm16099_vm0  ;;  %v16101_v48 = vld [vmem:[#allocation31_spill] sm:$0xff]  ;;  %v16106_v63 = vld [vmem:[#allocation78_spill] sm:$0xff] }
 0x24d   : > { %v16089_v4 = vsel %vm16086_vm5, %v16087_v2, %v16088_v18  ;;  %vm13428_vm4 = vcmp.lt.s32.totalorder %v16095_v49, 16  ;;  %v4474_v30 = vsel %vm13133_vm1, %v4465_v8, %v4473_v1  ;;  %v4475_v26 = vrot.slane %v4473_v1, 4  ;;  %v16110_v49 = vld [vmem:[#allocation83_spill] sm:$0xff] }
 0x24e   : > { %vm13419_vm2 = vcmp.lt.s32.totalorder %v16089_v4, 16  ;;  %v3455_v29 = vadd.f32 %v12980_v19, %v3412_v59  ;;  %v13435_v12 = vrot.slane %v4920_v43, 1  ;;  %4733 = vst.msk [vmem:[#allocation2 + $0x44] sm:$0xf] %vm16099_vm0, %v4474_v30  ;;  %v4454_v25 = vsel %vm13133_vm1, %v4445_v9, %v4453_v62  ;;  %v16103_v4 = vld [vmem:[#allocation81_spill] sm:$0xff]  ;;  %v16112_v30 = vld [vmem:[#allocation22_spill] sm:$0xff] }
 0x24f   : > { %v4455_v16 = vrot.slane %v4453_v62, 4  ;;  %v4505_v61 = vrot.slane %v13412_v42, 4  ;;  %v4477_v31 = vshrl.u32 %v9255_v37, 16  ;;  %4731 = vst.msk [vmem:[#allocation2 + $0x3c] sm:$0xf] %vm16100_vm13, %v4454_v25  ;;  %v4480_v8 = vshll.u32 %v9255_v37, 16  ;;  %v3290_v62 = vpop.f32.mrf.mxu0 }
 0x250   : > { %v3491_v32 = vmax.f32 %v3455_v29, 0.0  ;;  %v3367_v1 = vadd.f32 %v13367_v56, %v16101_v48  ;;  %v3372_v34 = vadd.f32 %v10053_v5, %v12787_v58  ;;  %v4912_v38 = vshll.u32 %v13238_v55, 16  ;;  %v16113_v29 = vld [vmem:[#allocation79_spill] sm:$0xff] }
 0x251   : > { %v4464_v59 = vsel %vm13133_vm1, %v4455_v16, %v4463_v57  ;;  %v4479_v43 = vrot.slane %v4477_v31, 6  ;;  %v4916_v9 = vshrl.u32 %v13238_v55, 16  ;;  %v4482_v2 = vrot.slane %v4480_v8, 7 }
 0x252   : > { %4732 = vst.msk [vmem:[#allocation2 + $0x40] sm:$0xf] %vm16102_vm14, %v4464_v59  ;;  %v4176_v37 = vsel %vm13394_vm12, %v3491_v32, 0.0  ;;  %v3410_v18 = vmul.f32 %v12956_v0, %v3367_v1  ;;  %v3415_v56 = vmul.f32 %v12956_v0, %v3372_v34  ;;  %v4914_v5 = vrot.slane %v4912_v38, 1  ;;  %v16117_v32 = vld [vmem:[#allocation86_spill] sm:$0xff]  ;;  %v16124_v38 = vld [vmem:[#allocation73_spill] sm:$0xff] }
 0x253   : > { %v9258_v58 = vpack.c.bf16 %v4176_v37, %v4176_v37  ;;  %v3370_v57 = vadd.f32 %v3287_v17, %v12791_v54  ;;  %vm16104_vm15 = vnez %v16103_v4  ;;  %v3373_v53 = vadd.f32 %v10054_v7, %v12797_v6  ;;  %v16119_v6 = vld [vmem:[#allocation41_spill] sm:$0xff]  ;;  %v16120_v7 = vld [vmem:[#allocation82_spill] sm:$0xff] }
 0x254   : > { %v16107_v55 = vsel %vm16104_vm15, %v16105_v11, %v16106_v63  ;;  %vm16111_vm12 = vnez %v16110_v49  ;;  %v13476_v54 = vor.u32 %v4482_v2, %v4479_v43  ;;  %v3453_v17 = vadd.f32 %v12980_v19, %v3410_v18 }
 0x255   : > { %vm13462_vm6 = vcmp.lt.s32.totalorder %v16107_v55, 16  ;;  %v16114_v25 = vsel %vm16111_vm12, %v16112_v30, %v16113_v29  ;;  %v3458_v31 = vadd.f32 %v12980_v19, %v3415_v56  ;;  %v3371_v8 = vadd.f32 %v3290_v62, %v12808_v35  ;;  %v10599_v56 = vld [vmem:[%s15570_s4 + $0x50] sm:$0xff]  }
 0x256   : > { %vm13472_vm9 = vcmp.lt.s32.totalorder %v16114_v25, 16  ;;  %vm16118_vm5 = vnez %v16117_v32  ;;  %v4507_v34 = vshrl.u32 %v9258_v58, 16  ;;  %v4510_v59 = vshll.u32 %v9258_v58, 16  ;;  %v13504_v11 = vld [vmem:[#allocation2 + $0x38] sm:$0xff]  }
 0x257   : > { %v16121_v48 = vsel %vm16118_vm5, %v16119_v6, %v16120_v7  ;;  %v4915_v43 = vsel %vm4903_vm11, %v16124_v38, %v4914_v5  ;;  %v4918_v2 = vor.u32 %v4916_v9, %v4914_v5  ;;  %v4484_v37 = vsel %vm13133_vm1, %v4475_v26, %v13476_v54  ;;  %v10057_v26 = vpop.f32.mrf.mxu0  ;;  %v10605_v7 = vld [vmem:[%s15570_s4 + $0x48] sm:$0xff]   ;;  %vm16137_vm5 = vmmov %vm16100_vm13 }
 0x258   : > { %vm13486_vm8 = vcmp.lt.s32.totalorder %v16121_v48, 16  ;;  %v4485_v35 = vrot.slane %v13476_v54, 4  ;;  %v3489_v62 = vmax.f32 %v3453_v17, 0.0  ;;  %v3494_v18 = vmax.f32 %v3458_v31, 0.0  ;;  %4734 = vst.msk [vmem:[#allocation2 + $0x48] sm:$0xf] %vm16100_vm13, %v4484_v37 }
 0x259   : > { %vm16125_vm0 = vcmask 523264   ;;  %v4509_v58 = vrot.slane %v4507_v34, 6  ;;  %v4512_v4 = vrot.slane %v4510_v59, 7  ;;  %v3413_v9 = vmul.f32 %v12956_v0, %v3370_v57  ;;  %v13519_v31 = vld [vmem:[#allocation2 + $0x40] sm:$0xff]  }
 0x25a   : > { %10075 = vmatprep.mubr.msk.bf16.mxu1 %vm16125_vm0, %v4915_v43  ;;  %v4923_v5 = vsel %vm4903_vm11, %v4918_v2, %v13435_v12  ;;  %v4174_v63 = vsel %vm13419_vm2, %v3489_v62, 0.0  ;;  %v4179_v55 = vsel %vm13428_vm4, %v3494_v18, 0.0  ;;  %vm16126_vm14 = vmmov %vm16125_vm0  ;;  %v3416_v49 = vmul.f32 %v12956_v0, %v3373_v53  ;;  %v16127_v53 = vld [vmem:[#allocation92_spill] sm:$0xff] }
 0x25b   : > { %10076 = vmatmul.mubr.msk.bf16.vlgmr.msra.gmra.mxu1 %vm16126_vm14, %v4923_v5  ;;  %v3414_v30 = vmul.f32 %v12956_v0, %v3371_v8  ;;  %v13513_v29 = vor.u32 %v4512_v4, %v4509_v58  ;;  %v9256_v57 = vpack.c.bf16 %v4174_v63, %v4174_v63  ;;  %v9261_v25 = vpack.c.bf16 %v4179_v55, %v4179_v55  ;;  %vm16128_vm2 = vmmov %vm16125_vm0  ;;  %v16129_v43 = vld [vmem:[#allocation88_spill] sm:$0xff] }
 0x25c   : > { %v3456_v17 = vadd.f32 %v12980_v19, %v3413_v9  ;;  %10156 = vmatpush3.bf16.msra.mxu1 %v10679_v14  ;;  %v3459_v13 = vadd.f32 %v12980_v19, %v3416_v49  ;;  %v3376_v6 = vadd.f32 %v10057_v26, %v16127_v53  ;;  %v4924_v8 = vshrl.u32 %v13248_v21, 16  ;;  %10132 = vmatmul.mubr.msk.bf16.gmra.mxu0 %vm16128_vm2, %v13504_v11  ;;  %v16131_v21 = vld [vmem:[#allocation50_spill] sm:$0xff]  ;;  %v16132_v2 = vld [vmem:[#allocation84_spill] sm:$0xff]  ;;  %vm16136_vm12 = vmmov %vm16125_vm0  ;;  %v3303_v9 = vpop.f32.mrf.mxu0 }
 0x25d   : > { %v3457_v32 = vadd.f32 %v12980_v19, %v3414_v30  ;;  %10157 = vmatprep.subr.bf16.mxu1 %v10599_v56  ;;  %v4514_v48 = vsel %vm13133_vm1, %v4505_v61, %v13513_v29  ;;  %v4515_v34 = vrot.slane %v13513_v29, 4  ;;  %v4487_v59 = vshrl.u32 %v9256_v57, 16  ;;  %10135 = vmatprep.mubr.msk.bf16.mxu0 %vm16136_vm12, %v13519_v31  ;;  %v10612_v49 = vld [vmem:[%s15570_s4 + $0x40] sm:$0xff]   ;;  %vm16146_vm0 = vmmov %vm16137_vm5 }
 0x25e   : > { %v4490_v38 = vshll.u32 %v9256_v57, 16  ;;  %vm16130_vm4 = vnez %v16129_v43  ;;  %4737 = vst.msk [vmem:[#allocation2 + $0x54] sm:$0xf] %vm16137_vm5, %v4514_v48  ;;  %v4537_v18 = vshrl.u32 %v9261_v25, 16  ;;  %v4540_v61 = vshll.u32 %v9261_v25, 16  ;;  %vm16148_vm13 = vmmov %vm16146_vm0 }
 0x25f   : > { %v16133_v37 = vsel %vm16130_vm4, %v16131_v21, %v16132_v2  ;;  %v3492_v58 = vmax.f32 %v3456_v17, 0.0  ;;  %v3495_v4 = vmax.f32 %v3459_v13, 0.0  ;;  %v4489_v5 = vrot.slane %v4487_v59, 6  ;;  %v13562_v59 = vpop.f32.mrf.mxu0  ;;  %vm16156_vm4 = vmmov %vm16146_vm0 }
 0x260   : > { %vm13541_vm15 = vcmp.lt.s32.totalorder %v16133_v37, 16  ;;  %v4492_v26 = vrot.slane %v4490_v38, 7  ;;  %v3493_v63 = vmax.f32 %v3457_v32, 0.0  ;;  %v3419_v55 = vmul.f32 %v12956_v0, %v3376_v6  ;;  %10158 = vmatpush3.bf16.msra.mxu1 %v10599_v56 }
 0x261   : > { %v4539_v30 = vrot.slane %v4537_v18, 6  ;;  %v4542_v57 = vrot.slane %v4540_v61, 7  ;;  %v4177_v14 = vsel %vm13462_vm6, %v3492_v58, 0.0  ;;  %v4180_v25 = vsel %vm13472_vm9, %v3495_v4, 0.0  ;;  %10159 = vmatprep.subr.bf16.mxu1 %v10605_v7  ;;  %vm16138_vm6 = vmmov %vm16137_vm5  ;;  %v16141_v18 = vld [vmem:[#allocation89_spill] sm:$0xff]  ;;  %v16142_v61 = vld [vmem:[#allocation26_spill] sm:$0xff] }
 0x262   : > { %v4493_v17 = vor.u32 %v4492_v26, %v4489_v5  ;;  %v9259_v13 = vpack.c.bf16 %v4177_v14, %v4177_v14  ;;  %v9262_v53 = vpack.c.bf16 %v4180_v25, %v4180_v25  ;;  %v4178_v0 = vsel %vm13486_vm8, %v3493_v63, 0.0 }
 0x263   : > { %v13558_v56 = vor.u32 %v4542_v57, %v4539_v30  ;;  %v9260_v32 = vpack.c.bf16 %v4178_v0, %v4178_v0  ;;  %v3462_v6 = vadd.f32 %v12980_v19, %v3419_v55  ;;  %v4926_v48 = vor.u32 %v4924_v8, %v13435_v12  ;;  %v10621_v12 = vld [vmem:[%s15570_s4 + $0x98] sm:$0xff]   ;;  %v3306_v30 = vpop.f32.mrf.mxu0 }
 0x264   : > { %v4494_v27 = vsel %vm13133_vm1, %v4485_v35, %v4493_v17  ;;  %v4495_v16 = vrot.slane %v4493_v17, 4  ;;  %v4517_v38 = vshrl.u32 %v9259_v13, 16  ;;  %v4520_v43 = vshll.u32 %v9259_v13, 16  ;;  %10160 = vmatpush3.bf16.msra.mxu1 %v10605_v7  ;;  %v16139_v7 = vld [vmem:[#allocation36_spill] sm:$0xff] }
 0x265   : > { %4735 = vst.msk [vmem:[#allocation2 + $0x4c] sm:$0xf] %vm16138_vm6, %v4494_v27  ;;  %v4545_v1 = vrot.slane %v13558_v56, 4  ;;  %v4547_v21 = vshrl.u32 %v9262_v53, 16  ;;  %v4550_v2 = vshll.u32 %v9262_v53, 16  ;;  %v4527_v19 = vshrl.u32 %v9260_v32, 16  ;;  %10161 = vmatprep.subr.bf16.mxu1 %v10612_v49 }
 0x266   : > { %v4504_v54 = vsel %vm13133_vm1, %v4495_v16, %v13412_v42  ;;  %v4519_v35 = vrot.slane %v4517_v38, 6  ;;  %v4522_v8 = vrot.slane %v4520_v43, 7  ;;  %v4530_v37 = vshll.u32 %v9260_v32, 16  ;;  %v16147_v53 = vld [vmem:[#allocation93_spill] sm:$0xff]  ;;  %v16151_v43 = vld [vmem:[#allocation39_spill] sm:$0xff] }
 0x267   : > { %vm16140_vm9 = vnez %v16139_v7  ;;  %4736 = vst.msk [vmem:[#allocation2 + $0x50] sm:$0xf] %vm16146_vm0, %v4504_v54  ;;  %v4549_v5 = vrot.slane %v4547_v21, 6  ;;  %v4552_v26 = vrot.slane %v4550_v2, 7  ;;  %v4529_v63 = vrot.slane %v4527_v19, 6  ;;  %v16152_v21 = vld [vmem:[#allocation87_spill] sm:$0xff] }
 0x268   : > { %v16143_v58 = vsel %vm16140_vm9, %v16141_v18, %v16142_v61  ;;  %v3498_v55 = vmax.f32 %v3462_v6, 0.0  ;;  %v4523_v42 = vor.u32 %v4522_v8, %v4519_v35  ;;  %v4532_v57 = vrot.slane %v4530_v37, 7  ;;  %10162 = vmatpush3.bf16.msra.mxu1 %v10612_v49  ;;  %v13606_v49 = vld [vmem:[%s15568_s2] ss:$0 sm:$0xff]  ;;  %v16159_v7 = vld [vmem:[#allocation59_spill] sm:$0xff]  ;;  %v16160_v18 = vld [vmem:[#allocation90_spill] sm:$0xff] }
 0x269   : > { %vm13581_vm8 = vcmp.lt.s32.totalorder %v16143_v58, 16  ;;  %v4928_v14 = vshll.u32 %v13348_v36, 16  ;;  %v4932_v25 = vshrl.u32 %v13348_v36, 16  ;;  %v13588_v17 = vor.u32 %v4552_v26, %v4549_v5  ;;  %10243 = vmatprep.subr.bf16.mxu1 %v10621_v12  ;;  %v16157_v37 = vld [vmem:[#allocation45_spill] sm:$0xff]  ;;  %vm16168_vm9 = vmmov %vm16146_vm0 }
 0x26a   : > { %v4183_v13 = vsel %vm13541_vm15, %v3498_v55, 0.0  ;;  %v3374_v0 = vadd.f32 %v3303_v9, %v16147_v53  ;;  %v4936_v32 = vshll.u32 %v13371_v51, 16  ;;  %v4524_v6 = vsel %vm13133_vm1, %v4515_v34, %v4523_v42  ;;  %v16149_v34 = vld [vmem:[#allocation91_spill] sm:$0xff]  ;;  %v16170_v53 = vld [vmem:[#allocation94_spill] sm:$0xff] }
 0x26b   : > { %v4525_v27 = vrot.slane %v4523_v42, 4  ;;  %v4533_v16 = vor.u32 %v4532_v57, %v4529_v63  ;;  %v9265_v38 = vpack.c.bf16 %v4183_v13, %v4183_v13  ;;  %4738 = vst.msk [vmem:[#allocation2 + $0x58] sm:$0xf] %vm16148_vm13, %v4524_v6  ;;  %v4554_v36 = vsel %vm13133_vm1, %v4545_v1, %v13588_v17  ;;  %v10061_v1 = vpop.f32.mrf.mxu0  ;;  %v13646_v57 = vld [vmem:[%s15569_s3] ss:$0 sm:$0xff]  ;;  %v16173_v6 = vld [vmem:[#allocation95_spill] sm:$0xff] }
 0x26c   : > { %v4555_v62 = vrot.slane %v13588_v17, 4  ;;  %v4930_v9 = vrot.slane %v4928_v14, 1  ;;  %v3417_v29 = vmul.f32 %v13606_v49, %v3374_v0  ;;  %vm16150_vm14 = vnez %v16149_v34  ;;  %4741 = vst.msk [vmem:[#allocation2 + $0x64] sm:$0xf] %vm16156_vm4, %v4554_v36  ;;  %v13639_v63 = vld [vmem:[#allocation2 + $0x48] sm:$0xff]  }
 0x26d   : > { %v16153_v2 = vsel %vm16150_vm14, %v16151_v43, %v16152_v21  ;;  %v4534_v12 = vsel %vm13133_vm1, %v4525_v27, %v4533_v16  ;;  %v4535_v54 = vrot.slane %v4533_v16, 4  ;;  %v4577_v35 = vshrl.u32 %v9265_v38, 16  ;;  %vm16172_vm14 = vmmov %vm16156_vm4  ;;  %v3319_v16 = vpop.f32.mrf.mxu0 }
 0x26e   : > { %vm13614_vm2 = vcmp.lt.s32.totalorder %v16153_v2, 16  ;;  %v4580_v8 = vshll.u32 %v9265_v38, 16  ;;  %vm16158_vm15 = vnez %v16157_v37  ;;  %vm16164_vm5 = vnez %v15915_v52  ;;  %4739 = vst.msk [vmem:[#allocation2 + $0x5c] sm:$0xf] %vm16168_vm9, %v4534_v12 }
 0x26f   : > { %v16161_v61 = vsel %vm16158_vm15, %v16159_v7, %v16160_v18  ;;  %v16165_v5 = vsel %vm16164_vm5, %v12892_v15, %v12823_v44  ;;  %v4931_v55 = vsel %vm4903_vm11, %v4926_v48, %v4930_v9  ;;  %v4934_v42 = vor.u32 %v4932_v25, %v4930_v9  ;;  %v13657_v25 = vld [vmem:[#allocation2 + $0x50] sm:$0xff]   ;;  %v10062_v7 = vpop.f32.mrf.mxu0 }
 0x270   : > { %vm13626_vm12 = vcmp.lt.s32.totalorder %v16161_v61, 16  ;;  %vm13635_vm6 = vcmp.lt.s32.totalorder %v16165_v5, 16  ;;  %v3460_v52 = vadd.f32 %v13646_v57, %v3417_v29  ;;  %v4938_v14 = vrot.slane %v4936_v32, 1 }
 0x271   : > { %v4544_v44 = vsel %vm13133_vm1, %v4535_v54, %v13558_v56  ;;  %v4579_v15 = vrot.slane %v4577_v35, 6  ;;  %v4582_v13 = vrot.slane %v4580_v8, 7  ;;  %vm16169_vm0 = vcmask 523264   ;;  %v16178_v35 = vld [vmem:[#allocation42_spill] sm:$0xff] }
 0x272   : > { %10079 = vmatprep.mubr.msk.bf16.mxu1 %vm16169_vm0, %v4931_v55  ;;  %v3377_v48 = vadd.f32 %v13562_v59, %v16170_v53  ;;  %vm16171_vm13 = vmmov %vm16169_vm0  ;;  %4740 = vst.msk [vmem:[#allocation2 + $0x60] sm:$0xf] %vm16172_vm14, %v4544_v44  ;;  %v3496_v0 = vmax.f32 %v3460_v52, 0.0  ;;  %v4939_v32 = vsel %vm4903_vm11, %v4934_v42, %v4938_v14  ;;  %v3375_v27 = vadd.f32 %v3306_v30, %v16173_v6 }
 0x273   : > { %10136 = vmatmul.mubr.msk.bf16.gmra.mxu0 %vm16171_vm13, %v13639_v63  ;;  %v3380_v56 = vadd.f32 %v10061_v1, %v12917_v41  ;;  %v13663_v38 = vor.u32 %v4582_v13, %v4579_v15  ;;  %vm16174_vm4 = vmmov %vm16169_vm0  ;;  %v4940_v36 = vshrl.u32 %v13371_v51, 16  ;;  %v4944_v9 = vshll.u32 %v13401_v24, 16 }
 0x274   : > { %10080 = vmatmul.mubr.msk.bf16.gmra.mxu1 %vm16174_vm4, %v4939_v32  ;;  %v3420_v59 = vmul.f32 %v13606_v49, %v3377_v48  ;;  %vm16175_vm15 = vmmov %vm16169_vm0  ;;  %v4181_v29 = vsel %vm13581_vm8, %v3496_v0, 0.0  ;;  %v3418_v30 = vmul.f32 %v13606_v49, %v3375_v27  ;;  %v4948_v34 = vshrl.u32 %v13401_v24, 16  ;;  %v16177_v24 = vld [vmem:[#allocation3_spill] sm:$0xff] }
 0x275   : > { %10139 = vmatprep.mubr.msk.bf16.mxu0 %vm16175_vm15, %v13657_v25  ;;  %v3423_v41 = vmul.f32 %v13606_v49, %v3380_v56  ;;  %vm3973_vm5 = vcmp.ne.s32.totalorder %v13086_v20, 0  ;;  %vm4009_vm9 = vcmp.lt.s32.totalorder %v13086_v20, 0  ;;  %v4585_v51 = vrot.slane %v13663_v38, 4  ;;  %v13694_v44 = vld [vmem:[#allocation2 + $0x58] sm:$0xff]   ;;  %vm16182_vm13 = vmmov %vm16174_vm4 }
 0x276   : > { %v9263_v43 = vpack.c.bf16 %v4181_v29, %v4181_v29  ;;  %v3463_v21 = vadd.f32 %v13646_v57, %v3420_v59  ;;  %v4942_v2 = vor.u32 %v4940_v36, %v4938_v14  ;;  %v3461_v1 = vadd.f32 %v13646_v57, %v3418_v30  ;;  %vm16186_vm14 = vmmov %vm16174_vm4  ;;  %v16188_v29 = vld [vmem:[#allocation19_spill] sm:$0xff] }
 0x277   : > { %v3466_v4 = vadd.f32 %v13646_v57, %v3423_v41  ;;  %v4946_v12 = vrot.slane %v4944_v9, 1  ;;  %v3378_v54 = vadd.f32 %v3319_v16, %v12924_v33  ;;  %vm16176_vm8 = vnez %v15919_v28  ;;  %v3322_v16 = vpop.f32.mrf.mxu0  ;;  %vm13751_vm15 = vmand %vm4009_vm9, %vm3973_vm5 }
 0x278   : > { %v16179_v8 = vsel %vm16176_vm8, %v16177_v24, %v16178_v35  ;;  %v4557_v18 = vshrl.u32 %v9263_v43, 16  ;;  %v4560_v61 = vshll.u32 %v9263_v43, 16  ;;  %v3499_v5 = vmax.f32 %v3463_v21, 0.0 }
 0x279   : > { %vm13688_vm0 = vcmp.lt.s32.totalorder %v16179_v8, 16  ;;  %v4952_v55 = vshll.u32 %v13410_v3, 16  ;;  %v3497_v42 = vmax.f32 %v3461_v1, 0.0  ;;  %v3502_v52 = vmax.f32 %v3466_v4, 0.0  ;;  %v13700_v48 = vld [vmem:[#allocation2 + $0x60] sm:$0xff]  }
 0x27a   : > { %v4947_v14 = vsel %vm4903_vm11, %v4942_v2, %v4946_v12  ;;  %v4950_v33 = vor.u32 %v4948_v34, %v4946_v12  ;;  %v4559_v28 = vrot.slane %v4557_v18, 6  ;;  %v4562_v15 = vrot.slane %v4560_v61, 7  ;;  %v16196_v61 = vld [vmem:[#allocation17_spill] sm:$0xff] }
 0x27b   : > { %v4184_v13 = vsel %vm13614_vm2, %v3499_v5, 0.0  ;;  %10083 = vmatprep.mubr.msk.bf16.mxu1 %vm16182_vm13, %v4947_v14  ;;  %v3421_v53 = vmul.f32 %v13606_v49, %v3378_v54  ;;  %v4182_v32 = vsel %vm13626_vm12, %v3497_v42, 0.0  ;;  %v4187_v6 = vsel %vm13635_vm6, %v3502_v52, 0.0  ;;  %10140 = vmatmul.mubr.msk.bf16.gmra.mxu0 %vm16186_vm14, %v13694_v44  ;;  %vm16187_vm12 = vmmov %vm16174_vm4  ;;  %v10065_v54 = vpop.f32.mrf.mxu0  ;;  %v16211_v52 = vld [vmem:[#allocation48_spill] sm:$0xff] }
 0x27c   : > { %v9266_v0 = vpack.c.bf16 %v4184_v13, %v4184_v13  ;;  %v13706_v27 = vrot.slane %v4952_v55, 1  ;;  %v16183_v19 = vsel %vm13006_vm7, %v12970_v39, %v12913_v47  ;;  %v4563_v58 = vor.u32 %v4562_v15, %v4559_v28  ;;  %10143 = vmatprep.mubr.msk.bf16.mxu0 %vm16187_vm12, %v13700_v48  ;;  %v13725_v47 = vld [vmem:[%s15570_s4 + $0xb8] sm:$0xff]   ;;  %vm16189_vm7 = vmmov %vm16174_vm4  ;;  %v16201_v15 = vld [vmem:[#allocation23_spill] sm:$0xff] }
 0x27d   : > { %vm13713_vm2 = vcmp.lt.s32.totalorder %v16183_v19, 16  ;;  %v9264_v59 = vpack.c.bf16 %v4182_v32, %v4182_v32  ;;  %v9269_v36 = vpack.c.bf16 %v4187_v6, %v4187_v6  ;;  %v3464_v26 = vadd.f32 %v13646_v57, %v3421_v53  ;;  %10287 = vmatprep.subr.bf16.mxu0 %v13725_v47  ;;  %v16197_v55 = vld [vmem:[#allocation16_spill] sm:$0xff] }
 0x27e   : > { %v4587_v39 = vshrl.u32 %v9266_v0, 16  ;;  %v4590_v60 = vshll.u32 %v9266_v0, 16  ;;  %v4955_v9 = vsel %vm4903_vm11, %v4950_v33, %v13706_v27  ;;  %v3381_v30 = vadd.f32 %v10062_v7, %v16188_v29  ;;  %v16202_v0 = vld [vmem:[#allocation30_spill] sm:$0xff] }
 0x27f   : > { %v4564_v41 = vsel %vm13133_vm1, %v4555_v62, %v4563_v58  ;;  %v4565_v34 = vrot.slane %v4563_v58, 4  ;;  %v4567_v43 = vshrl.u32 %v9264_v59, 16  ;;  %v4570_v21 = vshll.u32 %v9264_v59, 16  ;;  %10084 = vmatmul.mubr.msk.bf16.gmra.mxu1 %vm16189_vm7, %v4955_v9 }
 0x280   : > { %vm16190_vm6 = vcmask 519168   ;;  %v4589_v2 = vrot.slane %v4587_v39, 6  ;;  %v4592_v1 = vrot.slane %v4590_v60, 7  ;;  %v4617_v4 = vshrl.u32 %v9269_v36, 16 }
 0x281   : > { %4742 = vst.msk [vmem:[#allocation2 + $0x68] sm:$0xf] %vm16190_vm6, %v4564_v41  ;;  %v4620_v12 = vshll.u32 %v9269_v36, 16  ;;  %v16191_v17 = vsel %vm13026_vm3, %v13011_v10, %v12935_v46  ;;  %v4569_v24 = vrot.slane %v4567_v43, 6  ;;  %v4572_v35 = vrot.slane %v4570_v21, 7  ;;  %vm16205_vm5 = vmmov %vm16190_vm6 }
 0x282   : > { %vm13742_vm4 = vcmp.lt.s32.totalorder %v16191_v17, 16  ;;  %v3500_v8 = vmax.f32 %v3464_v26, 0.0  ;;  %v3424_v7 = vmul.f32 %v13606_v49, %v3381_v30  ;;  %v4593_v45 = vor.u32 %v4592_v1, %v4589_v2  ;;  %vm16206_vm9 = vmmov %vm16205_vm5 }
 0x283   : > { %v4619_v46 = vrot.slane %v4617_v4, 6  ;;  %v4622_v10 = vrot.slane %v4620_v12, 7  ;;  %v3379_v5 = vadd.f32 %v3322_v16, %v16196_v61  ;;  %v16198_v42 = vsel %vm13038_vm10, %v13033_v50, %v16197_v55  ;;  %vm16204_vm10 = vmmov %vm16190_vm6 }
 0x284   : > { %vm13761_vm3 = vcmp.lt.s32.totalorder %v16198_v42, 16  ;;  %v4573_v14 = vor.u32 %v4572_v35, %v4569_v24  ;;  %v4185_v33 = vsel %vm13688_vm0, %v3500_v8, 0.0  ;;  %v3467_v28 = vadd.f32 %v13646_v57, %v3424_v7  ;;  %v16207_v24 = vld [vmem:[#allocation32_spill] sm:$0xff]  ;;  %vm16208_vm8 = vmmov %vm16205_vm5 }
 0x285   : > { %v3384_v13 = vadd.f32 %v10065_v54, %v16201_v15  ;;  %v4594_v40 = vsel %vm13133_vm1, %v4585_v51, %v4593_v45  ;;  %v9267_v53 = vpack.c.bf16 %v4185_v33, %v4185_v33  ;;  %v4117_v50 = vsel %vm13751_vm15, %v13220_v22, %v13086_v20  ;;  %vm16209_vm0 = vmmov %vm16189_vm7 }
 0x286   : > { %v16203_v32 = vshrl.u32 %v16202_v0, 4  ;;  %4745 = vst.msk [vmem:[#allocation2 + $0x74] sm:$0xf] %vm16204_vm10, %v4594_v40  ;;  %v4574_v37 = vsel %vm13133_vm1, %v4565_v34, %v4573_v14  ;;  %v4575_v19 = vrot.slane %v4573_v14, 4  ;;  %v3503_v16 = vmax.f32 %v3467_v28, 0.0  ;;  %v3335_v34 = vpop.f32.mrf.mxu0  ;;  %vm16212_vm13 = vmmov %vm16209_vm0 }
 0x287   : > { %v3422_v58 = vmul.f32 %v13606_v49, %v3379_v5  ;;  %4743 = vst.msk [vmem:[#allocation2 + $0x6c] sm:$0xf] %vm16205_vm5, %v4574_v37  ;;  %v13784_v51 = vor.u32 %v4622_v10, %v4619_v46  ;;  %v4597_v59 = vshrl.u32 %v9267_v53, 16  ;;  %v4600_v36 = vshll.u32 %v9267_v53, 16  ;;  %vm16215_vm14 = vmmov %vm16205_vm5 }
 0x288   : > { %v3937_v6 = vmul.u32 18, %v16203_v32  ;;  %v3427_v20 = vmul.f32 %v13606_v49, %v3384_v13  ;;  %v4584_v22 = vsel %vm13133_vm1, %v4575_v19, %v13663_v38  ;;  %v4188_v26 = vsel %vm13713_vm2, %v3503_v16, 0.0  ;;  %v16210_v13 = vld [vmem:[#allocation27_spill] sm:$0xff]  ;;  %vm16216_vm12 = vmmov %vm16209_vm0  ;;  %v4754_v16 = vld [vmem:[#allocation2 + $0x98] sm:$0x3] }
 0x289   : > { %v3465_v39 = vadd.f32 %v13646_v57, %v3422_v58  ;;  %v4956_v60 = vshrl.u32 %v13410_v3, 16  ;;  %4744 = vst.msk [vmem:[#allocation2 + $0x70] sm:$0xf] %vm16206_vm9, %v4584_v22  ;;  %v4599_v9 = vrot.slane %v4597_v59, 6  ;;  %v4602_v29 = vrot.slane %v4600_v36, 7 }
 0x28a   : > { %v9270_v30 = vpack.c.bf16 %v4188_v26, %v4188_v26  ;;  %v3470_v41 = vadd.f32 %v13646_v57, %v3427_v20  ;;  %v4595_v43 = vrot.slane %v4593_v45, 4  ;;  %v4960_v38 = vshll.u32 %v13504_v11, 16  ;;  %v10066_v45 = vpop.f32.mrf.mxu0 }
 0x28b   : > { %v3501_v21 = vmax.f32 %v3465_v39, 0.0  ;;  %v4958_v2 = vor.u32 %v4956_v60, %v13706_v27  ;;  %v4603_v56 = vor.u32 %v4602_v29, %v4599_v9  ;;  %v4964_v54 = vshrl.u32 %v13504_v11, 16 }
 0x28c   : > { %v4627_v1 = vshrl.u32 %v9270_v30, 16  ;;  %v4630_v4 = vshll.u32 %v9270_v30, 16  ;;  %v3506_v12 = vmax.f32 %v3470_v41, 0.0  ;;  %v4962_v17 = vrot.slane %v4960_v38, 1  ;;  %v3338_v20 = vpop.f32.mrf.mxu0 }
 0x28d   : > { %v4186_v3 = vsel %vm13742_vm4, %v3501_v21, 0.0  ;;  %v3382_v35 = vadd.f32 %v3335_v34, %v16207_v24  ;;  %v4625_v8 = vrot.slane %v13784_v51, 4  ;;  %v4604_v7 = vsel %vm13133_vm1, %v4595_v43, %v4603_v56  ;;  %vm16217_vm4 = vmmov %vm16209_vm0  ;;  %v16218_v34 = vld [vmem:[#allocation20_spill] sm:$0xff] }
 0x28e   : > { %v4629_v27 = vrot.slane %v4627_v1, 6  ;;  %v4632_v18 = vrot.slane %v4630_v4, 7  ;;  %4746 = vst.msk [vmem:[#allocation2 + $0x78] sm:$0xf] %vm16208_vm8, %v4604_v7  ;;  %v9268_v46 = vpack.c.bf16 %v4186_v3, %v4186_v3  ;;  %v4191_v62 = vsel %vm13761_vm3, %v3506_v12, 0.0  ;;  %v13809_v5 = vld [vmem:[#allocation2 + $0x68] sm:$0xff]   ;;  %vm16220_vm3 = vmmov %vm16205_vm5 }
 0x28f   : > { %v4963_v10 = vsel %vm4903_vm11, %v4958_v2, %v4962_v17  ;;  %v4966_v61 = vor.u32 %v4964_v54, %v4962_v17  ;;  %v9273_v42 = vpack.c.bf16 %v4191_v62, %v4191_v62  ;;  %v3425_v14 = vmul.f32 %v13606_v49, %v3382_v35  ;;  %10144 = vmatmul.mubr.msk.bf16.gmra.mxu0 %vm16212_vm13, %v13809_v5  ;;  %vm16221_vm5 = vmmov %vm16220_vm3  ;;  %v16222_v62 = vld [vmem:[#allocation18_spill] sm:$0xff] }
 0x290   : > { %v13811_v55 = vor.u32 %v4632_v18, %v4629_v27  ;;  %10087 = vmatprep.mubr.msk.bf16.mxu1 %vm16209_vm0, %v4963_v10  ;;  %v4968_v33 = vshll.u32 %v13519_v31, 16  ;;  %v4607_v28 = vshrl.u32 %v9268_v46, 16  ;;  %v4610_v15 = vshll.u32 %v9268_v46, 16  ;;  %v13820_v0 = vld [vmem:[#allocation2 + $0x70] sm:$0xff]   ;;  %vm16223_vm13 = vmmov %vm16220_vm3 }
 0x291   : > { %v3385_v40 = vadd.f32 %v10066_v45, %v16210_v13  ;;  %v3938_v53 = vsub.s32 %v16211_v52, %v3937_v6  ;;  %v4605_v32 = vrot.slane %v4603_v56, 4  ;;  %v4657_v19 = vshrl.u32 %v9273_v42, 16  ;;  %10147 = vmatprep.mubr.msk.bf16.mxu0 %vm16216_vm12, %v13820_v0  ;;  %v16219_v56 = vld [vmem:[#allocation33_spill] sm:$0xff]  ;;  %vm16225_vm12 = vmmov %vm16217_vm4 }
 0x292   : > { %v4634_v37 = vsel %vm13133_vm1, %v4625_v8, %v13811_v55  ;;  %vm13825_vm2 = vcmp.lt.s32.totalorder %v4117_v50, 16  ;;  %v4609_v58 = vrot.slane %v4607_v28, 6  ;;  %v4612_v59 = vrot.slane %v4610_v15, 7 }
 0x293   : > { %4749 = vst.msk [vmem:[#allocation2 + $0x84] sm:$0xf] %vm16215_vm14, %v4634_v37  ;;  %v3468_v6 = vadd.f32 %v13646_v57, %v3425_v14  ;;  %v4970_v36 = vrot.slane %v4968_v33, 1  ;;  %v4635_v22 = vrot.slane %v13811_v55, 4  ;;  %v4660_v26 = vshll.u32 %v9273_v42, 16  ;;  %vm16224_vm14 = vmmov %vm16217_vm4 }
 0x294   : > { %v3428_v39 = vmul.f32 %v13606_v49, %v3385_v40  ;;  %vm3976_vm7 = vcmp.ne.s32.totalorder %v3938_v53, 0  ;;  %v4613_v50 = vor.u32 %v4612_v59, %v4609_v58  ;;  %vm4012_vm6 = vcmp.lt.s32.totalorder %v3938_v53, 0 }
 0x295   : > { %v3504_v60 = vmax.f32 %v3468_v6, 0.0  ;;  %v4971_v9 = vsel %vm4903_vm11, %v4966_v61, %v4970_v36  ;;  %v4659_v29 = vrot.slane %v4657_v19, 6  ;;  %vm4048_vm15 = vmand %vm4012_vm6, %vm3976_vm7  ;;  %v4084_v41 = vadd.s32 18, %v3938_v53 }
 0x296   : > { %10088 = vmatmul.mubr.msk.bf16.gmra.mxu1 %vm16217_vm4, %v4971_v9  ;;  %v3471_v30 = vadd.f32 %v13646_v57, %v3428_v39  ;;  %v3383_v43 = vadd.f32 %v3338_v20, %v16218_v34  ;;  %v4614_v21 = vsel %vm13133_vm1, %v4605_v32, %v4613_v50  ;;  %v4615_v2 = vrot.slane %v4613_v50, 4  ;;  %vm16226_vm7 = vmmov %vm16217_vm4 }
 0x297   : > { %v4189_v38 = vsel %vm13825_vm2, %v3504_v60, 0.0  ;;  %v3914_v1 = vshrl.u32 %v16219_v56, 4  ;;  %4747 = vst.msk [vmem:[#allocation2 + $0x7c] sm:$0xf] %vm16220_vm3, %v4614_v21  ;;  %v4662_v4 = vrot.slane %v4660_v26, 7  ;;  %v4120_v17 = vsel %vm4048_vm15, %v4084_v41, %v3938_v53  ;;  %vm16227_vm6 = vmmov %vm16220_vm3 }
 0x298   : > { %v9271_v12 = vpack.c.bf16 %v4189_v38, %v4189_v38  ;;  %v3507_v3 = vmax.f32 %v3471_v30, 0.0  ;;  %v4624_v54 = vsel %vm13133_vm1, %v4615_v2, %v13784_v51  ;;  %vm4156_vm10 = vcmp.lt.s32.totalorder %v4120_v17, 16  ;;  %v16228_v38 = vld [vmem:[#allocation14_spill] sm:$0xff]  ;;  %vm16230_vm3 = vmmov %vm16217_vm4 }
 0x299   : > { %v3426_v24 = vmul.f32 %v13606_v49, %v3383_v43  ;;  %v3915_v35 = vmul.u32 18, %v3914_v1  ;;  %4748 = vst.msk [vmem:[#allocation2 + $0x80] sm:$0xf] %vm16221_vm5, %v4624_v54  ;;  %v4972_v18 = vshrl.u32 %v13519_v31, 16  ;;  %v4976_v61 = vshll.u32 %v13639_v63, 16 }
 0x29a   : > { %v4637_v8 = vshrl.u32 %v9271_v12, 16  ;;  %v4640_v7 = vshll.u32 %v9271_v12, 16  ;;  %v4192_v27 = vsel %vm4156_vm10, %v3507_v3, 0.0  ;;  %v13854_v55 = vor.u32 %v4662_v4, %v4659_v29  ;;  %vm16231_vm10 = vmmov %vm16221_vm5 }
 0x29b   : > { %v9274_v45 = vpack.c.bf16 %v4192_v27, %v4192_v27  ;;  %v3469_v46 = vadd.f32 %v13646_v57, %v3426_v24  ;;  %v3916_v10 = vsub.s32 %v16222_v62, %v3915_v35  ;;  %v4974_v49 = vor.u32 %v4972_v18, %v4970_v36  ;;  %vm16232_vm5 = vmmov %vm16230_vm3 }
 0x29c   : > { %v4639_v51 = vrot.slane %v4637_v8, 6  ;;  %v4642_v42 = vrot.slane %v4640_v7, 7  ;;  %v4978_v40 = vrot.slane %v4976_v61, 1  ;;  %v4980_v53 = vshrl.u32 %v13639_v63, 16 }
 0x29d   : > { %v4667_v14 = vshrl.u32 %v9274_v45, 16  ;;  %v4670_v33 = vshll.u32 %v9274_v45, 16  ;;  %v3505_v28 = vmax.f32 %v3469_v46, 0.0  ;;  %vm3974_vm9 = vcmp.ne.s32.totalorder %v3916_v10, 0  ;;  %v13892_v45 = vld [vmem:[#allocation2 + $0xc] sm:$0xf] }
 0x29e   : > { %v13856_v15 = vor.u32 %v4642_v42, %v4639_v51  ;;  %vm4010_vm8 = vcmp.lt.s32.totalorder %v3916_v10, 0  ;;  %v4082_v13 = vadd.s32 18, %v3916_v10  ;;  %v4984_v32 = vshll.u32 %v13657_v25, 16  ;;  %v13865_v6 = vld [vmem:[#allocation2 + $0x78] sm:$0xff]   ;;  %v5544_v46 = vld [vmem:[#allocation2] sm:$0xe] }
 0x29f   : > { %v4669_v52 = vrot.slane %v4667_v14, 6  ;;  %v4672_v57 = vrot.slane %v4670_v33, 7  ;;  %vm4046_vm0 = vmand %vm4010_vm8, %vm3974_vm9  ;;  %v4665_v37 = vrot.slane %v13854_v55, 4  ;;  %v4979_v59 = vsel %vm4903_vm11, %v4974_v49, %v4978_v40  ;;  %10148 = vmatmul.mubr.msk.bf16.gmra.mxu0 %vm16225_vm12, %v13865_v6  ;;  %v5885_v14 = vld [vmem:[#allocation2 + $0x8] sm:$0xe]  ;;  %v13898_v33 = vld [vmem:[#allocation2 + $0x10] sm:$0xff]  }
 0x2a0   : > { %v4644_v19 = vsel %vm13133_vm1, %v4635_v22, %v13856_v15  ;;  %v4118_v58 = vsel %vm4046_vm0, %v4082_v13, %v3916_v10  ;;  %v4982_v20 = vor.u32 %v4980_v53, %v4978_v40  ;;  %10091 = vmatprep.mubr.msk.bf16.mxu1 %vm16224_vm14, %v4979_v59  ;;  %v4986_v26 = vrot.slane %v4984_v32, 1  ;;  %v13869_v39 = vld [vmem:[#allocation2 + $0x80] sm:$0xff]   ;;  %vm16233_vm9 = vmmov %vm16230_vm3 }
 0x2a1   : > { %4750 = vst.msk [vmem:[#allocation2 + $0x88] sm:$0xf] %vm16223_vm13, %v4644_v19  ;;  %v4673_v36 = vor.u32 %v4672_v57, %v4669_v52  ;;  %vm4154_vm2 = vcmp.lt.s32.totalorder %v4118_v58, 16  ;;  %v4988_v60 = vshrl.u32 %v13657_v25, 16  ;;  %v4992_v22 = vshll.u32 %v13694_v44, 16  ;;  %10151 = vmatprep.mubr.msk.bf16.mxu0 %vm16226_vm7, %v13869_v39  ;;  %vm16234_vm8 = vmmov %vm16227_vm6 }
 0x2a2   : > { %v4190_v50 = vsel %vm4154_vm2, %v3505_v28, 0.0  ;;  %v5000_v9 = vshll.u32 %v13700_v48, 16  ;;  %v4987_v34 = vsel %vm4903_vm11, %v4982_v20, %v4986_v26  ;;  %v4996_v21 = vshrl.u32 %v13694_v44, 16  ;;  %v13917_v20 = vld [vmem:[#allocation2 + $0x20] sm:$0xff]   ;;  %vm16235_vm0 = vmmov %vm16230_vm3 }
 0x2a3   : > { %v4674_v29 = vsel %vm13133_vm1, %v4665_v37, %v4673_v36  ;;  %v4675_v30 = vrot.slane %v4673_v36, 4  ;;  %v9272_v41 = vpack.c.bf16 %v4190_v50, %v4190_v50  ;;  %10092 = vmatmul.mubr.msk.bf16.gmra.mxu1 %vm16217_vm4, %v4987_v34  ;;  %v4990_v25 = vor.u32 %v4988_v60, %v4986_v26  ;;  %v10682_v37 = vld [vmem:[#allocation2 + $0x4] sm:$0xf]  ;;  %v13923_v50 = vld [vmem:[#allocation2 + $0x30] sm:$0xff]   ;;  %v10684_v34 = vld [vmem:[#allocation2 + $0x8] sm:$0xff]  }
 0x2a4   : > { %4753 = vst.msk [vmem:[#allocation2 + $0x94] sm:$0xf] %vm16227_vm6, %v4674_v29  ;;  %v4994_v43 = vrot.slane %v4992_v22, 1  ;;  %v5002_v2 = vrot.slane %v5000_v9, 1  ;;  %vm16229_vm15 = vnez %v16228_v38  ;;  %v5008_v12 = vshll.u32 %v13809_v5, 16  ;;  %v10683_v60 = vld [vmem:[#allocation2 + $0x10] sm:$0xff]   ;;  %vm16236_vm13 = vmmov %vm16235_vm0 }
 0x2a5   : > { %v4755_v56 = vsel %vm16229_vm15, %v4675_v30, %v4754_v16  ;;  %v4647_v1 = vshrl.u32 %v9272_v41, 16  ;;  %v4650_v4 = vshll.u32 %v9272_v41, 16  ;;  %v5004_v54 = vshrl.u32 %v13700_v48, 16  ;;  %v13913_v16 = vld [vmem:[#allocation2 + $0x18] sm:$0xff]   ;;  %vm16237_vm2 = vmmov %vm16235_vm0 }
 0x2a6   : > { %4756 = vst [vmem:[#allocation2 + $0x98] sm:$0x3] %v4755_v56  ;;  %v4995_v3 = vsel %vm4903_vm11, %v4990_v25, %v4994_v43  ;;  %v4998_v17 = vor.u32 %v4996_v21, %v4994_v43  ;;  %v5010_v8 = vrot.slane %v5008_v12, 1  ;;  %v5016_v27 = vshll.u32 %v13820_v0, 16  ;;  %v13925_v29 = vld [vmem:[#allocation2 + $0x38] sm:$0xff]   ;;  %vm16238_vm14 = vmmov %vm16235_vm0 }
 0x2a7   : > { %v4649_v24 = vrot.slane %v4647_v1, 6  ;;  %v4652_v35 = vrot.slane %v4650_v4, 7  ;;  %10095 = vmatprep.mubr.msk.bf16.mxu1 %vm16230_vm3, %v4995_v3  ;;  %v5006_v7 = vor.u32 %v5004_v54, %v5002_v2  ;;  %v5024_v18 = vshll.u32 %v13865_v6, 16  ;;  %v13933_v1 = vld [vmem:[#allocation2 + $0x40] sm:$0xff]   ;;  %v10685_v3 = vld [vmem:[#allocation2 + $0x18] sm:$0xff]   ;;  %vm16239_vm12 = vmmov %vm16235_vm0 }
 0x2a8   : > { %v4645_v62 = vrot.slane %v13856_v15, 4  ;;  %v5003_v61 = vsel %vm4903_vm11, %v4998_v17, %v5002_v2  ;;  %v5032_v49 = vshll.u32 %v13869_v39, 16  ;;  %v5012_v40 = vshrl.u32 %v13809_v5, 16  ;;  %vm16240_vm7 = vmmov %vm16235_vm0 }
 0x2a9   : > { %v4653_v10 = vor.u32 %v4652_v35, %v4649_v24  ;;  %v5011_v51 = vsel %vm4903_vm11, %v5006_v7, %v5010_v8  ;;  %v5026_v42 = vrot.slane %v5024_v18, 1  ;;  %v13904_v52 = vcombine.low %v5885_v14, %v13892_v45  ;;  %vm16241_vm6 = vmmov %vm16235_vm0 }
 0x2aa   : > { %v5018_v15 = vrot.slane %v5016_v27, 1  ;;  %v5028_v57 = vshrl.u32 %v13865_v6, 16  ;;  %v5014_v32 = vor.u32 %v5012_v40, %v5010_v8  ;;  %v9038_v19 = vcombine.low %v5544_v46, %v10682_v37  ;;  %v10686_v8 = vld [vmem:[#allocation2 + $0x20] sm:$0xff]   ;;  %v10687_v27 = vld [vmem:[#allocation2 + $0x28] sm:$0xff]   ;;  %v10688_v40 = vld [vmem:[#allocation2 + $0x30] sm:$0xff]  }
 0x2ab   : > { %v4654_v28 = vsel %vm13133_vm1, %v4645_v62, %v4653_v10  ;;  %v4655_v13 = vrot.slane %v4653_v10, 4  ;;  %10096 = vmatmul.mubr.msk.bf16.gmra.mxu1 %vm16232_vm5, %v5003_v61  ;;  %v5020_v58 = vshrl.u32 %v13820_v0, 16  ;;  %v5034_v36 = vrot.slane %v5032_v49, 1  ;;  %v13942_v62 = vld [vmem:[#allocation2 + $0x48] sm:$0xff]   ;;  %v13955_v49 = vld [vmem:[#allocation2 + $0x50] sm:$0xff]   ;;  %vm16242_vm4 = vmmov %vm16235_vm0 }
 0x2ac   : > { %4751 = vst.msk [vmem:[#allocation2 + $0x8c] sm:$0xf] %vm16231_vm10, %v4654_v28  ;;  %10099 = vmatprep.mubr.msk.bf16.mxu1 %vm16233_vm9, %v5011_v51  ;;  %v5030_v59 = vor.u32 %v5028_v57, %v5026_v42  ;;  %v6023_v26 = vrot.slane %v13904_v52, 1  ;;  %v6024_v23 = vrot.slane %v13898_v33, 1  ;;  %v5560_v22 = vrot.slane %v10683_v60, 1  ;;  %vm16243_vm3 = vmmov %vm16235_vm0 }
 0x2ad   : > { %v4664_v53 = vsel %vm13133_vm1, %v4655_v13, %v13854_v55  ;;  %v13921_v55 = vld [vmem:[#allocation2 + $0x28] sm:$0xff]   ;;  %v5022_v9 = vor.u32 %v5020_v58, %v5018_v15  ;;  %vm5556_vm1 = vcmask 1046528   ;;  %v5019_v30 = vsel %vm4903_vm11, %v5014_v32, %v5018_v15  ;;  %v13972_v58 = vld [vmem:[#allocation2 + $0x58] sm:$0xff]   ;;  %vm16244_vm10 = vmmov %vm16235_vm0 }
 0x2ae   : > { %4752 = vst.msk [vmem:[#allocation2 + $0x90] sm:$0xf] %vm16234_vm8, %v4664_v53  ;;  %v5557_v41 = vrot.slane %v9038_v19, 1  ;;  %v5558_v25 = vrot.slane %v10684_v34, 1  ;;  %v6026_v43 = vrot.slane %v13913_v16, 1  ;;  %v5035_v2 = vsel %vm4903_vm11, %v5030_v59, %v5034_v36  ;;  %vm16245_vm5 = vmmov %vm16235_vm0 }
 0x2af   : > { %v5027_v21 = vsel %vm4903_vm11, %v5022_v9, %v5026_v42  ;;  %v5036_v38 = vshrl.u32 %v13869_v39, 16  ;;  %v6028_v56 = vrot.slane %v13917_v20, 1  ;;  %v6025_v12 = vsel %vm5556_vm1, %v6023_v26, %v6024_v23  ;;  %vm16246_vm9 = vmmov %vm16235_vm0 }
 0x2b0   : > { %v5562_v17 = vrot.slane %v10685_v3, 1  ;;  %v6030_v54 = vrot.slane %v13921_v55, 1  ;;  %v6032_v24 = vrot.slane %v13923_v50, 1  ;;  %v5564_v7 = vrot.slane %v10686_v8, 1  ;;  %vm16247_vm8 = vmmov %vm16235_vm0 }
 0x2b1   : > { %v5038_v35 = vor.u32 %v5036_v38, %v5034_v36  ;;  %v5566_v18 = vrot.slane %v10687_v27, 1  ;;  %v6034_v46 = vrot.slane %v13925_v29, 1  ;;  %v13949_v61 = vsel %vm5556_vm1, %v5557_v41, %v5558_v25 }
 0x2b2   : > { %v6027_v51 = vsel %vm5556_vm1, %v6024_v23, %v6026_v43  ;;  %v13953_v42 = vsel %vm5556_vm1, %v5558_v25, %v5560_v22  ;;  %v6029_v28 = vsel %vm5556_vm1, %v6026_v43, %v6028_v56  ;;  %v6036_v13 = vrot.slane %v13933_v1, 1  ;;  %v13984_v23 = vld [vmem:[#allocation2 + $0x60] sm:$0xff]  }
 0x2b3   : > { %v13935_v4 = vld [vmem:[#allocation2 + $0x88] sm:$0xff]   ;;  %10100 = vmatmul.mubr.msk.bf16.gmra.mxu1 %vm16235_vm0, %v5019_v30  ;;  %v5568_v15 = vrot.slane %v10688_v40, 1  ;;  %v5570_v57 = vrot.slane %v13504_v11, 1  ;;  %v13964_v32 = vsel %vm5556_vm1, %v5560_v22, %v5562_v17  ;;  %v13967_v37 = vsel %vm5556_vm1, %v6028_v56, %v6030_v54 }
 0x2b4   : > { %10103 = vmatprep.mubr.msk.bf16.mxu1 %vm16236_vm13, %v5027_v21  ;;  %10152 = vmatmul.mubr.msk.bf16.gmra.mxu0 %vm16237_vm2, %v13935_v4  ;;  %v5040_v10 = vshll.u32 %v13935_v4, 16  ;;  %v13970_v19 = vsel %vm5556_vm1, %v6030_v54, %v6032_v24  ;;  %v13976_v36 = vsel %vm5556_vm1, %v5562_v17, %v5564_v7  ;;  %v13979_v26 = vsel %vm5556_vm1, %v5564_v7, %v5566_v18  ;;  %v14002_v56 = vld [vmem:[#allocation2 + $0x68] sm:$0xff]   ;;  %v10639_v17 = vld [vmem:[%s15570_s4 + $0xb0] sm:$0xff]   ;;  %vm16248_vm13 = vmmov %vm16235_vm0 }
 0x2b5   : > { %10207 = vmatprep.mubr.msk.bf16.mxu0 %vm16238_vm14, %v6025_v12  ;;  %v13958_v14 = vld [vmem:[#allocation2 + $0x90] ss:$0 sps:$4 sm:$0x11]   ;;  %v13982_v11 = vsel %vm5556_vm1, %v6032_v24, %v6034_v46  ;;  %v5044_v60 = vshrl.u32 %v13935_v4, 16  ;;  %v6038_v22 = vrot.slane %v13942_v62, 1  ;;  %v6040_v9 = vrot.slane %v13955_v49, 1  ;;  %vm16249_vm2 = vmmov %vm16235_vm0 }
 0x2b6   : > { %v5042_v53 = vrot.slane %v5040_v10, 1  ;;  %v5048_v59 = vshll.u32 %v13958_v14, 16  ;;  %v15690_v30 = vrot.slane %v13519_v31, 1  ;;  %v13992_v34 = vsel %vm5556_vm1, %v6034_v46, %v6036_v13  ;;  %v14036_v46 = vld [vmem:[#allocation2 + $0x70] sm:$0xff]   ;;  %v10642_v40 = vld [vmem:[%s15570_s4 + $0xa8] sm:$0xff]   ;;  %vm16250_vm14 = vmmov %vm16235_vm0 }
 0x2b7   : > { %v13995_v25 = vsel %vm5556_vm1, %v5566_v18, %v5568_v15  ;;  %v13998_v43 = vsel %vm5556_vm1, %v5568_v15, %v5570_v57  ;;  %v6042_v21 = vrot.slane %v13972_v58, 1  ;;  %v15688_v38 = vrot.slane %v13694_v44, 1  ;;  %v6825_v15 = vld [vmem:[#allocation2 + $0x8] sm:$0xc] }
 0x2b8   : > { %v5043_v41 = vsel %vm4903_vm11, %v5038_v35, %v5042_v53  ;;  %v5580_v12 = vrot.slane %v13700_v48, 1  ;;  %v5582_v3 = vrot.slane %v13809_v5, 1  ;;  %v5046_v54 = vor.u32 %v5044_v60, %v5042_v53 }
 0x2b9   : > { %v5050_v24 = vrot.slane %v5048_v59, 1  ;;  %v15689_v35 = vrot.slane %v13984_v23, 1  ;;  %v5584_v8 = vrot.slane %v13820_v0, 1  ;;  %v14015_v48 = vsel %vm5556_vm1, %v6036_v13, %v6038_v22 }
 0x2ba   : > { %v14020_v5 = vsel %vm5556_vm1, %v15688_v38, %v5580_v12  ;;  %v5586_v7 = vrot.slane %v13865_v6, 1  ;;  %v14028_v0 = vsel %vm5556_vm1, %v6038_v22, %v6040_v9  ;;  %v14033_v27 = vsel %vm5556_vm1, %v5570_v57, %v15690_v30 }
 0x2bb   : > { %10104 = vmatmul.mubr.msk.bf16.gmra.mxu1 %vm16239_vm12, %v5035_v2  ;;  %v14023_v2 = vsel %vm5556_vm1, %v5580_v12, %v5582_v3  ;;  %v14039_v10 = vsel %vm5556_vm1, %v5582_v3, %v5584_v8  ;;  %v5590_v13 = vrot.slane %v13935_v4, 1  ;;  %v5051_v57 = vsel %vm4903_vm11, %v5046_v54, %v5050_v24  ;;  %vm16251_vm12 = vmmov %vm16235_vm0 }
 0x2bc   : > { %10107 = vmatprep.mubr.msk.bf16.mxu1 %vm16240_vm7, %v5043_v41  ;;  %10208 = vmatmul.mubr.msk.bf16.vlgmr.msra.gmra.mxu0 %vm16241_vm6, %v6027_v51  ;;  %v14044_v51 = vsel %vm5556_vm1, %v5584_v8, %v5586_v7  ;;  %v14053_v53 = vsel %vm5556_vm1, %v6040_v9, %v6042_v21  ;;  %v9125_v59 = vcombine.low %v6825_v15, %v13892_v45  ;;  %vm6837_vm15 = vcmask 1045504   ;;  %v10644_v45 = vld [vmem:[%s15570_s4 + $0xa0] sm:$0xff]   ;;  %vm16252_vm7 = vmmov %vm16235_vm0 }
 0x2bd   : > { %10211 = vmatprep.mubr.msk.bf16.mxu0 %vm16242_vm4, %v6029_v28  ;;  %10288 = vmatpush3.bf16.msra.mxu0 %v13725_v47  ;;  %v5588_v28 = vrot.slane %v13869_v39, 1  ;;  %v14058_v47 = vsel %vm5556_vm1, %v6042_v21, %v15689_v35  ;;  %v6839_v60 = vrot.slane %v13898_v33, 2  ;;  %v5592_v41 = vrot.slane %v13958_v14, 1  ;;  %vm16253_vm6 = vmmov %vm16235_vm0 }
 0x2be   : > { %10289 = vmatprep.subr.bf16.mxu0 %v10639_v17  ;;  %v6838_v9 = vrot.slane %v9125_v59, 2  ;;  %vm6363_vm11 = vsmask.f32 6400  ;;  %v6365_v21 = vshrl.u32 %v13904_v52, 16  ;;  %v6368_v12 = vshll.u32 %v13904_v52, 16  ;;  %vm16254_vm4 = vmmov %vm16235_vm0 }
 0x2bf   : > { %v14062_v39 = vsel %vm5556_vm1, %v5586_v7, %v5588_v28  ;;  %v14065_v4 = vsel %vm5556_vm1, %v5588_v28, %v5590_v13  ;;  %v6373_v3 = vshrl.u32 %v13898_v33, 16  ;;  %v6376_v54 = vshll.u32 %v13898_v33, 16 }
 0x2c0   : > { %v14082_v14 = vsel %vm5556_vm1, %v5590_v13, %v5592_v41  ;;  %v6841_v24 = vrot.slane %v13913_v16, 2  ;;  %v6843_v8 = vrot.slane %v13917_v20, 2  ;;  %v6367_v52 = vrot.slane %v6365_v21, 1 }
 0x2c1   : > { %10290 = vmatpush3.bf16.msra.mxu0 %v10639_v17  ;;  %v14079_v17 = vsel %vm6837_vm15, %v6838_v9, %v6839_v60  ;;  %v6370_v33 = vrot.slane %v6368_v12, 2  ;;  %v6375_v7 = vrot.slane %v6373_v3, 1  ;;  %v6378_v28 = vrot.slane %v6376_v54, 2 }
 0x2c2   : > { %10291 = vmatprep.subr.bf16.mxu0 %v10642_v40  ;;  %v14093_v13 = vsel %vm6837_vm15, %v6839_v60, %v6841_v24  ;;  %v14096_v15 = vsel %vm6837_vm15, %v6841_v24, %v6843_v8  ;;  %v6391_v9 = vshrl.u32 %v13917_v20, 16  ;;  %v6394_v41 = vshll.u32 %v13917_v20, 16  ;;  %v10628_v20 = vld [vmem:[%s15570_s4 + $0x90] sm:$0xff]  }
 0x2c3   : > { %10108 = vmatmul.mubr.msk.bf16.gmra.mxu1 %vm16243_vm3, %v5051_v57  ;;  %v6382_v57 = vshrl.u32 %v13913_v16, 16  ;;  %v6379_v59 = vor.u32 %v6378_v28, %v6375_v7  ;;  %v6845_v21 = vrot.slane %v13921_v55, 2  ;;  %v6847_v12 = vrot.slane %v13923_v50, 2  ;;  %vm16255_vm3 = vmmov %vm16235_vm0 }
 0x2c4   : > { %10163 = vmatprep.mubr.msk.bf16.mxu1 %vm16244_vm10, %v13949_v61  ;;  %10212 = vmatmul.mubr.msk.bf16.gmra.mxu0 %vm16245_vm5, %v13967_v37  ;;  %v6385_v61 = vshll.u32 %v13913_v16, 16  ;;  %v6371_v37 = vor.u32 %v6370_v33, %v6367_v52  ;;  %v6393_v3 = vrot.slane %v6391_v9, 1  ;;  %v6396_v54 = vrot.slane %v6394_v41, 2  ;;  %vm16256_vm10 = vmmov %vm16235_vm0 }
 0x2c5   : > { %10215 = vmatprep.mubr.msk.bf16.mxu0 %vm16246_vm9, %v13970_v19  ;;  %10292 = vmatpush3.bf16.msra.mxu0 %v10642_v40  ;;  %v14105_v19 = vld [vmem:[%s15570_s4 + $0xf8] sm:$0xff]   ;;  %v6384_v40 = vrot.slane %v6382_v57, 1  ;;  %v6400_v24 = vshrl.u32 %v13921_v55, 16  ;;  %v14117_v33 = vsel %vm6837_vm15, %v6843_v8, %v6845_v21  ;;  %v14120_v7 = vsel %vm6837_vm15, %v6845_v21, %v6847_v12  ;;  %vm16258_vm5 = vmmov %vm16235_vm0 }
 0x2c6   : > { %10293 = vmatprep.subr.bf16.mxu0 %v10644_v45  ;;  %v6387_v60 = vrot.slane %v6385_v61, 2  ;;  %v14110_v16 = vsel %vm6363_vm11, %v6371_v37, %v6379_v59  ;;  %v6403_v28 = vshll.u32 %v13921_v55, 16  ;;  %v6397_v57 = vor.u32 %v6396_v54, %v6393_v3  ;;  %v10689_v55 = vld [vmem:[%s15570_s4 + $0x98] sm:$0xff]   ;;  %vm16262_vm9 = vmmov %vm16235_vm0 }
 0x2c7   : > { %v6402_v61 = vrot.slane %v6400_v24, 1  ;;  %v6409_v37 = vshrl.u32 %v13923_v50, 16  ;;  %v6412_v9 = vshll.u32 %v13923_v50, 16  ;;  %v6849_v41 = vrot.slane %v13925_v29, 2 }
 0x2c8   : > { %v6388_v52 = vor.u32 %v6387_v60, %v6384_v40  ;;  %v6405_v8 = vrot.slane %v6403_v28, 2  ;;  %v6851_v40 = vrot.slane %v13933_v1, 2  ;;  %v6421_v24 = vshll.u32 %v13925_v29, 16 }
 0x2c9   : > { %10294 = vmatpush3.bf16.msra.mxu0 %v10644_v45  ;;  %v6414_v60 = vrot.slane %v6412_v9, 2  ;;  %v14148_v3 = vsel %vm6837_vm15, %v6847_v12, %v6849_v41  ;;  %v6853_v12 = vrot.slane %v13942_v62, 2 }
 0x2ca   : > { %10375 = vmatprep.subr.bf16.mxu0 %v14105_v19  ;;  %v14129_v45 = vsel %vm6363_vm11, %v6379_v59, %v6388_v52  ;;  %v14139_v50 = vsel %vm6363_vm11, %v6388_v52, %v6397_v57  ;;  %v6418_v59 = vshrl.u32 %v13925_v29, 16  ;;  %v6406_v21 = vor.u32 %v6405_v8, %v6402_v61 }
 0x2cb   : > { %10164 = vmatmul.mubr.msk.bf16.vlgmr.msra.gmra.mxu1 %vm16247_vm8, %v13953_v42  ;;  %v6411_v42 = vrot.slane %v6409_v37, 1  ;;  %v14151_v54 = vsel %vm6837_vm15, %v6849_v41, %v6851_v40  ;;  %v6430_v37 = vshll.u32 %v13933_v1, 16  ;;  %v6423_v61 = vrot.slane %v6421_v24, 2  ;;  %vm16265_vm8 = vmmov %vm16235_vm0 }
 0x2cc   : > { %10167 = vmatprep.mubr.msk.bf16.mxu1 %vm16235_vm0, %v13964_v32  ;;  %10244 = vmatpush3.bf16.msra.mxu1 %v10689_v55  ;;  %v10633_v32 = vld [vmem:[%s15570_s4 + $0x88] sm:$0xff]   ;;  %v6420_v28 = vrot.slane %v6418_v59, 1  ;;  %v14159_v9 = vsel %vm6363_vm11, %v6397_v57, %v6406_v21  ;;  %v6855_v8 = vrot.slane %v13955_v49, 2  ;;  %v6436_v55 = vshrl.u32 %v13942_v62, 16 }
 0x2cd   : > { %10216 = vmatmul.mubr.msk.bf16.gmra.mxu0 %vm16248_vm13, %v13982_v11  ;;  %10245 = vmatprep.subr.bf16.mxu1 %v10628_v20  ;;  %v6415_v52 = vor.u32 %v6414_v60, %v6411_v42  ;;  %v6427_v11 = vshrl.u32 %v13933_v1, 16  ;;  %v10640_v1 = vld [vmem:[%s15570_s4 + $0x80] sm:$0xff]   ;;  %v14171_v42 = vsel %vm6837_vm15, %v6851_v40, %v6853_v12  ;;  %v6445_v24 = vshrl.u32 %v13955_v49, 16  ;;  %vm16270_vm13 = vmmov %vm16235_vm0 }
 0x2ce   : > { %10219 = vmatprep.mubr.msk.bf16.mxu0 %vm16249_vm2, %v13992_v34  ;;  %v6432_v34 = vrot.slane %v6430_v37, 2  ;;  %v6424_v57 = vor.u32 %v6423_v61, %v6420_v28  ;;  %v14174_v60 = vsel %vm6837_vm15, %v6853_v12, %v6855_v8  ;;  %v6857_v40 = vrot.slane %v13972_v58, 2  ;;  %vm16272_vm2 = vmmov %vm16235_vm0 }
 0x2cf   : > { %v14164_v29 = vsel %vm6363_vm11, %v6406_v21, %v6415_v52  ;;  %v6429_v41 = vrot.slane %v6427_v11, 1  ;;  %v6438_v21 = vrot.slane %v6436_v55, 1  ;;  %v6448_v11 = vshll.u32 %v13955_v49, 16 }
 0x2d0   : > { %10246 = vmatpush3.bf16.msra.mxu1 %v10628_v20  ;;  %v6439_v20 = vshll.u32 %v13942_v62, 16  ;;  %v14182_v37 = vsel %vm6363_vm11, %v6415_v52, %v6424_v57  ;;  %v6859_v61 = vrot.slane %v13984_v23, 2  ;;  %v6447_v12 = vrot.slane %v6445_v24, 1  ;;  %v14210_v24 = vld [vmem:[#allocation2 + $0x78] sm:$0xff]  }
 0x2d1   : > { %10247 = vmatprep.subr.bf16.mxu1 %v10633_v32  ;;  %v6433_v59 = vor.u32 %v6432_v34, %v6429_v41  ;;  %v6450_v49 = vrot.slane %v6448_v11, 2  ;;  %v6454_v41 = vshrl.u32 %v13972_v58, 16  ;;  %v6457_v34 = vshll.u32 %v13972_v58, 16 }
 0x2d2   : > { %v6441_v28 = vrot.slane %v6439_v20, 2  ;;  %v6466_v20 = vshll.u32 %v13984_v23, 16  ;;  %v6863_v58 = vrot.slane %v14036_v46, 2  ;;  %v6490_v35 = vshrl.u32 %v14210_v24, 16 }
 0x2d3   : > { %10168 = vmatmul.mubr.msk.bf16.gmra.mxu1 %vm16250_vm14, %v13976_v36  ;;  %v14189_v62 = vsel %vm6363_vm11, %v6424_v57, %v6433_v59  ;;  %v14197_v36 = vld [vmem:[%s15570_s4 + $0xd8] sm:$0xff]   ;;  %v6451_v55 = vor.u32 %v6450_v49, %v6447_v12  ;;  %v6463_v57 = vshrl.u32 %v13984_v23, 16  ;;  %v6459_v11 = vrot.slane %v6457_v34, 2  ;;  %vm16274_vm14 = vmmov %vm16235_vm0 }
 0x2d4   : > { %10171 = vmatprep.mubr.msk.bf16.mxu1 %vm16251_vm12, %v13979_v26  ;;  %10248 = vmatpush3.bf16.msra.mxu1 %v10633_v32  ;;  %v6442_v52 = vor.u32 %v6441_v28, %v6438_v21  ;;  %v14200_v26 = vsel %vm6837_vm15, %v6855_v8, %v6857_v40  ;;  %v14203_v32 = vsel %vm6837_vm15, %v6857_v40, %v6859_v61  ;;  %v14212_v21 = vld [vmem:[#allocation2 + $0x80] sm:$0xff]   ;;  %v6861_v28 = vrot.slane %v14002_v56, 2  ;;  %vm16276_vm12 = vmmov %vm16235_vm0 }
 0x2d5   : > { %10220 = vmatmul.mubr.msk.bf16.gmra.mxu0 %vm16252_vm7, %v14015_v48  ;;  %10249 = vmatprep.subr.bf16.mxu1 %v10640_v1  ;;  %v6456_v48 = vrot.slane %v6454_v41, 1  ;;  %v6465_v40 = vrot.slane %v6463_v57, 1  ;;  %v6468_v12 = vrot.slane %v6466_v20, 2  ;;  %v6472_v49 = vshrl.u32 %v14002_v56, 16  ;;  %v14235_v20 = vld [vmem:[#allocation2 + $0x88] sm:$0xff]   ;;  %vm16278_vm7 = vmmov %vm16235_vm0 }
 0x2d6   : > { %10223 = vmatprep.mubr.msk.bf16.mxu0 %vm16253_vm6, %v14028_v0  ;;  %v14215_v8 = vsel %vm6363_vm11, %v6433_v59, %v6442_v52  ;;  %v14220_v0 = vsel %vm6363_vm11, %v6442_v52, %v6451_v55  ;;  %v14225_v38 = vsel %vm6837_vm15, %v6859_v61, %v6861_v28  ;;  %v14228_v59 = vsel %vm6837_vm15, %v6861_v28, %v6863_v58  ;;  %vm16279_vm6 = vmmov %vm16235_vm0 }
 0x2d7   : > { %v6460_v41 = vor.u32 %v6459_v11, %v6456_v48  ;;  %v6475_v34 = vshll.u32 %v14002_v56, 16  ;;  %v6469_v22 = vor.u32 %v6468_v12, %v6465_v40  ;;  %v6481_v52 = vshrl.u32 %v14036_v46, 16  ;;  %v14237_v48 = vld [vmem:[#allocation2 + $0x90] sm:$0xff]  }
 0x2d8   : > { %10250 = vmatpush3.bf16.msra.mxu1 %v10640_v1  ;;  %v6474_v1 = vrot.slane %v6472_v49, 1  ;;  %v6484_v57 = vshll.u32 %v14036_v46, 16  ;;  %v6865_v28 = vrot.slane %v14210_v24, 2  ;;  %v6867_v40 = vrot.slane %v14212_v21, 2 }
 0x2d9   : > { %10331 = vmatprep.subr.bf16.mxu1 %v14197_v36  ;;  %v14240_v61 = vsel %vm6363_vm11, %v6451_v55, %v6460_v41  ;;  %v6477_v11 = vrot.slane %v6475_v34, 2  ;;  %v14247_v12 = vsel %vm6363_vm11, %v6460_v41, %v6469_v22  ;;  %v6483_v49 = vrot.slane %v6481_v52, 1 }
 0x2da   : > { %v14253_v34 = vsel %vm6837_vm15, %v6863_v58, %v6865_v28  ;;  %v14256_v6 = vsel %vm6837_vm15, %v6865_v28, %v6867_v40  ;;  %v6493_v30 = vshll.u32 %v14210_v24, 16  ;;  %v6492_v41 = vrot.slane %v6490_v35, 1 }
 0x2db   : > { %10172 = vmatmul.mubr.msk.bf16.gmra.mxu1 %vm16254_vm4, %v13995_v25  ;;  %v6486_v25 = vrot.slane %v6484_v57, 2  ;;  %v6478_v55 = vor.u32 %v6477_v11, %v6474_v1  ;;  %16257 = vst [vmem:[#allocation29_spill] sm:$0xff] %v14256_v6  ;;  %v6499_v52 = vshrl.u32 %v14212_v21, 16  ;;  %v6502_v57 = vshll.u32 %v14212_v21, 16  ;;  %vm16280_vm4 = vmmov %vm16235_vm0 }
 0x2dc   : > { %10175 = vmatprep.mubr.msk.bf16.mxu1 %vm16255_vm3, %v13998_v43  ;;  %v6495_v1 = vrot.slane %v6493_v30, 2  ;;  %v6869_v58 = vrot.slane %v14235_v20, 2  ;;  %v15691_v11 = vrot.slane %v14237_v48, 2  ;;  %v6511_v30 = vshll.u32 %v14235_v20, 16  ;;  %vm16281_vm3 = vmmov %vm16235_vm0 }
 0x2dd   : > { %10224 = vmatmul.mubr.msk.bf16.gmra.mxu0 %vm16256_vm10, %v14053_v53  ;;  %v6487_v43 = vor.u32 %v6486_v25, %v6483_v49  ;;  %v14264_v53 = vsel %vm6363_vm11, %v6469_v22, %v6478_v55  ;;  %v6501_v18 = vrot.slane %v6499_v52, 1  ;;  %v6504_v6 = vrot.slane %v6502_v57, 2  ;;  %v14283_v57 = vld [vmem:[#allocation2 + $0x98] ss:$0 sps:$4 sm:$0x33]   ;;  %vm16283_vm10 = vmmov %vm16235_vm0 }
 0x2de   : > { %10227 = vmatprep.mubr.msk.bf16.mxu0 %vm16258_vm5, %v14058_v47  ;;  %16259 = vst [vmem:[#allocation24_spill] sm:$0xff] %v14264_v53  ;;  %v6508_v47 = vshrl.u32 %v14235_v20, 16  ;;  %v6496_v35 = vor.u32 %v6495_v1, %v6492_v41  ;;  %v14273_v49 = vsel %vm6837_vm15, %v6867_v40, %v6869_v58  ;;  %v14278_v22 = vsel %vm6837_vm15, %v6869_v58, %v15691_v11  ;;  %vm16284_vm5 = vmmov %vm16235_vm0 }
 0x2df   : > { %v14269_v28 = vsel %vm6363_vm11, %v6478_v55, %v6487_v43  ;;  %16260 = vst [vmem:[#allocation37_spill] sm:$0xff] %v14273_v49  ;;  %16261 = vst [vmem:[#allocation34_spill] sm:$0xff] %v14278_v22  ;;  %v6505_v25 = vor.u32 %v6504_v6, %v6501_v18  ;;  %v6517_v55 = vshrl.u32 %v14237_v48, 16  ;;  %v6520_v52 = vshll.u32 %v14237_v48, 16 }
 0x2e0   : > { %v6510_v53 = vrot.slane %v6508_v47, 1  ;;  %v16263_v40 = vrot.slane %v13639_v63, 1  ;;  %v16264_v41 = vrot.slane %v13519_v31, 1  ;;  %v14293_v58 = vsel %vm6363_vm11, %v6487_v43, %v6496_v35 }
 0x2e1   : > { %v6513_v18 = vrot.slane %v6511_v30, 2  ;;  %v16266_v6 = vrot.slane %v14002_v56, 1  ;;  %v16267_v47 = vrot.slane %v13984_v23, 1  ;;  %v6519_v22 = vrot.slane %v6517_v55, 1 }
 0x2e2   : > { %v5575_v1 = vsel %vm5556_vm1, %v16264_v41, %v16263_v40  ;;  %v6522_v49 = vrot.slane %v6520_v52, 2  ;;  %v16268_v31 = vrot.slane %v14036_v46, 1  ;;  %v10690_v41 = vld [vmem:[#allocation2 + $0x50] sm:$0xff]   ;;  %v6529_v55 = vshll.u32 %v14283_v57, 16 }
 0x2e3   : > { %10176 = vmatmul.mubr.msk.bf16.gmra.mxu1 %vm16262_vm9, %v14033_v27  ;;  %v6047_v11 = vsel %vm5556_vm1, %v16267_v47, %v16266_v6  ;;  %v14302_v27 = vsel %vm6363_vm11, %v6496_v35, %v6505_v25  ;;  %v16269_v43 = vmov %v16266_v6  ;;  %v6514_v40 = vor.u32 %v6513_v18, %v6510_v53  ;;  %vm16285_vm9 = vmmov %vm16235_vm0 }
 0x2e4   : > { %10179 = vmatprep.mubr.msk.bf16.mxu1 %vm16265_vm8, %v5575_v1  ;;  %v6049_v30 = vsel %vm5556_vm1, %v16269_v43, %v16268_v31  ;;  %v5576_v1 = vrot.slane %v10690_v41, 1  ;;  %v6523_v23 = vor.u32 %v6522_v49, %v6519_v22  ;;  %v6526_v6 = vshrl.u32 %v14283_v57, 16  ;;  %v10641_v41 = vld [vmem:[#allocation2 + $0x98] ss:$0 sps:$4 sm:$0x11]   ;;  %vm16286_vm8 = vmmov %vm16235_vm0 }
 0x2e5   : > { %10228 = vmatmul.mubr.msk.bf16.gmra.mxu0 %vm16235_vm0, %v6047_v11  ;;  %v14313_v35 = vsel %vm6363_vm11, %v6505_v25, %v6514_v40  ;;  %v6050_v11 = vrot.slane %v14210_v24, 1  ;;  %v6052_v53 = vrot.slane %v14212_v21, 1  ;;  %v6531_v18 = vrot.slane %v6529_v55, 2  ;;  %v14381_v55 = vld [vmem:[#allocation2 + $0x18] sm:$0xff]  }
 0x2e6   : > { %10231 = vmatprep.mubr.msk.bf16.mxu0 %vm16270_vm13, %v6049_v30  ;;  %v14318_v52 = vsel %vm6363_vm11, %v6514_v40, %v6523_v23  ;;  %v6528_v56 = vrot.slane %v6526_v6, 1  ;;  %v16271_v47 = vrot.slane %v13639_v63, 1  ;;  %v16273_v22 = vrot.slane %v13694_v44, 1  ;;  %vm16287_vm13 = vmmov %vm16235_vm0  ;;  %v14379_v6 = vld [vmem:[#allocation2 + $0x14] sm:$0xf] }
 0x2e7   : > { %v16275_v24 = vrot.slane %v14036_v46, 1  ;;  %v6053_v21 = vsel %vm5556_vm1, %v6050_v11, %v6052_v53  ;;  %v6054_v44 = vrot.slane %v14235_v20, 1  ;;  %v6056_v30 = vrot.slane %v14237_v48, 1 }
 0x2e8   : > { %v5577_v49 = vsel %vm5556_vm1, %v16271_v47, %v5576_v1  ;;  %v5579_v25 = vsel %vm5556_vm1, %v5576_v1, %v16273_v22  ;;  %v6532_v31 = vor.u32 %v6531_v18, %v6528_v56  ;;  %v6058_v1 = vrot.slane %v10641_v41, 1  ;;  %v10655_v56 = vld [vmem:[%s15570_s4 + $0xe0] sm:$0xff]   ;;  %v14400_v18 = vld [vmem:[#allocation2 + $0x48] sm:$0xff]   ;;  %v14411_v22 = vld [vmem:[#allocation2 + $0x58] sm:$0xff]  }
 0x2e9   : > { %v6051_v43 = vsel %vm5556_vm1, %v16275_v24, %v6050_v11  ;;  %v6055_v46 = vsel %vm5556_vm1, %v6052_v53, %v6054_v44  ;;  %v6057_v40 = vsel %vm5556_vm1, %v6054_v44, %v6056_v30  ;;  %v14389_v11 = vld [vmem:[#allocation2 + $0x30] sm:$0xff]   ;;  %v14398_v53 = vld [vmem:[#allocation2 + $0x40] sm:$0xff]   ;;  %16293 = vst [vmem:[#allocation35_spill] sm:$0xff] %v14400_v18  ;;  %v8120_v24 = vrot.slane %v14381_v55, 3  ;;  %v14425_v44 = vld [vmem:[#allocation2 + $0x78] sm:$0xff]  }
 0x2ea   : > { %v14335_v63 = vsel %vm6363_vm11, %v6523_v23, %v6532_v31  ;;  %vm16282_vm11 = vmmov %vm16235_vm0  ;;  %v14348_v23 = vpop.f32.mrf.mxu0  ;;  %16292 = vst [vmem:[#allocation43_spill] sm:$0xff] %v14398_v53  ;;  %v14430_v41 = vld [vmem:[#allocation2 + $0x80] sm:$0xff]  }
 0x2eb   : > { %10180 = vmatmul.mubr.msk.bf16.gmra.mxu1 %vm16272_vm2, %v5577_v49  ;;  %16277 = vst [vmem:[#allocation25_spill] sm:$0xff] %v14335_v63  ;;  %vm16289_vm2 = vmmov %vm16235_vm0 }
 0x2ec   : > { %10183 = vmatprep.mubr.msk.bf16.mxu1 %vm16274_vm14, %v5579_v25  ;;  %vm16291_vm14 = vmmov %vm16235_vm0  ;;  %v14413_v25 = vld [vmem:[#allocation2 + $0x60] sm:$0xff]  }
 0x2ed   : > { %10232 = vmatmul.mubr.msk.bf16.gmra.mxu0 %vm16276_vm12, %v6051_v43  ;;  %vm16294_vm12 = vmmov %vm16235_vm0 }
 0x2ee   : > { %10235 = vmatprep.mubr.msk.bf16.mxu0 %vm16278_vm7, %v6053_v21  ;;  %vm8118_vm7 = vcmask 1044480   ;;  %v14421_v21 = vld [vmem:[#allocation2 + $0x68] sm:$0xff]  }
 0x2f3   : > { %10184 = vmatmul.mubr.msk.bf16.gmra.mxu1 %vm16279_vm6, %v14020_v5  ;;  %v6059_v5 = vsel %vm5556_vm1, %v6056_v30, %v6058_v1  ;;  %vm16288_vm1 = vmmov %vm16235_vm0  ;;  %v14432_v1 = vld [vmem:[#allocation2 + $0x88] sm:$0xff]  }
 0x2f4   : > { %10187 = vmatprep.mubr.msk.bf16.mxu1 %vm16280_vm4, %v14023_v2  ;;  %v14358_v2 = vpop.f32.mrf.mxu0  ;;  %vm16295_vm6 = vmmov %vm16235_vm0 }
 0x2f5   : > { %10236 = vmatmul.mubr.msk.bf16.gmra.mxu0 %vm16281_vm3, %v6055_v46  ;;  %vm16296_vm4 = vmmov %vm16235_vm0  ;;  %v8126_v46 = vrot.slane %v14389_v11, 3 }
 0x2f6   : > { %10239 = vmatprep.mubr.msk.bf16.mxu0 %vm16282_vm11, %v6057_v40  ;;  %v14360_v20 = vpop.f32.mrf.mxu0  ;;  %vm16304_vm3 = vmmov %vm16235_vm0 }
 0x2f7   : > { %vm16307_vm11 = vmmov %vm16235_vm0 }
 0x2fb   : > { %10188 = vmatmul.mubr.msk.bf16.gmra.mxu1 %vm16283_vm10, %v14039_v10  ;;  %v10649_v10 = vld [vmem:[%s15570_s4 + $0xf0] sm:$0xff]   ;;  %vm16311_vm10 = vmmov %vm16235_vm0 }
 0x2fc   : > { %10191 = vmatprep.mubr.msk.bf16.mxu1 %vm16284_vm5, %v14044_v51  ;;  %v14373_v51 = vpop.f32.mrf.mxu0  ;;  %vm16315_vm5 = vmmov %vm16235_vm0 }
 0x2fd   : > { %10240 = vmatmul.mubr.msk.bf16.gmra.mxu0 %vm16285_vm9, %v6059_v5  ;;  %16290 = vst [vmem:[#allocation46_spill] sm:$0xff] %v14373_v51  ;;  %vm16319_vm9 = vmmov %vm16235_vm0 }
 0x2fe   : > { %10295 = vmatprep.mubr.msk.bf16.mxu0 %vm16286_vm8, %v14079_v17  ;;  %v8106_v17 = vld [vmem:[#allocation2 + $0x10] sm:$0x8]  ;;  %vm16320_vm8 = vmmov %vm16235_vm0 }
 0x2ff   : > { %v9212_v47 = vcombine.low %v8106_v17, %v14379_v6  ;;  %v10646_v17 = vld [vmem:[%s15570_s4 + $0xd0] sm:$0xff]  }
 0x301   : > { %v8119_v31 = vrot.slane %v9212_v47, 3  ;;  %v14445_v47 = vld [vmem:[#allocation2 + $0x90] sm:$0xff]  }
 0x303   : > { %10192 = vmatmul.mubr.msk.bf16.gmra.mxu1 %vm16235_vm0, %v14062_v39  ;;  %v10652_v39 = vld [vmem:[%s15570_s4 + $0xe8] sm:$0xff]  }
 0x304   : > { %10195 = vmatprep.mubr.msk.bf16.mxu1 %vm16287_vm13, %v14065_v4  ;;  %v14383_v4 = vld [vmem:[#allocation2 + $0x20] sm:$0xff]   ;;  %vm16321_vm13 = vmmov %vm16235_vm0 }
 0x305   : > { %10296 = vmatmul.mubr.msk.bf16.vlgmr.msra.gmra.mxu0 %vm16288_vm1, %v14093_v13  ;;  %v14385_v13 = vpop.f32.mrf.mxu0  ;;  %v8122_v43 = vrot.slane %v14383_v4, 3  ;;  %vm16322_vm1 = vmmov %vm16235_vm0 }
 0x306   : > { %10299 = vmatprep.mubr.msk.bf16.mxu0 %vm16289_vm2, %v14096_v15  ;;  %10376 = vmatpush3.bf16.msra.mxu0 %v14105_v19  ;;  %v14387_v15 = vld [vmem:[#allocation2 + $0x28] sm:$0xff]   ;;  %v14391_v19 = vld [vmem:[#allocation2 + $0x38] sm:$0xff]   ;;  %vm16323_vm2 = vmmov %vm16235_vm0 }
 0x307   : > { %10377 = vmatprep.subr.bf16.mxu0 %v10649_v10  ;;  %v14405_v49 = vpop.f32.mrf.mxu0  ;;  %v8124_v30 = vrot.slane %v14387_v15, 3  ;;  %v8128_v40 = vrot.slane %v14391_v19, 3  ;;  %v14438_v5 = vsel %vm8118_vm7, %v8120_v24, %v8122_v43 }
 0x308   : > { %16298 = vst [vmem:[#allocation44_spill] sm:$0xff] %v14438_v5  ;;  %v14458_v5 = vld [vmem:[#allocation2 + $0x98] sm:$0xff]  }
 0x309   : > { %v14448_v51 = vsel %vm8118_vm7, %v8122_v43, %v8124_v30  ;;  %v14451_v63 = vsel %vm8118_vm7, %v8124_v30, %v8126_v46  ;;  %v8136_v30 = vrot.slane %v14411_v22, 3 }
 0x30a   : > { %10378 = vmatpush3.bf16.msra.mxu0 %v10649_v10  ;;  %v8130_v10 = vrot.slane %v14398_v53, 3  ;;  %16299 = vst [vmem:[#allocation40_spill] sm:$0xff] %v14448_v51  ;;  %16300 = vst [vmem:[#allocation55_spill] sm:$0xff] %v14451_v63  ;;  %v8144_v51 = vrot.slane %v14425_v44, 3 }
 0x30b   : > { %10196 = vmatmul.mubr.msk.bf16.gmra.mxu1 %vm16291_vm14, %v14082_v14  ;;  %10379 = vmatprep.subr.bf16.mxu0 %v10652_v39  ;;  %v14409_v14 = vld [vmem:[#allocation2 + $0x50] sm:$0xff]   ;;  %vm16324_vm14 = vmmov %vm16235_vm0 }
 0x30c   : > { %10251 = vmatprep.mubr.msk.bf16.mxu1 %vm16294_vm12, %v14110_v16  ;;  %v14419_v16 = vpop.f32.mrf.mxu0  ;;  %v8134_v43 = vrot.slane %v14409_v14, 3  ;;  %vm16325_vm12 = vmmov %vm16235_vm0 }
 0x30d   : > { %10300 = vmatmul.mubr.msk.bf16.gmra.mxu0 %vm16295_vm6, %v14117_v33  ;;  %v14423_v33 = vld [vmem:[#allocation2 + $0x70] sm:$0xff]   ;;  %vm16327_vm6 = vmmov %vm16235_vm0 }
 0x30e   : > { %10303 = vmatprep.mubr.msk.bf16.mxu0 %vm16296_vm4, %v14120_v7  ;;  %10380 = vmatpush3.bf16.msra.mxu0 %v10652_v39  ;;  %v14435_v7 = vsel %vm8118_vm7, %v8119_v31, %v8120_v24  ;;  %v8132_v39 = vrot.slane %v14400_v18, 3  ;;  %v14454_v31 = vsel %vm8118_vm7, %v8126_v46, %v8128_v40  ;;  %v14456_v24 = vpop.f32.mrf.mxu0  ;;  %v14463_v18 = vsel %vm8118_vm7, %v8128_v40, %v8130_v10  ;;  %vm16328_vm4 = vmmov %vm16235_vm0 }
 0x30f   : > { %10381 = vmatprep.subr.bf16.mxu0 %v10655_v56  ;;  %16297 = vst [vmem:[#allocation47_spill] sm:$0xff] %v14435_v7  ;;  %16301 = vst [vmem:[#allocation52_spill] sm:$0xff] %v14454_v31  ;;  %v14460_v7 = vld [vmem:[#allocation2 + $0xa0] ss:$0 sps:$4 sm:$0x77]   ;;  %v8138_v46 = vrot.slane %v14413_v25, 3 }
 0x310   : > { %16302 = vst [vmem:[#allocation49_spill] sm:$0xff] %v14463_v18  ;;  %v14466_v53 = vsel %vm8118_vm7, %v8130_v10, %v8132_v39  ;;  %v8140_v31 = vrot.slane %v14421_v21, 3  ;;  %v8142_v63 = vrot.slane %v14423_v33, 3  ;;  %v14477_v40 = vsel %vm8118_vm7, %v8132_v39, %v8134_v43 }
 0x311   : > { %16303 = vst [vmem:[#allocation7_spill] sm:$0xff] %v14466_v53  ;;  %16305 = vst [vmem:[#allocation6_spill] sm:$0xff] %v14477_v40  ;;  %v14480_v10 = vsel %vm8118_vm7, %v8134_v43, %v8136_v30  ;;  %v8146_v53 = vrot.slane %v14430_v41, 3  ;;  %v14488_v18 = vsel %vm8118_vm7, %v8136_v30, %v8138_v46  ;;  %v8150_v43 = vrot.slane %v14445_v47, 3 }
 0x312   : > { %10382 = vmatpush3.bf16.msra.mxu0 %v10655_v56  ;;  %16306 = vst [vmem:[#allocation51_spill] sm:$0xff] %v14480_v10  ;;  %v8148_v56 = vrot.slane %v14432_v1, 3  ;;  %16308 = vst [vmem:[#allocation57_spill] sm:$0xff] %v14488_v18  ;;  %v14494_v39 = vsel %vm8118_vm7, %v8140_v31, %v8142_v63  ;;  %v14505_v30 = vsel %vm8118_vm7, %v8142_v63, %v8144_v51 }
 0x313   : > { %10252 = vmatmul.mubr.msk.bf16.vlgmr.msra.gmra.mxu1 %vm16304_vm3, %v14129_v45  ;;  %v14491_v45 = vsel %vm8118_vm7, %v8138_v46, %v8140_v31  ;;  %16310 = vst [vmem:[#allocation4_spill] sm:$0xff] %v14494_v39  ;;  %16312 = vst [vmem:[#allocation8_spill] sm:$0xff] %v14505_v30  ;;  %v14508_v46 = vsel %vm8118_vm7, %v8144_v51, %v8146_v53  ;;  %v8152_v39 = vrot.slane %v14458_v5, 3 }
 0x314   : > { %10255 = vmatprep.mubr.msk.bf16.mxu1 %vm16307_vm11, %v14139_v50  ;;  %10332 = vmatpush3.bf16.msra.mxu1 %v14197_v36  ;;  %16309 = vst [vmem:[#allocation54_spill] sm:$0xff] %v14491_v45  ;;  %v10647_v50 = vld [vmem:[%s15570_s4 + $0xc8] sm:$0xff]   ;;  %v14502_v36 = vpop.f32.mrf.mxu0  ;;  %16313 = vst [vmem:[#allocation56_spill] sm:$0xff] %v14508_v46  ;;  %v14511_v31 = vsel %vm8118_vm7, %v8146_v53, %v8148_v56  ;;  %v8154_v45 = vrot.slane %v14460_v7, 3  ;;  %v10650_v53 = vld [vmem:[%s15570_s4 + $0xc0] sm:$0xff]  }
 0x315   : > { %10304 = vmatmul.mubr.msk.bf16.gmra.mxu0 %vm16311_vm10, %v14148_v3  ;;  %10333 = vmatprep.subr.bf16.mxu1 %v10646_v17  ;;  %16314 = vst [vmem:[#allocation5_spill] sm:$0xff] %v14511_v31  ;;  %v14517_v3 = vsel %vm8118_vm7, %v8148_v56, %v8150_v43  ;;  %v14521_v18 = vsel %vm8118_vm7, %v8150_v43, %v8152_v39  ;;  %vm16329_vm3 = vmmov %vm16235_vm0 }
 0x316   : > { %10307 = vmatprep.mubr.msk.bf16.mxu0 %vm16315_vm5, %v14151_v54  ;;  %16316 = vst [vmem:[#allocation60_spill] sm:$0xff] %v14517_v3  ;;  %16317 = vst [vmem:[#allocation58_spill] sm:$0xff] %v14521_v18  ;;  %v14523_v63 = vpop.f32.mrf.mxu0  ;;  %v14526_v51 = vsel %vm8118_vm7, %v8152_v39, %v8154_v45 }
 0x317   : > { %16318 = vst [vmem:[#allocation53_spill] sm:$0xff] %v14526_v51  ;;  %vm16326_vm7 = vmmov %vm16235_vm0 }
 0x318   : > { %10334 = vmatpush3.bf16.msra.mxu1 %v10646_v17  ;;  %v14535_v54 = vpop.f32.mrf.mxu0  ;;  %v14542_v17 = vld [vmem:[%s15570_s4 + $0x118] sm:$0xff]   ;;  %vm16330_vm11 = vmmov %vm16235_vm0 }
 0x319   : > { %10335 = vmatprep.subr.bf16.mxu1 %v10647_v50  ;;  %vm16331_vm10 = vmmov %vm16235_vm0 }
 0x31a   : > { %vm16332_vm5 = vmmov %vm16235_vm0 }
 0x31b   : > { %10256 = vmatmul.mubr.msk.bf16.gmra.mxu1 %vm16319_vm9, %v14159_v9  ;;  %v14546_v9 = vpop.f32.mrf.mxu0  ;;  %v10077_v56 = vpop.f32.mrf.mxu1  ;;  %vm16334_vm9 = vmmov %vm16235_vm0 }
 0x31c   : > { %10259 = vmatprep.mubr.msk.bf16.mxu1 %vm16320_vm8, %v14164_v29  ;;  %10336 = vmatpush3.bf16.msra.mxu1 %v10647_v50  ;;  %v14550_v29 = vadd.f32 %v14348_v23, %v10077_v56  ;;  %v7654_v50 = vshrl.u32 %v14381_v55, 16  ;;  %v16335_v56 = vld [vmem:[#allocation24_spill] sm:$0xff]  ;;  %vm16336_vm8 = vmmov %vm16235_vm0 }
 0x31d   : > { %10308 = vmatmul.mubr.msk.bf16.gmra.mxu0 %vm16235_vm0, %v14171_v42  ;;  %10337 = vmatprep.subr.bf16.mxu1 %v10650_v53  ;;  %v5164_v42 = vpop.f32.mrf.mxu1 }
 0x31e   : > { %10311 = vmatprep.mubr.msk.bf16.mxu0 %vm16321_vm13, %v14174_v60  ;;  %v14557_v45 = vadd.f32 %v14358_v2, %v5164_v42  ;;  %v14559_v60 = vpop.f32.mrf.mxu0  ;;  %vm16338_vm13 = vmmov %vm16235_vm0 }
 0x31f   : > { %v10078_v39 = vpop.f32.mrf.mxu1 }
 0x320   : > { %10338 = vmatpush3.bf16.msra.mxu1 %v10650_v53  ;;  %v14566_v23 = vadd.f32 %v14360_v20, %v10078_v39 }
 0x321   : > { %10419 = vmatprep.subr.bf16.mxu1 %v14542_v17 }
 0x323   : > { %10260 = vmatmul.mubr.msk.bf16.gmra.mxu1 %vm16322_vm1, %v14182_v37  ;;  %v14568_v37 = vpop.f32.mrf.mxu0  ;;  %vm16340_vm1 = vmmov %vm16235_vm0 }
 0x324   : > { %10263 = vmatprep.mubr.msk.bf16.mxu1 %vm16323_vm2, %v14189_v62  ;;  %vm7644_vm2 = vsmask.f32 5376 }
 0x325   : > { %10312 = vmatmul.mubr.msk.bf16.gmra.mxu0 %vm16324_vm14, %v14200_v26  ;;  %v14574_v62 = vpop.f32.mrf.mxu0  ;;  %vm16341_vm14 = vmmov %vm16235_vm0 }
 0x326   : > { %10315 = vmatprep.mubr.msk.bf16.mxu0 %vm16325_vm12, %v14203_v32  ;;  %v14582_v32 = vpop.f32.mrf.mxu1  ;;  %vm16342_vm12 = vmmov %vm16235_vm0 }
 0x327   : > { %v14580_v26 = vpop.f32.mrf.mxu0 }
 0x32b   : > { %10264 = vmatmul.mubr.msk.bf16.gmra.mxu1 %vm16326_vm7, %v14215_v8  ;;  %v7166_v8 = vld [vmem:[#allocation2 + $0x10] sm:$0xc]  ;;  %vm16344_vm7 = vmmov %vm16235_vm0 }
 0x32c   : > { %10267 = vmatprep.mubr.msk.bf16.mxu1 %vm16327_vm6, %v14220_v0  ;;  %v14598_v20 = vcombine.low %v7166_v8, %v14379_v6  ;;  %v16337_v8 = vld [vmem:[#allocation37_spill] sm:$0xff]  ;;  %vm16345_vm6 = vmmov %vm16235_vm0 }
 0x32d   : > { %10316 = vmatmul.mubr.msk.bf16.gmra.mxu0 %vm16328_vm4, %v14225_v38  ;;  %v16333_v38 = vld [vmem:[#allocation29_spill] sm:$0xff]  ;;  %vm16346_vm4 = vmmov %vm16235_vm0 }
 0x32e   : > { %10319 = vmatprep.mubr.msk.bf16.mxu0 %vm16329_vm3, %v14228_v59  ;;  %v7649_v42 = vshll.u32 %v14598_v20, 16  ;;  %vm16347_vm3 = vmmov %vm16235_vm0 }
 0x330   : > { %v7651_v51 = vrot.slane %v7649_v42, 3 }
 0x333   : > { %10268 = vmatmul.mubr.msk.bf16.gmra.mxu1 %vm16330_vm11, %v14240_v61  ;;  %v14588_v0 = vpop.f32.mrf.mxu0  ;;  %vm16348_vm11 = vmmov %vm16235_vm0 }
 0x334   : > { %10271 = vmatprep.mubr.msk.bf16.mxu1 %vm16331_vm10, %v14247_v12  ;;  %v10081_v59 = vpop.f32.mrf.mxu1  ;;  %vm16349_vm10 = vmmov %vm16235_vm0 }
 0x335   : > { %10320 = vmatmul.mubr.msk.bf16.gmra.mxu0 %vm16332_vm5, %v14253_v34  ;;  %v14595_v2 = vadd.f32 %v14385_v13, %v10081_v59  ;;  %v14600_v43 = vpop.f32.mrf.mxu0  ;;  %v7657_v34 = vshll.u32 %v14381_v55, 16  ;;  %v7646_v13 = vshrl.u32 %v14598_v20, 16  ;;  %vm16353_vm5 = vmmov %vm16235_vm0 }
 0x336   : > { %10323 = vmatprep.mubr.msk.bf16.mxu0 %vm16334_vm9, %v16333_v38  ;;  %v5180_v61 = vpop.f32.mrf.mxu1  ;;  %v7656_v38 = vrot.slane %v7654_v50, 2  ;;  %v7675_v50 = vshll.u32 %v14387_v15, 16  ;;  %vm16354_vm9 = vmmov %vm16235_vm0 }
 0x337   : > { %v14603_v12 = vadd.f32 %v14405_v49, %v5180_v61  ;;  %v14618_v39 = vpop.f32.mrf.mxu0  ;;  %v7659_v59 = vrot.slane %v7657_v34, 3  ;;  %v16339_v61 = vld [vmem:[#allocation34_spill] sm:$0xff]  ;;  %v6873_v34 = vrot.slane %v14283_v57, 2 }
 0x338   : > { %v10082_v53 = vpop.f32.mrf.mxu1 }
 0x339   : > { %v14612_v6 = vadd.f32 %v14419_v16, %v10082_v53  ;;  %v7663_v16 = vshrl.u32 %v14383_v4, 16  ;;  %v7666_v53 = vshll.u32 %v14383_v4, 16  ;;  %v7660_v3 = vor.u32 %v7659_v59, %v7656_v38 }
 0x33a   : > { %v14616_v49 = vpop.f32.mrf.mxu1 }
 0x33b   : > { %10272 = vmatmul.mubr.msk.bf16.gmra.mxu1 %vm16336_vm8, %v16335_v56  ;;  %v7648_v56 = vrot.slane %v7646_v13, 2  ;;  %v7665_v38 = vrot.slane %v7663_v16, 2  ;;  %v7668_v59 = vrot.slane %v7666_v53, 3  ;;  %v7684_v16 = vshll.u32 %v14389_v11, 16  ;;  %vm16355_vm8 = vmmov %vm16235_vm0 }
 0x33c   : > { %10275 = vmatprep.mubr.msk.bf16.mxu1 %vm16235_vm0, %v14269_v28  ;;  %v14626_v28 = vpop.f32.mrf.mxu0 }
 0x33d   : > { %10324 = vmatmul.mubr.msk.bf16.gmra.mxu0 %vm16338_vm13, %v16337_v8  ;;  %v7672_v8 = vshrl.u32 %v14387_v15, 16  ;;  %v7652_v42 = vor.u32 %v7651_v51, %v7648_v56  ;;  %v7677_v56 = vrot.slane %v7675_v50, 3  ;;  %vm16356_vm13 = vmmov %vm16235_vm0 }
 0x33e   : > { %10327 = vmatprep.mubr.msk.bf16.mxu0 %vm16340_vm1, %v16339_v61  ;;  %v14644_v57 = vpop.f32.mrf.mxu0  ;;  %vm16357_vm1 = vmmov %vm16235_vm0 }
 0x33f   : > { %v10085_v18 = vpop.f32.mrf.mxu1  ;;  %v7674_v51 = vrot.slane %v7672_v8, 2  ;;  %v7686_v8 = vrot.slane %v7684_v16, 3 }
 0x340   : > { %v14629_v31 = vadd.f32 %v14502_v36, %v10085_v18  ;;  %v16343_v18 = vrot.slane %v14237_v48, 2  ;;  %v7681_v48 = vshrl.u32 %v14389_v11, 16  ;;  %v14654_v53 = vpop.f32.mrf.mxu0 }
 0x341   : > { %v5196_v13 = vpop.f32.mrf.mxu1 }
 0x342   : > { %v14637_v61 = vadd.f32 %v14523_v63, %v5196_v13  ;;  %v6874_v36 = vsel %vm6837_vm15, %v16343_v18, %v6873_v34  ;;  %v7678_v34 = vor.u32 %v7677_v56, %v7674_v51  ;;  %v7690_v13 = vshrl.u32 %v14391_v19, 16  ;;  %v14663_v50 = vpop.f32.mrf.mxu0 }
 0x343   : > { %10276 = vmatmul.mubr.msk.bf16.gmra.mxu1 %vm16341_vm14, %v14293_v58  ;;  %v10086_v46 = vpop.f32.mrf.mxu1  ;;  %v7661_v58 = vsel %vm7644_vm2, %v7652_v42, %v7660_v3  ;;  %v7693_v18 = vshll.u32 %v14391_v19, 16  ;;  %v7304_v56 = vrot.slane %v14598_v20, 2  ;;  %vm16359_vm14 = vmmov %vm16235_vm0 }
 0x344   : > { %10279 = vmatprep.mubr.msk.bf16.mxu1 %vm16342_vm12, %v14302_v27  ;;  %v14649_v63 = vadd.f32 %v14535_v54, %v10086_v46  ;;  %v7669_v27 = vor.u32 %v7668_v59, %v7665_v38  ;;  %v7683_v54 = vrot.slane %v7681_v48, 2  ;;  %v7305_v59 = vrot.slane %v14381_v55, 2  ;;  %vm16360_vm12 = vmmov %vm16235_vm0 }
 0x345   : > { %10328 = vmatmul.mubr.msk.bf16.gmra.mxu0 %vm16344_vm7, %v6874_v36  ;;  %v7692_v36 = vrot.slane %v7690_v13, 2  ;;  %v7695_v38 = vrot.slane %v7693_v18, 3  ;;  %v14674_v48 = vpop.f32.mrf.mxu1  ;;  %v16352_v18 = vld [vmem:[#allocation25_spill] sm:$0xff]  ;;  %vm16361_vm7 = vmmov %vm16235_vm0 }
 0x346   : > { %10383 = vmatprep.mubr.msk.bf16.mxu0 %vm16345_vm6, %v7661_v58  ;;  %v7670_v46 = vsel %vm7644_vm2, %v7660_v3, %v7669_v27  ;;  %v7679_v42 = vsel %vm7644_vm2, %v7669_v27, %v7678_v34  ;;  %v16350_v58 = vld [vmem:[#allocation43_spill] sm:$0xff]  ;;  %v14671_v3 = vpop.f32.mrf.mxu0  ;;  %v7306_v55 = vsel %vm6837_vm15, %v7304_v56, %v7305_v59  ;;  %v7307_v56 = vrot.slane %v14383_v4, 2  ;;  %vm16362_vm6 = vmmov %vm16235_vm0 }
 0x347   : > { %v7699_v51 = vshrl.u32 %v16350_v58, 16  ;;  %v7696_v16 = vor.u32 %v7695_v38, %v7692_v36  ;;  %v7729_v4 = vshll.u32 %v14411_v22, 16 }
 0x34b   : > { %10280 = vmatmul.mubr.msk.bf16.gmra.mxu1 %vm16346_vm4, %v14313_v35  ;;  %v7687_v35 = vor.u32 %v7686_v8, %v7683_v54  ;;  %v7701_v8 = vrot.slane %v7699_v51, 2  ;;  %vm16363_vm4 = vmmov %vm16235_vm0 }
 0x34c   : > { %10283 = vmatprep.mubr.msk.bf16.mxu1 %vm16347_vm3, %v14318_v52  ;;  %v7702_v52 = vshll.u32 %v16350_v58, 16  ;;  %vm16364_vm3 = vmmov %vm16235_vm0 }
 0x34d   : > { %10384 = vmatmul.mubr.msk.bf16.vlgmr.msra.gmra.mxu0 %vm16348_vm11, %v7670_v46  ;;  %v16351_v46 = vld [vmem:[#allocation35_spill] sm:$0xff]  ;;  %v7688_v54 = vsel %vm7644_vm2, %v7678_v34, %v7687_v35  ;;  %v7697_v36 = vsel %vm7644_vm2, %v7687_v35, %v7696_v16  ;;  %v7309_v34 = vrot.slane %v14387_v15, 2  ;;  %v7720_v35 = vshll.u32 %v14409_v14, 16  ;;  %vm16365_vm11 = vmmov %vm16235_vm0 }
 0x34e   : > { %10387 = vmatprep.mubr.msk.bf16.mxu0 %vm16349_vm10, %v7679_v42  ;;  %v7708_v27 = vshrl.u32 %v16351_v46, 16  ;;  %v7711_v13 = vshll.u32 %v16351_v46, 16  ;;  %v7704_v42 = vrot.slane %v7702_v52, 3  ;;  %v10665_v15 = vld [vmem:[%s15570_s4 + $0x110] sm:$0xff]   ;;  %vm16366_vm10 = vmmov %vm16235_vm0 }
 0x34f   : > { %v14683_v30 = vpop.f32.mrf.mxu0 }
 0x350   : > { %v7710_v38 = vrot.slane %v7708_v27, 2  ;;  %v7713_v10 = vrot.slane %v7711_v13, 3 }
 0x351   : > { %v14698_v27 = vpop.f32.mrf.mxu0 }
 0x353   : > { %10284 = vmatmul.mubr.msk.bf16.gmra.mxu1 %vm16353_vm5, %v16352_v18  ;;  %v7705_v18 = vor.u32 %v7704_v42, %v7701_v8  ;;  %v7310_v42 = vsel %vm6837_vm15, %v7307_v56, %v7309_v34  ;;  %vm16367_vm5 = vmmov %vm16235_vm0 }
 0x354   : > { %10339 = vmatprep.mubr.msk.bf16.mxu1 %vm16354_vm9, %v7306_v55  ;;  %v7717_v55 = vshrl.u32 %v14409_v14, 16  ;;  %vm16368_vm9 = vmmov %vm16235_vm0 }
 0x355   : > { %10388 = vmatmul.mubr.msk.bf16.gmra.mxu0 %vm16355_vm8, %v7688_v54  ;;  %v7726_v54 = vshrl.u32 %v14411_v22, 16  ;;  %vm16369_vm8 = vmmov %vm16235_vm0 }
 0x356   : > { %v10089_v20 = vpop.f32.mrf.mxu1  ;;  %10391 = vmatprep.mubr.msk.bf16.mxu0 %vm16235_vm0, %v7697_v36  ;;  %v7706_v36 = vsel %vm7644_vm2, %v7696_v16, %v7705_v18  ;;  %v7313_v16 = vrot.slane %v14391_v19, 2 }
 0x357   : > { %v14688_v40 = vadd.f32 %v14559_v60, %v10089_v20  ;;  %v7714_v60 = vor.u32 %v7713_v10, %v7710_v38  ;;  %v7719_v38 = vrot.slane %v7717_v55, 2 }
 0x358   : > { %v5212_v51 = vpop.f32.mrf.mxu1 }
 0x359   : > { %v14694_v52 = vadd.f32 %v14568_v37, %v5212_v51  ;;  %v7308_v37 = vsel %vm6837_vm15, %v7305_v59, %v7307_v56  ;;  %v7722_v51 = vrot.slane %v7720_v35, 3  ;;  %v14717_v59 = vpop.f32.mrf.mxu0  ;;  %v7731_v56 = vrot.slane %v7729_v4, 3 }
 0x35a   : > { %v10090_v13 = vpop.f32.mrf.mxu1  ;;  %v7744_v4 = vshrl.u32 %v14421_v21, 16 }
 0x35b   : > { %v14707_v8 = vadd.f32 %v14574_v62, %v10090_v13  ;;  %10340 = vmatmul.mubr.msk.bf16.vlgmr.msra.gmra.mxu1 %vm16356_vm13, %v7308_v37  ;;  %v7715_v62 = vsel %vm7644_vm2, %v7705_v18, %v7714_v60  ;;  %v7728_v13 = vrot.slane %v7726_v54, 2  ;;  %v7723_v55 = vor.u32 %v7722_v51, %v7719_v38  ;;  %v14727_v35 = vpop.f32.mrf.mxu0  ;;  %vm16370_vm13 = vmmov %vm16235_vm0 }
 0x35c   : > { %v5215_v20 = vpop.f32.mrf.mxu1  ;;  %10343 = vmatprep.mubr.msk.bf16.mxu1 %vm16357_vm1, %v7310_v42  ;;  %10420 = vmatpush3.bf16.msra.mxu1 %v14542_v17  ;;  %v10670_v17 = vld [vmem:[%s15570_s4 + $0x108] sm:$0xff]   ;;  %v7735_v37 = vshrl.u32 %v14413_v25, 16  ;;  %v7738_v18 = vshll.u32 %v14413_v25, 16  ;;  %v7747_v42 = vshll.u32 %v14421_v21, 16  ;;  %vm16371_vm1 = vmmov %vm16235_vm0 }
 0x35d   : > { %v14714_v10 = vadd.f32 %v14580_v26, %v5215_v20  ;;  %10392 = vmatmul.mubr.msk.bf16.gmra.mxu0 %vm16359_vm14, %v7706_v36  ;;  %10421 = vmatprep.subr.bf16.mxu1 %v10665_v15  ;;  %v7311_v26 = vrot.slane %v14389_v11, 2  ;;  %v7732_v54 = vor.u32 %v7731_v56, %v7728_v13  ;;  %v10675_v11 = vld [vmem:[%s15570_s4 + $0x100] sm:$0xff]   ;;  %v7724_v38 = vsel %vm7644_vm2, %v7714_v60, %v7723_v55  ;;  %vm16372_vm14 = vmmov %vm16235_vm0 }
 0x35e   : > { %10395 = vmatprep.mubr.msk.bf16.mxu0 %vm16360_vm12, %v7715_v62  ;;  %v7737_v62 = vrot.slane %v7735_v37, 2  ;;  %v7740_v13 = vrot.slane %v7738_v18, 3  ;;  %v7317_v37 = vrot.slane %v16351_v46, 2  ;;  %vm16374_vm12 = vmmov %vm16235_vm0 }
 0x35f   : > { %16358 = vst [vmem:[#allocation11_spill] sm:$0xff] %v14714_v10  ;;  %v7312_v19 = vsel %vm6837_vm15, %v7309_v34, %v7311_v26  ;;  %v14744_v51 = vpop.f32.mrf.mxu0  ;;  %v7733_v34 = vsel %vm7644_vm2, %v7723_v55, %v7732_v54  ;;  %v7749_v10 = vrot.slane %v7747_v42, 3  ;;  %v7753_v55 = vshrl.u32 %v14423_v33, 16 }
 0x360   : > { %10422 = vmatpush3.bf16.msra.mxu1 %v10665_v15  ;;  %v7314_v15 = vsel %vm6837_vm15, %v7311_v26, %v7313_v16  ;;  %v7315_v26 = vrot.slane %v16350_v58, 2  ;;  %v7741_v18 = vor.u32 %v7740_v13, %v7737_v62  ;;  %v7762_v58 = vshrl.u32 %v14425_v44, 16 }
 0x361   : > { %10423 = vmatprep.subr.bf16.mxu1 %v10670_v17 }
 0x362   : > { %v7318_v62 = vsel %vm6837_vm15, %v7315_v26, %v7317_v37 }
 0x363   : > { %v10093_v20 = vpop.f32.mrf.mxu1  ;;  %10344 = vmatmul.mubr.msk.bf16.gmra.mxu1 %vm16361_vm7, %v7312_v19  ;;  %v7746_v19 = vrot.slane %v7744_v4, 2  ;;  %v7756_v4 = vshll.u32 %v14423_v33, 16  ;;  %vm16375_vm7 = vmmov %vm16235_vm0 }
 0x364   : > { %v14740_v36 = vadd.f32 %v14588_v0, %v10093_v20  ;;  %10347 = vmatprep.mubr.msk.bf16.mxu1 %vm16362_vm6, %v7314_v15  ;;  %10424 = vmatpush3.bf16.msra.mxu1 %v10670_v17  ;;  %v14757_v20 = vpop.f32.mrf.mxu0  ;;  %v7765_v15 = vshll.u32 %v14425_v44, 16  ;;  %vm16377_vm6 = vmmov %vm16235_vm0 }
 0x365   : > { %v5228_v56 = vpop.f32.mrf.mxu1  ;;  %10396 = vmatmul.mubr.msk.bf16.gmra.mxu0 %vm16363_vm4, %v7724_v38  ;;  %10425 = vmatprep.subr.bf16.mxu1 %v10675_v11  ;;  %v7750_v42 = vor.u32 %v7749_v10, %v7746_v19  ;;  %v7742_v10 = vsel %vm7644_vm2, %v7732_v54, %v7741_v18  ;;  %v7764_v19 = vrot.slane %v7762_v58, 2  ;;  %v7321_v54 = vrot.slane %v14411_v22, 2  ;;  %vm16378_vm4 = vmmov %vm16235_vm0 }
 0x366   : > { %v14749_v0 = vadd.f32 %v14600_v43, %v5228_v56  ;;  %10399 = vmatprep.mubr.msk.bf16.mxu0 %vm16364_vm3, %v7733_v34  ;;  %v7755_v56 = vrot.slane %v7753_v55, 2  ;;  %v7758_v34 = vrot.slane %v7756_v4, 3  ;;  %v7774_v58 = vshll.u32 %v14430_v41, 16  ;;  %vm16379_vm3 = vmmov %vm16235_vm0 }
 0x367   : > { %v10094_v60 = vpop.f32.mrf.mxu1 }
 0x368   : > { %v14755_v17 = vadd.f32 %v14618_v39, %v10094_v60  ;;  %10426 = vmatpush3.bf16.msra.mxu1 %v10675_v11  ;;  %v7316_v39 = vsel %vm6837_vm15, %v7313_v16, %v7315_v26  ;;  %v14774_v11 = vpop.f32.mrf.mxu0  ;;  %v7751_v16 = vsel %vm7644_vm2, %v7741_v18, %v7750_v42  ;;  %v7767_v60 = vrot.slane %v7765_v15, 3 }
 0x369   : > { %v5231_v43 = vpop.f32.mrf.mxu1  ;;  %v7771_v18 = vshrl.u32 %v14430_v41, 16 }
 0x36a   : > { %v14764_v38 = vadd.f32 %v14626_v28, %v5231_v43  ;;  %v14787_v4 = vpop.f32.mrf.mxu0 }
 0x36b   : > { %v10097_v46 = vpop.f32.mrf.mxu1  ;;  %10348 = vmatmul.mubr.msk.bf16.gmra.mxu1 %vm16365_vm11, %v7316_v39  ;;  %v7759_v39 = vor.u32 %v7758_v34, %v7755_v56  ;;  %vm16380_vm11 = vmmov %vm16235_vm0 }
 0x36c   : > { %v14770_v13 = vadd.f32 %v14644_v57, %v10097_v46  ;;  %10351 = vmatprep.mubr.msk.bf16.mxu1 %vm16366_vm10, %v7318_v62  ;;  %v7319_v57 = vrot.slane %v14409_v14, 2  ;;  %v7780_v46 = vshrl.u32 %v14432_v1, 16  ;;  %v7783_v14 = vshll.u32 %v14432_v1, 16  ;;  %vm16381_vm10 = vmmov %vm16235_vm0 }
 0x36d   : > { %v5244_v28 = vpop.f32.mrf.mxu1  ;;  %10400 = vmatmul.mubr.msk.bf16.gmra.mxu0 %vm16367_vm5, %v7742_v10  ;;  %vm16382_vm5 = vmmov %vm16235_vm0 }
 0x36e   : > { %v14779_v26 = vadd.f32 %v14654_v53, %v5244_v28  ;;  %10403 = vmatprep.mubr.msk.bf16.mxu0 %vm16368_vm9, %v7751_v16  ;;  %v7768_v53 = vor.u32 %v7767_v60, %v7764_v19  ;;  %v7320_v22 = vsel %vm6837_vm15, %v7317_v37, %v7319_v57  ;;  %v7322_v10 = vsel %vm6837_vm15, %v7319_v57, %v7321_v54  ;;  %vm16383_vm9 = vmmov %vm16235_vm0 }
 0x36f   : > { %v10098_v43 = vpop.f32.mrf.mxu1  ;;  %v7760_v28 = vsel %vm7644_vm2, %v7750_v42, %v7759_v39  ;;  %v7773_v16 = vrot.slane %v7771_v18, 2  ;;  %v7776_v19 = vrot.slane %v7774_v58, 3  ;;  %v7782_v37 = vrot.slane %v7780_v46, 2 }
 0x370   : > { %v14785_v55 = vadd.f32 %v14663_v50, %v10098_v43  ;;  %v7785_v43 = vrot.slane %v7783_v14, 3  ;;  %v7325_v42 = vrot.slane %v14421_v21, 2  ;;  %v7792_v46 = vshll.u32 %v14445_v47, 16 }
 0x371   : > { %v5247_v15 = vpop.f32.mrf.mxu1 }
 0x372   : > { %v14794_v62 = vadd.f32 %v14671_v3, %v5247_v15  ;;  %v7769_v3 = vsel %vm7644_vm2, %v7759_v39, %v7768_v53  ;;  %v7789_v39 = vshrl.u32 %v14445_v47, 16 }
 0x373   : > { %v10101_v50 = vpop.f32.mrf.mxu1  ;;  %10352 = vmatmul.mubr.msk.bf16.gmra.mxu1 %vm16369_vm8, %v7320_v22  ;;  %vm16384_vm8 = vmmov %vm16235_vm0 }
 0x374   : > { %v14800_v56 = vadd.f32 %v14683_v30, %v10101_v50  ;;  %10355 = vmatprep.mubr.msk.bf16.mxu1 %vm16235_vm0, %v7322_v10  ;;  %v10153_v34 = vpop.f32.mrf.mxu0  ;;  %v7323_v30 = vrot.slane %v14413_v25, 2  ;;  %v7777_v50 = vor.u32 %v7776_v19, %v7773_v16  ;;  %v7801_v16 = vshll.u32 %v14458_v5, 16 }
 0x375   : > { %v5260_v60 = vpop.f32.mrf.mxu1  ;;  %10404 = vmatmul.mubr.msk.bf16.gmra.mxu0 %vm16370_vm13, %v7760_v28  ;;  %vm16387_vm13 = vmmov %vm16235_vm0 }
 0x376   : > { %v14807_v15 = vadd.f32 %v14698_v27, %v5260_v60  ;;  %10407 = vmatprep.mubr.msk.bf16.mxu0 %vm16371_vm1, %v7769_v3  ;;  %v5529_v57 = vpop.f32.mrf.mxu0  ;;  %v7786_v27 = vor.u32 %v7785_v43, %v7782_v37  ;;  %v7324_v25 = vsel %vm6837_vm15, %v7321_v54, %v7323_v30  ;;  %v7326_v21 = vsel %vm6837_vm15, %v7323_v30, %v7325_v42  ;;  %vm16389_vm1 = vmmov %vm16235_vm0 }
 0x377   : > { %v10102_v22 = vpop.f32.mrf.mxu1  ;;  %v7791_v37 = vrot.slane %v7789_v39, 2  ;;  %v7794_v54 = vrot.slane %v7792_v46, 3 }
 0x378   : > { %v14813_v18 = vadd.f32 %v14717_v59, %v10102_v22  ;;  %v10154_v58 = vpop.f32.mrf.mxu0  ;;  %v7798_v59 = vshrl.u32 %v14458_v5, 16  ;;  %v7787_v22 = vsel %vm7644_vm2, %v7777_v50, %v7786_v27 }
 0x379   : > { %v5263_v14 = vpop.f32.mrf.mxu1 }
 0x37a   : > { %v14818_v10 = vadd.f32 %v14727_v35, %v5263_v14  ;;  %v5532_v28 = vpop.f32.mrf.mxu0  ;;  %v7778_v35 = vsel %vm7644_vm2, %v7768_v53, %v7777_v50  ;;  %v7327_v14 = vrot.slane %v14423_v33, 2  ;;  %v7803_v53 = vrot.slane %v7801_v16, 3 }
 0x37b   : > { %v10105_v60 = vpop.f32.mrf.mxu1  ;;  %10356 = vmatmul.mubr.msk.bf16.gmra.mxu1 %vm16372_vm14, %v7324_v25  ;;  %v7807_v50 = vshrl.u32 %v14460_v7, 16  ;;  %vm16393_vm14 = vmmov %vm16235_vm0 }
 0x37c   : > { %v14826_v19 = vadd.f32 %v14744_v51, %v10105_v60  ;;  %10359 = vmatprep.mubr.msk.bf16.mxu1 %vm16374_vm12, %v7326_v21  ;;  %v10209_v3 = vpop.f32.mrf.mxu0  ;;  %v7329_v60 = vrot.slane %v14425_v44, 2  ;;  %v7800_v21 = vrot.slane %v7798_v59, 2  ;;  %vm16396_vm12 = vmmov %vm16235_vm0 }
 0x37d   : > { %v5276_v43 = vpop.f32.mrf.mxu1  ;;  %10408 = vmatmul.mubr.msk.bf16.gmra.mxu0 %vm16375_vm7, %v7778_v35  ;;  %v7795_v35 = vor.u32 %v7794_v54, %v7791_v37  ;;  %v7809_v37 = vrot.slane %v7807_v50, 2  ;;  %vm16398_vm7 = vmmov %vm16235_vm0 }
 0x37e   : > { %16373 = vst [vmem:[#allocation63_spill] sm:$0xff] %v14826_v19  ;;  %v14833_v30 = vadd.f32 %v14757_v20, %v5276_v43  ;;  %10411 = vmatprep.mubr.msk.bf16.mxu0 %vm16377_vm6, %v7787_v22  ;;  %v6172_v51 = vpop.f32.mrf.mxu0  ;;  %v7810_v20 = vshll.u32 %v14460_v7, 16  ;;  %v7328_v22 = vsel %vm6837_vm15, %v7325_v42, %v7327_v14  ;;  %v7330_v44 = vsel %vm6837_vm15, %v7327_v14, %v7329_v60  ;;  %vm16400_vm6 = vmmov %vm16235_vm0 }
 0x37f   : > { %v10106_v25 = vpop.f32.mrf.mxu1  ;;  %v7796_v7 = vsel %vm7644_vm2, %v7786_v27, %v7795_v35  ;;  %v7333_v14 = vrot.slane %v14432_v1, 2 }
 0x380   : > { %16376 = vst [vmem:[#allocation61_spill] sm:$0xff] %v14833_v30  ;;  %v14839_v39 = vadd.f32 %v14774_v11, %v10106_v25  ;;  %v10210_v46 = vpop.f32.mrf.mxu0  ;;  %v7804_v11 = vor.u32 %v7803_v53, %v7800_v21  ;;  %v7812_v54 = vrot.slane %v7810_v20, 3 }
 0x381   : > { %v5279_v43 = vpop.f32.mrf.mxu1 }
 0x382   : > { %v14844_v33 = vadd.f32 %v14787_v4, %v5279_v43  ;;  %v6175_v30 = vpop.f32.mrf.mxu0  ;;  %v7805_v42 = vsel %vm7644_vm2, %v7795_v35, %v7804_v11  ;;  %v7331_v43 = vrot.slane %v14430_v41, 2  ;;  %v7813_v53 = vor.u32 %v7812_v54, %v7809_v37 }
 0x383   : > { %v10109_v19 = vpop.f32.mrf.mxu1  ;;  %10360 = vmatmul.mubr.msk.bf16.gmra.mxu1 %vm16378_vm4, %v7328_v22  ;;  %vm16402_vm4 = vmmov %vm16235_vm0 }
 0x384   : > { %v14849_v59 = vadd.f32 %v10153_v34, %v10109_v19  ;;  %10363 = vmatprep.mubr.msk.bf16.mxu1 %vm16379_vm3, %v7330_v44  ;;  %v10213_v16 = vpop.f32.mrf.mxu0  ;;  %v7332_v22 = vsel %vm6837_vm15, %v7329_v60, %v7331_v43  ;;  %v7334_v41 = vsel %vm6837_vm15, %v7331_v43, %v7333_v14  ;;  %v7814_v1 = vsel %vm7644_vm2, %v7804_v11, %v7813_v53  ;;  %vm16386_vm2 = vmmov %vm16235_vm0 }
 0x385   : > { %v5292_v4 = vpop.f32.mrf.mxu1  ;;  %10412 = vmatmul.mubr.msk.bf16.gmra.mxu0 %vm16380_vm11, %v7796_v7  ;;  %v7335_v60 = vrot.slane %v14445_v47, 2  ;;  %v7337_v53 = vrot.slane %v14458_v5, 2  ;;  %vm16404_vm3 = vmmov %vm16235_vm0 }
 0x386   : > { %v14855_v25 = vadd.f32 %v5529_v57, %v5292_v4  ;;  %10415 = vmatprep.mubr.msk.bf16.mxu0 %vm16381_vm10, %v7805_v42  ;;  %v6188_v34 = vpop.f32.mrf.mxu0  ;;  %v16385_v42 = vld [vmem:[#allocation46_spill] sm:$0xff]  ;;  %vm16406_vm11 = vmmov %vm16235_vm0 }
 0x387   : > { %v10110_v19 = vpop.f32.mrf.mxu1  ;;  %v5405_v43 = vadd.f32 %v16385_v42, %v14582_v32  ;;  %vm16408_vm10 = vmmov %vm16235_vm0 }
 0x388   : > { %v14860_v21 = vadd.f32 %v10154_v58, %v10110_v19  ;;  %v10214_v27 = vpop.f32.mrf.mxu0 }
 0x389   : > { %v5295_v50 = vpop.f32.mrf.mxu1 }
 0x38a   : > { %v14862_v20 = vadd.f32 %v5532_v28, %v5295_v50  ;;  %v6191_v35 = vpop.f32.mrf.mxu0 }
 0x38b   : > { %v10165_v57 = vpop.f32.mrf.mxu1  ;;  %10364 = vmatmul.mubr.msk.bf16.gmra.mxu1 %vm16382_vm5, %v7332_v22  ;;  %vm16411_vm5 = vmmov %vm16235_vm0 }
 0x38c   : > { %v5851_v44 = vadd.f32 %v10165_v57, %v14550_v29  ;;  %10367 = vmatprep.mubr.msk.bf16.mxu1 %vm16383_vm9, %v7334_v41  ;;  %v10677_v57 = vld [vmem:[#allocation2 + $0xa0] ss:$0 sps:$4 sm:$0x33]   ;;  %v7338_v41 = vsel %vm6837_vm15, %v7335_v60, %v7337_v53  ;;  %vm16414_vm9 = vmmov %vm16235_vm0 }
 0x38d   : > { %v5706_v58 = vpop.f32.mrf.mxu1  ;;  %v10217_v7 = vpop.f32.mrf.mxu0  ;;  %10416 = vmatmul.mubr.msk.bf16.gmra.mxu0 %vm16384_vm8, %v7814_v1  ;;  %vm16416_vm8 = vmmov %vm16235_vm0 }
 0x38e   : > { %v5849_v28 = vadd.f32 %v5706_v58, %v14557_v45  ;;  %v14873_v37 = vadd.f32 %v10209_v3, %v5851_v44  ;;  %v7336_v45 = vsel %vm6837_vm15, %v7333_v14, %v7335_v60  ;;  %v7339_v14 = vrot.slane %v10677_v57, 2 }
 0x38f   : > { %v10166_v54 = vpop.f32.mrf.mxu1  ;;  %v6204_v4 = vpop.f32.mrf.mxu0 }
 0x390   : > { %v5852_v29 = vadd.f32 %v10166_v54, %v14566_v23  ;;  %v14878_v19 = vadd.f32 %v6172_v51, %v5849_v28  ;;  %v5421_v54 = vadd.f32 %v14456_v24, %v14616_v49 }
 0x391   : > { %v5709_v11 = vpop.f32.mrf.mxu1  ;;  %v10218_v50 = vpop.f32.mrf.mxu0 }
 0x392   : > { %v5850_v22 = vadd.f32 %v5709_v11, %v5405_v43  ;;  %v14882_v47 = vadd.f32 %v10210_v46, %v5852_v29  ;;  %v7340_v29 = vsel %vm6837_vm15, %v7337_v53, %v7339_v14  ;;  %vm16391_vm15 = vmmov %vm16235_vm0 }
 0x393   : > { %v10169_v3 = vpop.f32.mrf.mxu1  ;;  %10368 = vmatmul.mubr.msk.bf16.gmra.mxu1 %vm16386_vm2, %v7336_v45  ;;  %v6207_v32 = vpop.f32.mrf.mxu0  ;;  %v16388_v45 = vld [vmem:[#allocation47_spill] sm:$0xff]  ;;  %vm16418_vm2 = vmmov %vm16235_vm0 }
 0x394   : > { %v5855_v23 = vadd.f32 %v10169_v3, %v14595_v2  ;;  %10371 = vmatprep.mubr.msk.bf16.mxu1 %vm16235_vm0, %v7338_v41  ;;  %v14888_v51 = vadd.f32 %v6175_v30, %v5850_v22  ;;  %v5437_v3 = vadd.f32 %v14546_v9, %v14674_v48 }
 0x395   : > { %v5722_v5 = vpop.f32.mrf.mxu1  ;;  %v10221_v44 = vpop.f32.mrf.mxu0 }
 0x396   : > { %v5853_v1 = vadd.f32 %v5722_v5, %v14603_v12  ;;  %v14891_v58 = vadd.f32 %v10213_v16, %v5855_v23 }
 0x397   : > { %v10170_v46 = vpop.f32.mrf.mxu1  ;;  %v6220_v28 = vpop.f32.mrf.mxu0 }
 0x398   : > { %v5856_v60 = vadd.f32 %v10170_v46, %v14612_v6  ;;  %v14896_v42 = vadd.f32 %v6188_v34, %v5853_v1  ;;  %v16390_v46 = vld [vmem:[#allocation44_spill] sm:$0xff] }
 0x399   : > { %v5725_v2 = vpop.f32.mrf.mxu1  ;;  %v10222_v43 = vpop.f32.mrf.mxu0 }
 0x39a   : > { %v5854_v30 = vadd.f32 %v5725_v2, %v5421_v54  ;;  %v14899_v11 = vadd.f32 %v10214_v27, %v5856_v60  ;;  %v16392_v54 = vld [vmem:[#allocation40_spill] sm:$0xff] }
 0x39b   : > { %v10173_v12 = vpop.f32.mrf.mxu1  ;;  %10372 = vmatmul.mubr.msk.bf16.gmra.mxu1 %vm16387_vm13, %v7340_v29  ;;  %v6223_v16 = vpop.f32.mrf.mxu0  ;;  %vm16421_vm13 = vmmov %vm16235_vm0 }
 0x39c   : > { %v5859_v22 = vadd.f32 %v10173_v12, %v14629_v31  ;;  %10427 = vmatprep.mubr.msk.bf16.mxu1 %vm16389_vm1, %v16388_v45  ;;  %v14905_v24 = vadd.f32 %v6191_v35, %v5854_v30  ;;  %vm16423_vm1 = vmmov %vm16235_vm0 }
 0x39d   : > { %v5738_v6 = vpop.f32.mrf.mxu1  ;;  %v10225_v49 = vpop.f32.mrf.mxu0 }
 0x39e   : > { %v5857_v34 = vadd.f32 %v5738_v6, %v14637_v61  ;;  %v14908_v57 = vadd.f32 %v10217_v7, %v5859_v22 }
 0x39f   : > { %v10174_v53 = vpop.f32.mrf.mxu1  ;;  %v6236_v27 = vpop.f32.mrf.mxu0 }
 0x3a0   : > { %v5860_v41 = vadd.f32 %v10174_v53, %v14649_v63  ;;  %v14913_v23 = vadd.f32 %v6204_v4, %v5857_v34  ;;  %v16395_v34 = vld [vmem:[#allocation55_spill] sm:$0xff] }
 0x3a1   : > { %v5741_v31 = vpop.f32.mrf.mxu1  ;;  %v10226_v5 = vpop.f32.mrf.mxu0 }
 0x3a2   : > { %v5858_v1 = vadd.f32 %v5741_v31, %v5437_v3  ;;  %v14915_v35 = vadd.f32 %v10218_v50, %v5860_v41 }
 0x3a3   : > { %v10177_v14 = vpop.f32.mrf.mxu1  ;;  %10428 = vmatmul.mubr.msk.bf16.vlgmr.msra.gmra.mxu1 %vm16391_vm15, %v16390_v46  ;;  %v6239_v61 = vpop.f32.mrf.mxu0  ;;  %vm16425_vm15 = vmmov %vm16235_vm0 }
 0x3a4   : > { %v5863_v7 = vadd.f32 %v10177_v14, %v14688_v40  ;;  %10431 = vmatprep.mubr.msk.bf16.mxu1 %vm16393_vm14, %v16392_v54  ;;  %v14922_v9 = vadd.f32 %v6207_v32, %v5858_v1  ;;  %v16394_v40 = vld [vmem:[#allocation11_spill] sm:$0xff]  ;;  %vm16431_vm14 = vmmov %vm16235_vm0 }
 0x3a5   : > { %v5754_v63 = vpop.f32.mrf.mxu1  ;;  %v10229_v48 = vpop.f32.mrf.mxu0 }
 0x3a6   : > { %v5861_v4 = vadd.f32 %v5754_v63, %v14694_v52  ;;  %v14925_v60 = vadd.f32 %v10221_v44, %v5863_v7  ;;  %v16397_v44 = vld [vmem:[#allocation52_spill] sm:$0xff] }
 0x3a7   : > { %v10178_v50 = vpop.f32.mrf.mxu1  ;;  %v6252_v2 = vpop.f32.mrf.mxu0 }
 0x3a8   : > { %v5864_v30 = vadd.f32 %v10178_v50, %v14707_v8  ;;  %v14928_v29 = vadd.f32 %v6220_v28, %v5861_v4  ;;  %v16399_v4 = vld [vmem:[#allocation49_spill] sm:$0xff] }
 0x3a9   : > { %v5757_v12 = vpop.f32.mrf.mxu1  ;;  %v10230_v22 = vpop.f32.mrf.mxu0 }
 0x3aa   : > { %v5862_v45 = vadd.f32 %v5757_v12, %v16394_v40  ;;  %v14931_v6 = vadd.f32 %v10222_v43, %v5864_v30 }
 0x3ab   : > { %v10181_v32 = vpop.f32.mrf.mxu1  ;;  %10432 = vmatmul.mubr.msk.bf16.gmra.mxu1 %vm16396_vm12, %v16395_v34  ;;  %v6255_v53 = vpop.f32.mrf.mxu0  ;;  %vm16432_vm12 = vmmov %vm16235_vm0 }
 0x3ac   : > { %v5867_v52 = vadd.f32 %v10181_v32, %v14740_v36  ;;  %10435 = vmatprep.mubr.msk.bf16.mxu1 %vm16398_vm7, %v16397_v44  ;;  %v14938_v3 = vadd.f32 %v6223_v16, %v5862_v45  ;;  %vm16433_vm7 = vmmov %vm16235_vm0 }
 0x3ad   : > { %v5770_v8 = vpop.f32.mrf.mxu1  ;;  %v10233_v28 = vpop.f32.mrf.mxu0 }
 0x3ae   : > { %v5865_v41 = vadd.f32 %v5770_v8, %v14749_v0  ;;  %v14941_v31 = vadd.f32 %v10225_v49, %v5867_v52  ;;  %v16401_v49 = vld [vmem:[#allocation7_spill] sm:$0xff]  ;;  %v16403_v8 = vld [vmem:[#allocation6_spill] sm:$0xff] }
 0x3af   : > { %v10182_v43 = vpop.f32.mrf.mxu1  ;;  %v6268_v1 = vpop.f32.mrf.mxu0 }
 0x3b0   : > { %v5868_v14 = vadd.f32 %v10182_v43, %v14755_v17  ;;  %v14944_v46 = vadd.f32 %v6236_v27, %v5865_v41 }
 0x3b1   : > { %v5773_v7 = vpop.f32.mrf.mxu1  ;;  %v10234_v54 = vpop.f32.mrf.mxu0 }
 0x3b2   : > { %v5866_v36 = vadd.f32 %v5773_v7, %v14764_v38  ;;  %v14947_v63 = vadd.f32 %v10226_v5, %v5868_v14 }
 0x3b3   : > { %v10185_v16 = vpop.f32.mrf.mxu1  ;;  %10436 = vmatmul.mubr.msk.bf16.gmra.mxu1 %vm16400_vm6, %v16399_v4  ;;  %v6271_v50 = vpop.f32.mrf.mxu0  ;;  %vm16434_vm6 = vmmov %vm16235_vm0 }
 0x3b4   : > { %v5871_v0 = vadd.f32 %v10185_v16, %v14770_v13  ;;  %10439 = vmatprep.mubr.msk.bf16.mxu1 %vm16402_vm4, %v16401_v49  ;;  %v14954_v30 = vadd.f32 %v6239_v61, %v5866_v36  ;;  %vm16435_vm4 = vmmov %vm16235_vm0 }
 0x3b5   : > { %v5786_v17 = vpop.f32.mrf.mxu1  ;;  %v10237_v27 = vpop.f32.mrf.mxu0 }
 0x3b6   : > { %v5869_v12 = vadd.f32 %v5786_v17, %v14779_v26  ;;  %v14957_v40 = vadd.f32 %v10229_v48, %v5871_v0  ;;  %v16405_v48 = vld [vmem:[#allocation51_spill] sm:$0xff]  ;;  %v16407_v17 = vld [vmem:[#allocation57_spill] sm:$0xff] }
 0x3b7   : > { %v10186_v38 = vpop.f32.mrf.mxu1  ;;  %v6284_v5 = vpop.f32.mrf.mxu0 }
 0x3b8   : > { %v5872_v45 = vadd.f32 %v10186_v38, %v14785_v55  ;;  %v14960_v32 = vadd.f32 %v6252_v2, %v5869_v12  ;;  %v16410_v38 = vld [vmem:[#allocation54_spill] sm:$0xff] }
 0x3b9   : > { %v5789_v34 = vpop.f32.mrf.mxu1  ;;  %v10238_v52 = vpop.f32.mrf.mxu0 }
 0x3ba   : > { %v5870_v13 = vadd.f32 %v5789_v34, %v14794_v62  ;;  %v14963_v44 = vadd.f32 %v10230_v22, %v5872_v45  ;;  %v16412_v34 = vld [vmem:[#allocation61_spill] sm:$0xff] }
 0x3bb   : > { %v10189_v61 = vpop.f32.mrf.mxu1  ;;  %10440 = vmatmul.mubr.msk.bf16.gmra.mxu1 %vm16404_vm3, %v16403_v8  ;;  %v6287_v41 = vpop.f32.mrf.mxu0  ;;  %vm16436_vm3 = vmmov %vm16235_vm0 }
 0x3bc   : > { %v5875_v26 = vadd.f32 %v10189_v61, %v14800_v56  ;;  %10443 = vmatprep.mubr.msk.bf16.mxu1 %vm16406_vm11, %v16405_v48  ;;  %v14970_v43 = vadd.f32 %v6255_v53, %v5870_v13  ;;  %vm16437_vm11 = vmmov %vm16235_vm0 }
 0x3bd   : > { %v5802_v55 = vpop.f32.mrf.mxu1  ;;  %v10241_v2 = vpop.f32.mrf.mxu0 }
 0x3be   : > { %v5873_v14 = vadd.f32 %v5802_v55, %v14807_v15  ;;  %v14973_v7 = vadd.f32 %v10233_v28, %v5875_v26  ;;  %v16409_v15 = vld [vmem:[#allocation63_spill] sm:$0xff] }
 0x3bf   : > { %v10190_v62 = vpop.f32.mrf.mxu1  ;;  %v6300_v22 = vpop.f32.mrf.mxu0 }
 0x3c0   : > { %v5876_v36 = vadd.f32 %v10190_v62, %v14813_v18  ;;  %v14976_v16 = vadd.f32 %v6268_v1, %v5873_v14 }
 0x3c1   : > { %v5805_v4 = vpop.f32.mrf.mxu1  ;;  %v10242_v0 = vpop.f32.mrf.mxu0 }
 0x3c2   : > { %v5874_v56 = vadd.f32 %v5805_v4, %v14818_v10  ;;  %v14979_v49 = vadd.f32 %v10234_v54, %v5876_v36  ;;  %v16413_v36 = vld [vmem:[#allocation4_spill] sm:$0xff] }
 0x3c3   : > { %v10193_v53 = vpop.f32.mrf.mxu1  ;;  %10444 = vmatmul.mubr.msk.bf16.gmra.mxu1 %vm16408_vm10, %v16407_v17  ;;  %v6303_v12 = vpop.f32.mrf.mxu0  ;;  %vm16438_vm10 = vmmov %vm16235_vm0 }
 0x3c4   : > { %v5879_v28 = vadd.f32 %v10193_v53, %v16409_v15  ;;  %10447 = vmatprep.mubr.msk.bf16.mxu1 %vm16411_vm5, %v16410_v38  ;;  %v14986_v45 = vadd.f32 %v6271_v50, %v5874_v56  ;;  %v16415_v56 = vld [vmem:[#allocation8_spill] sm:$0xff]  ;;  %vm16439_vm5 = vmmov %vm16235_vm0 }
 0x3c5   : > { %v5818_v18 = vpop.f32.mrf.mxu1  ;;  %v10297_v1 = vpop.f32.mrf.mxu0 }
 0x3c6   : > { %v5877_v13 = vadd.f32 %v5818_v18, %v16412_v34  ;;  %v14989_v61 = vadd.f32 %v10237_v27, %v5879_v28 }
 0x3c7   : > { %v10194_v10 = vpop.f32.mrf.mxu1  ;;  %v6987_v54 = vpop.f32.mrf.mxu0 }
 0x3c8   : > { %v5880_v8 = vadd.f32 %v10194_v10, %v14839_v39  ;;  %v14992_v26 = vadd.f32 %v6284_v5, %v5877_v13  ;;  %v16417_v10 = vld [vmem:[#allocation56_spill] sm:$0xff] }
 0x3c9   : > { %v5821_v48 = vpop.f32.mrf.mxu1  ;;  %v10298_v55 = vpop.f32.mrf.mxu0 }
 0x3ca   : > { %v5878_v14 = vadd.f32 %v5821_v48, %v14844_v33  ;;  %v14995_v62 = vadd.f32 %v10238_v52, %v5880_v8 }
 0x3cb   : > { %v10197_v50 = vpop.f32.mrf.mxu1  ;;  %10448 = vmatmul.mubr.msk.bf16.gmra.mxu1 %vm16414_vm9, %v16413_v36  ;;  %v6990_v4 = vpop.f32.mrf.mxu0  ;;  %vm16440_vm9 = vmmov %vm16235_vm0 }
 0x3cc   : > { %v5883_v27 = vadd.f32 %v10197_v50, %v14849_v59  ;;  %10451 = vmatprep.mubr.msk.bf16.mxu1 %vm16416_vm8, %v16415_v56  ;;  %v15002_v53 = vadd.f32 %v6287_v41, %v5878_v14  ;;  %vm16441_vm8 = vmmov %vm16235_vm0 }
 0x3cd   : > { %v5834_v39 = vpop.f32.mrf.mxu1  ;;  %v10301_v5 = vpop.f32.mrf.mxu0 }
 0x3ce   : > { %v5881_v17 = vadd.f32 %v5834_v39, %v14855_v25  ;;  %v15005_v15 = vadd.f32 %v10241_v2, %v5883_v27  ;;  %v16419_v2 = vld [vmem:[#allocation5_spill] sm:$0xff] }
 0x3cf   : > { %v10198_v33 = vpop.f32.mrf.mxu1  ;;  %v7003_v52 = vpop.f32.mrf.mxu0 }
 0x3d0   : > { %v5884_v28 = vadd.f32 %v10198_v33, %v14860_v21  ;;  %v15008_v38 = vadd.f32 %v6300_v22, %v5881_v17  ;;  %v16420_v33 = vld [vmem:[#allocation60_spill] sm:$0xff] }
 0x3d1   : > { %v5837_v18 = vpop.f32.mrf.mxu1  ;;  %v10302_v34 = vpop.f32.mrf.mxu0 }
 0x3d2   : > { %v5882_v59 = vadd.f32 %v5837_v18, %v14862_v20  ;;  %v15011_v13 = vadd.f32 %v10242_v0, %v5884_v28 }
 0x3d3   : > { %v10253_v41 = vpop.f32.mrf.mxu1  ;;  %10452 = vmatmul.mubr.msk.bf16.gmra.mxu1 %vm16418_vm2, %v16417_v10  ;;  %v7006_v8 = vpop.f32.mrf.mxu0  ;;  %vm16442_vm2 = vmmov %vm16235_vm0 }
 0x3d4   : > { %v6791_v25 = vadd.f32 %v10253_v41, %v14873_v37  ;;  %10455 = vmatprep.mubr.msk.bf16.mxu1 %vm16235_vm0, %v16419_v2  ;;  %v15018_v48 = vadd.f32 %v6303_v12, %v5882_v59 }
 0x3d5   : > { %v6646_v21 = vpop.f32.mrf.mxu1  ;;  %v10305_v22 = vpop.f32.mrf.mxu0 }
 0x3d6   : > { %v6789_v14 = vadd.f32 %v6646_v21, %v14878_v19  ;;  %v15021_v50 = vadd.f32 %v10297_v1, %v6791_v25  ;;  %v16422_v1 = vld [vmem:[#allocation58_spill] sm:$0xff] }
 0x3d7   : > { %v10254_v20 = vpop.f32.mrf.mxu1  ;;  %v7019_v0 = vpop.f32.mrf.mxu0 }
 0x3d8   : > { %v6792_v36 = vadd.f32 %v10254_v20, %v14882_v47  ;;  %v15024_v27 = vadd.f32 %v6987_v54, %v6789_v14  ;;  %v16424_v20 = vld [vmem:[#allocation53_spill] sm:$0xff] }
 0x3d9   : > { %v6649_v56 = vpop.f32.mrf.mxu1  ;;  %v10306_v39 = vpop.f32.mrf.mxu0 }
 0x3da   : > { %v6790_v37 = vadd.f32 %v6649_v56, %v14888_v51  ;;  %v15027_v17 = vadd.f32 %v10298_v55, %v6792_v36 }
 0x3db   : > { %v10257_v12 = vpop.f32.mrf.mxu1  ;;  %10456 = vmatmul.mubr.msk.bf16.gmra.mxu1 %vm16421_vm13, %v16420_v33  ;;  %v7022_v28 = vpop.f32.mrf.mxu0  ;;  %vm16443_vm13 = vmmov %vm16235_vm0 }
 0x3dc   : > { %v6795_v19 = vadd.f32 %v10257_v12, %v14891_v58  ;;  %10459 = vmatprep.mubr.msk.bf16.mxu1 %vm16423_vm1, %v16422_v1  ;;  %v15034_v18 = vadd.f32 %v6990_v4, %v6790_v37  ;;  %vm16444_vm1 = vmmov %vm16235_vm0 }
 0x3dd   : > { %v6662_v47 = vpop.f32.mrf.mxu1  ;;  %v10309_v54 = vpop.f32.mrf.mxu0 }
 0x3de   : > { %v6793_v59 = vadd.f32 %v6662_v47, %v14896_v42  ;;  %v15037_v41 = vadd.f32 %v10301_v5, %v6795_v19 }
 0x3df   : > { %v10258_v51 = vpop.f32.mrf.mxu1  ;;  %v7035_v55 = vpop.f32.mrf.mxu0 }
 0x3e0   : > { %v6796_v10 = vadd.f32 %v10258_v51, %v14899_v11  ;;  %v15040_v25 = vadd.f32 %v7003_v52, %v6793_v59 }
 0x3e1   : > { %v6665_v2 = vpop.f32.mrf.mxu1  ;;  %v10310_v21 = vpop.f32.mrf.mxu0 }
 0x3e2   : > { %v6794_v58 = vadd.f32 %v6665_v2, %v14905_v24  ;;  %v15043_v14 = vadd.f32 %v10302_v34, %v6796_v10 }
 0x3e3   : > { %v10261_v4 = vpop.f32.mrf.mxu1  ;;  %10460 = vmatmul.mubr.msk.bf16.gmra.mxu1 %vm16425_vm15, %v16424_v20  ;;  %v7038_v36 = vpop.f32.mrf.mxu0  ;;  %vm16445_vm15 = vmmov %vm16235_vm0 }
 0x3e4   : > { %v6799_v42 = vadd.f32 %v10261_v4, %v14908_v57  ;;  %v15048_v5 = vadd.f32 %v7006_v8, %v6794_v58 }
 0x3e5   : > { %v6678_v56 = vpop.f32.mrf.mxu1  ;;  %v10313_v37 = vpop.f32.mrf.mxu0 }
 0x3e6   : > { %v6797_v11 = vadd.f32 %v6678_v56, %v14913_v23  ;;  %v15051_v52 = vadd.f32 %v10305_v22, %v6799_v42 }
 0x3e7   : > { %v10262_v12 = vpop.f32.mrf.mxu1  ;;  %v7051_v33 = vpop.f32.mrf.mxu0 }
 0x3e8   : > { %v6800_v24 = vadd.f32 %v10262_v12, %v14915_v35  ;;  %v15054_v34 = vadd.f32 %v7019_v0, %v6797_v11 }
 0x3e9   : > { %v6681_v19 = vpop.f32.mrf.mxu1  ;;  %v10314_v1 = vpop.f32.mrf.mxu0 }
 0x3ea   : > { %v6798_v47 = vadd.f32 %v6681_v19, %v14922_v9  ;;  %v15057_v59 = vadd.f32 %v10306_v39, %v6800_v24 }
 0x3eb   : > { %v10265_v57 = vpop.f32.mrf.mxu1  ;;  %v7054_v8 = vpop.f32.mrf.mxu0 }
 0x3ec   : > { %v6803_v51 = vadd.f32 %v10265_v57, %v14925_v60  ;;  %v15060_v10 = vadd.f32 %v7022_v28, %v6798_v47 }
 0x3ed   : > { %v6694_v23 = vpop.f32.mrf.mxu1  ;;  %v10317_v22 = vpop.f32.mrf.mxu0 }
 0x3ee   : > { %v6801_v2 = vadd.f32 %v6694_v23, %v14928_v29  ;;  %v15063_v58 = vadd.f32 %v10309_v54, %v6803_v51 }
 0x3ef   : > { %v10266_v35 = vpop.f32.mrf.mxu1  ;;  %v7067_v0 = vpop.f32.mrf.mxu0 }
 0x3f0   : > { %v6804_v4 = vadd.f32 %v10266_v35, %v14931_v6  ;;  %v15066_v20 = vadd.f32 %v7035_v55, %v6801_v2 }
 0x3f1   : > { %v6697_v9 = vpop.f32.mrf.mxu1  ;;  %v10318_v39 = vpop.f32.mrf.mxu0 }
 0x3f2   : > { %v6802_v42 = vadd.f32 %v6697_v9, %v14938_v3  ;;  %v15069_v56 = vadd.f32 %v10310_v21, %v6804_v4 }
 0x3f3   : > { %v10269_v60 = vpop.f32.mrf.mxu1  ;;  %v7070_v28 = vpop.f32.mrf.mxu0 }
 0x3f4   : > { %v6807_v11 = vadd.f32 %v10269_v60, %v14941_v31  ;;  %v15072_v12 = vadd.f32 %v7038_v36, %v6802_v42 }
 0x3f5   : > { %v6710_v29 = vpop.f32.mrf.mxu1  ;;  %v10321_v54 = vpop.f32.mrf.mxu0 }
 0x3f6   : > { %v6805_v24 = vadd.f32 %v6710_v29, %v14944_v46  ;;  %v15075_v19 = vadd.f32 %v10313_v37, %v6807_v11 }
 0x3f7   : > { %v10270_v6 = vpop.f32.mrf.mxu1  ;;  %v7083_v55 = vpop.f32.mrf.mxu0 }
 0x3f8   : > { %v6808_v47 = vadd.f32 %v10270_v6, %v14947_v63  ;;  %v15078_v57 = vadd.f32 %v7051_v33, %v6805_v24 }
 0x3f9   : > { %v6713_v3 = vpop.f32.mrf.mxu1  ;;  %v10322_v21 = vpop.f32.mrf.mxu0 }
 0x3fa   : > { %v6806_v51 = vadd.f32 %v6713_v3, %v14954_v30  ;;  %v15081_v23 = vadd.f32 %v10314_v1, %v6808_v47 }
 0x3fb   : > { %v10273_v31 = vpop.f32.mrf.mxu1  ;;  %v7086_v36 = vpop.f32.mrf.mxu0 }
 0x3fc   : > { %v6811_v2 = vadd.f32 %v10273_v31, %v14957_v40  ;;  %v15084_v35 = vadd.f32 %v7054_v8, %v6806_v51 }
 0x3fd   : > { %v6726_v46 = vpop.f32.mrf.mxu1  ;;  %v10325_v37 = vpop.f32.mrf.mxu0 }
 0x3fe   : > { %v6809_v4 = vadd.f32 %v6726_v46, %v14960_v32  ;;  %v15087_v9 = vadd.f32 %v10317_v22, %v6811_v2 }
 0x3ff   : > { %v10274_v63 = vpop.f32.mrf.mxu1  ;;  %v7099_v33 = vpop.f32.mrf.mxu0 }
 0x400   : > { %v6812_v42 = vadd.f32 %v10274_v63, %v14963_v44  ;;  %v15090_v60 = vadd.f32 %v7067_v0, %v6809_v4 }
 0x401   : > { %v6729_v30 = vpop.f32.mrf.mxu1  ;;  %v10326_v11 = vpop.f32.mrf.mxu0 }
 0x402   : > { %v6810_v1 = vadd.f32 %v6729_v30, %v14970_v43  ;;  %v15093_v29 = vadd.f32 %v10318_v39, %v6812_v42 }
 0x403   : > { %v10277_v40 = vpop.f32.mrf.mxu1  ;;  %v7102_v6 = vpop.f32.mrf.mxu0 }
 0x404   : > { %v6815_v8 = vadd.f32 %v10277_v40, %v14973_v7  ;;  %v15096_v24 = vadd.f32 %v7070_v28, %v6810_v1 }
 0x405   : > { %v6742_v32 = vpop.f32.mrf.mxu1  ;;  %v10329_v51 = vpop.f32.mrf.mxu0 }
 0x406   : > { %v6813_v22 = vadd.f32 %v6742_v32, %v14976_v16  ;;  %v15099_v47 = vadd.f32 %v10321_v54, %v6815_v8 }
 0x407   : > { %v10278_v44 = vpop.f32.mrf.mxu1  ;;  %v7115_v46 = vpop.f32.mrf.mxu0 }
 0x408   : > { %v6816_v0 = vadd.f32 %v10278_v44, %v14979_v49  ;;  %v15102_v3 = vadd.f32 %v7083_v55, %v6813_v22 }
 0x409   : > { %v6745_v43 = vpop.f32.mrf.mxu1  ;;  %v10330_v42 = vpop.f32.mrf.mxu0 }
 0x40a   : > { %v6814_v39 = vadd.f32 %v6745_v43, %v14986_v45  ;;  %v15105_v31 = vadd.f32 %v10322_v21, %v6816_v0 }
 0x40b   : > { %v10281_v7 = vpop.f32.mrf.mxu1  ;;  %v7118_v40 = vpop.f32.mrf.mxu0 }
 0x40c   : > { %v6819_v28 = vadd.f32 %v10281_v7, %v14989_v61  ;;  %v15108_v2 = vadd.f32 %v7086_v36, %v6814_v39 }
 0x40d   : > { %v6758_v16 = vpop.f32.mrf.mxu1 }
 0x40e   : > { %v6817_v54 = vadd.f32 %v6758_v16, %v14992_v26  ;;  %v15111_v4 = vadd.f32 %v10325_v37, %v6819_v28 }
 0x40f   : > { %v10282_v49 = vpop.f32.mrf.mxu1 }
 0x410   : > { %v6820_v55 = vadd.f32 %v10282_v49, %v14995_v62  ;;  %v15114_v63 = vadd.f32 %v7099_v33, %v6817_v54 }
 0x411   : > { %v6761_v45 = vpop.f32.mrf.mxu1 }
 0x412   : > { %v6818_v21 = vadd.f32 %v6761_v45, %v15002_v53  ;;  %v15117_v30 = vadd.f32 %v10326_v11, %v6820_v55  ;;  %v15128_v53 = vpop.f32.mrf.mxu0 }
 0x413   : > { %v10285_v61 = vpop.f32.mrf.mxu1 }
 0x414   : > { %v6823_v36 = vadd.f32 %v10285_v61, %v15005_v15  ;;  %v15120_v1 = vadd.f32 %v7102_v6, %v6818_v21  ;;  %v15138_v43 = vpop.f32.mrf.mxu0 }
 0x415   : > { %v6774_v26 = vpop.f32.mrf.mxu1 }
 0x416   : > { %v6821_v37 = vadd.f32 %v6774_v26, %v15008_v38  ;;  %v15123_v8 = vadd.f32 %v10329_v51, %v6823_v36 }
 0x417   : > { %v10286_v62 = vpop.f32.mrf.mxu1 }
 0x418   : > { %v6824_v33 = vadd.f32 %v10286_v62, %v15011_v13  ;;  %v15126_v32 = vadd.f32 %v7115_v46, %v6821_v37 }
 0x419   : > { %v6777_v22 = vpop.f32.mrf.mxu1 }
 0x41a   : > { %v6822_v11 = vadd.f32 %v6777_v22, %v15018_v48  ;;  %v15131_v44 = vadd.f32 %v10330_v42, %v6824_v33  ;;  %v15146_v48 = vpop.f32.mrf.mxu0 }
 0x41b   : > { %v10341_v15 = vpop.f32.mrf.mxu1 }
 0x41c   : > { %v15134_v6 = vadd.f32 %v10341_v15, %v15021_v50  ;;  %v15136_v0 = vadd.f32 %v7118_v40, %v6822_v11  ;;  %v15154_v46 = vpop.f32.mrf.mxu0 }
 0x41d   : > { %v7453_v38 = vpop.f32.mrf.mxu1 }
 0x41e   : > { %v15141_v13 = vadd.f32 %v7453_v38, %v15024_v27  ;;  %v15162_v45 = vpop.f32.mrf.mxu0 }
 0x41f   : > { %v10342_v39 = vpop.f32.mrf.mxu1 }
 0x420   : > { %v15144_v51 = vadd.f32 %v10342_v39, %v15027_v17  ;;  %v15170_v61 = vpop.f32.mrf.mxu0 }
 0x421   : > { %v7456_v7 = vpop.f32.mrf.mxu1 }
 0x422   : > { %v15149_v28 = vadd.f32 %v7456_v7, %v15034_v18  ;;  %v15178_v40 = vpop.f32.mrf.mxu0 }
 0x423   : > { %v10345_v50 = vpop.f32.mrf.mxu1 }
 0x424   : > { %v15152_v16 = vadd.f32 %v10345_v50, %v15037_v41  ;;  %v15186_v33 = vpop.f32.mrf.mxu0 }
 0x425   : > { %v7469_v54 = vpop.f32.mrf.mxu1 }
 0x426   : > { %v15157_v27 = vadd.f32 %v7469_v54, %v15040_v25  ;;  %v15194_v15 = vpop.f32.mrf.mxu0 }
 0x427   : > { %v10346_v49 = vpop.f32.mrf.mxu1 }
 0x428   : > { %v15160_v17 = vadd.f32 %v10346_v49, %v15043_v14  ;;  %v15202_v7 = vpop.f32.mrf.mxu0 }
 0x429   : > { %v7472_v55 = vpop.f32.mrf.mxu1 }
 0x42a   : > { %v15165_v18 = vadd.f32 %v7472_v55, %v15048_v5  ;;  %v15210_v49 = vpop.f32.mrf.mxu0 }
 0x42b   : > { %v10349_v42 = vpop.f32.mrf.mxu1 }
 0x42c   : > { %v15168_v41 = vadd.f32 %v10349_v42, %v15051_v52 }
 0x42d   : > { %v7485_v21 = vpop.f32.mrf.mxu1 }
 0x42e   : > { %v15173_v25 = vadd.f32 %v7485_v21, %v15054_v34  ;;  %v15218_v21 = vpop.f32.mrf.mxu0 }
 0x42f   : > { %v10350_v36 = vpop.f32.mrf.mxu1 }
 0x430   : > { %v15176_v14 = vadd.f32 %v10350_v36, %v15057_v59 }
 0x431   : > { %v7488_v26 = vpop.f32.mrf.mxu1 }
 0x432   : > { %v15181_v5 = vadd.f32 %v7488_v26, %v15060_v10 }
 0x433   : > { %v10353_v37 = vpop.f32.mrf.mxu1 }
 0x434   : > { %v15184_v52 = vadd.f32 %v10353_v37, %v15063_v58  ;;  %v15226_v37 = vpop.f32.mrf.mxu0 }
 0x435   : > { %v7501_v62 = vpop.f32.mrf.mxu1 }
 0x436   : > { %v15189_v34 = vadd.f32 %v7501_v62, %v15066_v20 }
 0x437   : > { %v10354_v22 = vpop.f32.mrf.mxu1 }
 0x438   : > { %v15192_v59 = vadd.f32 %v10354_v22, %v15069_v56 }
 0x439   : > { %v7504_v11 = vpop.f32.mrf.mxu1 }
 0x43a   : > { %v15197_v10 = vadd.f32 %v7504_v11, %v15072_v12  ;;  %v15234_v11 = vpop.f32.mrf.mxu0 }
 0x43b   : > { %v10357_v38 = vpop.f32.mrf.mxu1 }
 0x43c   : > { %v15200_v58 = vadd.f32 %v10357_v38, %v15075_v19 }
 0x43d   : > { %v7517_v39 = vpop.f32.mrf.mxu1 }
 0x43e   : > { %v15205_v20 = vadd.f32 %v7517_v39, %v15078_v57 }
 0x43f   : > { %v10358_v50 = vpop.f32.mrf.mxu1 }
 0x440   : > { %v15208_v56 = vadd.f32 %v10358_v50, %v15081_v23  ;;  %v15242_v50 = vpop.f32.mrf.mxu0 }
 0x441   : > { %v7520_v54 = vpop.f32.mrf.mxu1 }
 0x442   : > { %v15213_v12 = vadd.f32 %v7520_v54, %v15084_v35 }
 0x443   : > { %v10361_v55 = vpop.f32.mrf.mxu1 }
 0x444   : > { %v15216_v19 = vadd.f32 %v10361_v55, %v15087_v9 }
 0x445   : > { %v7533_v42 = vpop.f32.mrf.mxu1 }
 0x446   : > { %v15221_v57 = vadd.f32 %v7533_v42, %v15090_v60  ;;  %v15250_v42 = vpop.f32.mrf.mxu0 }
 0x447   : > { %v10362_v36 = vpop.f32.mrf.mxu1 }
 0x448   : > { %v15224_v23 = vadd.f32 %v10362_v36, %v15093_v29 }
 0x449   : > { %v7536_v26 = vpop.f32.mrf.mxu1 }
 0x44a   : > { %v15229_v35 = vadd.f32 %v7536_v26, %v15096_v24 }
 0x44b   : > { %v10365_v62 = vpop.f32.mrf.mxu1 }
 0x44c   : > { %v15232_v9 = vadd.f32 %v10365_v62, %v15099_v47  ;;  %v15258_v62 = vpop.f32.mrf.mxu0 }
 0x44d   : > { %v7549_v22 = vpop.f32.mrf.mxu1 }
 0x44e   : > { %v15237_v60 = vadd.f32 %v7549_v22, %v15102_v3 }
 0x44f   : > { %v10366_v38 = vpop.f32.mrf.mxu1 }
 0x450   : > { %v15240_v29 = vadd.f32 %v10366_v38, %v15105_v31 }
 0x451   : > { %v7552_v39 = vpop.f32.mrf.mxu1 }
 0x452   : > { %v15245_v24 = vadd.f32 %v7552_v39, %v15108_v2  ;;  %v15266_v39 = vpop.f32.mrf.mxu0 }
 0x453   : > { %v10369_v54 = vpop.f32.mrf.mxu1 }
 0x454   : > { %v15248_v47 = vadd.f32 %v10369_v54, %v15111_v4 }
 0x455   : > { %v7565_v55 = vpop.f32.mrf.mxu1 }
 0x456   : > { %v15253_v3 = vadd.f32 %v7565_v55, %v15114_v63 }
 0x457   : > { %v10370_v36 = vpop.f32.mrf.mxu1 }
 0x458   : > { %v15256_v31 = vadd.f32 %v10370_v36, %v15117_v30  ;;  %v15274_v36 = vpop.f32.mrf.mxu0 }
 0x459   : > { %v7568_v26 = vpop.f32.mrf.mxu1 }
 0x45a   : > { %v15261_v2 = vadd.f32 %v7568_v26, %v15120_v1 }
 0x45b   : > { %v10373_v22 = vpop.f32.mrf.mxu1 }
 0x45c   : > { %16426 = vst [vmem:[#allocation12_spill] sm:$0xff] %v15261_v2  ;;  %v15264_v4 = vadd.f32 %v10373_v22, %v15123_v8  ;;  %v8072_v8 = vadd.f32 %v15128_v53, %v15134_v6 }
 0x45d   : > { %v7581_v38 = vpop.f32.mrf.mxu1 }
 0x45e   : > { %16427 = vst [vmem:[#allocation64_spill] sm:$0xff] %v15264_v4  ;;  %v15269_v63 = vadd.f32 %v7581_v38, %v15126_v32  ;;  %v15284_v32 = vld [vmem:[%s15571_s5] ss:$0 sm:$0xff] }
 0x45f   : > { %v10374_v54 = vpop.f32.mrf.mxu1  ;;  %v15291_v38 = vld [vmem:[%s15572_s6] ss:$0 sm:$0xff] }
 0x460   : > { %16428 = vst [vmem:[#allocation9_spill] sm:$0xff] %v15269_v63  ;;  %v15272_v30 = vadd.f32 %v10374_v54, %v15131_v44  ;;  %v8070_v44 = vadd.f32 %v15138_v43, %v15141_v13  ;;  %v15293_v54 = vpop.f32.mrf.mxu0  ;;  %v8533_v63 = vld [vmem:[%s10772_s18 + $0x13] sm:$0xff] }
 0x461   : > { %v7584_v55 = vpop.f32.mrf.mxu1 }
 0x462   : > { %16429 = vst [vmem:[#allocation66_spill] sm:$0xff] %v15272_v30  ;;  %v15277_v1 = vadd.f32 %v7584_v55, %v15136_v0  ;;  %v8073_v55 = vadd.f32 %v15146_v48, %v15144_v51  ;;  %v8071_v30 = vadd.f32 %v15154_v46, %v15149_v28  ;;  %v8076_v28 = vadd.f32 %v15162_v45, %v15152_v16 }
 0x463   : > { %v10429_v26 = vpop.f32.mrf.mxu1 }
 0x464   : > { %16430 = vst [vmem:[#allocation65_spill] sm:$0xff] %v15277_v1  ;;  %v8413_v22 = vadd.f32 %v10429_v26, %v8072_v8  ;;  %v8535_v8 = vld [vmem:[%s10772_s18 + $0x23] sm:$0xff] }
 0x465   : > { %v8268_v0 = vpop.f32.mrf.mxu1 }
 0x466   : > { %v8456_v53 = vmul.f32 %v15284_v32, %v8413_v22  ;;  %v8411_v6 = vadd.f32 %v8268_v0, %v8070_v44  ;;  %v15305_v22 = vpop.f32.mrf.mxu0 }
 0x467   : > { %v10430_v26 = vpop.f32.mrf.mxu1 }
 0x468   : > { %v8499_v43 = vadd.f32 %v15291_v38, %v8456_v53  ;;  %v8454_v13 = vmul.f32 %v15284_v32, %v8411_v6  ;;  %v8414_v1 = vadd.f32 %v10430_v26, %v8073_v55  ;;  %v8536_v53 = vld [vmem:[%s10772_s18 + $0x2b] sm:$0xff]  ;;  %v8074_v6 = vadd.f32 %v15170_v61, %v15157_v27  ;;  %v15324_v2 = vpop.f32.mrf.mxu0 }
 0x469   : > { %v8271_v4 = vpop.f32.mrf.mxu1 }
 0x46a   : > { %v8571_v44 = vadd.f32 %v8535_v8, %v8499_v43  ;;  %v8497_v51 = vadd.f32 %v15291_v38, %v8454_v13  ;;  %v8457_v48 = vmul.f32 %v15284_v32, %v8414_v1  ;;  %v8412_v0 = vadd.f32 %v8271_v4, %v8071_v30  ;;  %v8534_v30 = vld [vmem:[%s10772_s18 + $0x1b] sm:$0xff] }
 0x46b   : > { %v10433_v46 = vpop.f32.mrf.mxu1  ;;  %v8077_v13 = vadd.f32 %v15178_v40, %v15160_v17 }
 0x46c   : > { %v8607_v55 = vmax.f32 %v8571_v44, 0.0  ;;  %v8569_v8 = vadd.f32 %v8533_v63, %v8497_v51  ;;  %v8500_v1 = vadd.f32 %v15291_v38, %v8457_v48  ;;  %v8455_v4 = vmul.f32 %v15284_v32, %v8412_v0  ;;  %v8539_v48 = vld [vmem:[%s10772_s18 + $0x43] sm:$0xff] }
 0x46d   : > { %v8417_v26 = vadd.f32 %v10433_v46, %v8076_v28  ;;  %v8284_v43 = vpop.f32.mrf.mxu1  ;;  %v8075_v51 = vadd.f32 %v15186_v33, %v15165_v18  ;;  %v8537_v46 = vld [vmem:[%s10772_s18 + $0x33] sm:$0xff] }
 0x46e   : > { %8643 = vst.msk [vmem:[%s15312_s8 + $0x10] sm:$0xff] %vm16431_vm14, %v8607_v55  ;;  %v8605_v16 = vmax.f32 %v8569_v8, 0.0  ;;  %v8572_v27 = vadd.f32 %v8536_v53, %v8500_v1  ;;  %v8498_v45 = vadd.f32 %v15291_v38, %v8455_v4  ;;  %v8415_v61 = vadd.f32 %v8284_v43, %v8074_v6  ;;  %v15340_v8 = vpop.f32.mrf.mxu0  ;;  %vm16446_vm14 = vmmov %vm16235_vm0 }
 0x46f   : > { %v8460_v63 = vmul.f32 %v15284_v32, %v8417_v26  ;;  %v10434_v44 = vpop.f32.mrf.mxu1  ;;  %v8080_v55 = vadd.f32 %v15194_v15, %v15168_v41  ;;  %v8540_v26 = vld [vmem:[%s10772_s18 + $0x4b] sm:$0xff] }
 0x470   : > { %8641 = vst.msk [vmem:[%s15312_s8] sm:$0xff] %vm16432_vm12, %v8605_v16  ;;  %v8608_v17 = vmax.f32 %v8572_v27, 0.0  ;;  %v8570_v40 = vadd.f32 %v8534_v30, %v8498_v45  ;;  %v8458_v0 = vmul.f32 %v15284_v32, %v8415_v61  ;;  %v8418_v53 = vadd.f32 %v10434_v44, %v8077_v13  ;;  %v8538_v45 = vld [vmem:[%s10772_s18 + $0x3b] sm:$0xff]  ;;  %vm16447_vm12 = vmmov %vm16235_vm0 }
 0x471   : > { %v8503_v28 = vadd.f32 %v15291_v38, %v8460_v63  ;;  %v8287_v6 = vpop.f32.mrf.mxu1  ;;  %v8078_v61 = vadd.f32 %v15202_v7, %v15173_v25  ;;  %v8081_v44 = vadd.f32 %v15210_v49, %v15176_v14  ;;  %v8079_v25 = vadd.f32 %v15218_v21, %v15181_v5 }
 0x472   : > { %8644 = vst.msk [vmem:[%s15312_s8 + $0x18] sm:$0xff] %vm16433_vm7, %v8608_v17  ;;  %v8606_v18 = vmax.f32 %v8570_v40, 0.0  ;;  %v8501_v33 = vadd.f32 %v15291_v38, %v8458_v0  ;;  %v8461_v1 = vmul.f32 %v15284_v32, %v8418_v53  ;;  %v8416_v4 = vadd.f32 %v8287_v6, %v8075_v51  ;;  %v15356_v51 = vpop.f32.mrf.mxu0  ;;  %v8543_v53 = vld [vmem:[%s10772_s18 + $0x63] sm:$0xff]  ;;  %vm16448_vm7 = vmmov %vm16235_vm0 }
 0x473   : > { %v8575_v30 = vadd.f32 %v8539_v48, %v8503_v28  ;;  %v10437_v43 = vpop.f32.mrf.mxu1 }
 0x474   : > { %8642 = vst.msk [vmem:[%s15312_s8 + $0x8] sm:$0xff] %vm16434_vm6, %v8606_v18  ;;  %v8573_v13 = vadd.f32 %v8537_v46, %v8501_v33  ;;  %v8504_v41 = vadd.f32 %v15291_v38, %v8461_v1  ;;  %v8459_v15 = vmul.f32 %v15284_v32, %v8416_v4  ;;  %v8421_v16 = vadd.f32 %v10437_v43, %v8080_v55  ;;  %v15371_v1 = vpop.f32.mrf.mxu0  ;;  %v8541_v4 = vld [vmem:[%s10772_s18 + $0x53] sm:$0xff]  ;;  %vm16449_vm6 = vmmov %vm16235_vm0 }
 0x475   : > { %v8611_v27 = vmax.f32 %v8575_v30, 0.0  ;;  %v8300_v63 = vpop.f32.mrf.mxu1  ;;  %v8084_v33 = vadd.f32 %v15226_v37, %v15184_v52 }
 0x476   : > { %v8609_v17 = vmax.f32 %v8573_v13, 0.0  ;;  %v8576_v40 = vadd.f32 %v8540_v26, %v8504_v41  ;;  %v8502_v48 = vadd.f32 %v15291_v38, %v8459_v15  ;;  %v8464_v0 = vmul.f32 %v15284_v32, %v8421_v16  ;;  %v8544_v13 = vld [vmem:[%s10772_s18 + $0x6b] sm:$0xff] }
 0x477   : > { %8647 = vst.msk [vmem:[%s15312_s8 + $0x30] sm:$0xff] %vm16435_vm4, %v8611_v27  ;;  %v8419_v28 = vadd.f32 %v8300_v63, %v8078_v61  ;;  %v10438_v46 = vpop.f32.mrf.mxu1  ;;  %v8082_v15 = vadd.f32 %v15234_v11, %v15189_v34  ;;  %v8542_v61 = vld [vmem:[%s10772_s18 + $0x5b] sm:$0xff]  ;;  %vm16450_vm4 = vmmov %vm16235_vm0 }
 0x478   : > { %8645 = vst.msk [vmem:[%s15312_s8 + $0x20] sm:$0xff] %vm16436_vm3, %v8609_v17  ;;  %v8612_v14 = vmax.f32 %v8576_v40, 0.0  ;;  %v8574_v7 = vadd.f32 %v8538_v45, %v8502_v48  ;;  %v8507_v49 = vadd.f32 %v15291_v38, %v8464_v0  ;;  %v8422_v6 = vadd.f32 %v10438_v46, %v8081_v44  ;;  %v15386_v44 = vpop.f32.mrf.mxu0  ;;  %v8547_v0 = vld [vmem:[%s10772_s18 + $0x83] sm:$0xff]  ;;  %vm16451_vm3 = vmmov %vm16235_vm0 }
 0x479   : > { %v8462_v55 = vmul.f32 %v15284_v32, %v8419_v28  ;;  %v8303_v18 = vpop.f32.mrf.mxu1  ;;  %v8083_v46 = vadd.f32 %v15250_v42, %v15197_v10 }
 0x47a   : > { %8648 = vst.msk [vmem:[%s15312_s8 + $0x38] sm:$0xff] %vm16437_vm11, %v8612_v14  ;;  %v8610_v5 = vmax.f32 %v8574_v7, 0.0  ;;  %v8579_v21 = vadd.f32 %v8543_v53, %v8507_v49  ;;  %v8465_v30 = vmul.f32 %v15284_v32, %v8422_v6  ;;  %v8420_v26 = vadd.f32 %v8303_v18, %v8079_v25  ;;  %v8545_v6 = vld [vmem:[%s10772_s18 + $0x73] sm:$0xff]  ;;  %vm16452_vm11 = vmmov %vm16235_vm0 }
 0x47b   : > { %v8505_v43 = vadd.f32 %v15291_v38, %v8462_v55  ;;  %v10441_v41 = vpop.f32.mrf.mxu1  ;;  %v8085_v53 = vadd.f32 %v15242_v50, %v15192_v59  ;;  %v8088_v59 = vadd.f32 %v15258_v62, %v15200_v58  ;;  %v15404_v50 = vpop.f32.mrf.mxu0 }
 0x47c   : > { %8646 = vst.msk [vmem:[%s15312_s8 + $0x28] sm:$0xff] %vm16438_vm10, %v8610_v5  ;;  %v8615_v52 = vmax.f32 %v8579_v21, 0.0  ;;  %v8508_v37 = vadd.f32 %v15291_v38, %v8465_v30  ;;  %v8463_v16 = vmul.f32 %v15284_v32, %v8420_v26  ;;  %v8425_v27 = vadd.f32 %v10441_v41, %v8084_v33  ;;  %v8548_v26 = vld [vmem:[%s10772_s18 + $0x8b] sm:$0xff]  ;;  %vm16453_vm10 = vmmov %vm16235_vm0 }
 0x47d   : > { %v8577_v45 = vadd.f32 %v8541_v4, %v8505_v43  ;;  %v8316_v63 = vpop.f32.mrf.mxu1  ;;  %v8086_v30 = vadd.f32 %v15266_v39, %v15205_v20 }
 0x47e   : > { %8651 = vst.msk [vmem:[%s15312_s8 + $0x50] sm:$0xff] %vm16439_vm5, %v8615_v52  ;;  %v8580_v17 = vadd.f32 %v8544_v13, %v8508_v37  ;;  %v8506_v34 = vadd.f32 %v15291_v38, %v8463_v16  ;;  %v8468_v11 = vmul.f32 %v15284_v32, %v8425_v27  ;;  %v8423_v40 = vadd.f32 %v8316_v63, %v8082_v15  ;;  %v8546_v15 = vld [vmem:[%s10772_s18 + $0x7b] sm:$0xff]  ;;  %v15420_v16 = vpop.f32.mrf.mxu0  ;;  %v8551_v63 = vld [vmem:[%s10772_s18 + $0xa3] sm:$0xff]  ;;  %vm16454_vm5 = vmmov %vm16235_vm0 }
 0x47f   : > { %v8613_v48 = vmax.f32 %v8577_v45, 0.0  ;;  %v10442_v28 = vpop.f32.mrf.mxu1  ;;  %v8089_v37 = vadd.f32 %v15274_v36, %v15208_v56 }
 0x480   : > { %v8616_v25 = vmax.f32 %v8580_v17, 0.0  ;;  %v8578_v14 = vadd.f32 %v8542_v61, %v8506_v34  ;;  %v8511_v7 = vadd.f32 %v15291_v38, %v8468_v11  ;;  %v8466_v49 = vmul.f32 %v15284_v32, %v8423_v40 }
 0x481   : > { %8649 = vst.msk [vmem:[%s15312_s8 + $0x40] sm:$0xff] %vm16440_vm9, %v8613_v48  ;;  %v8426_v55 = vadd.f32 %v10442_v28, %v8085_v53  ;;  %v8319_v18 = vpop.f32.mrf.mxu1  ;;  %v8549_v48 = vld [vmem:[%s10772_s18 + $0x93] sm:$0xff]  ;;  %v8092_v28 = vadd.f32 %v15305_v22, %v15216_v19  ;;  %vm16456_vm9 = vmmov %vm16235_vm0 }
 0x482   : > { %8652 = vst.msk [vmem:[%s15312_s8 + $0x58] sm:$0xff] %vm16441_vm8, %v8616_v25  ;;  %v8614_v10 = vmax.f32 %v8578_v14, 0.0  ;;  %v8583_v42 = vadd.f32 %v8547_v0, %v8511_v7  ;;  %v8509_v33 = vadd.f32 %v15291_v38, %v8466_v49  ;;  %v8424_v5 = vadd.f32 %v8319_v18, %v8083_v46  ;;  %v15436_v46 = vpop.f32.mrf.mxu0  ;;  %vm16458_vm8 = vmmov %vm16235_vm0 }
 0x483   : > { %v8469_v21 = vmul.f32 %v15284_v32, %v8426_v55  ;;  %v10445_v4 = vpop.f32.mrf.mxu1  ;;  %v8087_v0 = vadd.f32 %v15293_v54, %v15213_v12  ;;  %v8090_v12 = vadd.f32 %v15324_v2, %v15221_v57 }
 0x484   : > { %8650 = vst.msk [vmem:[%s15312_s8 + $0x48] sm:$0xff] %vm16442_vm2, %v8614_v10  ;;  %v8619_v58 = vmax.f32 %v8583_v42, 0.0  ;;  %v8581_v62 = vadd.f32 %v8545_v6, %v8509_v33  ;;  %v8467_v43 = vmul.f32 %v15284_v32, %v8424_v5  ;;  %v8429_v13 = vadd.f32 %v10445_v4, %v8088_v59  ;;  %v8552_v6 = vld [vmem:[%s10772_s18 + $0xab] sm:$0xff]  ;;  %v15451_v5 = vpop.f32.mrf.mxu0  ;;  %vm16460_vm2 = vmmov %vm16235_vm0 }
 0x485   : > { %v8512_v41 = vadd.f32 %v15291_v38, %v8469_v21  ;;  %v8332_v52 = vpop.f32.mrf.mxu1  ;;  %v8093_v33 = vadd.f32 %v15340_v8, %v15224_v23  ;;  %v8550_v21 = vld [vmem:[%s10772_s18 + $0x9b] sm:$0xff] }
 0x486   : > { %8655 = vst.msk [vmem:[%s15312_s8 + $0x70] sm:$0xff] %vm16235_vm0, %v8619_v58  ;;  %v8617_v20 = vmax.f32 %v8581_v62, 0.0  ;;  %v8510_v39 = vadd.f32 %v15291_v38, %v8467_v43  ;;  %v8472_v27 = vmul.f32 %v15284_v32, %v8429_v13  ;;  %v8427_v45 = vadd.f32 %v8332_v52, %v8086_v30  ;;  %v8555_v62 = vld [vmem:[%s10772_s18 + $0xc3] sm:$0xff]  ;;  %v8553_v52 = vld [vmem:[%s10772_s18 + $0xb3] sm:$0xff] }
 0x487   : > { %v8584_v61 = vadd.f32 %v8548_v26, %v8512_v41  ;;  %v10446_v17 = vpop.f32.mrf.mxu1  ;;  %v8091_v43 = vadd.f32 %v15356_v51, %v15229_v35 }
 0x488   : > { %8653 = vst.msk [vmem:[%s15312_s8 + $0x60] sm:$0xff] %vm16443_vm13, %v8617_v20  ;;  %v8582_v34 = vadd.f32 %v8546_v15, %v8510_v39  ;;  %v8515_v56 = vadd.f32 %v15291_v38, %v8472_v27  ;;  %v8470_v36 = vmul.f32 %v15284_v32, %v8427_v45  ;;  %v8430_v11 = vadd.f32 %v10446_v17, %v8089_v37  ;;  %v10414_v20 = vpop.f32.mrf.mxu0  ;;  %vm16463_vm13 = vmmov %vm16235_vm0 }
 0x489   : > { %v8620_v40 = vmax.f32 %v8584_v61, 0.0  ;;  %v8335_v53 = vpop.f32.mrf.mxu1  ;;  %v8556_v61 = vld [vmem:[%s10772_s18 + $0xcb] sm:$0xff] }
 0x48a   : > { %v8618_v25 = vmax.f32 %v8582_v34, 0.0  ;;  %v8587_v14 = vadd.f32 %v8551_v63, %v8515_v56  ;;  %v8513_v7 = vadd.f32 %v15291_v38, %v8470_v36  ;;  %v8473_v49 = vmul.f32 %v15284_v32, %v8430_v11 }
 0x48b   : > { %8656 = vst.msk [vmem:[%s15312_s8 + $0x78] sm:$0xff] %vm16444_vm1, %v8620_v40  ;;  %v8428_v55 = vadd.f32 %v8335_v53, %v8087_v0  ;;  %v10449_v18 = vpop.f32.mrf.mxu1  ;;  %v8096_v63 = vadd.f32 %v15371_v1, %v15232_v9  ;;  %v8094_v34 = vadd.f32 %v15386_v44, %v15237_v60  ;;  %v8097_v9 = vadd.f32 %v15404_v50, %v15240_v29  ;;  %v8042_v1 = vpop.f32.mrf.mxu0  ;;  %v8559_v50 = vld [vmem:[%s10772_s18 + $0xe3] sm:$0xff]  ;;  %vm16464_vm1 = vmmov %vm16235_vm0 }
 0x48c   : > { %8654 = vst.msk [vmem:[%s15312_s8 + $0x68] sm:$0xff] %vm16445_vm15, %v8618_v25  ;;  %v8623_v19 = vmax.f32 %v8587_v14, 0.0  ;;  %v8585_v54 = vadd.f32 %v8549_v48, %v8513_v7  ;;  %v8516_v22 = vadd.f32 %v15291_v38, %v8473_v49  ;;  %v8433_v59 = vadd.f32 %v10449_v18, %v8092_v28  ;;  %v8554_v48 = vld [vmem:[%s10772_s18 + $0xbb] sm:$0xff]  ;;  %vm16465_vm15 = vmmov %vm16235_vm0 }
 0x48d   : > { %v8471_v10 = vmul.f32 %v15284_v32, %v8428_v55  ;;  %v8348_v42 = vpop.f32.mrf.mxu1  ;;  %v8095_v49 = vadd.f32 %v15420_v16, %v15245_v24 }
 0x48e   : > { %8659 = vst.msk [vmem:[%s15312_s8 + $0x90] sm:$0xff] %vm16446_vm14, %v8623_v19  ;;  %v8621_v57 = vmax.f32 %v8585_v54, 0.0  ;;  %v8588_v2 = vadd.f32 %v8552_v6, %v8516_v22  ;;  %v8476_v4 = vmul.f32 %v15284_v32, %v8433_v59  ;;  %v8431_v30 = vadd.f32 %v8348_v42, %v8090_v12  ;;  %v8557_v19 = vld [vmem:[%s10772_s18 + $0xd3] sm:$0xff]  ;;  %v10417_v59 = vpop.f32.mrf.mxu0  ;;  %vm16466_vm14 = vmmov %vm16235_vm0 }
 0x48f   : > { %v8514_v58 = vadd.f32 %v15291_v38, %v8471_v10  ;;  %v10450_v26 = vpop.f32.mrf.mxu1  ;;  %v8100_v22 = vadd.f32 %v15436_v46, %v15248_v47 }
 0x490   : > { %8657 = vst.msk [vmem:[%s15312_s8 + $0x80] sm:$0xff] %vm16447_vm12, %v8621_v57  ;;  %v8624_v23 = vmax.f32 %v8588_v2, 0.0  ;;  %v8519_v8 = vadd.f32 %v15291_v38, %v8476_v4  ;;  %v8474_v13 = vmul.f32 %v15284_v32, %v8431_v30  ;;  %v8434_v41 = vadd.f32 %v10450_v26, %v8093_v33  ;;  %v8560_v57 = vld [vmem:[%s10772_s18 + $0xeb] sm:$0xff]  ;;  %vm16467_vm12 = vmmov %vm16235_vm0 }
 0x491   : > { %v8586_v15 = vadd.f32 %v8550_v21, %v8514_v58  ;;  %v8351_v37 = vpop.f32.mrf.mxu1  ;;  %v8558_v58 = vld [vmem:[%s10772_s18 + $0xdb] sm:$0xff] }
 0x492   : > { %8660 = vst.msk [vmem:[%s15312_s8 + $0x98] sm:$0xff] %vm16448_vm7, %v8624_v23  ;;  %v8591_v39 = vadd.f32 %v8555_v62, %v8519_v8  ;;  %v8517_v35 = vadd.f32 %v15291_v38, %v8474_v13  ;;  %v8477_v51 = vmul.f32 %v15284_v32, %v8434_v41  ;;  %v8432_v27 = vadd.f32 %v8351_v37, %v8091_v43  ;;  %v8055_v23 = vpop.f32.mrf.mxu0  ;;  %vm16468_vm7 = vmmov %vm16235_vm0 }
 0x493   : > { %v8622_v45 = vmax.f32 %v8586_v15, 0.0  ;;  %v10453_v17 = vpop.f32.mrf.mxu1  ;;  %v8098_v62 = vadd.f32 %v15451_v5, %v15253_v3  ;;  %v8101_v43 = vadd.f32 %v10414_v20, %v15256_v31 }
 0x494   : > { %v8627_v56 = vmax.f32 %v8591_v39, 0.0  ;;  %v8589_v36 = vadd.f32 %v8553_v52, %v8517_v35  ;;  %v8520_v11 = vadd.f32 %v15291_v38, %v8477_v51  ;;  %v8475_v40 = vmul.f32 %v15284_v32, %v8432_v27  ;;  %v8563_v52 = vld [vmem:[%s10772_s18 + $0x103] sm:$0xff]  ;;  %v16455_v35 = vld [vmem:[#allocation12_spill] sm:$0xff] }
 0x495   : > { %8658 = vst.msk [vmem:[%s15312_s8 + $0x88] sm:$0xff] %vm16449_vm6, %v8622_v45  ;;  %v8437_v0 = vadd.f32 %v10453_v17, %v8096_v63  ;;  %v8364_v53 = vpop.f32.mrf.mxu1  ;;  %v8099_v51 = vadd.f32 %v8042_v1, %v16455_v35  ;;  %v10418_v17 = vpop.f32.mrf.mxu0  ;;  %vm16469_vm6 = vmmov %vm16235_vm0 }
 0x496   : > { %8663 = vst.msk [vmem:[%s15312_s8 + $0xb0] sm:$0xff] %vm16450_vm4, %v8627_v56  ;;  %v8625_v60 = vmax.f32 %v8589_v36, 0.0  ;;  %v8592_v44 = vadd.f32 %v8556_v61, %v8520_v11  ;;  %v8518_v28 = vadd.f32 %v15291_v38, %v8475_v40  ;;  %v8435_v25 = vadd.f32 %v8364_v53, %v8094_v34  ;;  %v16457_v61 = vld [vmem:[#allocation64_spill] sm:$0xff] }
 0x497   : > { %v8480_v14 = vmul.f32 %v15284_v32, %v8437_v0  ;;  %v10454_v7 = vpop.f32.mrf.mxu1  ;;  %v8104_v63 = vadd.f32 %v10417_v59, %v16457_v61  ;;  %v8561_v36 = vld [vmem:[%s10772_s18 + $0xf3] sm:$0xff]  ;;  %v8564_v0 = vld [vmem:[%s10772_s18 + $0x10b] sm:$0xff] }
 0x498   : > { %8661 = vst.msk [vmem:[%s15312_s8 + $0xa0] sm:$0xff] %vm16451_vm3, %v8625_v60  ;;  %v8628_v6 = vmax.f32 %v8592_v44, 0.0  ;;  %v8590_v29 = vadd.f32 %v8554_v48, %v8518_v28  ;;  %v8478_v55 = vmul.f32 %v15284_v32, %v8435_v25  ;;  %v8438_v18 = vadd.f32 %v10454_v7, %v8097_v9  ;;  %v16459_v9 = vld [vmem:[#allocation9_spill] sm:$0xff] }
 0x499   : > { %v8523_v12 = vadd.f32 %v15291_v38, %v8480_v14  ;;  %v8367_v54 = vpop.f32.mrf.mxu1  ;;  %v8102_v1 = vadd.f32 %v8055_v23, %v16459_v9  ;;  %v8562_v7 = vld [vmem:[%s10772_s18 + $0xfb] sm:$0xff]  ;;  %v8568_v23 = vld [vmem:[%s10772_s18 + $0x12b] sm:$0xff] }
 0x49a   : > { %8664 = vst.msk [vmem:[%s15312_s8 + $0xb8] sm:$0xff] %vm16452_vm11, %v8628_v6  ;;  %v8626_v24 = vmax.f32 %v8590_v29, 0.0  ;;  %v8521_v16 = vadd.f32 %v15291_v38, %v8478_v55  ;;  %v8481_v10 = vmul.f32 %v15284_v32, %v8438_v18  ;;  %v8436_v42 = vadd.f32 %v8367_v54, %v8095_v49  ;;  %v8058_v6 = vpop.f32.mrf.mxu0  ;;  %v16461_v54 = vld [vmem:[#allocation66_spill] sm:$0xff] }
 0x49b   : > { %v8595_v33 = vadd.f32 %v8559_v50, %v8523_v12  ;;  %v10457_v2 = vpop.f32.mrf.mxu1 }
 0x49c   : > { %8662 = vst.msk [vmem:[%s15312_s8 + $0xa8] sm:$0xff] %vm16453_vm10, %v8626_v24  ;;  %v8593_v21 = vadd.f32 %v8557_v19, %v8521_v16  ;;  %v8524_v47 = vadd.f32 %v15291_v38, %v8481_v10  ;;  %v8479_v46 = vmul.f32 %v15284_v32, %v8436_v42  ;;  %v8441_v4 = vadd.f32 %v10457_v2, %v8100_v22  ;;  %v8567_v19 = vld [vmem:[%s10772_s18 + $0x123] sm:$0xff]  ;;  %v8565_v2 = vld [vmem:[%s10772_s18 + $0x113] sm:$0xff] }
 0x49d   : > { %v8631_v30 = vmax.f32 %v8595_v33, 0.0  ;;  %v8380_v26 = vpop.f32.mrf.mxu1  ;;  %v8105_v22 = vadd.f32 %v10418_v17, %v16461_v54  ;;  %v16462_v24 = vld [vmem:[#allocation65_spill] sm:$0xff] }
 0x49e   : > { %v8629_v8 = vmax.f32 %v8593_v21, 0.0  ;;  %v8596_v13 = vadd.f32 %v8560_v57, %v8524_v47  ;;  %v8522_v41 = vadd.f32 %v15291_v38, %v8479_v46  ;;  %v8484_v15 = vmul.f32 %v15284_v32, %v8441_v4 }
 0x49f   : > { %8667 = vst.msk [vmem:[%s15312_s8 + $0xd0] sm:$0xff] %vm16454_vm5, %v8631_v30  ;;  %v8439_v37 = vadd.f32 %v8380_v26, %v8098_v62  ;;  %v10458_v39 = vpop.f32.mrf.mxu1  ;;  %v8103_v16 = vadd.f32 %v8058_v6, %v16462_v24 }
 0x4a0   : > { %8665 = vst.msk [vmem:[%s15312_s8 + $0xc0] sm:$0xff] %vm16456_vm9, %v8629_v8  ;;  %v8632_v3 = vmax.f32 %v8596_v13, 0.0  ;;  %v8594_v31 = vadd.f32 %v8558_v58, %v8522_v41  ;;  %v8527_v5 = vadd.f32 %v15291_v38, %v8484_v15  ;;  %v8442_v20 = vadd.f32 %v10458_v39, %v8101_v43  ;;  %v8566_v41 = vld [vmem:[%s10772_s18 + $0x11b] sm:$0xff] }
 0x4a1   : > { %v8482_v27 = vmul.f32 %v15284_v32, %v8439_v37  ;;  %v8383_v45 = vpop.f32.mrf.mxu1 }
 0x4a2   : > { %8668 = vst.msk [vmem:[%s15312_s8 + $0xd8] sm:$0xff] %vm16458_vm8, %v8632_v3  ;;  %v8630_v34 = vmax.f32 %v8594_v31, 0.0  ;;  %v8599_v56 = vadd.f32 %v8563_v52, %v8527_v5  ;;  %v8485_v11 = vmul.f32 %v15284_v32, %v8442_v20  ;;  %v8440_v40 = vadd.f32 %v8383_v45, %v8099_v51 }
 0x4a3   : > { %v8525_v48 = vadd.f32 %v15291_v38, %v8482_v27  ;;  %v10461_v53 = vpop.f32.mrf.mxu1 }
 0x4a4   : > { %8666 = vst.msk [vmem:[%s15312_s8 + $0xc8] sm:$0xff] %vm16460_vm2, %v8630_v34  ;;  %v8635_v60 = vmax.f32 %v8599_v56, 0.0  ;;  %v8528_v44 = vadd.f32 %v15291_v38, %v8485_v11  ;;  %v8483_v28 = vmul.f32 %v15284_v32, %v8440_v40  ;;  %v8445_v25 = vadd.f32 %v10461_v53, %v8104_v63 }
 0x4a5   : > { %v8597_v14 = vadd.f32 %v8561_v36, %v8525_v48  ;;  %v8396_v49 = vpop.f32.mrf.mxu1 }
 0x4a6   : > { %8671 = vst.msk [vmem:[%s15312_s8 + $0xf0] sm:$0xff] %vm16235_vm0, %v8635_v60  ;;  %v8600_v29 = vadd.f32 %v8564_v0, %v8528_v44  ;;  %v8526_v50 = vadd.f32 %v15291_v38, %v8483_v28  ;;  %v8488_v55 = vmul.f32 %v15284_v32, %v8445_v25  ;;  %v8443_v18 = vadd.f32 %v8396_v49, %v8102_v1 }
 0x4a7   : > { %v8633_v12 = vmax.f32 %v8597_v14, 0.0  ;;  %v10462_v59 = vpop.f32.mrf.mxu1 }
 0x4a8   : > { %v8636_v10 = vmax.f32 %v8600_v29, 0.0  ;;  %v8598_v42 = vadd.f32 %v8562_v7, %v8526_v50  ;;  %v8531_v33 = vadd.f32 %v15291_v38, %v8488_v55  ;;  %v8486_v57 = vmul.f32 %v15284_v32, %v8443_v18 }
 0x4a9   : > { %8669 = vst.msk [vmem:[%s15312_s8 + $0xe0] sm:$0xff] %vm16463_vm13, %v8633_v12  ;;  %v8446_v21 = vadd.f32 %v10462_v59, %v8105_v22  ;;  %v8399_v47 = vpop.f32.mrf.mxu1 }
 0x4aa   : > { %8672 = vst.msk [vmem:[%s15312_s8 + $0xf8] sm:$0xff] %vm16464_vm1, %v8636_v10  ;;  %v8634_v46 = vmax.f32 %v8598_v42, 0.0  ;;  %v8603_v4 = vadd.f32 %v8567_v19, %v8531_v33  ;;  %v8529_v30 = vadd.f32 %v15291_v38, %v8486_v57  ;;  %v8444_v58 = vadd.f32 %v8399_v47, %v8103_v16 }
 0x4ab   : > { %v8489_v62 = vmul.f32 %v15284_v32, %v8446_v21 }
 0x4ac   : > { %8670 = vst.msk [vmem:[%s15312_s8 + $0xe8] sm:$0xff] %vm16465_vm15, %v8634_v46  ;;  %v8639_v26 = vmax.f32 %v8603_v4, 0.0  ;;  %v8601_v43 = vadd.f32 %v8565_v2, %v8529_v30  ;;  %v8487_v8 = vmul.f32 %v15284_v32, %v8444_v58 }
 0x4ad   : > { %v8532_v13 = vadd.f32 %v15291_v38, %v8489_v62 }
 0x4ae   : > { %8675 = vst.msk [vmem:[%s15312_s8 + $0x110] sm:$0xff] %vm16466_vm14, %v8639_v26  ;;  %v8637_v15 = vmax.f32 %v8601_v43, 0.0  ;;  %v8530_v52 = vadd.f32 %v15291_v38, %v8487_v8 }
 0x4af   : > { %v8604_v37 = vadd.f32 %v8568_v23, %v8532_v13 }
 0x4b0   : > { %8673 = vst.msk [vmem:[%s15312_s8 + $0x100] sm:$0xff] %vm16467_vm12, %v8637_v15  ;;  %v8602_v39 = vadd.f32 %v8566_v41, %v8530_v52 }
 0x4b1   : > { %v8640_v35 = vmax.f32 %v8604_v37, 0.0 }
 0x4b2   : > { %v8638_v51 = vmax.f32 %v8602_v39, 0.0 }
 0x4b3   : > { %8676 = vst.msk [vmem:[%s15312_s8 + $0x118] sm:$0xff] %vm16468_vm7, %v8640_v35 }
 0x4b4   : > { %8674 = vst.msk [vmem:[%s15312_s8 + $0x108] sm:$0xff] %vm16469_vm6, %v8638_v51 }
 0x4b5 PF: > { %s17_s24 = sadd.s32 1, %s10697_s24  }
 0x4b6   : > { %p14_p4 = scmp.ge.s32.totalorder %s17_s24, 4  }
 0x4b8   :  { %16 = sbr.rel (!%p14_p4) target bundleno = 1 (0x1), region = 78 }

</bundles_post_ra>
